<compile_context>
chip_gen: v5e
topology: v5e:2x2
jax: 0.10.0
libtpu: 0.0.40
codegen_flags: <defaults>
</compile_context>

<pallas_src>
import functools

import numpy as np

import jax
import jax.numpy as jnp
from jax.experimental import pallas as pl
from jax.experimental.pallas import tpu as pltpu


# (cin, cout, kernel, stride) for the four conv layers.
CONV_CFGS = ((4, 16, 7, 3), (16, 16, 5, 2), (16, 16, 3, 1), (16, 16, 3, 1))
FC1_IN = 784
FC1_OUT = 64
LEAKY_SLOPE = 0.01          # nn.LeakyReLU default
BN_EPS = 1e-5               # nn.BatchNorm2d default


def _conv_out(size, k, s):
    return (size - k) // s + 1


def _leaky(x):
    return jnp.where(x >= 0.0, x, LEAKY_SLOPE * x)


# ----------------------------------------------------------------------------
# The single fused Pallas kernel: whole forward for one sample, VMEM resident.
# ----------------------------------------------------------------------------
def _reward_forward_kernel(x_ref, *refs, conv_shapes):
    """refs layout: (sel, toeplitz, scale, shift) x 4 conv layers,
    then fc1w_taps, fc1b, fc2w, fc2b, then the output ref."""
    conv_refs = [refs[4 * l: 4 * l + 4] for l in range(4)]
    fc1w_ref, fc1b_ref, fc2w_ref, fc2b_ref, o_ref = refs[16:]

    x = x_ref[0]                                        # (H0, W0*Cin) bf16
    for (sel_ref, t_ref, sc_ref, sh_ref), (k, ho, wo, cout) in zip(conv_refs, conv_shapes):
        acc = jnp.zeros((ho, wo * cout), jnp.float32)
        for i in range(k):
            # 0/1 selection matmul == strided row gather (rows ho*stride + i).
            rows = jnp.dot(sel_ref[i], x,
                           preferred_element_type=jnp.float32).astype(jnp.bfloat16)
            # Toeplitz matmul applies every column tap of kernel row i at once.
            acc = acc + jnp.dot(rows, t_ref[i], preferred_element_type=jnp.float32)
        y = acc * sc_ref[...] + sh_ref[...]             # conv bias + BatchNorm folded
        x = _leaky(y).astype(jnp.bfloat16)              # (ho, wo*cout), next layer's input

    # fc1: contract the (7, 112) activation with per-row weight taps (7 small matmuls).
    n_rows = conv_shapes[-1][1]
    acc1 = jnp.zeros((1, FC1_OUT), jnp.float32)
    for h in range(n_rows):
        acc1 = acc1 + jnp.dot(x[h:h + 1, :], fc1w_ref[h],
                              preferred_element_type=jnp.float32)
    h1 = _leaky(acc1 + fc1b_ref[...])                   # (1, 64) f32

    # fc2 (64 -> 1) on the VPU/XLU; a 1-lane MXU matmul would be wasted work.
    val = jnp.sum(h1 * fc2w_ref[...], axis=-1, keepdims=True) + fc2b_ref[...]   # (1, 1)
    o_ref[...] = jnp.broadcast_to(val, o_ref.shape)     # lane-padded (1, 1, 128) slot


# ----------------------------------------------------------------------------
# Parameters (PyTorch layouts, deterministic)
# ----------------------------------------------------------------------------
def make_params(key):
    def nrm(k, shape, s=0.05):
        return jax.random.normal(k, shape, jnp.float32) * s

    keys = iter(jax.random.split(key, 32))
    params = {}
    for li, (cin, cout, k, stride) in enumerate(CONV_CFGS):
        params[f"conv{li}"] = dict(
            w=nrm(next(keys), (cout, cin, k, k)),       # OIHW
            b=nrm(next(keys), (cout,)),
            gamma=1.0 + nrm(next(keys), (cout,)),
            beta=nrm(next(keys), (cout,)),
            rmean=nrm(next(keys), (cout,)),
            rvar=1.0 + jnp.abs(nrm(next(keys), (cout,))),
        )
    params["fc1"] = dict(w=nrm(next(keys), (FC1_OUT, FC1_IN)), b=nrm(next(keys), (FC1_OUT,)))
    params["fc2"] = dict(w=nrm(next(keys), (1, FC1_OUT)), b=nrm(next(keys), (1,)))
    return params


# ----------------------------------------------------------------------------
# Host-side (one-time) folding of params into kernel operands.
# ----------------------------------------------------------------------------
def build_kernel_operands(params, h0, w0):
    operands = []
    conv_shapes = []
    h, w = h0, w0
    for li, (cin, cout, k, stride) in enumerate(CONV_CFGS):
        p = params[f"conv{li}"]
        w_oihw = np.asarray(p["w"], np.float32)
        ho, wo = _conv_out(h, k, stride), _conv_out(w, k, stride)

        # Selection matrices: S[i, r, r*stride + i] = 1 (strided row gather as a matmul).
        sel = np.zeros((k, ho, h), np.float32)
        for i in range(k):
            sel[i, np.arange(ho), np.arange(ho) * stride + i] = 1.0

        # Toeplitz weights: T[i, win*cin+ci, col*cout+co] = w[co, ci, i, win - col*stride].
        toep = np.zeros((k, w * cin, wo * cout), np.float32)
        for i in range(k):
            for j in range(k):
                blk = w_oihw[:, :, i, j].T              # (cin, cout)
                for col in range(wo):
                    win = col * stride + j
                    toep[i, win * cin:(win + 1) * cin, col * cout:(col + 1) * cout] = blk

        # Fold conv bias into the eval-mode BatchNorm affine, tiled to lane layout.
        scale = np.asarray(p["gamma"]) / np.sqrt(np.asarray(p["rvar"]) + BN_EPS)
        shift = np.asarray(p["beta"]) + scale * (np.asarray(p["b"]) - np.asarray(p["rmean"]))
        scale_row = np.tile(scale, wo).reshape(1, wo * cout).astype(np.float32)
        shift_row = np.tile(shift, wo).reshape(1, wo * cout).astype(np.float32)

        operands += [jnp.asarray(sel, jnp.bfloat16), jnp.asarray(toep, jnp.bfloat16),
                     jnp.asarray(scale_row), jnp.asarray(shift_row)]
        conv_shapes.append((k, ho, wo, cout))
        h, w = ho, wo

    # fc1: reorder PyTorch's NCHW-flatten weight into per-row taps over our (h, w*c) layout.
    cout_last = CONV_CFGS[-1][1]
    w1 = np.asarray(params["fc1"]["w"], np.float32).reshape(FC1_OUT, cout_last, h, w)
    fc1_taps = np.transpose(w1, (2, 3, 1, 0)).reshape(h, w * cout_last, FC1_OUT)
    fc1_b = np.asarray(params["fc1"]["b"], np.float32).reshape(1, FC1_OUT)
    fc2_w = np.asarray(params["fc2"]["w"], np.float32).reshape(1, FC1_OUT)
    fc2_b = np.asarray(params["fc2"]["b"], np.float32).reshape(1, 1)

    operands += [jnp.asarray(fc1_taps, jnp.bfloat16), jnp.asarray(fc1_b),
                 jnp.asarray(fc2_w), jnp.asarray(fc2_b)]
    return operands, tuple(conv_shapes)


# ----------------------------------------------------------------------------
# Forward wrapper
# ----------------------------------------------------------------------------
def _const_index_map(ndim):
    zeros = (0,) * ndim
    return lambda b: zeros


def _forward_impl(operands, x_nchw, conv_shapes):
    n, c0, h0, w0 = x_nchw.shape
    # NCHW -> (N, H, W*C) bf16 row-flattened layout (layout glue only).
    x2d = jnp.transpose(x_nchw, (0, 2, 3, 1)).reshape(n, h0, w0 * c0).astype(jnp.bfloat16)

    in_specs = [pl.BlockSpec((1, h0, w0 * c0), lambda b: (b, 0, 0))]
    for op in operands:
        in_specs.append(pl.BlockSpec(op.shape, _const_index_map(op.ndim)))

    # Advisory cost estimate for XLA scheduling around the single custom call.
    flops = 0
    hh, ww, cc = h0, w0, c0
    for (k, ho, wo, cout) in conv_shapes:
        flops += 2 * k * (ho * hh * (ww * cc) + ho * (ww * cc) * (wo * cout))
        hh, ww, cc = ho, wo, cout
    flops += 2 * (FC1_IN * FC1_OUT + FC1_OUT)
    flops *= n
    bytes_accessed = sum(int(np.prod(op.shape)) * op.dtype.itemsize for op in operands)
    bytes_accessed += int(x2d.size) * 2 + n * 128 * 4

    kernel = functools.partial(_reward_forward_kernel, conv_shapes=conv_shapes)
    out = pl.pallas_call(
        kernel,
        out_shape=jax.ShapeDtypeStruct((n, 1, 128), jnp.float32),
        grid=(n,),
        in_specs=in_specs,
        out_specs=pl.BlockSpec((1, 1, 128), lambda b: (b, 0, 0)),
        compiler_params=pltpu.CompilerParams(
            dimension_semantics=("parallel",),              # both TCs get work on v7x
            vmem_limit_bytes=32 * 1024 * 1024),
        cost_estimate=pl.CostEstimate(flops=int(flops), transcendentals=0,
                                      bytes_accessed=int(bytes_accessed)),
    )(x2d, *operands)
    return out[:, 0, :1]                                    # (N, 1) f32


_forward_jit = jax.jit(_forward_impl, static_argnums=2)


def reward_model_forward(operands, conv_shapes, x_nchw):
    """Mirrors RewardModel.forward, including the 3-D input branch."""
    if x_nchw.ndim == 3:
        return _forward_jit(operands, x_nchw[None], conv_shapes)[0]
    return _forward_jit(operands, x_nchw, conv_shapes)


if __name__ == "__main__":
    key = jax.random.PRNGKey(0)
    pkey, xkey = jax.random.split(key)
    params = make_params(pkey)

    # Spatial size must be 79x79 so the flattened conv output is 784,
    # as implied by nn.Linear(in_features=784, ...).
    H0 = W0 = 79
    operands, conv_shapes = build_kernel_operands(params, H0, W0)

    x = jax.random.normal(xkey, (2, 4, H0, W0), jnp.float32)    # NCHW, batch=2

    out = reward_model_forward(operands, conv_shapes, x)
    out = jax.block_until_ready(out)
    assert out.shape == (2, 1), out.shape
    assert bool(jnp.all(jnp.isfinite(out)))
    print("KERNEL_OK")
</pallas_src>

<mosaic_0001>
module attributes {stable_mosaic.version = 11 : i64} {
  func.func @_reward_forward_kernel(%arg0: i32, %arg1: memref<1x79x316xbf16, #tpu.memory_space<vmem>>, %arg2: memref<7x25x79xbf16, #tpu.memory_space<vmem>>, %arg3: memref<7x316x400xbf16, #tpu.memory_space<vmem>>, %arg4: memref<1x400xf32, #tpu.memory_space<vmem>>, %arg5: memref<1x400xf32, #tpu.memory_space<vmem>>, %arg6: memref<5x11x25xbf16, #tpu.memory_space<vmem>>, %arg7: memref<5x400x176xbf16, #tpu.memory_space<vmem>>, %arg8: memref<1x176xf32, #tpu.memory_space<vmem>>, %arg9: memref<1x176xf32, #tpu.memory_space<vmem>>, %arg10: memref<3x9x11xbf16, #tpu.memory_space<vmem>>, %arg11: memref<3x176x144xbf16, #tpu.memory_space<vmem>>, %arg12: memref<1x144xf32, #tpu.memory_space<vmem>>, %arg13: memref<1x144xf32, #tpu.memory_space<vmem>>, %arg14: memref<3x7x9xbf16, #tpu.memory_space<vmem>>, %arg15: memref<3x144x112xbf16, #tpu.memory_space<vmem>>, %arg16: memref<1x112xf32, #tpu.memory_space<vmem>>, %arg17: memref<1x112xf32, #tpu.memory_space<vmem>>, %arg18: memref<7x112x64xbf16, #tpu.memory_space<vmem>>, %arg19: memref<1x64xf32, #tpu.memory_space<vmem>>, %arg20: memref<1x64xf32, #tpu.memory_space<vmem>>, %arg21: memref<1x1xf32, #tpu.memory_space<vmem>>, %arg22: memref<1x1x128xf32, #tpu.memory_space<vmem>>) attributes {dimension_semantics = [#tpu.dimension_semantics<parallel>], iteration_bounds = array<i64: 2>, scalar_prefetch = 0 : i64, scratch_operands = 0 : i64, tpu.core_type = #tpu.core_type<tc>, window_params = [{transform_indices = @transform_0, window_bounds = array<i64: 1, 79, 316>}, {pipeline_mode = #tpu.pipeline_mode<synchronous>, transform_indices = @transform_1, window_bounds = array<i64: 7, 25, 79>}, {pipeline_mode = #tpu.pipeline_mode<synchronous>, transform_indices = @transform_2, window_bounds = array<i64: 7, 316, 400>}, {pipeline_mode = #tpu.pipeline_mode<synchronous>, transform_indices = @transform_3, window_bounds = array<i64: 1, 400>}, {pipeline_mode = #tpu.pipeline_mode<synchronous>, transform_indices = @transform_4, window_bounds = array<i64: 1, 400>}, {pipeline_mode = #tpu.pipeline_mode<synchronous>, transform_indices = @transform_5, window_bounds = array<i64: 5, 11, 25>}, {pipeline_mode = #tpu.pipeline_mode<synchronous>, transform_indices = @transform_6, window_bounds = array<i64: 5, 400, 176>}, {pipeline_mode = #tpu.pipeline_mode<synchronous>, transform_indices = @transform_7, window_bounds = array<i64: 1, 176>}, {pipeline_mode = #tpu.pipeline_mode<synchronous>, transform_indices = @transform_8, window_bounds = array<i64: 1, 176>}, {pipeline_mode = #tpu.pipeline_mode<synchronous>, transform_indices = @transform_9, window_bounds = array<i64: 3, 9, 11>}, {pipeline_mode = #tpu.pipeline_mode<synchronous>, transform_indices = @transform_10, window_bounds = array<i64: 3, 176, 144>}, {pipeline_mode = #tpu.pipeline_mode<synchronous>, transform_indices = @transform_11, window_bounds = array<i64: 1, 144>}, {pipeline_mode = #tpu.pipeline_mode<synchronous>, transform_indices = @transform_12, window_bounds = array<i64: 1, 144>}, {pipeline_mode = #tpu.pipeline_mode<synchronous>, transform_indices = @transform_13, window_bounds = array<i64: 3, 7, 9>}, {pipeline_mode = #tpu.pipeline_mode<synchronous>, transform_indices = @transform_14, window_bounds = array<i64: 3, 144, 112>}, {pipeline_mode = #tpu.pipeline_mode<synchronous>, transform_indices = @transform_15, window_bounds = array<i64: 1, 112>}, {pipeline_mode = #tpu.pipeline_mode<synchronous>, transform_indices = @transform_16, window_bounds = array<i64: 1, 112>}, {pipeline_mode = #tpu.pipeline_mode<synchronous>, transform_indices = @transform_17, window_bounds = array<i64: 7, 112, 64>}, {pipeline_mode = #tpu.pipeline_mode<synchronous>, transform_indices = @transform_18, window_bounds = array<i64: 1, 64>}, {pipeline_mode = #tpu.pipeline_mode<synchronous>, transform_indices = @transform_19, window_bounds = array<i64: 1, 64>}, {pipeline_mode = #tpu.pipeline_mode<synchronous>, transform_indices = @transform_20, window_bounds = array<i64: 1, 1>}, {transform_indices = @transform_21, window_bounds = array<i64: 1, 1, 128>}]} {
    %c0 = arith.constant 0 : index
    %c0_0 = arith.constant 0 : index
    %c0_1 = arith.constant 0 : index
    %0 = vector.load %arg1[%c0, %c0_0, %c0_1] : memref<1x79x316xbf16, #tpu.memory_space<vmem>>, vector<1x79x316xbf16>
    %1 = vector.shape_cast %0 : vector<1x79x316xbf16> to vector<79x316xbf16>
    %cst = arith.constant 0.000000e+00 : f32
    %2 = vector.broadcast %cst : f32 to vector<25x400xf32>
    %c0_2 = arith.constant 0 : index
    %c0_3 = arith.constant 0 : index
    %c0_4 = arith.constant 0 : index
    %3 = vector.load %arg2[%c0_2, %c0_3, %c0_4] : memref<7x25x79xbf16, #tpu.memory_space<vmem>>, vector<1x25x79xbf16>
    %4 = vector.shape_cast %3 : vector<1x25x79xbf16> to vector<25x79xbf16>
    %cst_5 = arith.constant dense<0.000000e+00> : vector<25x316xf32>
    %5 = tpu.matmul %4, %1, %cst_5 {dimension_numbers = #tpu.dot_dimension_numbers<[1], [0], [0], [1], [0, 0, 1, 1], [], []>} : vector<25x79xbf16>, vector<79x316xbf16>, vector<25x316xf32> -> vector<25x316xf32>
    %6 = arith.truncf %5 : vector<25x316xf32> to vector<25x316xbf16>
    %c0_6 = arith.constant 0 : index
    %c0_7 = arith.constant 0 : index
    %c0_8 = arith.constant 0 : index
    %7 = vector.load %arg3[%c0_6, %c0_7, %c0_8] : memref<7x316x400xbf16, #tpu.memory_space<vmem>>, vector<1x316x400xbf16>
    %8 = vector.shape_cast %7 : vector<1x316x400xbf16> to vector<316x400xbf16>
    %cst_9 = arith.constant dense<0.000000e+00> : vector<25x400xf32>
    %9 = tpu.matmul %6, %8, %cst_9 {dimension_numbers = #tpu.dot_dimension_numbers<[1], [0], [0], [1], [0, 0, 1, 1], [], []>} : vector<25x316xbf16>, vector<316x400xbf16>, vector<25x400xf32> -> vector<25x400xf32>
    %10 = arith.addf %2, %9 : vector<25x400xf32>
    %c1 = arith.constant 1 : index
    %c0_10 = arith.constant 0 : index
    %c0_11 = arith.constant 0 : index
    %11 = vector.load %arg2[%c1, %c0_10, %c0_11] : memref<7x25x79xbf16, #tpu.memory_space<vmem>>, vector<1x25x79xbf16>
    %12 = vector.shape_cast %11 : vector<1x25x79xbf16> to vector<25x79xbf16>
    %cst_12 = arith.constant dense<0.000000e+00> : vector<25x316xf32>
    %13 = tpu.matmul %12, %1, %cst_12 {dimension_numbers = #tpu.dot_dimension_numbers<[1], [0], [0], [1], [0, 0, 1, 1], [], []>} : vector<25x79xbf16>, vector<79x316xbf16>, vector<25x316xf32> -> vector<25x316xf32>
    %14 = arith.truncf %13 : vector<25x316xf32> to vector<25x316xbf16>
    %c1_13 = arith.constant 1 : index
    %c0_14 = arith.constant 0 : index
    %c0_15 = arith.constant 0 : index
    %15 = vector.load %arg3[%c1_13, %c0_14, %c0_15] : memref<7x316x400xbf16, #tpu.memory_space<vmem>>, vector<1x316x400xbf16>
    %16 = vector.shape_cast %15 : vector<1x316x400xbf16> to vector<316x400xbf16>
    %cst_16 = arith.constant dense<0.000000e+00> : vector<25x400xf32>
    %17 = tpu.matmul %14, %16, %cst_16 {dimension_numbers = #tpu.dot_dimension_numbers<[1], [0], [0], [1], [0, 0, 1, 1], [], []>} : vector<25x316xbf16>, vector<316x400xbf16>, vector<25x400xf32> -> vector<25x400xf32>
    %18 = arith.addf %10, %17 : vector<25x400xf32>
    %c2 = arith.constant 2 : index
    %c0_17 = arith.constant 0 : index
    %c0_18 = arith.constant 0 : index
    %19 = vector.load %arg2[%c2, %c0_17, %c0_18] : memref<7x25x79xbf16, #tpu.memory_space<vmem>>, vector<1x25x79xbf16>
    %20 = vector.shape_cast %19 : vector<1x25x79xbf16> to vector<25x79xbf16>
    %cst_19 = arith.constant dense<0.000000e+00> : vector<25x316xf32>
    %21 = tpu.matmul %20, %1, %cst_19 {dimension_numbers = #tpu.dot_dimension_numbers<[1], [0], [0], [1], [0, 0, 1, 1], [], []>} : vector<25x79xbf16>, vector<79x316xbf16>, vector<25x316xf32> -> vector<25x316xf32>
    %22 = arith.truncf %21 : vector<25x316xf32> to vector<25x316xbf16>
    %c2_20 = arith.constant 2 : index
    %c0_21 = arith.constant 0 : index
    %c0_22 = arith.constant 0 : index
    %23 = vector.load %arg3[%c2_20, %c0_21, %c0_22] : memref<7x316x400xbf16, #tpu.memory_space<vmem>>, vector<1x316x400xbf16>
    %24 = vector.shape_cast %23 : vector<1x316x400xbf16> to vector<316x400xbf16>
    %cst_23 = arith.constant dense<0.000000e+00> : vector<25x400xf32>
    %25 = tpu.matmul %22, %24, %cst_23 {dimension_numbers = #tpu.dot_dimension_numbers<[1], [0], [0], [1], [0, 0, 1, 1], [], []>} : vector<25x316xbf16>, vector<316x400xbf16>, vector<25x400xf32> -> vector<25x400xf32>
    %26 = arith.addf %18, %25 : vector<25x400xf32>
    %c3 = arith.constant 3 : index
    %c0_24 = arith.constant 0 : index
    %c0_25 = arith.constant 0 : index
    %27 = vector.load %arg2[%c3, %c0_24, %c0_25] : memref<7x25x79xbf16, #tpu.memory_space<vmem>>, vector<1x25x79xbf16>
    %28 = vector.shape_cast %27 : vector<1x25x79xbf16> to vector<25x79xbf16>
    %cst_26 = arith.constant dense<0.000000e+00> : vector<25x316xf32>
    %29 = tpu.matmul %28, %1, %cst_26 {dimension_numbers = #tpu.dot_dimension_numbers<[1], [0], [0], [1], [0, 0, 1, 1], [], []>} : vector<25x79xbf16>, vector<79x316xbf16>, vector<25x316xf32> -> vector<25x316xf32>
    %30 = arith.truncf %29 : vector<25x316xf32> to vector<25x316xbf16>
    %c3_27 = arith.constant 3 : index
    %c0_28 = arith.constant 0 : index
    %c0_29 = arith.constant 0 : index
    %31 = vector.load %arg3[%c3_27, %c0_28, %c0_29] : memref<7x316x400xbf16, #tpu.memory_space<vmem>>, vector<1x316x400xbf16>
    %32 = vector.shape_cast %31 : vector<1x316x400xbf16> to vector<316x400xbf16>
    %cst_30 = arith.constant dense<0.000000e+00> : vector<25x400xf32>
    %33 = tpu.matmul %30, %32, %cst_30 {dimension_numbers = #tpu.dot_dimension_numbers<[1], [0], [0], [1], [0, 0, 1, 1], [], []>} : vector<25x316xbf16>, vector<316x400xbf16>, vector<25x400xf32> -> vector<25x400xf32>
    %34 = arith.addf %26, %33 : vector<25x400xf32>
    %c4 = arith.constant 4 : index
    %c0_31 = arith.constant 0 : index
    %c0_32 = arith.constant 0 : index
    %35 = vector.load %arg2[%c4, %c0_31, %c0_32] : memref<7x25x79xbf16, #tpu.memory_space<vmem>>, vector<1x25x79xbf16>
    %36 = vector.shape_cast %35 : vector<1x25x79xbf16> to vector<25x79xbf16>
    %cst_33 = arith.constant dense<0.000000e+00> : vector<25x316xf32>
    %37 = tpu.matmul %36, %1, %cst_33 {dimension_numbers = #tpu.dot_dimension_numbers<[1], [0], [0], [1], [0, 0, 1, 1], [], []>} : vector<25x79xbf16>, vector<79x316xbf16>, vector<25x316xf32> -> vector<25x316xf32>
    %38 = arith.truncf %37 : vector<25x316xf32> to vector<25x316xbf16>
    %c4_34 = arith.constant 4 : index
    %c0_35 = arith.constant 0 : index
    %c0_36 = arith.constant 0 : index
    %39 = vector.load %arg3[%c4_34, %c0_35, %c0_36] : memref<7x316x400xbf16, #tpu.memory_space<vmem>>, vector<1x316x400xbf16>
    %40 = vector.shape_cast %39 : vector<1x316x400xbf16> to vector<316x400xbf16>
    %cst_37 = arith.constant dense<0.000000e+00> : vector<25x400xf32>
    %41 = tpu.matmul %38, %40, %cst_37 {dimension_numbers = #tpu.dot_dimension_numbers<[1], [0], [0], [1], [0, 0, 1, 1], [], []>} : vector<25x316xbf16>, vector<316x400xbf16>, vector<25x400xf32> -> vector<25x400xf32>
    %42 = arith.addf %34, %41 : vector<25x400xf32>
    %c5 = arith.constant 5 : index
    %c0_38 = arith.constant 0 : index
    %c0_39 = arith.constant 0 : index
    %43 = vector.load %arg2[%c5, %c0_38, %c0_39] : memref<7x25x79xbf16, #tpu.memory_space<vmem>>, vector<1x25x79xbf16>
    %44 = vector.shape_cast %43 : vector<1x25x79xbf16> to vector<25x79xbf16>
    %cst_40 = arith.constant dense<0.000000e+00> : vector<25x316xf32>
    %45 = tpu.matmul %44, %1, %cst_40 {dimension_numbers = #tpu.dot_dimension_numbers<[1], [0], [0], [1], [0, 0, 1, 1], [], []>} : vector<25x79xbf16>, vector<79x316xbf16>, vector<25x316xf32> -> vector<25x316xf32>
    %46 = arith.truncf %45 : vector<25x316xf32> to vector<25x316xbf16>
    %c5_41 = arith.constant 5 : index
    %c0_42 = arith.constant 0 : index
    %c0_43 = arith.constant 0 : index
    %47 = vector.load %arg3[%c5_41, %c0_42, %c0_43] : memref<7x316x400xbf16, #tpu.memory_space<vmem>>, vector<1x316x400xbf16>
    %48 = vector.shape_cast %47 : vector<1x316x400xbf16> to vector<316x400xbf16>
    %cst_44 = arith.constant dense<0.000000e+00> : vector<25x400xf32>
    %49 = tpu.matmul %46, %48, %cst_44 {dimension_numbers = #tpu.dot_dimension_numbers<[1], [0], [0], [1], [0, 0, 1, 1], [], []>} : vector<25x316xbf16>, vector<316x400xbf16>, vector<25x400xf32> -> vector<25x400xf32>
    %50 = arith.addf %42, %49 : vector<25x400xf32>
    %c6 = arith.constant 6 : index
    %c0_45 = arith.constant 0 : index
    %c0_46 = arith.constant 0 : index
    %51 = vector.load %arg2[%c6, %c0_45, %c0_46] : memref<7x25x79xbf16, #tpu.memory_space<vmem>>, vector<1x25x79xbf16>
    %52 = vector.shape_cast %51 : vector<1x25x79xbf16> to vector<25x79xbf16>
    %cst_47 = arith.constant dense<0.000000e+00> : vector<25x316xf32>
    %53 = tpu.matmul %52, %1, %cst_47 {dimension_numbers = #tpu.dot_dimension_numbers<[1], [0], [0], [1], [0, 0, 1, 1], [], []>} : vector<25x79xbf16>, vector<79x316xbf16>, vector<25x316xf32> -> vector<25x316xf32>
    %54 = arith.truncf %53 : vector<25x316xf32> to vector<25x316xbf16>
    %c6_48 = arith.constant 6 : index
    %c0_49 = arith.constant 0 : index
    %c0_50 = arith.constant 0 : index
    %55 = vector.load %arg3[%c6_48, %c0_49, %c0_50] : memref<7x316x400xbf16, #tpu.memory_space<vmem>>, vector<1x316x400xbf16>
    %56 = vector.shape_cast %55 : vector<1x316x400xbf16> to vector<316x400xbf16>
    %cst_51 = arith.constant dense<0.000000e+00> : vector<25x400xf32>
    %57 = tpu.matmul %54, %56, %cst_51 {dimension_numbers = #tpu.dot_dimension_numbers<[1], [0], [0], [1], [0, 0, 1, 1], [], []>} : vector<25x316xbf16>, vector<316x400xbf16>, vector<25x400xf32> -> vector<25x400xf32>
    %58 = arith.addf %50, %57 : vector<25x400xf32>
    %c0_52 = arith.constant 0 : index
    %c0_53 = arith.constant 0 : index
    %59 = vector.load %arg4[%c0_52, %c0_53] : memref<1x400xf32, #tpu.memory_space<vmem>>, vector<1x400xf32>
    %60 = vector.broadcast %59 : vector<1x400xf32> to vector<25x400xf32>
    %61 = arith.mulf %58, %60 : vector<25x400xf32>
    %c0_54 = arith.constant 0 : index
    %c0_55 = arith.constant 0 : index
    %62 = vector.load %arg5[%c0_54, %c0_55] : memref<1x400xf32, #tpu.memory_space<vmem>>, vector<1x400xf32>
    %63 = vector.broadcast %62 : vector<1x400xf32> to vector<25x400xf32>
    %64 = arith.addf %61, %63 : vector<25x400xf32>
    %cst_56 = arith.constant 0.000000e+00 : f32
    %65 = vector.broadcast %cst_56 : f32 to vector<25x400xf32>
    %66 = arith.cmpf oge, %64, %65 : vector<25x400xf32>
    %cst_57 = arith.constant 0.00999999977 : f32
    %67 = vector.broadcast %cst_57 : f32 to vector<25x400xf32>
    %68 = arith.mulf %67, %64 : vector<25x400xf32>
    %69 = arith.select %66, %64, %68 : vector<25x400xi1>, vector<25x400xf32>
    %70 = arith.truncf %69 : vector<25x400xf32> to vector<25x400xbf16>
    %cst_58 = arith.constant 0.000000e+00 : f32
    %71 = vector.broadcast %cst_58 : f32 to vector<11x176xf32>
    %c0_59 = arith.constant 0 : index
    %c0_60 = arith.constant 0 : index
    %c0_61 = arith.constant 0 : index
    %72 = vector.load %arg6[%c0_59, %c0_60, %c0_61] : memref<5x11x25xbf16, #tpu.memory_space<vmem>>, vector<1x11x25xbf16>
    %73 = vector.shape_cast %72 : vector<1x11x25xbf16> to vector<11x25xbf16>
    %cst_62 = arith.constant dense<0.000000e+00> : vector<11x400xf32>
    %74 = tpu.matmul %73, %70, %cst_62 {dimension_numbers = #tpu.dot_dimension_numbers<[1], [0], [0], [1], [0, 0, 1, 1], [], []>} : vector<11x25xbf16>, vector<25x400xbf16>, vector<11x400xf32> -> vector<11x400xf32>
    %75 = arith.truncf %74 : vector<11x400xf32> to vector<11x400xbf16>
    %c0_63 = arith.constant 0 : index
    %c0_64 = arith.constant 0 : index
    %c0_65 = arith.constant 0 : index
    %76 = vector.load %arg7[%c0_63, %c0_64, %c0_65] : memref<5x400x176xbf16, #tpu.memory_space<vmem>>, vector<1x400x176xbf16>
    %77 = vector.shape_cast %76 : vector<1x400x176xbf16> to vector<400x176xbf16>
    %cst_66 = arith.constant dense<0.000000e+00> : vector<11x176xf32>
    %78 = tpu.matmul %75, %77, %cst_66 {dimension_numbers = #tpu.dot_dimension_numbers<[1], [0], [0], [1], [0, 0, 1, 1], [], []>} : vector<11x400xbf16>, vector<400x176xbf16>, vector<11x176xf32> -> vector<11x176xf32>
    %79 = arith.addf %71, %78 : vector<11x176xf32>
    %c1_67 = arith.constant 1 : index
    %c0_68 = arith.constant 0 : index
    %c0_69 = arith.constant 0 : index
    %80 = vector.load %arg6[%c1_67, %c0_68, %c0_69] : memref<5x11x25xbf16, #tpu.memory_space<vmem>>, vector<1x11x25xbf16>
    %81 = vector.shape_cast %80 : vector<1x11x25xbf16> to vector<11x25xbf16>
    %cst_70 = arith.constant dense<0.000000e+00> : vector<11x400xf32>
    %82 = tpu.matmul %81, %70, %cst_70 {dimension_numbers = #tpu.dot_dimension_numbers<[1], [0], [0], [1], [0, 0, 1, 1], [], []>} : vector<11x25xbf16>, vector<25x400xbf16>, vector<11x400xf32> -> vector<11x400xf32>
    %83 = arith.truncf %82 : vector<11x400xf32> to vector<11x400xbf16>
    %c1_71 = arith.constant 1 : index
    %c0_72 = arith.constant 0 : index
    %c0_73 = arith.constant 0 : index
    %84 = vector.load %arg7[%c1_71, %c0_72, %c0_73] : memref<5x400x176xbf16, #tpu.memory_space<vmem>>, vector<1x400x176xbf16>
    %85 = vector.shape_cast %84 : vector<1x400x176xbf16> to vector<400x176xbf16>
    %cst_74 = arith.constant dense<0.000000e+00> : vector<11x176xf32>
    %86 = tpu.matmul %83, %85, %cst_74 {dimension_numbers = #tpu.dot_dimension_numbers<[1], [0], [0], [1], [0, 0, 1, 1], [], []>} : vector<11x400xbf16>, vector<400x176xbf16>, vector<11x176xf32> -> vector<11x176xf32>
    %87 = arith.addf %79, %86 : vector<11x176xf32>
    %c2_75 = arith.constant 2 : index
    %c0_76 = arith.constant 0 : index
    %c0_77 = arith.constant 0 : index
    %88 = vector.load %arg6[%c2_75, %c0_76, %c0_77] : memref<5x11x25xbf16, #tpu.memory_space<vmem>>, vector<1x11x25xbf16>
    %89 = vector.shape_cast %88 : vector<1x11x25xbf16> to vector<11x25xbf16>
    %cst_78 = arith.constant dense<0.000000e+00> : vector<11x400xf32>
    %90 = tpu.matmul %89, %70, %cst_78 {dimension_numbers = #tpu.dot_dimension_numbers<[1], [0], [0], [1], [0, 0, 1, 1], [], []>} : vector<11x25xbf16>, vector<25x400xbf16>, vector<11x400xf32> -> vector<11x400xf32>
    %91 = arith.truncf %90 : vector<11x400xf32> to vector<11x400xbf16>
    %c2_79 = arith.constant 2 : index
    %c0_80 = arith.constant 0 : index
    %c0_81 = arith.constant 0 : index
    %92 = vector.load %arg7[%c2_79, %c0_80, %c0_81] : memref<5x400x176xbf16, #tpu.memory_space<vmem>>, vector<1x400x176xbf16>
    %93 = vector.shape_cast %92 : vector<1x400x176xbf16> to vector<400x176xbf16>
    %cst_82 = arith.constant dense<0.000000e+00> : vector<11x176xf32>
    %94 = tpu.matmul %91, %93, %cst_82 {dimension_numbers = #tpu.dot_dimension_numbers<[1], [0], [0], [1], [0, 0, 1, 1], [], []>} : vector<11x400xbf16>, vector<400x176xbf16>, vector<11x176xf32> -> vector<11x176xf32>
    %95 = arith.addf %87, %94 : vector<11x176xf32>
    %c3_83 = arith.constant 3 : index
    %c0_84 = arith.constant 0 : index
    %c0_85 = arith.constant 0 : index
    %96 = vector.load %arg6[%c3_83, %c0_84, %c0_85] : memref<5x11x25xbf16, #tpu.memory_space<vmem>>, vector<1x11x25xbf16>
    %97 = vector.shape_cast %96 : vector<1x11x25xbf16> to vector<11x25xbf16>
    %cst_86 = arith.constant dense<0.000000e+00> : vector<11x400xf32>
    %98 = tpu.matmul %97, %70, %cst_86 {dimension_numbers = #tpu.dot_dimension_numbers<[1], [0], [0], [1], [0, 0, 1, 1], [], []>} : vector<11x25xbf16>, vector<25x400xbf16>, vector<11x400xf32> -> vector<11x400xf32>
    %99 = arith.truncf %98 : vector<11x400xf32> to vector<11x400xbf16>
    %c3_87 = arith.constant 3 : index
    %c0_88 = arith.constant 0 : index
    %c0_89 = arith.constant 0 : index
    %100 = vector.load %arg7[%c3_87, %c0_88, %c0_89] : memref<5x400x176xbf16, #tpu.memory_space<vmem>>, vector<1x400x176xbf16>
    %101 = vector.shape_cast %100 : vector<1x400x176xbf16> to vector<400x176xbf16>
    %cst_90 = arith.constant dense<0.000000e+00> : vector<11x176xf32>
    %102 = tpu.matmul %99, %101, %cst_90 {dimension_numbers = #tpu.dot_dimension_numbers<[1], [0], [0], [1], [0, 0, 1, 1], [], []>} : vector<11x400xbf16>, vector<400x176xbf16>, vector<11x176xf32> -> vector<11x176xf32>
    %103 = arith.addf %95, %102 : vector<11x176xf32>
    %c4_91 = arith.constant 4 : index
    %c0_92 = arith.constant 0 : index
    %c0_93 = arith.constant 0 : index
    %104 = vector.load %arg6[%c4_91, %c0_92, %c0_93] : memref<5x11x25xbf16, #tpu.memory_space<vmem>>, vector<1x11x25xbf16>
    %105 = vector.shape_cast %104 : vector<1x11x25xbf16> to vector<11x25xbf16>
    %cst_94 = arith.constant dense<0.000000e+00> : vector<11x400xf32>
    %106 = tpu.matmul %105, %70, %cst_94 {dimension_numbers = #tpu.dot_dimension_numbers<[1], [0], [0], [1], [0, 0, 1, 1], [], []>} : vector<11x25xbf16>, vector<25x400xbf16>, vector<11x400xf32> -> vector<11x400xf32>
    %107 = arith.truncf %106 : vector<11x400xf32> to vector<11x400xbf16>
    %c4_95 = arith.constant 4 : index
    %c0_96 = arith.constant 0 : index
    %c0_97 = arith.constant 0 : index
    %108 = vector.load %arg7[%c4_95, %c0_96, %c0_97] : memref<5x400x176xbf16, #tpu.memory_space<vmem>>, vector<1x400x176xbf16>
    %109 = vector.shape_cast %108 : vector<1x400x176xbf16> to vector<400x176xbf16>
    %cst_98 = arith.constant dense<0.000000e+00> : vector<11x176xf32>
    %110 = tpu.matmul %107, %109, %cst_98 {dimension_numbers = #tpu.dot_dimension_numbers<[1], [0], [0], [1], [0, 0, 1, 1], [], []>} : vector<11x400xbf16>, vector<400x176xbf16>, vector<11x176xf32> -> vector<11x176xf32>
    %111 = arith.addf %103, %110 : vector<11x176xf32>
    %c0_99 = arith.constant 0 : index
    %c0_100 = arith.constant 0 : index
    %112 = vector.load %arg8[%c0_99, %c0_100] : memref<1x176xf32, #tpu.memory_space<vmem>>, vector<1x176xf32>
    %113 = vector.broadcast %112 : vector<1x176xf32> to vector<11x176xf32>
    %114 = arith.mulf %111, %113 : vector<11x176xf32>
    %c0_101 = arith.constant 0 : index
    %c0_102 = arith.constant 0 : index
    %115 = vector.load %arg9[%c0_101, %c0_102] : memref<1x176xf32, #tpu.memory_space<vmem>>, vector<1x176xf32>
    %116 = vector.broadcast %115 : vector<1x176xf32> to vector<11x176xf32>
    %117 = arith.addf %114, %116 : vector<11x176xf32>
    %cst_103 = arith.constant 0.000000e+00 : f32
    %118 = vector.broadcast %cst_103 : f32 to vector<11x176xf32>
    %119 = arith.cmpf oge, %117, %118 : vector<11x176xf32>
    %cst_104 = arith.constant 0.00999999977 : f32
    %120 = vector.broadcast %cst_104 : f32 to vector<11x176xf32>
    %121 = arith.mulf %120, %117 : vector<11x176xf32>
    %122 = arith.select %119, %117, %121 : vector<11x176xi1>, vector<11x176xf32>
    %123 = arith.truncf %122 : vector<11x176xf32> to vector<11x176xbf16>
    %cst_105 = arith.constant 0.000000e+00 : f32
    %124 = vector.broadcast %cst_105 : f32 to vector<9x144xf32>
    %c0_106 = arith.constant 0 : index
    %c0_107 = arith.constant 0 : index
    %c0_108 = arith.constant 0 : index
    %125 = vector.load %arg10[%c0_106, %c0_107, %c0_108] : memref<3x9x11xbf16, #tpu.memory_space<vmem>>, vector<1x9x11xbf16>
    %126 = vector.shape_cast %125 : vector<1x9x11xbf16> to vector<9x11xbf16>
    %cst_109 = arith.constant dense<0.000000e+00> : vector<9x176xf32>
    %127 = tpu.matmul %126, %123, %cst_109 {dimension_numbers = #tpu.dot_dimension_numbers<[1], [0], [0], [1], [0, 0, 1, 1], [], []>} : vector<9x11xbf16>, vector<11x176xbf16>, vector<9x176xf32> -> vector<9x176xf32>
    %128 = arith.truncf %127 : vector<9x176xf32> to vector<9x176xbf16>
    %c0_110 = arith.constant 0 : index
    %c0_111 = arith.constant 0 : index
    %c0_112 = arith.constant 0 : index
    %129 = vector.load %arg11[%c0_110, %c0_111, %c0_112] : memref<3x176x144xbf16, #tpu.memory_space<vmem>>, vector<1x176x144xbf16>
    %130 = vector.shape_cast %129 : vector<1x176x144xbf16> to vector<176x144xbf16>
    %cst_113 = arith.constant dense<0.000000e+00> : vector<9x144xf32>
    %131 = tpu.matmul %128, %130, %cst_113 {dimension_numbers = #tpu.dot_dimension_numbers<[1], [0], [0], [1], [0, 0, 1, 1], [], []>} : vector<9x176xbf16>, vector<176x144xbf16>, vector<9x144xf32> -> vector<9x144xf32>
    %132 = arith.addf %124, %131 : vector<9x144xf32>
    %c1_114 = arith.constant 1 : index
    %c0_115 = arith.constant 0 : index
    %c0_116 = arith.constant 0 : index
    %133 = vector.load %arg10[%c1_114, %c0_115, %c0_116] : memref<3x9x11xbf16, #tpu.memory_space<vmem>>, vector<1x9x11xbf16>
    %134 = vector.shape_cast %133 : vector<1x9x11xbf16> to vector<9x11xbf16>
    %cst_117 = arith.constant dense<0.000000e+00> : vector<9x176xf32>
    %135 = tpu.matmul %134, %123, %cst_117 {dimension_numbers = #tpu.dot_dimension_numbers<[1], [0], [0], [1], [0, 0, 1, 1], [], []>} : vector<9x11xbf16>, vector<11x176xbf16>, vector<9x176xf32> -> vector<9x176xf32>
    %136 = arith.truncf %135 : vector<9x176xf32> to vector<9x176xbf16>
    %c1_118 = arith.constant 1 : index
    %c0_119 = arith.constant 0 : index
    %c0_120 = arith.constant 0 : index
    %137 = vector.load %arg11[%c1_118, %c0_119, %c0_120] : memref<3x176x144xbf16, #tpu.memory_space<vmem>>, vector<1x176x144xbf16>
    %138 = vector.shape_cast %137 : vector<1x176x144xbf16> to vector<176x144xbf16>
    %cst_121 = arith.constant dense<0.000000e+00> : vector<9x144xf32>
    %139 = tpu.matmul %136, %138, %cst_121 {dimension_numbers = #tpu.dot_dimension_numbers<[1], [0], [0], [1], [0, 0, 1, 1], [], []>} : vector<9x176xbf16>, vector<176x144xbf16>, vector<9x144xf32> -> vector<9x144xf32>
    %140 = arith.addf %132, %139 : vector<9x144xf32>
    %c2_122 = arith.constant 2 : index
    %c0_123 = arith.constant 0 : index
    %c0_124 = arith.constant 0 : index
    %141 = vector.load %arg10[%c2_122, %c0_123, %c0_124] : memref<3x9x11xbf16, #tpu.memory_space<vmem>>, vector<1x9x11xbf16>
    %142 = vector.shape_cast %141 : vector<1x9x11xbf16> to vector<9x11xbf16>
    %cst_125 = arith.constant dense<0.000000e+00> : vector<9x176xf32>
    %143 = tpu.matmul %142, %123, %cst_125 {dimension_numbers = #tpu.dot_dimension_numbers<[1], [0], [0], [1], [0, 0, 1, 1], [], []>} : vector<9x11xbf16>, vector<11x176xbf16>, vector<9x176xf32> -> vector<9x176xf32>
    %144 = arith.truncf %143 : vector<9x176xf32> to vector<9x176xbf16>
    %c2_126 = arith.constant 2 : index
    %c0_127 = arith.constant 0 : index
    %c0_128 = arith.constant 0 : index
    %145 = vector.load %arg11[%c2_126, %c0_127, %c0_128] : memref<3x176x144xbf16, #tpu.memory_space<vmem>>, vector<1x176x144xbf16>
    %146 = vector.shape_cast %145 : vector<1x176x144xbf16> to vector<176x144xbf16>
    %cst_129 = arith.constant dense<0.000000e+00> : vector<9x144xf32>
    %147 = tpu.matmul %144, %146, %cst_129 {dimension_numbers = #tpu.dot_dimension_numbers<[1], [0], [0], [1], [0, 0, 1, 1], [], []>} : vector<9x176xbf16>, vector<176x144xbf16>, vector<9x144xf32> -> vector<9x144xf32>
    %148 = arith.addf %140, %147 : vector<9x144xf32>
    %c0_130 = arith.constant 0 : index
    %c0_131 = arith.constant 0 : index
    %149 = vector.load %arg12[%c0_130, %c0_131] : memref<1x144xf32, #tpu.memory_space<vmem>>, vector<1x144xf32>
    %150 = vector.broadcast %149 : vector<1x144xf32> to vector<9x144xf32>
    %151 = arith.mulf %148, %150 : vector<9x144xf32>
    %c0_132 = arith.constant 0 : index
    %c0_133 = arith.constant 0 : index
    %152 = vector.load %arg13[%c0_132, %c0_133] : memref<1x144xf32, #tpu.memory_space<vmem>>, vector<1x144xf32>
    %153 = vector.broadcast %152 : vector<1x144xf32> to vector<9x144xf32>
    %154 = arith.addf %151, %153 : vector<9x144xf32>
    %cst_134 = arith.constant 0.000000e+00 : f32
    %155 = vector.broadcast %cst_134 : f32 to vector<9x144xf32>
    %156 = arith.cmpf oge, %154, %155 : vector<9x144xf32>
    %cst_135 = arith.constant 0.00999999977 : f32
    %157 = vector.broadcast %cst_135 : f32 to vector<9x144xf32>
    %158 = arith.mulf %157, %154 : vector<9x144xf32>
    %159 = arith.select %156, %154, %158 : vector<9x144xi1>, vector<9x144xf32>
    %160 = arith.truncf %159 : vector<9x144xf32> to vector<9x144xbf16>
    %cst_136 = arith.constant 0.000000e+00 : f32
    %161 = vector.broadcast %cst_136 : f32 to vector<7x112xf32>
    %c0_137 = arith.constant 0 : index
    %c0_138 = arith.constant 0 : index
    %c0_139 = arith.constant 0 : index
    %162 = vector.load %arg14[%c0_137, %c0_138, %c0_139] : memref<3x7x9xbf16, #tpu.memory_space<vmem>>, vector<1x7x9xbf16>
    %163 = vector.shape_cast %162 : vector<1x7x9xbf16> to vector<7x9xbf16>
    %cst_140 = arith.constant dense<0.000000e+00> : vector<7x144xf32>
    %164 = tpu.matmul %163, %160, %cst_140 {dimension_numbers = #tpu.dot_dimension_numbers<[1], [0], [0], [1], [0, 0, 1, 1], [], []>} : vector<7x9xbf16>, vector<9x144xbf16>, vector<7x144xf32> -> vector<7x144xf32>
    %165 = arith.truncf %164 : vector<7x144xf32> to vector<7x144xbf16>
    %c0_141 = arith.constant 0 : index
    %c0_142 = arith.constant 0 : index
    %c0_143 = arith.constant 0 : index
    %166 = vector.load %arg15[%c0_141, %c0_142, %c0_143] : memref<3x144x112xbf16, #tpu.memory_space<vmem>>, vector<1x144x112xbf16>
    %167 = vector.shape_cast %166 : vector<1x144x112xbf16> to vector<144x112xbf16>
    %cst_144 = arith.constant dense<0.000000e+00> : vector<7x112xf32>
    %168 = tpu.matmul %165, %167, %cst_144 {dimension_numbers = #tpu.dot_dimension_numbers<[1], [0], [0], [1], [0, 0, 1, 1], [], []>} : vector<7x144xbf16>, vector<144x112xbf16>, vector<7x112xf32> -> vector<7x112xf32>
    %169 = arith.addf %161, %168 : vector<7x112xf32>
    %c1_145 = arith.constant 1 : index
    %c0_146 = arith.constant 0 : index
    %c0_147 = arith.constant 0 : index
    %170 = vector.load %arg14[%c1_145, %c0_146, %c0_147] : memref<3x7x9xbf16, #tpu.memory_space<vmem>>, vector<1x7x9xbf16>
    %171 = vector.shape_cast %170 : vector<1x7x9xbf16> to vector<7x9xbf16>
    %cst_148 = arith.constant dense<0.000000e+00> : vector<7x144xf32>
    %172 = tpu.matmul %171, %160, %cst_148 {dimension_numbers = #tpu.dot_dimension_numbers<[1], [0], [0], [1], [0, 0, 1, 1], [], []>} : vector<7x9xbf16>, vector<9x144xbf16>, vector<7x144xf32> -> vector<7x144xf32>
    %173 = arith.truncf %172 : vector<7x144xf32> to vector<7x144xbf16>
    %c1_149 = arith.constant 1 : index
    %c0_150 = arith.constant 0 : index
    %c0_151 = arith.constant 0 : index
    %174 = vector.load %arg15[%c1_149, %c0_150, %c0_151] : memref<3x144x112xbf16, #tpu.memory_space<vmem>>, vector<1x144x112xbf16>
    %175 = vector.shape_cast %174 : vector<1x144x112xbf16> to vector<144x112xbf16>
    %cst_152 = arith.constant dense<0.000000e+00> : vector<7x112xf32>
    %176 = tpu.matmul %173, %175, %cst_152 {dimension_numbers = #tpu.dot_dimension_numbers<[1], [0], [0], [1], [0, 0, 1, 1], [], []>} : vector<7x144xbf16>, vector<144x112xbf16>, vector<7x112xf32> -> vector<7x112xf32>
    %177 = arith.addf %169, %176 : vector<7x112xf32>
    %c2_153 = arith.constant 2 : index
    %c0_154 = arith.constant 0 : index
    %c0_155 = arith.constant 0 : index
    %178 = vector.load %arg14[%c2_153, %c0_154, %c0_155] : memref<3x7x9xbf16, #tpu.memory_space<vmem>>, vector<1x7x9xbf16>
    %179 = vector.shape_cast %178 : vector<1x7x9xbf16> to vector<7x9xbf16>
    %cst_156 = arith.constant dense<0.000000e+00> : vector<7x144xf32>
    %180 = tpu.matmul %179, %160, %cst_156 {dimension_numbers = #tpu.dot_dimension_numbers<[1], [0], [0], [1], [0, 0, 1, 1], [], []>} : vector<7x9xbf16>, vector<9x144xbf16>, vector<7x144xf32> -> vector<7x144xf32>
    %181 = arith.truncf %180 : vector<7x144xf32> to vector<7x144xbf16>
    %c2_157 = arith.constant 2 : index
    %c0_158 = arith.constant 0 : index
    %c0_159 = arith.constant 0 : index
    %182 = vector.load %arg15[%c2_157, %c0_158, %c0_159] : memref<3x144x112xbf16, #tpu.memory_space<vmem>>, vector<1x144x112xbf16>
    %183 = vector.shape_cast %182 : vector<1x144x112xbf16> to vector<144x112xbf16>
    %cst_160 = arith.constant dense<0.000000e+00> : vector<7x112xf32>
    %184 = tpu.matmul %181, %183, %cst_160 {dimension_numbers = #tpu.dot_dimension_numbers<[1], [0], [0], [1], [0, 0, 1, 1], [], []>} : vector<7x144xbf16>, vector<144x112xbf16>, vector<7x112xf32> -> vector<7x112xf32>
    %185 = arith.addf %177, %184 : vector<7x112xf32>
    %c0_161 = arith.constant 0 : index
    %c0_162 = arith.constant 0 : index
    %186 = vector.load %arg16[%c0_161, %c0_162] : memref<1x112xf32, #tpu.memory_space<vmem>>, vector<1x112xf32>
    %187 = vector.broadcast %186 : vector<1x112xf32> to vector<7x112xf32>
    %188 = arith.mulf %185, %187 : vector<7x112xf32>
    %c0_163 = arith.constant 0 : index
    %c0_164 = arith.constant 0 : index
    %189 = vector.load %arg17[%c0_163, %c0_164] : memref<1x112xf32, #tpu.memory_space<vmem>>, vector<1x112xf32>
    %190 = vector.broadcast %189 : vector<1x112xf32> to vector<7x112xf32>
    %191 = arith.addf %188, %190 : vector<7x112xf32>
    %cst_165 = arith.constant 0.000000e+00 : f32
    %192 = vector.broadcast %cst_165 : f32 to vector<7x112xf32>
    %193 = arith.cmpf oge, %191, %192 : vector<7x112xf32>
    %cst_166 = arith.constant 0.00999999977 : f32
    %194 = vector.broadcast %cst_166 : f32 to vector<7x112xf32>
    %195 = arith.mulf %194, %191 : vector<7x112xf32>
    %196 = arith.select %193, %191, %195 : vector<7x112xi1>, vector<7x112xf32>
    %197 = arith.truncf %196 : vector<7x112xf32> to vector<7x112xbf16>
    %cst_167 = arith.constant 0.000000e+00 : f32
    %198 = vector.broadcast %cst_167 : f32 to vector<1x64xf32>
    %199 = vector.extract_strided_slice %197 {offsets = [0, 0], sizes = [1, 112], strides = [1, 1]} : vector<7x112xbf16> to vector<1x112xbf16>
    %c0_168 = arith.constant 0 : index
    %c0_169 = arith.constant 0 : index
    %c0_170 = arith.constant 0 : index
    %200 = vector.load %arg18[%c0_168, %c0_169, %c0_170] : memref<7x112x64xbf16, #tpu.memory_space<vmem>>, vector<1x112x64xbf16>
    %201 = vector.shape_cast %200 : vector<1x112x64xbf16> to vector<112x64xbf16>
    %cst_171 = arith.constant dense<0.000000e+00> : vector<1x64xf32>
    %202 = tpu.matmul %199, %201, %cst_171 {dimension_numbers = #tpu.dot_dimension_numbers<[1], [0], [0], [1], [0, 0, 1, 1], [], []>} : vector<1x112xbf16>, vector<112x64xbf16>, vector<1x64xf32> -> vector<1x64xf32>
    %203 = arith.addf %198, %202 : vector<1x64xf32>
    %204 = vector.extract_strided_slice %197 {offsets = [1, 0], sizes = [1, 112], strides = [1, 1]} : vector<7x112xbf16> to vector<1x112xbf16>
    %c1_172 = arith.constant 1 : index
    %c0_173 = arith.constant 0 : index
    %c0_174 = arith.constant 0 : index
    %205 = vector.load %arg18[%c1_172, %c0_173, %c0_174] : memref<7x112x64xbf16, #tpu.memory_space<vmem>>, vector<1x112x64xbf16>
    %206 = vector.shape_cast %205 : vector<1x112x64xbf16> to vector<112x64xbf16>
    %cst_175 = arith.constant dense<0.000000e+00> : vector<1x64xf32>
    %207 = tpu.matmul %204, %206, %cst_175 {dimension_numbers = #tpu.dot_dimension_numbers<[1], [0], [0], [1], [0, 0, 1, 1], [], []>} : vector<1x112xbf16>, vector<112x64xbf16>, vector<1x64xf32> -> vector<1x64xf32>
    %208 = arith.addf %203, %207 : vector<1x64xf32>
    %209 = vector.extract_strided_slice %197 {offsets = [2, 0], sizes = [1, 112], strides = [1, 1]} : vector<7x112xbf16> to vector<1x112xbf16>
    %c2_176 = arith.constant 2 : index
    %c0_177 = arith.constant 0 : index
    %c0_178 = arith.constant 0 : index
    %210 = vector.load %arg18[%c2_176, %c0_177, %c0_178] : memref<7x112x64xbf16, #tpu.memory_space<vmem>>, vector<1x112x64xbf16>
    %211 = vector.shape_cast %210 : vector<1x112x64xbf16> to vector<112x64xbf16>
    %cst_179 = arith.constant dense<0.000000e+00> : vector<1x64xf32>
    %212 = tpu.matmul %209, %211, %cst_179 {dimension_numbers = #tpu.dot_dimension_numbers<[1], [0], [0], [1], [0, 0, 1, 1], [], []>} : vector<1x112xbf16>, vector<112x64xbf16>, vector<1x64xf32> -> vector<1x64xf32>
    %213 = arith.addf %208, %212 : vector<1x64xf32>
    %214 = vector.extract_strided_slice %197 {offsets = [3, 0], sizes = [1, 112], strides = [1, 1]} : vector<7x112xbf16> to vector<1x112xbf16>
    %c3_180 = arith.constant 3 : index
    %c0_181 = arith.constant 0 : index
    %c0_182 = arith.constant 0 : index
    %215 = vector.load %arg18[%c3_180, %c0_181, %c0_182] : memref<7x112x64xbf16, #tpu.memory_space<vmem>>, vector<1x112x64xbf16>
    %216 = vector.shape_cast %215 : vector<1x112x64xbf16> to vector<112x64xbf16>
    %cst_183 = arith.constant dense<0.000000e+00> : vector<1x64xf32>
    %217 = tpu.matmul %214, %216, %cst_183 {dimension_numbers = #tpu.dot_dimension_numbers<[1], [0], [0], [1], [0, 0, 1, 1], [], []>} : vector<1x112xbf16>, vector<112x64xbf16>, vector<1x64xf32> -> vector<1x64xf32>
    %218 = arith.addf %213, %217 : vector<1x64xf32>
    %219 = vector.extract_strided_slice %197 {offsets = [4, 0], sizes = [1, 112], strides = [1, 1]} : vector<7x112xbf16> to vector<1x112xbf16>
    %c4_184 = arith.constant 4 : index
    %c0_185 = arith.constant 0 : index
    %c0_186 = arith.constant 0 : index
    %220 = vector.load %arg18[%c4_184, %c0_185, %c0_186] : memref<7x112x64xbf16, #tpu.memory_space<vmem>>, vector<1x112x64xbf16>
    %221 = vector.shape_cast %220 : vector<1x112x64xbf16> to vector<112x64xbf16>
    %cst_187 = arith.constant dense<0.000000e+00> : vector<1x64xf32>
    %222 = tpu.matmul %219, %221, %cst_187 {dimension_numbers = #tpu.dot_dimension_numbers<[1], [0], [0], [1], [0, 0, 1, 1], [], []>} : vector<1x112xbf16>, vector<112x64xbf16>, vector<1x64xf32> -> vector<1x64xf32>
    %223 = arith.addf %218, %222 : vector<1x64xf32>
    %224 = vector.extract_strided_slice %197 {offsets = [5, 0], sizes = [1, 112], strides = [1, 1]} : vector<7x112xbf16> to vector<1x112xbf16>
    %c5_188 = arith.constant 5 : index
    %c0_189 = arith.constant 0 : index
    %c0_190 = arith.constant 0 : index
    %225 = vector.load %arg18[%c5_188, %c0_189, %c0_190] : memref<7x112x64xbf16, #tpu.memory_space<vmem>>, vector<1x112x64xbf16>
    %226 = vector.shape_cast %225 : vector<1x112x64xbf16> to vector<112x64xbf16>
    %cst_191 = arith.constant dense<0.000000e+00> : vector<1x64xf32>
    %227 = tpu.matmul %224, %226, %cst_191 {dimension_numbers = #tpu.dot_dimension_numbers<[1], [0], [0], [1], [0, 0, 1, 1], [], []>} : vector<1x112xbf16>, vector<112x64xbf16>, vector<1x64xf32> -> vector<1x64xf32>
    %228 = arith.addf %223, %227 : vector<1x64xf32>
    %229 = vector.extract_strided_slice %197 {offsets = [6, 0], sizes = [1, 112], strides = [1, 1]} : vector<7x112xbf16> to vector<1x112xbf16>
    %c6_192 = arith.constant 6 : index
    %c0_193 = arith.constant 0 : index
    %c0_194 = arith.constant 0 : index
    %230 = vector.load %arg18[%c6_192, %c0_193, %c0_194] : memref<7x112x64xbf16, #tpu.memory_space<vmem>>, vector<1x112x64xbf16>
    %231 = vector.shape_cast %230 : vector<1x112x64xbf16> to vector<112x64xbf16>
    %cst_195 = arith.constant dense<0.000000e+00> : vector<1x64xf32>
    %232 = tpu.matmul %229, %231, %cst_195 {dimension_numbers = #tpu.dot_dimension_numbers<[1], [0], [0], [1], [0, 0, 1, 1], [], []>} : vector<1x112xbf16>, vector<112x64xbf16>, vector<1x64xf32> -> vector<1x64xf32>
    %233 = arith.addf %228, %232 : vector<1x64xf32>
    %c0_196 = arith.constant 0 : index
    %c0_197 = arith.constant 0 : index
    %234 = vector.load %arg19[%c0_196, %c0_197] : memref<1x64xf32, #tpu.memory_space<vmem>>, vector<1x64xf32>
    %235 = arith.addf %233, %234 : vector<1x64xf32>
    %cst_198 = arith.constant 0.000000e+00 : f32
    %236 = vector.broadcast %cst_198 : f32 to vector<1x64xf32>
    %237 = arith.cmpf oge, %235, %236 : vector<1x64xf32>
    %cst_199 = arith.constant 0.00999999977 : f32
    %238 = vector.broadcast %cst_199 : f32 to vector<1x64xf32>
    %239 = arith.mulf %238, %235 : vector<1x64xf32>
    %240 = arith.select %237, %235, %239 : vector<1x64xi1>, vector<1x64xf32>
    %c0_200 = arith.constant 0 : index
    %c0_201 = arith.constant 0 : index
    %241 = vector.load %arg20[%c0_200, %c0_201] : memref<1x64xf32, #tpu.memory_space<vmem>>, vector<1x64xf32>
    %242 = arith.mulf %240, %241 : vector<1x64xf32>
    %cst_202 = arith.constant dense<0.000000e+00> : vector<1xf32>
    %243 = vector.multi_reduction <add>, %242, %cst_202 [1] : vector<1x64xf32> to vector<1xf32>
    %244 = vector.shape_cast %243 : vector<1xf32> to vector<1x1xf32>
    %c0_203 = arith.constant 0 : index
    %c0_204 = arith.constant 0 : index
    %245 = vector.load %arg21[%c0_203, %c0_204] : memref<1x1xf32, #tpu.memory_space<vmem>>, vector<1x1xf32>
    %246 = arith.addf %244, %245 : vector<1x1xf32>
    %247 = vector.shape_cast %246 : vector<1x1xf32> to vector<1x1x1xf32>
    %248 = vector.broadcast %247 : vector<1x1x1xf32> to vector<1x1x128xf32>
    %c0_205 = arith.constant 0 : index
    %c0_206 = arith.constant 0 : index
    %c0_207 = arith.constant 0 : index
    %249 = vector.load %arg22[%c0_205, %c0_206, %c0_207] : memref<1x1x128xf32, #tpu.memory_space<vmem>>, vector<1x1x128xf32>
    tpu.vector_store %arg22[%c0_205, %c0_206, %c0_207], %248 {strides = array<i32>} : memref<1x1x128xf32, #tpu.memory_space<vmem>>, vector<1x1x128xf32>,
    return
  }
  func.func @transform_0(%arg0: i32) -> (i32, i32, i32) {
    %c0_i32 = arith.constant 0 : i32
    %c0_i32_0 = arith.constant 0 : i32
    %c0_i32_1 = arith.constant 0 : i32
    return %arg0, %c0_i32, %c0_i32_0 : i32, i32, i32
  }
  func.func @transform_1(%arg0: i32) -> (i32, i32, i32) {
    %c0_i32 = arith.constant 0 : i32
    %c0_i32_0 = arith.constant 0 : i32
    %c0_i32_1 = arith.constant 0 : i32
    %c0_i32_2 = arith.constant 0 : i32
    return %c0_i32, %c0_i32_0, %c0_i32_1 : i32, i32, i32
  }
  func.func @transform_2(%arg0: i32) -> (i32, i32, i32) {
    %c0_i32 = arith.constant 0 : i32
    %c0_i32_0 = arith.constant 0 : i32
    %c0_i32_1 = arith.constant 0 : i32
    %c0_i32_2 = arith.constant 0 : i32
    return %c0_i32, %c0_i32_0, %c0_i32_1 : i32, i32, i32
  }
  func.func @transform_3(%arg0: i32) -> (i32, i32) {
    %c0_i32 = arith.constant 0 : i32
    %c0_i32_0 = arith.constant 0 : i32
    %c0_i32_1 = arith.constant 0 : i32
    return %c0_i32, %c0_i32_0 : i32, i32
  }
  func.func @transform_4(%arg0: i32) -> (i32, i32) {
    %c0_i32 = arith.constant 0 : i32
    %c0_i32_0 = arith.constant 0 : i32
    %c0_i32_1 = arith.constant 0 : i32
    return %c0_i32, %c0_i32_0 : i32, i32
  }
  func.func @transform_5(%arg0: i32) -> (i32, i32, i32) {
    %c0_i32 = arith.constant 0 : i32
    %c0_i32_0 = arith.constant 0 : i32
    %c0_i32_1 = arith.constant 0 : i32
    %c0_i32_2 = arith.constant 0 : i32
    return %c0_i32, %c0_i32_0, %c0_i32_1 : i32, i32, i32
  }
  func.func @transform_6(%arg0: i32) -> (i32, i32, i32) {
    %c0_i32 = arith.constant 0 : i32
    %c0_i32_0 = arith.constant 0 : i32
    %c0_i32_1 = arith.constant 0 : i32
    %c0_i32_2 = arith.constant 0 : i32
    return %c0_i32, %c0_i32_0, %c0_i32_1 : i32, i32, i32
  }
  func.func @transform_7(%arg0: i32) -> (i32, i32) {
    %c0_i32 = arith.constant 0 : i32
    %c0_i32_0 = arith.constant 0 : i32
    %c0_i32_1 = arith.constant 0 : i32
    return %c0_i32, %c0_i32_0 : i32, i32
  }
  func.func @transform_8(%arg0: i32) -> (i32, i32) {
    %c0_i32 = arith.constant 0 : i32
    %c0_i32_0 = arith.constant 0 : i32
    %c0_i32_1 = arith.constant 0 : i32
    return %c0_i32, %c0_i32_0 : i32, i32
  }
  func.func @transform_9(%arg0: i32) -> (i32, i32, i32) {
    %c0_i32 = arith.constant 0 : i32
    %c0_i32_0 = arith.constant 0 : i32
    %c0_i32_1 = arith.constant 0 : i32
    %c0_i32_2 = arith.constant 0 : i32
    return %c0_i32, %c0_i32_0, %c0_i32_1 : i32, i32, i32
  }
  func.func @transform_10(%arg0: i32) -> (i32, i32, i32) {
    %c0_i32 = arith.constant 0 : i32
    %c0_i32_0 = arith.constant 0 : i32
    %c0_i32_1 = arith.constant 0 : i32
    %c0_i32_2 = arith.constant 0 : i32
    return %c0_i32, %c0_i32_0, %c0_i32_1 : i32, i32, i32
  }
  func.func @transform_11(%arg0: i32) -> (i32, i32) {
    %c0_i32 = arith.constant 0 : i32
    %c0_i32_0 = arith.constant 0 : i32
    %c0_i32_1 = arith.constant 0 : i32
    return %c0_i32, %c0_i32_0 : i32, i32
  }
  func.func @transform_12(%arg0: i32) -> (i32, i32) {
    %c0_i32 = arith.constant 0 : i32
    %c0_i32_0 = arith.constant 0 : i32
    %c0_i32_1 = arith.constant 0 : i32
    return %c0_i32, %c0_i32_0 : i32, i32
  }
  func.func @transform_13(%arg0: i32) -> (i32, i32, i32) {
    %c0_i32 = arith.constant 0 : i32
    %c0_i32_0 = arith.constant 0 : i32
    %c0_i32_1 = arith.constant 0 : i32
    %c0_i32_2 = arith.constant 0 : i32
    return %c0_i32, %c0_i32_0, %c0_i32_1 : i32, i32, i32
  }
  func.func @transform_14(%arg0: i32) -> (i32, i32, i32) {
    %c0_i32 = arith.constant 0 : i32
    %c0_i32_0 = arith.constant 0 : i32
    %c0_i32_1 = arith.constant 0 : i32
    %c0_i32_2 = arith.constant 0 : i32
    return %c0_i32, %c0_i32_0, %c0_i32_1 : i32, i32, i32
  }
  func.func @transform_15(%arg0: i32) -> (i32, i32) {
    %c0_i32 = arith.constant 0 : i32
    %c0_i32_0 = arith.constant 0 : i32
    %c0_i32_1 = arith.constant 0 : i32
    return %c0_i32, %c0_i32_0 : i32, i32
  }
  func.func @transform_16(%arg0: i32) -> (i32, i32) {
    %c0_i32 = arith.constant 0 : i32
    %c0_i32_0 = arith.constant 0 : i32
    %c0_i32_1 = arith.constant 0 : i32
    return %c0_i32, %c0_i32_0 : i32, i32
  }
  func.func @transform_17(%arg0: i32) -> (i32, i32, i32) {
    %c0_i32 = arith.constant 0 : i32
    %c0_i32_0 = arith.constant 0 : i32
    %c0_i32_1 = arith.constant 0 : i32
    %c0_i32_2 = arith.constant 0 : i32
    return %c0_i32, %c0_i32_0, %c0_i32_1 : i32, i32, i32
  }
  func.func @transform_18(%arg0: i32) -> (i32, i32) {
    %c0_i32 = arith.constant 0 : i32
    %c0_i32_0 = arith.constant 0 : i32
    %c0_i32_1 = arith.constant 0 : i32
    return %c0_i32, %c0_i32_0 : i32, i32
  }
  func.func @transform_19(%arg0: i32) -> (i32, i32) {
    %c0_i32 = arith.constant 0 : i32
    %c0_i32_0 = arith.constant 0 : i32
    %c0_i32_1 = arith.constant 0 : i32
    return %c0_i32, %c0_i32_0 : i32, i32
  }
  func.func @transform_20(%arg0: i32) -> (i32, i32) {
    %c0_i32 = arith.constant 0 : i32
    %c0_i32_0 = arith.constant 0 : i32
    %c0_i32_1 = arith.constant 0 : i32
    return %c0_i32, %c0_i32_0 : i32, i32
  }
  func.func @transform_21(%arg0: i32) -> (i32, i32, i32) {
    %c0_i32 = arith.constant 0 : i32
    %c0_i32_0 = arith.constant 0 : i32
    %c0_i32_1 = arith.constant 0 : i32
    return %arg0, %c0_i32, %c0_i32_0 : i32, i32, i32
  }
}

</mosaic_0001>

<bundles_post_ra>
// kernel: _forward_impl.1
= control target key start
LH: loop header
LB: loop body
LE: loop exit
PB: predicated region body
PF: predicated region fallthrough
CT: control target
= control target key end

     0   :  { %s16992_s26 = smov 0   ;;  %s24209_s0 = inlined_call_operand.vmem [shape: bf16[2,79,316], index: 0, kind: input, shape index: {}]   ;;  %s24210_s1 = inlined_call_operand.vmem [shape: bf16[7,25,79], index: 1, kind: input, shape index: {}]   ;;  %s24211_s2 = inlined_call_operand.vmem [shape: bf16[7,316,400], index: 2, kind: input, shape index: {}]   ;;  %s24212_s3 = inlined_call_operand.vmem [shape: f32[1,400], index: 3, kind: input, shape index: {}]   ;;  %s24213_s4 = inlined_call_operand.vmem [shape: f32[1,400], index: 4, kind: input, shape index: {}]   ;;  %s24214_s5 = inlined_call_operand.vmem [shape: bf16[5,11,25], index: 5, kind: input, shape index: {}]   ;;  %s24215_s6 = inlined_call_operand.vmem [shape: bf16[5,400,176], index: 6, kind: input, shape index: {}]   ;;  %s24216_s7 = inlined_call_operand.vmem [shape: f32[1,176], index: 7, kind: input, shape index: {}]   ;;  %s24217_s8 = inlined_call_operand.vmem [shape: f32[1,176], index: 8, kind: input, shape index: {}]   ;;  %s24218_s9 = inlined_call_operand.vmem [shape: bf16[3,9,11], index: 9, kind: input, shape index: {}]   ;;  %s24219_s10 = inlined_call_operand.vmem [shape: bf16[3,176,144], index: 10, kind: input, shape index: {}]   ;;  %s24220_s11 = inlined_call_operand.vmem [shape: f32[1,144], index: 11, kind: input, shape index: {}]   ;;  %s24221_s12 = inlined_call_operand.vmem [shape: f32[1,144], index: 12, kind: input, shape index: {}]   ;;  %s24222_s13 = inlined_call_operand.vmem [shape: bf16[3,7,9], index: 13, kind: input, shape index: {}]   ;;  %s24223_s14 = inlined_call_operand.vmem [shape: bf16[3,144,112], index: 14, kind: input, shape index: {}]   ;;  %s24224_s15 = inlined_call_operand.vmem [shape: f32[1,112], index: 15, kind: input, shape index: {}]   ;;  %s24225_s16 = inlined_call_operand.vmem [shape: f32[1,112], index: 16, kind: input, shape index: {}]   ;;  %s24226_s17 = inlined_call_operand.vmem [shape: bf16[7,112,64], index: 17, kind: input, shape index: {}]   ;;  %s24227_s18 = inlined_call_operand.vmem [shape: f32[1,64], index: 18, kind: input, shape index: {}]   ;;  %s24228_s19 = inlined_call_operand.vmem [shape: f32[1,64], index: 19, kind: input, shape index: {}]   ;;  %s24229_s20 = inlined_call_operand.<no memory space> [shape: f32[1,1], index: 20, kind: input, shape index: {}]   ;;  %s24230_s21 = inlined_call_operand.vmem [shape: f32[2,1,128], index: 21, kind: output, shape index: {}]  }
   0x1   :  { %24243 = sst [smem:[#allocation112_spill]] %s24209_s0  ;;  %v26_v0 = vstv %s24229_s20 }
   0x2   :  { %24244 = sst [smem:[#allocation113_spill]] %s24210_s1  ;;  %27 = vst [vmem:[#allocation2] sm:$0x1] %v26_v0 }
   0x3   :  { %24245 = sst [smem:[#allocation114_spill]] %s24211_s2 }
   0x4   :  { %24246 = sst [smem:[#allocation115_spill]] %s24212_s3 }
   0x5   :  { %24247 = sst [smem:[#allocation116_spill]] %s24213_s4 }
   0x6   :  { %24248 = sst [smem:[#allocation117_spill]] %s24214_s5 }
   0x7 LB: > { %s10864_s27 = sadd.s32 4294967295, %s16875_s26   ;;  %p10868_p0 = scmp.ge.s32.totalorder %s16875_s26, 1  ;;  %s16875_s26 = sphi %s16992_s26, %s33_s26  }
   0x8   : > { %p589_p1 = scmp.lt.s32.totalorder %s16875_s26, 3 }
   0xa   : > { %p590_p2 = pnand %p10868_p0, %p589_p1 }
   0xc   : > { %593 = sbr.rel (%p590_p2) target bundleno = 3922 (0xf52), region = 104 }
  0x11   : > { %p647_p3 = scmp.lt.s32.totalorder %s10864_s27, 1  ;;  %vm774_vm0 = vcmask 1046528   ;;  %vm775_vm1 = vcmask 1047552   ;;  %v24234_v1 = vmov 65535   ;;  %s24249_s29 = sld [smem:[#allocation112_spill]]  ;;  %vm767_vm2 = vcmask 646144  }
  0x12   : > { %v776_v2 = vsel %vm774_vm0, 4294967295, %v24234_v1  ;;  %s24250_s5 = sld [smem:[#allocation113_spill]]  ;;  %vm1498_vm3 = vcmask 1045504   ;;  %vm1491_vm4 = vcmask 490496   ;;  %vm6615_vm7 = vcmask 1043456  }
  0x13   : > { %s24480_s27 = smov (!%p647_p3, %s10864_s27), 1  ;;  %v777_v3 = vsel %vm775_vm1, %v776_v2, 0  ;;  %s24251_s30 = sld [smem:[#allocation114_spill]]  ;;  %vm6616_vm9 = vcmask 1044480   ;;  %vm6611_vm11 = vcmask 203776  }
  0x14   : > { %s16855_s20 = smul.u32 120, %s24480_s27  ;;  %s24358_s1 = sld [smem:[#allocation115_spill]] }
  0x15   : > { %s24360_s25 = sld [smem:[#allocation116_spill]] }
  0x16   : > { %s24438_s28 = sld [smem:[#allocation117_spill]] }
  0x17   : > { %s17007_s0 = scalar_lea.vmem %s24249_s29, %s16855_s20 }
  0x18   : > { %v10928_v4 = vld [vmem:[%s17007_s0 + $0x60] sm:$0xf]  ;;  %v15879_v5 = vld [vmem:[%s17007_s0 + $0x68] sm:$0xf0]  ;;  %v15878_v6 = vld [vmem:[%s17007_s0 + $0x64] sm:$0xf] }
  0x19   : > { %v10929_v7 = vor.u32 %v15879_v5, %v10928_v4  ;;  %v10930_v8 = vld [vmem:[%s17007_s0 + $0x6c] sm:$0xf0]  ;;  %v10916_v10 = vld [vmem:[%s17007_s0 + $0x48] sm:$0xf]  ;;  %v15876_v11 = vld [vmem:[%s17007_s0 + $0x50] sm:$0xf0] }
  0x1a   : > { %v10933_v9 = vor.u32 %v15878_v6, %v10930_v8  ;;  %v15875_v13 = vld [vmem:[%s17007_s0 + $0x4c] sm:$0xf]  ;;  %v10918_v14 = vld [vmem:[%s17007_s0 + $0x54] sm:$0xf0]  ;;  %v17023_v16 = vor.u32 %v15876_v11, %v10916_v10  ;;  %v10904_v18 = vld [vmem:[%s17007_s0 + $0x30] sm:$0xf] }
  0x1b   : > { %v17015_v12 = vand.u32 %v10929_v7, %v777_v3  ;;  %v17026_v17 = vor.u32 %v15875_v13, %v10918_v14  ;;  %v15873_v19 = vld [vmem:[%s17007_s0 + $0x38] sm:$0xf0]  ;;  %v10936_v20 = vld [vmem:[%s17007_s0 + $0x68] sm:$0xf]  ;;  %v15872_v21 = vld [vmem:[%s17007_s0 + $0x34] sm:$0xf] }
  0x1c   : > { %v17019_v15 = vand.u32 %v10933_v9, %v777_v3  ;;  %v10906_v22 = vld [vmem:[%s17007_s0 + $0x3c] sm:$0xf0]  ;;  %v15880_v23 = vld [vmem:[%s17007_s0 + $0x70] sm:$0xf0]  ;;  %v17036_v25 = vor.u32 %v15873_v19, %v10904_v18  ;;  %v10892_v27 = vld [vmem:[%s17007_s0 + $0x18] sm:$0xf] }
  0x1d   : > { %790 = vmatpush.bf16.msra.mxu0 %v17015_v12  ;;  %954 = vmatpush.bf16.msra.mxu3 %v17015_v12  ;;  %v10937_v24 = vor.u32 %v15880_v23, %v10936_v20  ;;  %v17039_v26 = vor.u32 %v15872_v21, %v10906_v22  ;;  %v15870_v28 = vld [vmem:[%s17007_s0 + $0x20] sm:$0xf0]  ;;  %v15869_v29 = vld [vmem:[%s17007_s0 + $0x1c] sm:$0xf]  ;;  %v10894_v31 = vld [vmem:[%s17007_s0 + $0x24] sm:$0xf0] }
  0x1e   : > { %809 = vmatpush.bf16.msra.mxu1 %v17019_v15  ;;  %v10924_v32 = vld [vmem:[%s17007_s0 + $0x50] sm:$0xf]  ;;  %v15877_v33 = vld [vmem:[%s17007_s0 + $0x58] sm:$0xf0]  ;;  %v17052_v34 = vor.u32 %v15870_v28, %v10892_v27  ;;  %v17055_v35 = vor.u32 %v15869_v29, %v10894_v31  ;;  %v10880_v36 = vld [vmem:[%s17007_s0] sm:$0xf] }
  0x1f   : > { %v17044_v30 = vand.u32 %v10937_v24, %v777_v3  ;;  %v15867_v37 = vld [vmem:[%s17007_s0 + $0x8] sm:$0xf0]  ;;  %v15866_v38 = vld [vmem:[%s17007_s0 + $0x4] sm:$0xf]  ;;  %v17060_v39 = vor.u32 %v15877_v33, %v10924_v32  ;;  %v10882_v40 = vld [vmem:[%s17007_s0 + $0xc] sm:$0xf0] }
  0x20   : > { %v10912_v41 = vld [vmem:[%s17007_s0 + $0x38] sm:$0xf]  ;;  %v15874_v42 = vld [vmem:[%s17007_s0 + $0x40] sm:$0xf0]  ;;  %v17068_v43 = vor.u32 %v15867_v37, %v10880_v36  ;;  %v17071_v44 = vor.u32 %v15866_v38, %v10882_v40  ;;  %v17081_v47 = vld [vmem:[%s24250_s5 + $0x10] sm:$0xff] }
  0x21   : > { %791 = vmatpush.bf16.msra.mxu0 %v17023_v16  ;;  %955 = vmatpush.bf16.msra.mxu3 %v17023_v16  ;;  %v17073_v45 = vor.u32 %v15874_v42, %v10912_v41  ;;  %v15881_v46 = vld [vmem:[%s24250_s5] sm:$0xff]  ;;  %v15871_v49 = vld [vmem:[%s17007_s0 + $0x28] sm:$0xf0]  ;;  %v10888_v51 = vld [vmem:[%s17007_s0 + $0x8] sm:$0xf] }
  0x22   : > { %810 = vmatpush.bf16.msra.mxu1 %v17026_v17  ;;  %828 = vmatpush.bf16.msra.mxu2 %v17044_v30  ;;  %v10900_v48 = vld [vmem:[%s17007_s0 + $0x20] sm:$0xf]  ;;  %v15868_v52 = vld [vmem:[%s17007_s0 + $0x10] sm:$0xf0]  ;;  %v10876_v54 = vld [vmem:[%s24250_s5 + $0x8] sm:$0xf] }
  0x23   : > { %v17091_v50 = vor.u32 %v15871_v49, %v10900_v48  ;;  %v17102_v53 = vor.u32 %v15868_v52, %v10888_v51  ;;  %v15882_v55 = vld [vmem:[%s24250_s5 + $0x8] sm:$0x10]  ;;  %v10954_v56 = vld [vmem:[%s24250_s5 + $0x18] sm:$0xf]  ;;  %v15964_v57 = vld [vmem:[%s24250_s5 + $0x18] sm:$0x10] }
  0x24   : > { %v10877_v58 = vor.u32 %v15882_v55, %v10876_v54  ;;  %v10955_v59 = vor.u32 %v15964_v57, %v10954_v56  ;;  %v11156_v60 = vld [vmem:[%s24251_s30 + $0x360] sm:$0xf]  ;;  %v15995_v61 = vld [vmem:[%s24251_s30 + $0x36c] sm:$0xf0]  ;;  %v15993_v62 = vld [vmem:[%s24251_s30 + $0x364] sm:$0xf] }
  0x25   : > { %792 = vmatpush.bf16.msra.mxu0 %v17036_v25  ;;  %956 = vmatpush.bf16.msra.mxu3 %v17036_v25  ;;  %v11157_v63 = vor.u32 %v15995_v61, %v11156_v60  ;;  %v11158_v0 = vld [vmem:[%s24251_s30 + $0x370] sm:$0xf0]  ;;  %v11140_v2 = vld [vmem:[%s24251_s30 + $0x340] sm:$0xf]  ;;  %v15991_v3 = vld [vmem:[%s24251_s30 + $0x34c] sm:$0xf0] }
  0x26   : > { %811 = vmatpush.bf16.msra.mxu1 %v17039_v26  ;;  %829 = vmatpush.bf16.msra.mxu2 %v17060_v39  ;;  %v11161_v4 = vor.u32 %v15993_v62, %v11158_v0  ;;  %v15989_v5 = vld [vmem:[%s24251_s30 + $0x344] sm:$0xf]  ;;  %v11142_v6 = vld [vmem:[%s24251_s30 + $0x350] sm:$0xf0]  ;;  %v11141_v7 = vor.u32 %v15991_v3, %v11140_v2  ;;  %v11124_v9 = vld [vmem:[%s24251_s30 + $0x320] sm:$0xf] }
  0x27   : > { %v11145_v8 = vor.u32 %v15989_v5, %v11142_v6  ;;  %v15987_v10 = vld [vmem:[%s24251_s30 + $0x32c] sm:$0xf0]  ;;  %v15985_v11 = vld [vmem:[%s24251_s30 + $0x324] sm:$0xf]  ;;  %v11126_v13 = vld [vmem:[%s24251_s30 + $0x330] sm:$0xf0] }
  0x28   : > { %v11125_v14 = vor.u32 %v15987_v10, %v11124_v9  ;;  %v11129_v18 = vor.u32 %v15985_v11, %v11126_v13  ;;  %v11108_v19 = vld [vmem:[%s24251_s30 + $0x300] sm:$0xf]  ;;  %v15983_v20 = vld [vmem:[%s24251_s30 + $0x30c] sm:$0xf0]  ;;  %v15981_v21 = vld [vmem:[%s24251_s30 + $0x304] sm:$0xf] }
  0x29   : > { %793 = vmatpush.bf16.msra.mxu0 %v17052_v34  ;;  %957 = vmatpush.bf16.msra.mxu3 %v17052_v34  ;;  %v11110_v22 = vld [vmem:[%s24251_s30 + $0x310] sm:$0xf0]  ;;  %v11109_v23 = vor.u32 %v15983_v20, %v11108_v19  ;;  %v11092_v27 = vld [vmem:[%s24251_s30 + $0x2e0] sm:$0xf]  ;;  %v15979_v28 = vld [vmem:[%s24251_s30 + $0x2ec] sm:$0xf0] }
  0x2a   : > { %812 = vmatpush.bf16.msra.mxu1 %v17055_v35  ;;  %830 = vmatpush.bf16.msra.mxu2 %v17073_v45  ;;  %v11113_v24 = vor.u32 %v15981_v21, %v11110_v22  ;;  %v15977_v29 = vld [vmem:[%s24251_s30 + $0x2e4] sm:$0xf]  ;;  %v11093_v31 = vor.u32 %v15979_v28, %v11092_v27  ;;  %v11094_v32 = vld [vmem:[%s24251_s30 + $0x2f0] sm:$0xf0]  ;;  %v11076_v36 = vld [vmem:[%s24251_s30 + $0x2c0] sm:$0xf] }
  0x2b   : > { %v11097_v33 = vor.u32 %v15977_v29, %v11094_v32  ;;  %v15975_v37 = vld [vmem:[%s24251_s30 + $0x2cc] sm:$0xf0]  ;;  %v15973_v38 = vld [vmem:[%s24251_s30 + $0x2c4] sm:$0xf]  ;;  %v11078_v41 = vld [vmem:[%s24251_s30 + $0x2d0] sm:$0xf0] }
  0x2c   : > { %v11077_v40 = vor.u32 %v15975_v37, %v11076_v36  ;;  %v11081_v42 = vor.u32 %v15973_v38, %v11078_v41  ;;  %v15969_v48 = vld [vmem:[%s24251_s30 + $0x2a4] sm:$0xf]  ;;  %v11062_v51 = vld [vmem:[%s24251_s30 + $0x2b0] sm:$0xf0]  ;;  %v11284_v54 = vld [vmem:[%s24251_s30 + $0x460] sm:$0xf] }
  0x2d   : > { %794 = vmatpush.bf16.msra.mxu0 %v17068_v43  ;;  %958 = vmatpush.bf16.msra.mxu3 %v17068_v43  ;;  %v11065_v52 = vor.u32 %v15969_v48, %v11062_v51  ;;  %v16027_v55 = vld [vmem:[%s24251_s30 + $0x46c] sm:$0xf0]  ;;  %v11044_v57 = vld [vmem:[%s24251_s30 + $0x280] sm:$0xf]  ;;  %v11046_v61 = vld [vmem:[%s24251_s30 + $0x290] sm:$0xf0] }
  0x2e   : > { %813 = vmatpush.bf16.msra.mxu1 %v17071_v44  ;;  %831 = vmatpush.bf16.msra.mxu2 %v17091_v50  ;;  %v11285_v56 = vor.u32 %v16027_v55, %v11284_v54  ;;  %v16023_v0 = vld [vmem:[%s24251_s30 + $0x44c] sm:$0xf0]  ;;  %v16025_v3 = vld [vmem:[%s24251_s30 + $0x464] sm:$0xf]  ;;  %v11292_v5 = vld [vmem:[%s24251_s30 + $0x468] sm:$0xf] }
  0x2f   : > { %v16019_v9 = vld [vmem:[%s24251_s30 + $0x42c] sm:$0xf0]  ;;  %v16021_v13 = vld [vmem:[%s24251_s30 + $0x444] sm:$0xf]  ;;  %v16024_v20 = vld [vmem:[%s24251_s30 + $0x454] sm:$0xf0] }
  0x30   : > { %10938 = vmatmul.msk.bf16.vlgmr.msra.gmra.mxu0 %vm767_vm2, %v15881_v46  ;;  %10956 = vmatmul.msk.bf16.vlgmr.msra.gmra.mxu3 %vm767_vm2, %v17081_v47  ;;  %v11236_v22 = vld [vmem:[%s24251_s30 + $0x400] sm:$0xf]  ;;  %v16017_v27 = vld [vmem:[%s24251_s30 + $0x424] sm:$0xf]  ;;  %v11254_v28 = vld [vmem:[%s24251_s30 + $0x430] sm:$0xf0] }
  0x31   : > { %973 = vmatpush.bf16.msrb.mxu0 %v17019_v15  ;;  %10940 = vmatmul.msk.bf16.vlgmr.msra.gmra.mxu1 %vm767_vm2, %v15881_v46  ;;  %v11260_v29 = vld [vmem:[%s24251_s30 + $0x428] sm:$0xf]  ;;  %v16020_v32 = vld [vmem:[%s24251_s30 + $0x434] sm:$0xf0]  ;;  %v16043_v36 = vld [vmem:[%s24251_s30 + $0x4ec] sm:$0x30] }
  0x32   : > { %992 = vmatpush.bf16.msrb.mxu1 %v17044_v30  ;;  %832 = vmatpush.bf16.msra.mxu2 %v17102_v53  ;;  %v11261_v37 = vor.u32 %v16020_v32, %v11260_v29  ;;  %v11220_v38 = vld [vmem:[%s24251_s30 + $0x3e0] sm:$0xf]  ;;  %v11238_v48 = vld [vmem:[%s24251_s30 + $0x410] sm:$0xf0]  ;;  %v11244_v51 = vld [vmem:[%s24251_s30 + $0x408] sm:$0xf] }
  0x33   : > { %1530 = vmatpush.bf16.msrb.mxu3 %v11285_v56  ;;  %v11204_v55 = vld [vmem:[%s24251_s30 + $0x3c0] sm:$0xf]  ;;  %v16007_v56 = vld [vmem:[%s24251_s30 + $0x3cc] sm:$0xf0] }
  0x34   : > { %v16031_v29 = vld [vmem:[%s24251_s30 + $0x48c] sm:$0xf0] }
  0x35   : > { %974 = vmatpush.bf16.msrb.mxu0 %v17026_v17  ;;  %10942 = vmatmul.msk.bf16.vlgmr.msra.gmra.mxu2 %vm767_vm2, %v15881_v46  ;;  %v11060_v46 = vld [vmem:[%s24251_s30 + $0x2a0] sm:$0xf]  ;;  %v16061_v1 = vld [vmem:[%s24251_s30 + $0x56c] sm:$0xf0] }
  0x36   : > { %993 = vmatpush.bf16.msrb.mxu1 %v17060_v39  ;;  %1511 = vmatpush.bf16.msrb.mxu2 %v11157_v63  ;;  %v11268_v63 = vld [vmem:[%s24251_s30 + $0x440] sm:$0xf] }
  0x37   : > { %v11269_v2 = vor.u32 %v16023_v0, %v11268_v63  ;;  %v11222_v63 = vld [vmem:[%s24251_s30 + $0x3f0] sm:$0xf0]  ;;  %v11228_v0 = vld [vmem:[%s24251_s30 + $0x3e8] sm:$0xf] }
  0x39   : > { %975 = vmatpush.bf16.msrb.mxu0 %v17039_v26  ;;  %1531 = vmatpush.bf16.msrb.mxu3 %v11269_v2 }
  0x3a   : > { %994 = vmatpush.bf16.msrb.mxu1 %v17073_v45  ;;  %1512 = vmatpush.bf16.msrb.mxu2 %v11141_v7  ;;  %v16028_v7 = vld [vmem:[%s24251_s30 + $0x474] sm:$0xf0] }
  0x3b   : > { %v11293_v10 = vor.u32 %v16028_v7, %v11292_v5  ;;  %v11188_v5 = vld [vmem:[%s24251_s30 + $0x3a0] sm:$0xf] }
  0x3d   : > { %976 = vmatpush.bf16.msrb.mxu0 %v17055_v35 }
  0x3e   : > { %995 = vmatpush.bf16.msrb.mxu1 %v17091_v50  ;;  %1513 = vmatpush.bf16.msrb.mxu2 %v11125_v14  ;;  %v11270_v14 = vld [vmem:[%s24251_s30 + $0x450] sm:$0xf0] }
  0x3f   : > { %v11273_v19 = vor.u32 %v16021_v13, %v11270_v14  ;;  %v11206_v14 = vld [vmem:[%s24251_s30 + $0x3d0] sm:$0xf0] }
  0x40   : > { %10939 = vmatmul.msk.bf16.gmra.mxu0 %vm767_vm2, %v10877_v58  ;;  %10957 = vmatmul.msk.bf16.gmra.mxu3 %vm767_vm2, %v10955_v59 }
  0x41   : > { %977 = vmatpush.bf16.msrb.mxu0 %v17071_v44  ;;  %10941 = vmatmul.msk.bf16.gmra.mxu1 %vm767_vm2, %v10877_v58 }
  0x42   : > { %996 = vmatpush.bf16.msrb.mxu1 %v17102_v53  ;;  %1514 = vmatpush.bf16.msrb.mxu2 %v11109_v23  ;;  %v16015_v23 = vld [vmem:[%s24251_s30 + $0x40c] sm:$0xf0] }
  0x45   : > { %10943 = vmatmul.msk.bf16.gmra.mxu2 %vm767_vm2, %v10877_v58  ;;  %v15967_v58 = vld [vmem:[%s24251_s30 + $0x28c] sm:$0xf0] }
  0x46   : > { %1568 = vmatpush.bf16.msra.mxu1 %v11161_v4  ;;  %1515 = vmatpush.bf16.msrb.mxu2 %v11093_v31  ;;  %v11045_v60 = vor.u32 %v15967_v58, %v11044_v57  ;;  %v11286_v4 = vld [vmem:[%s24251_s30 + $0x470] sm:$0xf0]  ;;  %v11257_v31 = vor.u32 %v16017_v27, %v11254_v28  ;;  %v11332_v57 = vld [vmem:[%s24251_s30 + $0x4c0] sm:$0xf]  ;;  %v11205_v58 = vor.u32 %v16007_v56, %v11204_v55  ;;  %v16000_v55 = vld [vmem:[%s24251_s30 + $0x394] sm:$0xf0] }
  0x47   : > { %v11289_v6 = vor.u32 %v16025_v3, %v11286_v4  ;;  %v16012_v4 = vld [vmem:[%s24251_s30 + $0x3f4] sm:$0xf0]  ;;  %v11300_v27 = vld [vmem:[%s24251_s30 + $0x480] sm:$0xf] }
  0x48   : > { %v11229_v7 = vor.u32 %v16012_v4, %v11228_v0  ;;  %v11301_v32 = vor.u32 %v16031_v29, %v11300_v27  ;;  %v15988_v4 = vld [vmem:[%s24251_s30 + $0x334] sm:$0xf0]  ;;  %v11084_v27 = vld [vmem:[%s24251_s30 + $0x2c8] sm:$0xf] }
  0x4a   : > { %1569 = vmatpush.bf16.msra.mxu1 %v11145_v8  ;;  %1516 = vmatpush.bf16.msrb.mxu2 %v11077_v40  ;;  %v11252_v8 = vld [vmem:[%s24251_s30 + $0x420] sm:$0xf]  ;;  %v16011_v40 = vld [vmem:[%s24251_s30 + $0x3ec] sm:$0xf0] }
  0x4b   : > { %v11253_v11 = vor.u32 %v16019_v9, %v11252_v8  ;;  %v11316_v9 = vld [vmem:[%s24251_s30 + $0x4a0] sm:$0xf] }
  0x4d   : > { %1532 = vmatpush.bf16.msrb.mxu3 %v11253_v11  ;;  %v16005_v11 = vld [vmem:[%s24251_s30 + $0x3c4] sm:$0xf] }
  0x4e   : > { %1570 = vmatpush.bf16.msra.mxu1 %v11129_v18  ;;  %v11276_v18 = vld [vmem:[%s24251_s30 + $0x448] sm:$0xf] }
  0x4f   : > { %v11277_v21 = vor.u32 %v16024_v20, %v11276_v18  ;;  %v11212_v18 = vld [vmem:[%s24251_s30 + $0x3c8] sm:$0xf]  ;;  %v11209_v20 = vor.u32 %v16005_v11, %v11206_v14  ;;  %v11350_v14 = vld [vmem:[%s24251_s30 + $0x4f0] sm:$0x30] }
  0x50   : > { %10958 = vmatmul.msk.bf16.vlgmr.msrb.gmra.mxu0 %vm767_vm2, %v17081_v47 }
  0x51   : > { %10960 = vmatmul.msk.bf16.vlgmr.msrb.gmra.mxu1 %vm767_vm2, %v17081_v47  ;;  %v15971_v47 = vld [vmem:[%s24251_s30 + $0x2ac] sm:$0xf0] }
  0x52   : > { %1571 = vmatpush.bf16.msra.mxu1 %v11113_v24  ;;  %v11061_v49 = vor.u32 %v15971_v47, %v11060_v46  ;;  %v11237_v24 = vor.u32 %v16015_v23, %v11236_v22  ;;  %v16013_v47 = vld [vmem:[%s24251_s30 + $0x404] sm:$0xf]  ;;  %v11172_v23 = vld [vmem:[%s24251_s30 + $0x380] sm:$0xf] }
  0x54   : > { %1517 = vmatpush.bf16.msrb.mxu2 %v11061_v49  ;;  %1533 = vmatpush.bf16.msrb.mxu3 %v11237_v24  ;;  %v11241_v49 = vor.u32 %v16013_v47, %v11238_v48  ;;  %v15999_v24 = vld [vmem:[%s24251_s30 + $0x38c] sm:$0xf0]  ;;  %v15996_v47 = vld [vmem:[%s24251_s30 + $0x374] sm:$0xf0] }
  0x55   : > { %v11173_v28 = vor.u32 %v15999_v24, %v11172_v23  ;;  %v16037_v23 = vld [vmem:[%s24251_s30 + $0x4c4] sm:$0xf]  ;;  %v11334_v24 = vld [vmem:[%s24251_s30 + $0x4d0] sm:$0xf0] }
  0x56   : > { %1572 = vmatpush.bf16.msra.mxu1 %v11097_v33  ;;  %v11348_v33 = vld [vmem:[%s24251_s30 + $0x4e0] sm:$0xf] }
  0x57   : > { %v11349_v41 = vor.u32 %v16043_v36, %v11348_v33  ;;  %v16001_v33 = vld [vmem:[%s24251_s30 + $0x3a4] sm:$0xf]  ;;  %v11190_v36 = vld [vmem:[%s24251_s30 + $0x3b0] sm:$0xf0] }
  0x58   : > { %1518 = vmatpush.bf16.msrb.mxu2 %v11045_v60 }
  0x59   : > { %v1500_v46 = vsel %vm1498_vm3, %v11349_v41, 0  ;;  %v16004_v41 = vld [vmem:[%s24251_s30 + $0x3b4] sm:$0xf0] }
  0x5a   : > { %1573 = vmatpush.bf16.msra.mxu1 %v11081_v42  ;;  %v11221_v42 = vor.u32 %v16011_v40, %v11220_v38  ;;  %1553 = vmatpush.bf16.msra.mxu0 %v1500_v46  ;;  %v11193_v40 = vor.u32 %v16001_v33, %v11190_v36  ;;  %v11164_v46 = vld [vmem:[%s24251_s30 + $0x368] sm:$0xf] }
  0x5b   : > { %v11165_v48 = vor.u32 %v15996_v47, %v11164_v46  ;;  %v11358_v47 = vld [vmem:[%s24251_s30 + $0x4f8] sm:$0x30] }
  0x5c   : > { %1587 = vmatpush.bf16.msra.mxu2 %v11289_v6  ;;  %1534 = vmatpush.bf16.msrb.mxu3 %v11221_v42  ;;  %v16003_v6 = vld [vmem:[%s24251_s30 + $0x3ac] sm:$0xf0] }
  0x5d   : > { %v11189_v8 = vor.u32 %v16003_v6, %v11188_v5 }
  0x5e   : > { %1574 = vmatpush.bf16.msra.mxu1 %v11065_v52  ;;  %v16016_v52 = vld [vmem:[%s24251_s30 + $0x414] sm:$0xf0] }
  0x5f   : > { %v11245_v54 = vor.u32 %v16016_v52, %v11244_v51  ;;  %v11174_v51 = vld [vmem:[%s24251_s30 + $0x390] sm:$0xf0]  ;;  %v11180_v52 = vld [vmem:[%s24251_s30 + $0x388] sm:$0xf] }
  0x60   : > { %10959 = vmatmul.msk.bf16.gmra.mxu0 %vm767_vm2, %v10955_v59  ;;  %1588 = vmatpush.bf16.msra.mxu2 %v11273_v19  ;;  %v16008_v19 = vld [vmem:[%s24251_s30 + $0x3d4] sm:$0xf0] }
  0x61   : > { %10961 = vmatmul.msk.bf16.gmra.mxu1 %vm767_vm2, %v10955_v59  ;;  %v15965_v59 = vld [vmem:[%s24251_s30 + $0x284] sm:$0xf]  ;;  %1535 = vmatpush.bf16.msrb.mxu3 %v11205_v58  ;;  %v11148_v58 = vld [vmem:[%s24251_s30 + $0x348] sm:$0xf] }
  0x62   : > { %v11049_v62 = vor.u32 %v15965_v59, %v11046_v61  ;;  %v16039_v59 = vld [vmem:[%s24251_s30 + $0x4cc] sm:$0xf0] }
  0x63   : > { %v11333_v61 = vor.u32 %v16039_v59, %v11332_v57  ;;  %v11181_v57 = vor.u32 %v16000_v55, %v11180_v52  ;;  %v15992_v59 = vld [vmem:[%s24251_s30 + $0x354] sm:$0xf0]  ;;  %v11318_v52 = vld [vmem:[%s24251_s30 + $0x4b0] sm:$0xf0] }
  0x64   : > { %1575 = vmatpush.bf16.msra.mxu1 %v11049_v62  ;;  %1589 = vmatpush.bf16.msra.mxu2 %v11257_v31  ;;  %v16009_v62 = vld [vmem:[%s24251_s30 + $0x3e4] sm:$0xf] }
  0x65   : > { %v11225_v3 = vor.u32 %v16009_v62, %v11222_v63  ;;  %1554 = vmatpush.bf16.msra.mxu0 %v11333_v61  ;;  %1536 = vmatpush.bf16.msrb.mxu3 %v11189_v8  ;;  %v11149_v62 = vor.u32 %v15992_v59, %v11148_v58  ;;  %v15984_v8 = vld [vmem:[%s24251_s30 + $0x314] sm:$0xf0]  ;;  %v11340_v58 = vld [vmem:[%s24251_s30 + $0x4c8] sm:$0xf] }
  0x68   : > { %1644 = vmatpush.bf16.msrb.mxu1 %v11293_v10  ;;  %1590 = vmatpush.bf16.msra.mxu2 %v11241_v49  ;;  %v16035_v10 = vld [vmem:[%s24251_s30 + $0x4ac] sm:$0xf0]  ;;  %v15997_v49 = vld [vmem:[%s24251_s30 + $0x384] sm:$0xf] }
  0x69   : > { %v11317_v13 = vor.u32 %v16035_v10, %v11316_v9  ;;  %1537 = vmatpush.bf16.msrb.mxu3 %v11173_v28  ;;  %v15976_v28 = vld [vmem:[%s24251_s30 + $0x2d4] sm:$0xf0] }
  0x6a   : > { %v11085_v33 = vor.u32 %v15976_v28, %v11084_v27 }
  0x6b   : > { %1555 = vmatpush.bf16.msra.mxu0 %v11317_v13  ;;  %v16041_v13 = vld [vmem:[%s24251_s30 + $0x4e4] sm:$0xf] }
  0x6c   : > { %1645 = vmatpush.bf16.msrb.mxu1 %v11277_v21  ;;  %1591 = vmatpush.bf16.msra.mxu2 %v11225_v3  ;;  %v11213_v21 = vor.u32 %v16008_v19, %v11212_v18  ;;  %v11132_v3 = vld [vmem:[%s24251_s30 + $0x328] sm:$0xf]  ;;  %v11353_v18 = vor.u32 %v16041_v13, %v11350_v14  ;;  %v15968_v14 = vld [vmem:[%s24251_s30 + $0x294] sm:$0xf0] }
  0x6d   : > { %v11133_v5 = vor.u32 %v15988_v4, %v11132_v3  ;;  %v11100_v19 = vld [vmem:[%s24251_s30 + $0x2e8] sm:$0xf]  ;;  %v16040_v3 = vld [vmem:[%s24251_s30 + $0x4d4] sm:$0xf0]  ;;  %v16038_v4 = vld [vmem:[%s24251_s30 + $0x4cc] sm:$0xf] }
  0x6e   : > { %v11052_v13 = vld [vmem:[%s24251_s30 + $0x288] sm:$0xf] }
  0x6f   : > { %1556 = vmatpush.bf16.msra.mxu0 %v11301_v32  ;;  %v11337_v32 = vor.u32 %v16037_v23, %v11334_v24  ;;  %v11326_v23 = vld [vmem:[%s24251_s30 + $0x4b8] sm:$0xf0] }
  0x70   : > { %1646 = vmatpush.bf16.msrb.mxu1 %v11261_v37  ;;  %1592 = vmatpush.bf16.msra.mxu2 %v11209_v20  ;;  %v11196_v37 = vld [vmem:[%s24251_s30 + $0x3a8] sm:$0xf]  ;;  %v15980_v20 = vld [vmem:[%s24251_s30 + $0x2f4] sm:$0xf0] }
  0x71   : > { %v11197_v42 = vor.u32 %v16004_v41, %v11196_v37  ;;  %v11356_v37 = vld [vmem:[%s24251_s30 + $0x4e8] sm:$0xf]  ;;  %v16042_v41 = vld [vmem:[%s24251_s30 + $0x4ec] sm:$0xf] }
  0x73   : > { %1625 = vmatpush.bf16.msrb.mxu0 %v11165_v48 }
  0x74   : > { %1647 = vmatpush.bf16.msrb.mxu1 %v11245_v54  ;;  %1593 = vmatpush.bf16.msra.mxu2 %v11193_v40  ;;  %v11177_v54 = vor.u32 %v15997_v49, %v11174_v51  ;;  %v16044_v40 = vld [vmem:[%s24251_s30 + $0x4f4] sm:$0x30]  ;;  %v11361_v49 = vor.u32 %v16042_v41, %v11358_v47  ;;  %v16033_v51 = vld [vmem:[%s24251_s30 + $0x4a4] sm:$0xf]  ;;  %v16026_v41 = vld [vmem:[%s24251_s30 + $0x46c] sm:$0xf] }
  0x75   : > { %v11357_v46 = vor.u32 %v16044_v40, %v11356_v37  ;;  %v15994_v37 = vld [vmem:[%s24251_s30 + $0x36c] sm:$0xf]  ;;  %v11166_v40 = vld [vmem:[%s24251_s30 + $0x378] sm:$0xf0] }
  0x76   : > { %v1509_v59 = vsel %vm1498_vm3, %v11361_v49, 0  ;;  %v16032_v49 = vld [vmem:[%s24251_s30 + $0x494] sm:$0xf0] }
  0x77   : > { %1626 = vmatpush.bf16.msrb.mxu0 %v11149_v62  ;;  %v1506_v55 = vsel %vm1498_vm3, %v11357_v46, 0  ;;  %v11294_v46 = vld [vmem:[%s24251_s30 + $0x478] sm:$0xf0] }
  0x78   : > { %1648 = vmatpush.bf16.msrb.mxu1 %v11229_v7  ;;  %1594 = vmatpush.bf16.msra.mxu2 %v11177_v54  ;;  %v11116_v7 = vld [vmem:[%s24251_s30 + $0x308] sm:$0xf]  ;;  %v11297_v47 = vor.u32 %v16026_v41, %v11294_v46  ;;  %v15982_v41 = vld [vmem:[%s24251_s30 + $0x30c] sm:$0xf] }
  0x79   : > { %v11117_v9 = vor.u32 %v15984_v8, %v11116_v7  ;;  %v11068_v54 = vld [vmem:[%s24251_s30 + $0x2a8] sm:$0xf]  ;;  %v16029_v7 = vld [vmem:[%s24251_s30 + $0x484] sm:$0xf]  ;;  %v11302_v8 = vld [vmem:[%s24251_s30 + $0x490] sm:$0xf0] }
  0x7a   : > { %v16014_v46 = vld [vmem:[%s24251_s30 + $0x40c] sm:$0xf] }
  0x7b   : > { %1627 = vmatpush.bf16.msrb.mxu0 %v11133_v5  ;;  %v11341_v5 = vor.u32 %v16040_v3, %v11340_v58 }
  0x7c   : > { %1649 = vmatpush.bf16.msrb.mxu1 %v11213_v21  ;;  %v11101_v21 = vor.u32 %v15980_v20, %v11100_v19  ;;  %v11305_v19 = vor.u32 %v16029_v7, %v11302_v8  ;;  %v11053_v20 = vor.u32 %v15968_v14, %v11052_v13  ;;  %v15911_v7 = vld [vmem:[%s24251_s30 + $0xe4] sm:$0xf]  ;;  %v11486_v13 = vld [vmem:[%s24251_s30 + $0xf0] sm:$0xf0]  ;;  %v15986_v14 = vld [vmem:[%s24251_s30 + $0x32c] sm:$0xf] }
  0x7f   : > { %1628 = vmatpush.bf16.msrb.mxu0 %v11117_v9 }
  0x80   : > { %1650 = vmatpush.bf16.msrb.mxu1 %v11197_v42 }
  0x83   : > { %1629 = vmatpush.bf16.msrb.mxu0 %v11101_v21  ;;  %v16036_v21 = vld [vmem:[%s24251_s30 + $0x4b4] sm:$0xf0] }
  0x84   : > { %1651 = vmatpush.bf16.msrb.mxu1 %v11181_v57  ;;  %v15972_v57 = vld [vmem:[%s24251_s30 + $0x2b4] sm:$0xf0] }
  0x85   : > { %v11069_v62 = vor.u32 %v15972_v57, %v11068_v54  ;;  %v11310_v54 = vld [vmem:[%s24251_s30 + $0x498] sm:$0xf0] }
  0x87   : > { %1630 = vmatpush.bf16.msrb.mxu0 %v11085_v33 }
  0x8b   : > { %1631 = vmatpush.bf16.msrb.mxu0 %v11069_v62  ;;  %v11278_v62 = vld [vmem:[%s24251_s30 + $0x458] sm:$0xf0] }
  0x8f   : > { %1632 = vmatpush.bf16.msrb.mxu0 %v11053_v20 }
  0xad   : > { %v17327_v60 = vpop.f32.mrf.mxu0 }
  0xae   : > { %v17338_v2 = vpop.f32.mrf.mxu1 }
  0xb3   : > { %v960_v22 = vpop.f32.mrf.mxu3 }
  0xb5   : > { %v17379_v31 = vpop.f32.mrf.mxu0 }
  0xb6   : > { %v17390_v38 = vpop.f32.mrf.mxu1 }
  0xbb   : > { %v962_v56 = vpop.f32.mrf.mxu3 }
  0xbc   : > { %v17419_v61 = vpack.c.bf16 %v962_v56, %v960_v22  ;;  %v1503_v22 = vsel %vm1498_vm3, %v11353_v18, 0  ;;  %v11321_v56 = vor.u32 %v16033_v51, %v11318_v52  ;;  %v11324_v18 = vld [vmem:[%s24251_s30 + $0x4a8] sm:$0xf]  ;;  %v16030_v51 = vld [vmem:[%s24251_s30 + $0x48c] sm:$0xf] }
  0xbd   : > { %v17421_v63 = vpop.f32.mrf.mxu0  ;;  %1610 = vmatpush.bf16.msra.mxu3 %v1503_v22  ;;  %v16034_v22 = vld [vmem:[%s24251_s30 + $0x4ac] sm:$0xf]  ;;  %v11325_v24 = vor.u32 %v16036_v21, %v11324_v18  ;;  %v11313_v57 = vor.u32 %v16030_v51, %v11310_v54  ;;  %v11134_v18 = vld [vmem:[%s24251_s30 + $0x338] sm:$0xf0]  ;;  %v15903_v54 = vld [vmem:[%s24251_s30 + $0xa4] sm:$0xf] }
  0xbe   : > { %v17423_v0 = vpop.f32.mrf.mxu1  ;;  %1519 = vmatmul.bf16.vlgmr.msrb.gmra.mxu2 %v17419_v61  ;;  %1576 = vmatmul.bf16.vlgmr.msra.gmra.mxu1 %v17419_v61  ;;  %v11329_v28 = vor.u32 %v16034_v22, %v11326_v23  ;;  %v11137_v20 = vor.u32 %v15986_v14, %v11134_v18  ;;  %v16018_v21 = vld [vmem:[%s24251_s30 + $0x42c] sm:$0xf]  ;;  %v11262_v22 = vld [vmem:[%s24251_s30 + $0x438] sm:$0xf0]  ;;  %v11468_v23 = vld [vmem:[%s24251_s30 + $0xc0] sm:$0xf] }
  0xbf   : > { %1667 = vmatpush.bf16.msrb.mxu2 %v1506_v55  ;;  %1724 = vmatpush.bf16.msra.mxu1 %v1509_v59  ;;  %v15990_v55 = vld [vmem:[%s24251_s30 + $0x34c] sm:$0xf]  ;;  %v15901_v14 = vld [vmem:[%s24251_s30 + $0x8c] sm:$0xf0]  ;;  %v15899_v18 = vld [vmem:[%s24251_s30 + $0x84] sm:$0xf] }
  0xc0   : > { %v16022_v59 = vld [vmem:[%s24251_s30 + $0x44c] sm:$0xf] }
  0xc1   : > { %1611 = vmatpush.bf16.msra.mxu3 %v11337_v32  ;;  %v11281_v3 = vor.u32 %v16022_v59, %v11278_v62 }
  0xc3   : > { %v965_v6 = vpop.f32.mrf.mxu3  ;;  %1668 = vmatpush.bf16.msrb.mxu2 %v11341_v5  ;;  %v11484_v5 = vld [vmem:[%s24251_s30 + $0xe0] sm:$0xf] }
  0xc5   : > { %v17439_v10 = vpop.f32.mrf.mxu0  ;;  %1612 = vmatpush.bf16.msra.mxu3 %v11321_v56  ;;  %v11150_v56 = vld [vmem:[%s24251_s30 + $0x358] sm:$0xf0] }
  0xc6   : > { %v17441_v11 = vpop.f32.mrf.mxu1  ;;  %v11153_v58 = vor.u32 %v15990_v55, %v11150_v56  ;;  %v11454_v55 = vld [vmem:[%s24251_s30 + $0xb0] sm:$0xf0] }
  0xc7   : > { %1669 = vmatpush.bf16.msrb.mxu2 %v11325_v24  ;;  %v11265_v24 = vor.u32 %v16018_v21, %v11262_v22  ;;  %v15974_v21 = vld [vmem:[%s24251_s30 + $0x2cc] sm:$0xf]  ;;  %v11086_v22 = vld [vmem:[%s24251_s30 + $0x2d8] sm:$0xf0] }
  0xc9   : > { %1613 = vmatpush.bf16.msra.mxu3 %v11305_v19  ;;  %v11489_v19 = vor.u32 %v15911_v7, %v11486_v13  ;;  %v16010_v7 = vld [vmem:[%s24251_s30 + $0x3ec] sm:$0xf]  ;;  %v11436_v13 = vld [vmem:[%s24251_s30 + $0x80] sm:$0xf] }
  0xcb   : > { %v967_v29 = vpop.f32.mrf.mxu3 }
  0xcc   : > { %v17468_v36 = vpack.c.bf16 %v967_v29, %v965_v6  ;;  %v11342_v6 = vld [vmem:[%s24251_s30 + $0x4d8] sm:$0xf0] }
  0xcd   : > { %v979_v42 = vpop.f32.mrf.mxu0  ;;  %v11345_v9 = vor.u32 %v16038_v4, %v11342_v6  ;;  %v15913_v6 = vld [vmem:[%s24251_s30 + $0xec] sm:$0xf0] }
  0xce   : > { %v998_v48 = vpop.f32.mrf.mxu1  ;;  %1524 = vmatmul.bf16.gmra.mxu2 %v17468_v36  ;;  %1581 = vmatmul.bf16.gmra.mxu1 %v17468_v36 }
  0xcf   : > { %1725 = vmatpush.bf16.msra.mxu1 %v11345_v9  ;;  %v11485_v9 = vor.u32 %v15913_v6, %v11484_v5  ;;  %v15978_v5 = vld [vmem:[%s24251_s30 + $0x2ec] sm:$0xf]  ;;  %v11102_v6 = vld [vmem:[%s24251_s30 + $0x2f8] sm:$0xf0] }
  0xd3   : > { %1726 = vmatpush.bf16.msra.mxu1 %v11329_v28  ;;  %v15907_v28 = vld [vmem:[%s24251_s30 + $0xc4] sm:$0xf] }
  0xd5   : > { %v981_v27 = vpop.f32.mrf.mxu0 }
  0xd6   : > { %v17534_v29 = vpack.c.bf16 %v981_v27, %v979_v42  ;;  %v1000_v32 = vpop.f32.mrf.mxu1  ;;  %v11169_v42 = vor.u32 %v15994_v37, %v11166_v40  ;;  %v15909_v27 = vld [vmem:[%s24251_s30 + $0xcc] sm:$0xf0] }
  0xd7   : > { %v17536_v33 = vpack.c.bf16 %v1000_v32, %v998_v48  ;;  %v11308_v48 = vld [vmem:[%s24251_s30 + $0x488] sm:$0xf]  ;;  %1727 = vmatpush.bf16.msra.mxu1 %v11313_v57  ;;  %v11470_v32 = vld [vmem:[%s24251_s30 + $0xd0] sm:$0xf0]  ;;  %v11469_v37 = vor.u32 %v15909_v27, %v11468_v23  ;;  %v16006_v27 = vld [vmem:[%s24251_s30 + $0x3cc] sm:$0xf] }
  0xd8   : > { %1538 = vmatmul.bf16.vlgmr.msrb.gmra.mxu3 %v17534_v29  ;;  %v11309_v52 = vor.u32 %v16032_v49, %v11308_v48  ;;  %v11473_v40 = vor.u32 %v15907_v28, %v11470_v32  ;;  %v11452_v48 = vld [vmem:[%s24251_s30 + $0xa0] sm:$0xf]  ;;  %v15905_v49 = vld [vmem:[%s24251_s30 + $0xac] sm:$0xf0]  ;;  %v11214_v28 = vld [vmem:[%s24251_s30 + $0x3d8] sm:$0xf0] }
  0xd9   : > { %11362 = vmatmul.msk.bf16.vlgmr.msra.gmra.mxu0 %vm1491_vm4, %v17536_v33  ;;  %1682 = vmatpush.bf16.msrb.mxu3 %v11169_v42  ;;  %v11118_v42 = vld [vmem:[%s24251_s30 + $0x318] sm:$0xf0]  ;;  %v11453_v56 = vor.u32 %v15905_v49, %v11452_v48  ;;  %v11217_v32 = vor.u32 %v16006_v27, %v11214_v28  ;;  %v15945_v27 = vld [vmem:[%s24251_s30 + $0x1ec] sm:$0xf0] }
  0xda   : > { %1701 = vmatpush.bf16.msra.mxu0 %v11297_v47  ;;  %1670 = vmatpush.bf16.msrb.mxu2 %v11309_v52  ;;  %v11246_v47 = vld [vmem:[%s24251_s30 + $0x418] sm:$0xf0]  ;;  %v11121_v51 = vor.u32 %v15982_v41, %v11118_v42  ;;  %v15895_v41 = vld [vmem:[%s24251_s30 + $0x64] sm:$0xf] }
  0xdb   : > { %v11249_v52 = vor.u32 %v16014_v46, %v11246_v47  ;;  %v11422_v46 = vld [vmem:[%s24251_s30 + $0x70] sm:$0xf0]  ;;  %v15970_v47 = vld [vmem:[%s24251_s30 + $0x2ac] sm:$0xf]  ;;  %v11070_v48 = vld [vmem:[%s24251_s30 + $0x2b8] sm:$0xf0] }
  0xdc   : > { %v11425_v49 = vor.u32 %v15895_v41, %v11422_v46  ;;  %v11596_v46 = vld [vmem:[%s24251_s30 + $0x1c0] sm:$0xf] }
  0xdd   : > { %v984_v4 = vpop.f32.mrf.mxu0  ;;  %1683 = vmatpush.bf16.msrb.mxu3 %v11153_v58  ;;  %v11457_v58 = vor.u32 %v15903_v54, %v11454_v55  ;;  %v11198_v54 = vld [vmem:[%s24251_s30 + $0x3b8] sm:$0xf0]  ;;  %v11404_v55 = vld [vmem:[%s24251_s30 + $0x40] sm:$0xf] }
  0xde   : > { %v1003_v8 = vpop.f32.mrf.mxu1  ;;  %1595 = vmatmul.bf16.vlgmr.msra.gmra.mxu2 %v17534_v29  ;;  %1652 = vmatmul.bf16.vlgmr.msrb.gmra.mxu1 %v17534_v29 }
  0xdf   : > { %1702 = vmatpush.bf16.msra.mxu0 %v11281_v3  ;;  %2153 = vmatpush.bf16.msra.mxu2 %v11485_v9 }
  0xe0   : > { %2210 = vmatpush.bf16.msrb.mxu1 %v11489_v19  ;;  %v11437_v19 = vor.u32 %v15901_v14, %v11436_v13  ;;  %v11388_v13 = vld [vmem:[%s24251_s30 + $0x20] sm:$0xf]  ;;  %v15889_v14 = vld [vmem:[%s24251_s30 + $0x2c] sm:$0xf0] }
  0xe1   : > { %1684 = vmatpush.bf16.msrb.mxu3 %v11137_v20  ;;  %v11438_v20 = vld [vmem:[%s24251_s30 + $0x90] sm:$0xf0] }
  0xe2   : > { %v11441_v23 = vor.u32 %v15899_v18, %v11438_v20  ;;  %v15887_v20 = vld [vmem:[%s24251_s30 + $0x24] sm:$0xf] }
  0xe3   : > { %1703 = vmatpush.bf16.msra.mxu0 %v11265_v24  ;;  %2154 = vmatpush.bf16.msra.mxu2 %v11469_v37  ;;  %v11089_v24 = vor.u32 %v15974_v21, %v11086_v22  ;;  %v11420_v37 = vld [vmem:[%s24251_s30 + $0x60] sm:$0xf]  ;;  %v11390_v21 = vld [vmem:[%s24251_s30 + $0x30] sm:$0xf0]  ;;  %v11389_v22 = vor.u32 %v15889_v14, %v11388_v13  ;;  %v15933_v13 = vld [vmem:[%s24251_s30 + $0x18c] sm:$0xf0] }
  0xe4   : > { %2211 = vmatpush.bf16.msrb.mxu1 %v11473_v40  ;;  %v15897_v40 = vld [vmem:[%s24251_s30 + $0x6c] sm:$0xf0] }
  0xe5   : > { %v986_v57 = vpop.f32.mrf.mxu0  ;;  %1685 = vmatpush.bf16.msrb.mxu3 %v11121_v51  ;;  %v11421_v42 = vor.u32 %v15897_v40, %v11420_v37  ;;  %v11073_v51 = vor.u32 %v15970_v47, %v11070_v48  ;;  %v15885_v37 = vld [vmem:[%s24251_s30 + $0xc] sm:$0xf0]  ;;  %v15883_v40 = vld [vmem:[%s24251_s30 + $0x4] sm:$0xf] }
  0xe6   : > { %v17639_v59 = vpack.c.bf16 %v986_v57, %v984_v4  ;;  %v1005_v62 = vpop.f32.mrf.mxu1  ;;  %v11105_v4 = vor.u32 %v15978_v5, %v11102_v6  ;;  %v15893_v57 = vld [vmem:[%s24251_s30 + $0x4c] sm:$0xf0] }
  0xe7   : > { %v17641_v3 = vpack.c.bf16 %v1005_v62, %v1003_v8  ;;  %1704 = vmatpush.bf16.msra.mxu0 %v11249_v52  ;;  %2155 = vmatpush.bf16.msra.mxu2 %v11453_v56  ;;  %v11230_v8 = vld [vmem:[%s24251_s30 + $0x3f8] sm:$0xf0]  ;;  %v16002_v52 = vld [vmem:[%s24251_s30 + $0x3ac] sm:$0xf]  ;;  %v11406_v62 = vld [vmem:[%s24251_s30 + $0x50] sm:$0xf0]  ;;  %v11405_v5 = vor.u32 %v15893_v57, %v11404_v55 }
  0xe8   : > { %1543 = vmatmul.bf16.gmra.mxu3 %v17639_v59  ;;  %2212 = vmatpush.bf16.msrb.mxu1 %v11457_v58  ;;  %v11233_v9 = vor.u32 %v16010_v7, %v11230_v8  ;;  %v11201_v56 = vor.u32 %v16002_v52, %v11198_v54  ;;  %v15891_v58 = vld [vmem:[%s24251_s30 + $0x44] sm:$0xf]  ;;  %v15966_v7 = vld [vmem:[%s24251_s30 + $0x28c] sm:$0xf]  ;;  %v15941_v47 = vld [vmem:[%s24251_s30 + $0x1cc] sm:$0xf0] }
  0xe9   : > { %11363 = vmatmul.msk.bf16.gmra.mxu0 %vm1491_vm4, %v17641_v3  ;;  %1686 = vmatpush.bf16.msrb.mxu3 %v11105_v4  ;;  %v11409_v6 = vor.u32 %v15891_v58, %v11406_v62  ;;  %v11054_v4 = vld [vmem:[%s24251_s30 + $0x298] sm:$0xf0]  ;;  %v15998_v8 = vld [vmem:[%s24251_s30 + $0x38c] sm:$0xf]  ;;  %v11614_v52 = vld [vmem:[%s24251_s30 + $0x1f0] sm:$0xf0] }
  0xea   : > { %v11057_v18 = vor.u32 %v15966_v7, %v11054_v4  ;;  %v11620_v54 = vld [vmem:[%s24251_s30 + $0x1e8] sm:$0xf]  ;;  %v11580_v57 = vld [vmem:[%s24251_s30 + $0x1a0] sm:$0xf]  ;;  %v15937_v58 = vld [vmem:[%s24251_s30 + $0x1ac] sm:$0xf0] }
  0xeb   : > { %1705 = vmatpush.bf16.msra.mxu0 %v11233_v9  ;;  %2156 = vmatpush.bf16.msra.mxu2 %v11437_v19  ;;  %v11182_v9 = vld [vmem:[%s24251_s30 + $0x398] sm:$0xf0]  ;;  %v11604_v7 = vld [vmem:[%s24251_s30 + $0x1c8] sm:$0xf] }
  0xec   : > { %2213 = vmatpush.bf16.msrb.mxu1 %v11441_v23  ;;  %v11185_v19 = vor.u32 %v15998_v8, %v11182_v9  ;;  %v11393_v23 = vor.u32 %v15887_v20, %v11390_v21  ;;  %v15942_v8 = vld [vmem:[%s24251_s30 + $0x1d4] sm:$0xf0]  ;;  %v11564_v9 = vld [vmem:[%s24251_s30 + $0x180] sm:$0xf]  ;;  %v11588_v20 = vld [vmem:[%s24251_s30 + $0x1a8] sm:$0xf] }
  0xed   : > { %1687 = vmatpush.bf16.msrb.mxu3 %v11089_v24  ;;  %v11612_v24 = vld [vmem:[%s24251_s30 + $0x1e0] sm:$0xf]  ;;  %v11605_v14 = vor.u32 %v15942_v8, %v11604_v7  ;;  %v15938_v21 = vld [vmem:[%s24251_s30 + $0x1b4] sm:$0xf0] }
  0xee   : > { %1600 = vmatmul.bf16.gmra.mxu2 %v17639_v59  ;;  %1657 = vmatmul.bf16.gmra.mxu1 %v17639_v59  ;;  %v11613_v28 = vor.u32 %v15945_v27, %v11612_v24  ;;  %v11589_v24 = vor.u32 %v15938_v21, %v11588_v20  ;;  %v11676_v27 = vld [vmem:[%s24251_s30 + $0x260] sm:$0xf]  ;;  %v11534_v21 = vld [vmem:[%s24251_s30 + $0x150] sm:$0xf0] }
  0xef   : > { %1706 = vmatpush.bf16.msra.mxu0 %v11217_v32  ;;  %2157 = vmatpush.bf16.msra.mxu2 %v11421_v42  ;;  %v11372_v32 = vld [vmem:[%s24251_s30] sm:$0xf]  ;;  %v11374_v42 = vld [vmem:[%s24251_s30 + $0x10] sm:$0xf0] }
  0xf0   : > { %2214 = vmatpush.bf16.msrb.mxu1 %v11425_v49  ;;  %v11373_v41 = vor.u32 %v15885_v37, %v11372_v32  ;;  %v11377_v48 = vor.u32 %v15883_v40, %v11374_v42  ;;  %v11597_v49 = vor.u32 %v15941_v47, %v11596_v46  ;;  %v11548_v32 = vld [vmem:[%s24251_s30 + $0x160] sm:$0xf]  ;;  %v15929_v37 = vld [vmem:[%s24251_s30 + $0x16c] sm:$0xf0]  ;;  %v15931_v46 = vld [vmem:[%s24251_s30 + $0x184] sm:$0xf] }
  0xf1   : > { %1688 = vmatpush.bf16.msrb.mxu3 %v11073_v51  ;;  %v15943_v51 = vld [vmem:[%s24251_s30 + $0x1e4] sm:$0xf]  ;;  %v11566_v47 = vld [vmem:[%s24251_s30 + $0x190] sm:$0xf0]  ;;  %v11516_v8 = vld [vmem:[%s24251_s30 + $0x120] sm:$0xf] }
  0xf2   : > { %v11617_v55 = vor.u32 %v15943_v51, %v11614_v52  ;;  %v15934_v51 = vld [vmem:[%s24251_s30 + $0x194] sm:$0xf0]  ;;  %v11532_v52 = vld [vmem:[%s24251_s30 + $0x140] sm:$0xf] }
  0xf3   : > { %1707 = vmatpush.bf16.msra.mxu0 %v11201_v56  ;;  %2158 = vmatpush.bf16.msra.mxu2 %v11405_v5  ;;  %v15946_v56 = vld [vmem:[%s24251_s30 + $0x1f4] sm:$0xf0]  ;;  %v11581_v5 = vor.u32 %v15937_v58, %v11580_v57  ;;  %v15957_v57 = vld [vmem:[%s24251_s30 + $0x24c] sm:$0xf0] }
  0xf4   : > { %2215 = vmatpush.bf16.msrb.mxu1 %v11409_v6  ;;  %v11621_v62 = vor.u32 %v15946_v56, %v11620_v54  ;;  %v11598_v6 = vld [vmem:[%s24251_s30 + $0x1d0] sm:$0xf0]  ;;  %v11660_v56 = vld [vmem:[%s24251_s30 + $0x240] sm:$0xf] }
  0xf5   : > { %1689 = vmatpush.bf16.msrb.mxu3 %v11057_v18  ;;  %v15935_v18 = vld [vmem:[%s24251_s30 + $0x1a4] sm:$0xf] }
  0xf7   : > { %1708 = vmatpush.bf16.msra.mxu0 %v11185_v19  ;;  %2159 = vmatpush.bf16.msra.mxu2 %v11389_v22  ;;  %v11582_v19 = vld [vmem:[%s24251_s30 + $0x1b0] sm:$0xf0]  ;;  %v11565_v22 = vor.u32 %v15933_v13, %v11564_v9  ;;  %v15921_v9 = vld [vmem:[%s24251_s30 + $0x12c] sm:$0xf0] }
  0xf8   : > { %11364 = vmatmul.msk.bf16.vlgmr.msra.gmra.mxu3 %vm1491_vm4, %v17536_v33  ;;  %2216 = vmatpush.bf16.msrb.mxu1 %v11393_v23  ;;  %v11585_v23 = vor.u32 %v15935_v18, %v11582_v19  ;;  %v15953_v18 = vld [vmem:[%s24251_s30 + $0x22c] sm:$0xf0]  ;;  %v15923_v19 = vld [vmem:[%s24251_s30 + $0x144] sm:$0xf] }
  0xf9   : > { %1633 = vmatmul.bf16.vlgmr.msrb.gmra.mxu0 %v17419_v61  ;;  %2172 = vmatpush.bf16.msra.mxu3 %v11613_v28  ;;  %v15961_v28 = vld [vmem:[%s24251_s30 + $0x26c] sm:$0x30] }
  0xfa   : > { %v11677_v40 = vor.u32 %v15961_v28, %v11676_v27  ;;  %v11500_v28 = vld [vmem:[%s24251_s30 + $0x100] sm:$0xf] }
  0xfb   : > { %2160 = vmatpush.bf16.msra.mxu2 %v11373_v41  ;;  %v11549_v41 = vor.u32 %v15929_v37, %v11548_v32  ;;  %v15917_v32 = vld [vmem:[%s24251_s30 + $0x10c] sm:$0xf0]  ;;  %v11628_v37 = vld [vmem:[%s24251_s30 + $0x200] sm:$0xf] }
  0xfc   : > { %2217 = vmatpush.bf16.msrb.mxu1 %v11377_v48  ;;  %v2142_v42 = vsel %vm1498_vm3, %v11677_v40, 0  ;;  %v11569_v48 = vor.u32 %v15931_v46, %v11566_v47  ;;  %v15949_v40 = vld [vmem:[%s24251_s30 + $0x20c] sm:$0xf0]  ;;  %v11501_v46 = vor.u32 %v15917_v32, %v11500_v28  ;;  %v15955_v28 = vld [vmem:[%s24251_s30 + $0x244] sm:$0xf] }
  0xfd   : > { %2173 = vmatpush.bf16.msra.mxu3 %v11597_v49  ;;  %2195 = vmatpush.bf16.msrb.mxu0 %v2142_v42  ;;  %v11572_v49 = vld [vmem:[%s24251_s30 + $0x188] sm:$0xf]  ;;  %v11518_v42 = vld [vmem:[%s24251_s30 + $0x130] sm:$0xf0]  ;;  %v11629_v47 = vor.u32 %v15949_v40, %v11628_v37  ;;  %v15894_v40 = vld [vmem:[%s24251_s30 + $0x54] sm:$0xf0] }
  0xfe   : > { %11366 = vmatmul.msk.bf16.vlgmr.msrb.gmra.mxu2 %vm1491_vm4, %v17536_v33  ;;  %11368 = vmatmul.msk.bf16.vlgmr.msra.gmra.mxu1 %vm1491_vm4, %v17536_v33  ;;  %v15939_v33 = vld [vmem:[%s24251_s30 + $0x1c4] sm:$0xf]  ;;  %v11573_v54 = vor.u32 %v15934_v51, %v11572_v49  ;;  %v15922_v49 = vld [vmem:[%s24251_s30 + $0x134] sm:$0xf0]  ;;  %v11662_v32 = vld [vmem:[%s24251_s30 + $0x250] sm:$0xf0] }
  0xff   : > { %2229 = vmatpush.bf16.msrb.mxu2 %v11617_v55  ;;  %v11601_v4 = vor.u32 %v15939_v33, %v11598_v6  ;;  %v15925_v55 = vld [vmem:[%s24251_s30 + $0x14c] sm:$0xf0]  ;;  %v11550_v33 = vld [vmem:[%s24251_s30 + $0x170] sm:$0xf0]  ;;  %v11556_v6 = vld [vmem:[%s24251_s30 + $0x168] sm:$0xf] }
 0x100   : > { %2286 = vmatpush.bf16.msra.mxu1 %v11621_v62  ;;  %v11533_v58 = vor.u32 %v15925_v55, %v11532_v52  ;;  %v11661_v62 = vor.u32 %v15957_v57, %v11660_v56  ;;  %v15914_v55 = vld [vmem:[%s24251_s30 + $0xf4] sm:$0xf0]  ;;  %v17935_v57 = vpop.f32.mrf.mxu2  ;;  %v11412_v37 = vld [vmem:[%s24251_s30 + $0x48] sm:$0xf] }
 0x101   : > { %2174 = vmatpush.bf16.msra.mxu3 %v11581_v5  ;;  %v15927_v5 = vld [vmem:[%s24251_s30 + $0x164] sm:$0xf] }
 0x102   : > { %v11553_v7 = vor.u32 %v15927_v5, %v11550_v33  ;;  %2196 = vmatpush.bf16.msrb.mxu0 %v11661_v62  ;;  %v11502_v62 = vld [vmem:[%s24251_s30 + $0x110] sm:$0xf0]  ;;  %v11508_v5 = vld [vmem:[%s24251_s30 + $0x108] sm:$0xf] }
 0x103   : > { %2230 = vmatpush.bf16.msrb.mxu2 %v11601_v4  ;;  %v15930_v4 = vld [vmem:[%s24251_s30 + $0x174] sm:$0xf0] }
 0x104   : > { %2287 = vmatpush.bf16.msra.mxu1 %v11605_v14  ;;  %v11557_v13 = vor.u32 %v15930_v4, %v11556_v6  ;;  %v11517_v14 = vor.u32 %v15921_v9, %v11516_v8  ;;  %v11476_v6 = vld [vmem:[%s24251_s30 + $0xc8] sm:$0xf]  ;;  %v17957_v4 = vpack.c.bf16 %v17379_v31, %v17327_v60  ;;  %v15902_v31 = vld [vmem:[%s24251_s30 + $0x94] sm:$0xf0] }
 0x105   : > { %2175 = vmatpush.bf16.msra.mxu3 %v11565_v22  ;;  %v11540_v22 = vld [vmem:[%s24251_s30 + $0x148] sm:$0xf] }
 0x106   : > { %v11460_v9 = vld [vmem:[%s24251_s30 + $0xa8] sm:$0xf] }
 0x107   : > { %2231 = vmatpush.bf16.msrb.mxu2 %v11585_v23  ;;  %v15926_v23 = vld [vmem:[%s24251_s30 + $0x154] sm:$0xf0]  ;;  %v11444_v60 = vld [vmem:[%s24251_s30 + $0x88] sm:$0xf] }
 0x108   : > { %11365 = vmatmul.msk.bf16.gmra.mxu3 %vm1491_vm4, %v17641_v3  ;;  %2288 = vmatpush.bf16.msra.mxu1 %v11589_v24  ;;  %v11537_v24 = vor.u32 %v15923_v19, %v11534_v21  ;;  %v11541_v27 = vor.u32 %v15926_v23, %v11540_v22  ;;  %v15959_v19 = vld [vmem:[%s24251_s30 + $0x264] sm:$0xf]  ;;  %v11428_v22 = vld [vmem:[%s24251_s30 + $0x68] sm:$0xf]  ;;  %v15898_v23 = vld [vmem:[%s24251_s30 + $0x74] sm:$0xf0] }
 0x109   : > { %1638 = vmatmul.bf16.gmra.mxu0 %v17468_v36  ;;  %2176 = vmatpush.bf16.msra.mxu3 %v11549_v41  ;;  %v15919_v41 = vld [vmem:[%s24251_s30 + $0x124] sm:$0xf] }
 0x10a   : > { %v11521_v51 = vor.u32 %v15919_v41, %v11518_v42  ;;  %v11684_v41 = vld [vmem:[%s24251_s30 + $0x268] sm:$0xf]  ;;  %v15962_v42 = vld [vmem:[%s24251_s30 + $0x274] sm:$0x30] }
 0x10b   : > { %2232 = vmatpush.bf16.msrb.mxu2 %v11569_v48  ;;  %v11524_v48 = vld [vmem:[%s24251_s30 + $0x128] sm:$0xf] }
 0x10c   : > { %2289 = vmatpush.bf16.msra.mxu1 %v11573_v54  ;;  %v11525_v52 = vor.u32 %v15922_v49, %v11524_v48  ;;  %v11492_v54 = vld [vmem:[%s24251_s30 + $0xe8] sm:$0xf]  ;;  %v11685_v48 = vor.u32 %v15962_v42, %v11684_v41  ;;  %v15950_v41 = vld [vmem:[%s24251_s30 + $0x214] sm:$0xf0]  ;;  %v15948_v42 = vld [vmem:[%s24251_s30 + $0x20c] sm:$0xf] }
 0x10d   : > { %2177 = vmatpush.bf16.msra.mxu3 %v11533_v58  ;;  %v11493_v56 = vor.u32 %v15914_v55, %v11492_v54  ;;  %v15915_v58 = vld [vmem:[%s24251_s30 + $0x104] sm:$0xf]  ;;  %v11646_v54 = vld [vmem:[%s24251_s30 + $0x230] sm:$0xf0] }
 0x10e   : > { %11367 = vmatmul.msk.bf16.gmra.mxu2 %vm1491_vm4, %v17641_v3  ;;  %11369 = vmatmul.msk.bf16.gmra.mxu1 %vm1491_vm4, %v17641_v3  ;;  %v11644_v3 = vld [vmem:[%s24251_s30 + $0x220] sm:$0xf] }
 0x10f   : > { %2233 = vmatpush.bf16.msrb.mxu2 %v11553_v7  ;;  %v11645_v20 = vor.u32 %v15953_v18, %v11644_v3  ;;  %v15910_v7 = vld [vmem:[%s24251_s30 + $0xd4] sm:$0xf0]  ;;  %v17967_v3 = vpop.f32.mrf.mxu2  ;;  %v11445_v18 = vor.u32 %v15902_v31, %v11444_v60 }
 0x110   : > { %2290 = vmatpush.bf16.msra.mxu1 %v11557_v13  ;;  %v11477_v8 = vor.u32 %v15910_v7, %v11476_v6  ;;  %v15906_v13 = vld [vmem:[%s24251_s30 + $0xb4] sm:$0xf0]  ;;  %v11670_v7 = vld [vmem:[%s24251_s30 + $0x258] sm:$0xf0] }
 0x111   : > { %2178 = vmatpush.bf16.msra.mxu3 %v11517_v14  ;;  %2197 = vmatpush.bf16.msrb.mxu0 %v11645_v20  ;;  %v11461_v14 = vor.u32 %v15906_v13, %v11460_v9  ;;  %v11678_v20 = vld [vmem:[%s24251_s30 + $0x270] sm:$0x30]  ;;  %v15947_v9 = vld [vmem:[%s24251_s30 + $0x204] sm:$0xf]  ;;  %v15886_v31 = vld [vmem:[%s24251_s30 + $0x14] sm:$0xf0] }
 0x112   : > { %v11681_v21 = vor.u32 %v15959_v19, %v11678_v20  ;;  %v11630_v13 = vld [vmem:[%s24251_s30 + $0x210] sm:$0xf0]  ;;  %v11652_v19 = vld [vmem:[%s24251_s30 + $0x228] sm:$0xf]  ;;  %v15954_v20 = vld [vmem:[%s24251_s30 + $0x234] sm:$0xf0] }
 0x113   : > { %2234 = vmatpush.bf16.msrb.mxu2 %v11537_v24  ;;  %v11429_v24 = vor.u32 %v15898_v23, %v11428_v22  ;;  %v11633_v60 = vor.u32 %v15947_v9, %v11630_v13  ;;  %v18071_v22 = vpack.c.bf16 %v17390_v38, %v17338_v2  ;;  %v11653_v23 = vor.u32 %v15954_v20, %v11652_v19  ;;  %v11494_v2 = vld [vmem:[%s24251_s30 + $0xf8] sm:$0xf0]  ;;  %v15944_v38 = vld [vmem:[%s24251_s30 + $0x1ec] sm:$0xf] }
 0x114   : > { %2291 = vmatpush.bf16.msra.mxu1 %v11541_v27  ;;  %v2145_v27 = vsel %vm1498_vm3, %v11681_v21, 0  ;;  %v15952_v21 = vld [vmem:[%s24251_s30 + $0x22c] sm:$0xf]  ;;  %v11446_v9 = vld [vmem:[%s24251_s30 + $0x98] sm:$0xf0] }
 0x115   : > { %2179 = vmatpush.bf16.msra.mxu3 %v11501_v46  ;;  %2198 = vmatpush.bf16.msrb.mxu0 %v11629_v47  ;;  %v11413_v47 = vor.u32 %v15894_v40, %v11412_v37  ;;  %v15912_v37 = vld [vmem:[%s24251_s30 + $0xec] sm:$0xf]  ;;  %v11636_v40 = vld [vmem:[%s24251_s30 + $0x208] sm:$0xf] }
 0x116   : > { %v15932_v13 = vld [vmem:[%s24251_s30 + $0x18c] sm:$0xf] }
 0x117   : > { %2235 = vmatpush.bf16.msrb.mxu2 %v11521_v51  ;;  %v18012_v46 = vpop.f32.mrf.mxu2  ;;  %v2148_v51 = vsel %vm1498_vm3, %v11685_v48, 0  ;;  %v11638_v48 = vld [vmem:[%s24251_s30 + $0x218] sm:$0xf0]  ;;  %v15896_v20 = vld [vmem:[%s24251_s30 + $0x6c] sm:$0xf] }
 0x118   : > { %1690 = vmatmul.bf16.vlgmr.msrb.gmra.mxu3 %v17419_v61  ;;  %2292 = vmatpush.bf16.msra.mxu1 %v11525_v52  ;;  %v11505_v61 = vor.u32 %v15915_v58, %v11502_v62  ;;  %v15951_v52 = vld [vmem:[%s24251_s30 + $0x224] sm:$0xf]  ;;  %v11396_v58 = vld [vmem:[%s24251_s30 + $0x28] sm:$0xf]  ;;  %v15890_v62 = vld [vmem:[%s24251_s30 + $0x34] sm:$0xf0] }
 0x119   : > { %1709 = vmatmul.bf16.vlgmr.msra.gmra.mxu0 %v17534_v29  ;;  %v15918_v29 = vld [vmem:[%s24251_s30 + $0x114] sm:$0xf0]  ;;  %2252 = vmatpush.bf16.msrb.mxu3 %v2145_v27  ;;  %v18078_v27 = vpack.c.bf16 %v17967_v3, %v17935_v57  ;;  %v11497_v57 = vor.u32 %v15912_v37, %v11494_v2  ;;  %v11622_v3 = vld [vmem:[%s24251_s30 + $0x1f8] sm:$0xf0]  ;;  %v15924_v2 = vld [vmem:[%s24251_s30 + $0x14c] sm:$0xf] }
 0x11a   : > { %2267 = vmatpush.bf16.msra.mxu0 %v11493_v56  ;;  %v11509_v33 = vor.u32 %v15918_v29, %v11508_v5  ;;  %v11649_v56 = vor.u32 %v15951_v52, %v11646_v54  ;;  %v11397_v5 = vor.u32 %v15890_v62, %v11396_v58  ;;  %v15958_v29 = vld [vmem:[%s24251_s30 + $0x254] sm:$0xf0]  ;;  %v15940_v52 = vld [vmem:[%s24251_s30 + $0x1cc] sm:$0xf]  ;;  %v11462_v62 = vld [vmem:[%s24251_s30 + $0xb8] sm:$0xf0] }
 0x11b   : > { %2236 = vmatpush.bf16.msrb.mxu2 %v11505_v61  ;;  %v11668_v61 = vld [vmem:[%s24251_s30 + $0x248] sm:$0xf]  ;;  %v15904_v58 = vld [vmem:[%s24251_s30 + $0xac] sm:$0xf]  ;;  %v11414_v37 = vld [vmem:[%s24251_s30 + $0x58] sm:$0xf0] }
 0x11c   : > { %2293 = vmatpush.bf16.msra.mxu1 %v11509_v33  ;;  %v15956_v33 = vld [vmem:[%s24251_s30 + $0x24c] sm:$0xf]  ;;  %v11669_v6 = vor.u32 %v15958_v29, %v11668_v61  ;;  %v11465_v61 = vor.u32 %v15904_v58, %v11462_v62  ;;  %v11590_v29 = vld [vmem:[%s24251_s30 + $0x1b8] sm:$0xf0] }
 0x11e   : > { %2161 = vmatmul.bf16.vlgmr.msra.gmra.mxu2 %v17957_v4  ;;  %2218 = vmatmul.bf16.vlgmr.msrb.gmra.mxu1 %v17957_v4 }
 0x11f   : > { %2268 = vmatpush.bf16.msra.mxu0 %v11477_v8  ;;  %2309 = vmatpush.bf16.msra.mxu2 %v2148_v51  ;;  %v11673_v8 = vor.u32 %v15956_v33, %v11670_v7  ;;  %v11478_v51 = vld [vmem:[%s24251_s30 + $0xd8] sm:$0xf0] }
 0x123   : > { %2269 = vmatpush.bf16.msra.mxu0 %v11461_v14  ;;  %v11380_v14 = vld [vmem:[%s24251_s30 + $0x8] sm:$0xf]  ;;  %2310 = vmatpush.bf16.msra.mxu2 %v11669_v6 }
 0x127   : > { %2270 = vmatpush.bf16.msra.mxu0 %v11445_v18  ;;  %v11381_v18 = vor.u32 %v15886_v31, %v11380_v14  ;;  %2311 = vmatpush.bf16.msra.mxu2 %v11653_v23  ;;  %v15928_v23 = vld [vmem:[%s24251_s30 + $0x16c] sm:$0xf] }
 0x128   : > { %1695 = vmatmul.bf16.gmra.mxu3 %v17468_v36  ;;  %v18001_v36 = vpack.c.bf16 %v17439_v10, %v17421_v63  ;;  %v15960_v63 = vld [vmem:[%s24251_s30 + $0x26c] sm:$0xf]  ;;  %v11686_v10 = vld [vmem:[%s24251_s30 + $0x278] sm:$0x30] }
 0x129   : > { %1714 = vmatmul.bf16.gmra.mxu0 %v17639_v59  ;;  %v11665_v59 = vor.u32 %v15955_v28, %v11662_v32  ;;  %v11689_v49 = vor.u32 %v15960_v63, %v11686_v10  ;;  %v841_v28 = vpop.f32.mrf.mxu2  ;;  %v11641_v10 = vor.u32 %v15948_v42, %v11638_v48 }
 0x12a   : > { %v18158_v19 = vpack.c.bf16 %v841_v28, %v18012_v46 }
 0x12b   : > { %2271 = vmatpush.bf16.msra.mxu0 %v11429_v24  ;;  %2253 = vmatpush.bf16.msrb.mxu3 %v11665_v59  ;;  %v2151_v55 = vsel %vm1498_vm3, %v11689_v49, 0  ;;  %v11654_v24 = vld [vmem:[%s24251_s30 + $0x238] sm:$0xf0]  ;;  %v11625_v59 = vor.u32 %v15944_v38, %v11622_v3  ;;  %v15908_v49 = vld [vmem:[%s24251_s30 + $0xcc] sm:$0xf] }
 0x12c   : > { %2366 = vmatpush.bf16.msrb.mxu1 %v2151_v55  ;;  %v11657_v32 = vor.u32 %v15952_v21, %v11654_v24  ;;  %v11481_v54 = vor.u32 %v15908_v49, %v11478_v51  ;;  %v11606_v55 = vld [vmem:[%s24251_s30 + $0x1d8] sm:$0xf0]  ;;  %v15884_v51 = vld [vmem:[%s24251_s30 + $0xc] sm:$0xf] }
 0x12d   : > { %v11430_v21 = vld [vmem:[%s24251_s30 + $0x78] sm:$0xf0] }
 0x12e   : > { %2166 = vmatmul.bf16.gmra.mxu2 %v18001_v36  ;;  %2223 = vmatmul.bf16.gmra.mxu1 %v18001_v36 }
 0x12f   : > { %2272 = vmatpush.bf16.msra.mxu0 %v11413_v47  ;;  %2254 = vmatpush.bf16.msrb.mxu3 %v11649_v56  ;;  %v11637_v47 = vor.u32 %v15950_v41, %v11636_v40  ;;  %v11609_v56 = vor.u32 %v15940_v52, %v11606_v55  ;;  %v11398_v40 = vld [vmem:[%s24251_s30 + $0x38] sm:$0xf0]  ;;  %v15920_v41 = vld [vmem:[%s24251_s30 + $0x12c] sm:$0xf] }
 0x130   : > { %2367 = vmatpush.bf16.msrb.mxu1 %v11673_v8  ;;  %v15900_v8 = vld [vmem:[%s24251_s30 + $0x8c] sm:$0xf]  ;;  %v11382_v52 = vld [vmem:[%s24251_s30 + $0x18] sm:$0xf0] }
 0x131   : > { %2312 = vmatpush.bf16.msra.mxu2 %v11637_v47  ;;  %v11449_v14 = vor.u32 %v15900_v8, %v11446_v9  ;;  %v11526_v47 = vld [vmem:[%s24251_s30 + $0x138] sm:$0xf0]  ;;  %v11385_v55 = vor.u32 %v15884_v51, %v11382_v52 }
 0x133   : > { %2273 = vmatpush.bf16.msra.mxu0 %v11397_v5  ;;  %2255 = vmatpush.bf16.msrb.mxu3 %v11633_v60  ;;  %v15936_v5 = vld [vmem:[%s24251_s30 + $0x1ac] sm:$0xf]  ;;  %v11574_v60 = vld [vmem:[%s24251_s30 + $0x198] sm:$0xf0] }
 0x134   : > { %2368 = vmatpush.bf16.msrb.mxu1 %v11657_v32  ;;  %v11593_v6 = vor.u32 %v15936_v5, %v11590_v29  ;;  %v11577_v31 = vor.u32 %v15932_v13, %v11574_v60  ;;  %v15892_v32 = vld [vmem:[%s24251_s30 + $0x4c] sm:$0xf] }
 0x135   : > { %v11417_v38 = vor.u32 %v15892_v32, %v11414_v37 }
 0x137   : > { %2274 = vmatpush.bf16.msra.mxu0 %v11381_v18  ;;  %v18155_v18 = vpack.c.bf16 %v17441_v11, %v17423_v0  ;;  %v11433_v0 = vor.u32 %v15896_v20, %v11430_v21  ;;  %v11558_v11 = vld [vmem:[%s24251_s30 + $0x178] sm:$0xf0] }
 0x138   : > { %2180 = vmatmul.bf16.vlgmr.msra.gmra.mxu3 %v18071_v22  ;;  %2369 = vmatpush.bf16.msrb.mxu1 %v11641_v10  ;;  %v11561_v24 = vor.u32 %v15928_v23, %v11558_v11  ;;  %v11529_v10 = vor.u32 %v15920_v41, %v11526_v47 }
 0x139   : > { %11690 = vmatmul.msk.bf16.vlgmr.msrb.gmra.mxu0 %vm1491_vm4, %v18078_v27  ;;  %2324 = vmatpush.bf16.msra.mxu3 %v11497_v57  ;;  %v11542_v57 = vld [vmem:[%s24251_s30 + $0x158] sm:$0xf0] }
 0x13a   : > { %v11545_v3 = vor.u32 %v15924_v2, %v11542_v57 }
 0x13b   : > { %v18107_v63 = vpop.f32.mrf.mxu1  ;;  %2343 = vmatpush.bf16.msrb.mxu0 %v11625_v59  ;;  %v15888_v59 = vld [vmem:[%s24251_s30 + $0x2c] sm:$0xf] }
 0x13c   : > { %v11401_v42 = vor.u32 %v15888_v59, %v11398_v40 }
 0x13d   : > { %2325 = vmatpush.bf16.msra.mxu3 %v11481_v54  ;;  %v15916_v54 = vld [vmem:[%s24251_s30 + $0x10c] sm:$0xf] }
 0x13e   : > { %2237 = vmatmul.bf16.vlgmr.msrb.gmra.mxu2 %v18071_v22  ;;  %2294 = vmatmul.bf16.vlgmr.msra.gmra.mxu1 %v18071_v22 }
 0x13f   : > { %2344 = vmatpush.bf16.msrb.mxu0 %v11609_v56  ;;  %2405 = vmatpush.bf16.msrb.mxu2 %v17015_v12  ;;  %v11510_v56 = vld [vmem:[%s24251_s30 + $0x118] sm:$0xf0] }
 0x140   : > { %v11513_v58 = vor.u32 %v15916_v54, %v11510_v56  ;;  %v11708_v54 = vld [vmem:[%s24250_s5 + $0x28] sm:$0xf] }
 0x141   : > { %v18136_v33 = vpop.f32.mrf.mxu2  ;;  %2326 = vmatpush.bf16.msra.mxu3 %v11465_v61 }
 0x143   : > { %v18138_v7 = vpop.f32.mrf.mxu1  ;;  %2345 = vmatpush.bf16.msrb.mxu0 %v11593_v6  ;;  %2406 = vmatpush.bf16.msrb.mxu2 %v17023_v16 }
 0x144   : > { %24252 = vst [vmem:[#allocation3_spill] sm:$0xff] %v18138_v7  ;;  %v12916_v7 = vld [vmem:[%s24251_s30 + $0xc18] sm:$0xf0] }
 0x145   : > { %2327 = vmatpush.bf16.msra.mxu3 %v11449_v14 }
 0x147   : > { %2346 = vmatpush.bf16.msrb.mxu0 %v11577_v31  ;;  %2407 = vmatpush.bf16.msrb.mxu2 %v17036_v25 }
 0x148   : > { %2185 = vmatmul.bf16.gmra.mxu3 %v18155_v18 }
 0x149   : > { %11691 = vmatmul.msk.bf16.gmra.mxu0 %vm1491_vm4, %v18158_v19  ;;  %v1522_v46 = vpop.f32.mrf.mxu2  ;;  %2328 = vmatpush.bf16.msra.mxu3 %v11433_v0 }
 0x14b   : > { %v18176_v28 = vpop.f32.mrf.mxu1  ;;  %2347 = vmatpush.bf16.msrb.mxu0 %v11561_v24  ;;  %2408 = vmatpush.bf16.msrb.mxu2 %v17052_v34 }
 0x14d   : > { %2329 = vmatpush.bf16.msra.mxu3 %v11417_v38 }
 0x14e   : > { %2242 = vmatmul.bf16.gmra.mxu2 %v18155_v18  ;;  %2299 = vmatmul.bf16.gmra.mxu1 %v18155_v18 }
 0x14f   : > { %2348 = vmatpush.bf16.msrb.mxu0 %v11545_v3  ;;  %2409 = vmatpush.bf16.msrb.mxu2 %v17068_v43 }
 0x151   : > { %v1525_v48 = vpop.f32.mrf.mxu2  ;;  %2330 = vmatpush.bf16.msra.mxu3 %v11401_v42 }
 0x153   : > { %v18206_v49 = vpop.f32.mrf.mxu1  ;;  %2349 = vmatpush.bf16.msrb.mxu0 %v11529_v10 }
 0x154   : > { %24253 = vst [vmem:[#allocation4_spill] sm:$0xff] %v18206_v49 }
 0x155   : > { %2331 = vmatpush.bf16.msra.mxu3 %v11385_v55  ;;  %v16046_v55 = vld [vmem:[%s24250_s5 + $0x28] sm:$0x10] }
 0x156   : > { %v1558_v62 = vpop.f32.mrf.mxu0 }
 0x157   : > { %2350 = vmatpush.bf16.msrb.mxu0 %v11513_v58  ;;  %v11709_v58 = vor.u32 %v16046_v55, %v11708_v54 }
 0x158   : > { %11692 = vmatmul.msk.bf16.vlgmr.msrb.gmra.mxu3 %vm1491_vm4, %v18078_v27 }
 0x159   : > { %2275 = vmatmul.bf16.vlgmr.msra.gmra.mxu0 %v17957_v4  ;;  %v1527_v5 = vpop.f32.mrf.mxu2  ;;  %2424 = vmatpush.bf16.msrb.mxu3 %v17019_v15 }
 0x15b   : > { %2443 = vmatpush.bf16.msra.mxu0 %v17044_v30  ;;  %v1539_v61 = vpop.f32.mrf.mxu3  ;;  %v1653_v29 = vpop.f32.mrf.mxu1 }
 0x15c   : > { %v1540_v6 = vadd.f32 %v1539_v61, %v18136_v33 }
 0x15d   : > { %2425 = vmatpush.bf16.msrb.mxu3 %v17026_v17 }
 0x15e   : > { %v1560_v8 = vpop.f32.mrf.mxu0  ;;  %11694 = vmatmul.msk.bf16.vlgmr.msra.gmra.mxu2 %vm1491_vm4, %v18078_v27  ;;  %11696 = vmatmul.msk.bf16.vlgmr.msrb.gmra.mxu1 %vm1491_vm4, %v18078_v27  ;;  %v18231_v9 = vadd.f32 %v1558_v62, %v1540_v6 }
 0x15f   : > { %2444 = vmatpush.bf16.msra.mxu0 %v17060_v39 }
 0x161   : > { %v1596_v13 = vpop.f32.mrf.mxu2  ;;  %2426 = vmatpush.bf16.msrb.mxu3 %v17039_v26 }
 0x162   : > { %v1597_v14 = vadd.f32 %v1596_v13, %v18107_v63 }
 0x163   : > { %v1541_v60 = vpop.f32.mrf.mxu3  ;;  %v18236_v33 = vpop.f32.mrf.mxu1  ;;  %2445 = vmatpush.bf16.msra.mxu0 %v17073_v45 }
 0x164   : > { %24254 = vst [vmem:[#allocation5_spill] sm:$0xff] %v18236_v33  ;;  %v1542_v31 = vadd.f32 %v1541_v60, %v1522_v46 }
 0x165   : > { %2427 = vmatpush.bf16.msrb.mxu3 %v17055_v35 }
 0x166   : > { %v1563_v20 = vpop.f32.mrf.mxu0  ;;  %v18240_v21 = vadd.f32 %v1560_v8, %v1542_v31 }
 0x167   : > { %2446 = vmatpush.bf16.msra.mxu0 %v17091_v50 }
 0x168   : > { %11693 = vmatmul.msk.bf16.gmra.mxu3 %vm1491_vm4, %v18158_v19 }
 0x169   : > { %2280 = vmatmul.bf16.gmra.mxu0 %v18001_v36  ;;  %v18246_v27 = vpop.f32.mrf.mxu2  ;;  %2428 = vmatpush.bf16.msrb.mxu3 %v17071_v44 }
 0x16a   : > { %24255 = vst [vmem:[#allocation6_spill] sm:$0xff] %v18246_v27 }
 0x16b   : > { %v1544_v63 = vpop.f32.mrf.mxu3  ;;  %v1658_v23 = vpop.f32.mrf.mxu1  ;;  %2447 = vmatpush.bf16.msra.mxu0 %v17102_v53 }
 0x16c   : > { %v1545_v0 = vadd.f32 %v1544_v63, %v1525_v48 }
 0x16e   : > { %v1565_v11 = vpop.f32.mrf.mxu0  ;;  %11695 = vmatmul.msk.bf16.gmra.mxu2 %vm1491_vm4, %v18158_v19  ;;  %11697 = vmatmul.msk.bf16.gmra.mxu1 %vm1491_vm4, %v18158_v19  ;;  %v18254_v46 = vadd.f32 %v1563_v20, %v1545_v0  ;;  %v16045_v19 = vld [vmem:[%s24250_s5 + $0x20] sm:$0xff] }
 0x171   : > { %v1601_v24 = vpop.f32.mrf.mxu2 }
 0x172   : > { %v1602_v32 = vadd.f32 %v1601_v24, %v18176_v28 }
 0x173   : > { %v1546_v37 = vpop.f32.mrf.mxu3  ;;  %v18257_v2 = vpop.f32.mrf.mxu1 }
 0x174   : > { %24256 = vst [vmem:[#allocation7_spill] sm:$0xff] %v18257_v2  ;;  %v1547_v38 = vadd.f32 %v1546_v37, %v1527_v5  ;;  %v12368_v2 = vld [vmem:[%s24251_s30 + $0x8a0] sm:$0xf] }
 0x176   : > { %v1634_v57 = vpop.f32.mrf.mxu0  ;;  %v18259_v3 = vadd.f32 %v1565_v11, %v1547_v38 }
 0x177   : > { %v1654_v59 = vadd.f32 %v1653_v29, %v1634_v57 }
 0x178   : > { %2332 = vmatmul.bf16.vlgmr.msra.gmra.mxu3 %v17957_v4 }
 0x179   : > { %2351 = vmatmul.bf16.vlgmr.msrb.gmra.mxu0 %v18071_v22  ;;  %v18263_v40 = vpop.f32.mrf.mxu2 }
 0x17a   : > { %24257 = vst [vmem:[#allocation8_spill] sm:$0xff] %v18263_v40  ;;  %v12666_v40 = vld [vmem:[%s24251_s30 + $0xa20] sm:$0xf] }
 0x17b   : > { %v1615_v41 = vpop.f32.mrf.mxu3  ;;  %v1729_v28 = vpop.f32.mrf.mxu1 }
 0x17c   : > { %v1616_v42 = vadd.f32 %v1615_v41, %v1597_v14 }
 0x17e   : > { %v18268_v47 = vpop.f32.mrf.mxu0  ;;  %11710 = vmatmul.msk.bf16.vlgmr.msrb.gmra.mxu2 %vm767_vm2, %v16045_v19 }
 0x17f   : > { %24258 = vst [vmem:[#allocation9_spill] sm:$0xff] %v18268_v47 }
 0x181   : > { %v1672_v48 = vpop.f32.mrf.mxu2 }
 0x182   : > { %v18271_v10 = vadd.f32 %v1672_v48, %v1654_v59 }
 0x183   : > { %v18273_v51 = vpop.f32.mrf.mxu3  ;;  %v18275_v4 = vpop.f32.mrf.mxu1 }
 0x184   : > { %24259 = vst [vmem:[#allocation10_spill] sm:$0xff] %v18273_v51  ;;  %v16181_v51 = vld [vmem:[%s24251_s30 + $0x924] sm:$0xf] }
 0x185   : > { %24260 = vst [vmem:[#allocation11_spill] sm:$0xff] %v18275_v4 }
 0x186   : > { %v1639_v22 = vpop.f32.mrf.mxu0 }
 0x187   : > { %v1659_v52 = vadd.f32 %v1658_v23, %v1639_v22 }
 0x188   : > { %2337 = vmatmul.bf16.gmra.mxu3 %v18001_v36 }
 0x189   : > { %2356 = vmatmul.bf16.gmra.mxu0 %v18155_v18  ;;  %v18285_v56 = vpop.f32.mrf.mxu2 }
 0x18a   : > { %24261 = vst [vmem:[#allocation12_spill] sm:$0xff] %v18285_v56 }
 0x18b   : > { %v1620_v62 = vpop.f32.mrf.mxu3  ;;  %v1734_v5 = vpop.f32.mrf.mxu1 }
 0x18c   : > { %v1621_v61 = vadd.f32 %v1620_v62, %v1602_v32 }
 0x18e   : > { %v18287_v29 = vpop.f32.mrf.mxu0  ;;  %11711 = vmatmul.msk.bf16.gmra.mxu2 %vm767_vm2, %v11709_v58 }
 0x18f   : > { %24262 = vst [vmem:[#allocation13_spill] sm:$0xff] %v18287_v29 }
 0x191   : > { %v1677_v6 = vpop.f32.mrf.mxu2 }
 0x192   : > { %v18290_v8 = vadd.f32 %v1677_v6, %v1659_v52 }
 0x193   : > { %v18292_v13 = vpop.f32.mrf.mxu3  ;;  %v18294_v14 = vpop.f32.mrf.mxu1 }
 0x194   : > { %24263 = vst [vmem:[#allocation14_spill] sm:$0xff] %v18292_v13 }
 0x195   : > { %24264 = vst [vmem:[#allocation15_spill] sm:$0xff] %v18294_v14 }
 0x196   : > { %v1710_v36 = vpop.f32.mrf.mxu0 }
 0x198   : > { %11712 = vmatmul.msk.bf16.vlgmr.msrb.gmra.mxu3 %vm767_vm2, %v16045_v19 }
 0x199   : > { %11714 = vmatmul.msk.bf16.vlgmr.msra.gmra.mxu0 %vm767_vm2, %v16045_v19  ;;  %v18298_v18 = vpop.f32.mrf.mxu2 }
 0x19a   : > { %24265 = vst [vmem:[#allocation16_spill] sm:$0xff] %v18298_v18 }
 0x19b   : > { %v1691_v60 = vpop.f32.mrf.mxu3  ;;  %v2219_v31 = vpop.f32.mrf.mxu1 }
 0x19c   : > { %v1711_v20 = vadd.f32 %v1710_v36, %v1691_v60  ;;  %v2220_v63 = vadd.f32 %v2219_v31, %v1616_v42 }
 0x19e   : > { %v18300_v23 = vpop.f32.mrf.mxu0  ;;  %v18302_v0 = vadd.f32 %v1729_v28, %v1711_v20 }
 0x19f   : > { %24266 = vst [vmem:[#allocation17_spill] sm:$0xff] %v18300_v23 }
 0x1a1   : > { %v2162_v11 = vpop.f32.mrf.mxu2 }
 0x1a2   : > { %v2163_v24 = vadd.f32 %v2162_v11, %v18231_v9 }
 0x1a3   : > { %v18305_v32 = vpop.f32.mrf.mxu3  ;;  %v18307_v37 = vpop.f32.mrf.mxu1 }
 0x1a4   : > { %24267 = vst [vmem:[#allocation18_spill] sm:$0xff] %v18305_v32 }
 0x1a5   : > { %24268 = vst [vmem:[#allocation19_spill] sm:$0xff] %v18307_v37 }
 0x1a6   : > { %v1715_v38 = vpop.f32.mrf.mxu0 }
 0x1a8   : > { %11713 = vmatmul.msk.bf16.gmra.mxu3 %vm767_vm2, %v11709_v58 }
 0x1a9   : > { %11715 = vmatmul.msk.bf16.gmra.mxu0 %vm767_vm2, %v11709_v58  ;;  %v18311_v57 = vpop.f32.mrf.mxu2 }
 0x1ab   : > { %v1696_v59 = vpop.f32.mrf.mxu3  ;;  %v2224_v19 = vpop.f32.mrf.mxu1 }
 0x1ac   : > { %v1716_v41 = vadd.f32 %v1715_v38, %v1696_v59  ;;  %v2225_v42 = vadd.f32 %v2224_v19, %v1621_v61  ;;  %v11910_v38 = vld [vmem:[%s24251_s30 + $0x5e0] sm:$0xf] }
 0x1ae   : > { %v18313_v28 = vpop.f32.mrf.mxu0  ;;  %v18315_v48 = vadd.f32 %v1734_v5, %v1716_v41  ;;  %v11912_v41 = vld [vmem:[%s24251_s30 + $0x5f0] sm:$0xf0] }
 0x1af   : > { %24269 = vst [vmem:[#allocation20_spill] sm:$0xff] %v18313_v28 }
 0x1b1   : > { %v2167_v9 = vpop.f32.mrf.mxu2 }
 0x1b2   : > { %v2168_v22 = vadd.f32 %v2167_v9, %v18254_v46 }
 0x1b3   : > { %v18318_v52 = vpop.f32.mrf.mxu3  ;;  %v18328_v20 = vpop.f32.mrf.mxu1 }
 0x1b4   : > { %24270 = vst [vmem:[#allocation21_spill] sm:$0xff] %v18318_v52 }
 0x1b5   : > { %24271 = vst [vmem:[#allocation22_spill] sm:$0xff] %v18328_v20 }
 0x1b6   : > { %v2200_v54 = vpop.f32.mrf.mxu0 }
 0x1b9   : > { %v18320_v55 = vpop.f32.mrf.mxu2 }
 0x1bb   : > { %v2181_v62 = vpop.f32.mrf.mxu3 }
 0x1bc   : > { %v2182_v58 = vadd.f32 %v2181_v62, %v2163_v24  ;;  %v16077_v24 = vld [vmem:[%s24251_s30 + $0x5ec] sm:$0xf0] }
 0x1bd   : > { %v11911_v19 = vor.u32 %v16077_v24, %v11910_v38 }
 0x1be   : > { %v18322_v6 = vadd.f32 %v2200_v54, %v2182_v58  ;;  %v18324_v36 = vpop.f32.mrf.mxu0  ;;  %v11894_v58 = vld [vmem:[%s24251_s30 + $0x5c0] sm:$0xf] }
 0x1bf   : > { %2960 = vmatpush.bf16.msra.mxu1 %v11911_v19 }
 0x1c1   : > { %v2238_v60 = vpop.f32.mrf.mxu2 }
 0x1c2   : > { %v2239_v61 = vadd.f32 %v2238_v60, %v2220_v63  ;;  %v16075_v63 = vld [vmem:[%s24251_s30 + $0x5e4] sm:$0xf] }
 0x1c3   : > { %v18326_v31 = vpop.f32.mrf.mxu3  ;;  %v11915_v9 = vor.u32 %v16075_v63, %v11912_v41  ;;  %v16071_v60 = vld [vmem:[%s24251_s30 + $0x5c4] sm:$0xf]  ;;  %v11878_v41 = vld [vmem:[%s24251_s30 + $0x5a0] sm:$0xf] }
 0x1c5   : > { %3017 = vmatpush.bf16.msrb.mxu0 %v11915_v9  ;;  %v16069_v9 = vld [vmem:[%s24251_s30 + $0x5ac] sm:$0xf0] }
 0x1c6   : > { %v2205_v5 = vpop.f32.mrf.mxu0 }
 0x1c9   : > { %v18330_v11 = vpop.f32.mrf.mxu2 }
 0x1ca   : > { %24272 = vst [vmem:[#allocation23_spill] sm:$0xff] %v18330_v11 }
 0x1cb   : > { %v2186_v46 = vpop.f32.mrf.mxu3 }
 0x1cc   : > { %v2187_v59 = vadd.f32 %v2186_v46, %v2168_v22  ;;  %v16073_v22 = vld [vmem:[%s24251_s30 + $0x5cc] sm:$0xf0] }
 0x1cd   : > { %v11895_v46 = vor.u32 %v16073_v22, %v11894_v58  ;;  %v16067_v58 = vld [vmem:[%s24251_s30 + $0x5a4] sm:$0xf]  ;;  %v11879_v22 = vor.u32 %v16069_v9, %v11878_v41 }
 0x1ce   : > { %v18344_v54 = vadd.f32 %v2205_v5, %v2187_v59  ;;  %v18346_v62 = vpop.f32.mrf.mxu0  ;;  %v11896_v5 = vld [vmem:[%s24251_s30 + $0x5d0] sm:$0xf0]  ;;  %v2295_v59 = vpop.f32.mrf.mxu1  ;;  %v16063_v41 = vld [vmem:[%s24251_s30 + $0x584] sm:$0xf] }
 0x1cf   : > { %24273 = vst [vmem:[#allocation24_spill] sm:$0xff] %v18346_v62  ;;  %v11899_v24 = vor.u32 %v16071_v60, %v11896_v5  ;;  %2961 = vmatpush.bf16.msra.mxu1 %v11895_v46  ;;  %v13358_v62 = vld [vmem:[%s24251_s30 + $0xeb8] sm:$0xf0] }
 0x1d1   : > { %v2243_v38 = vpop.f32.mrf.mxu2  ;;  %3018 = vmatpush.bf16.msrb.mxu0 %v11899_v24  ;;  %v16065_v24 = vld [vmem:[%s24251_s30 + $0x58c] sm:$0xf0] }
 0x1d2   : > { %v18360_v63 = vadd.f32 %v2243_v38, %v2225_v42  ;;  %v11880_v42 = vld [vmem:[%s24251_s30 + $0x5b0] sm:$0xf0]  ;;  %v11862_v38 = vld [vmem:[%s24251_s30 + $0x580] sm:$0xf] }
 0x1d3   : > { %v18362_v19 = vpop.f32.mrf.mxu3  ;;  %v11883_v60 = vor.u32 %v16067_v58, %v11880_v42  ;;  %2962 = vmatpush.bf16.msra.mxu1 %v11879_v22  ;;  %v11863_v9 = vor.u32 %v16065_v24, %v11862_v38  ;;  %v11864_v58 = vld [vmem:[%s24251_s30 + $0x590] sm:$0xf0]  ;;  %v16059_v38 = vld [vmem:[%s24251_s30 + $0x564] sm:$0xf] }
 0x1d4   : > { %v11867_v42 = vor.u32 %v16063_v41, %v11864_v58  ;;  %v11830_v58 = vld [vmem:[%s24251_s30 + $0x540] sm:$0xf] }
 0x1d5   : > { %3019 = vmatpush.bf16.msrb.mxu0 %v11883_v60 }
 0x1d6   : > { %v2276_v46 = vpop.f32.mrf.mxu0 }
 0x1d7   : > { %v2277_v5 = vadd.f32 %v2276_v46, %v18271_v10  ;;  %2963 = vmatpush.bf16.msra.mxu1 %v11863_v9  ;;  %v11846_v46 = vld [vmem:[%s24251_s30 + $0x560] sm:$0xf] }
 0x1d8   : > { %v11847_v14 = vor.u32 %v16061_v1, %v11846_v46  ;;  %v16055_v1 = vld [vmem:[%s24251_s30 + $0x544] sm:$0xf] }
 0x1d9   : > { %v18389_v22 = vpop.f32.mrf.mxu2  ;;  %v2296_v10 = vadd.f32 %v2295_v59, %v2277_v5  ;;  %3020 = vmatpush.bf16.msrb.mxu0 %v11867_v42  ;;  %v11848_v59 = vld [vmem:[%s24251_s30 + $0x570] sm:$0xf0]  ;;  %v18405_v5 = vpop.f32.mrf.mxu1 }
 0x1da   : > { %24274 = vst [vmem:[#allocation25_spill] sm:$0xff] %v18389_v22  ;;  %v11851_v41 = vor.u32 %v16059_v38, %v11848_v59 }
 0x1db   : > { %v2257_v60 = vpop.f32.mrf.mxu3  ;;  %24275 = vst [vmem:[#allocation26_spill] sm:$0xff] %v18405_v5  ;;  %2964 = vmatpush.bf16.msra.mxu1 %v11847_v14  ;;  %v16097_v5 = vld [vmem:[%s24251_s30 + $0x68c] sm:$0xf0] }
 0x1dc   : > { %v18400_v24 = vadd.f32 %v2257_v60, %v2239_v61  ;;  %v16057_v61 = vld [vmem:[%s24251_s30 + $0x54c] sm:$0xf0]  ;;  %v11832_v60 = vld [vmem:[%s24251_s30 + $0x550] sm:$0xf0] }
 0x1dd   : > { %3021 = vmatpush.bf16.msrb.mxu0 %v11851_v41  ;;  %v11831_v42 = vor.u32 %v16057_v61, %v11830_v58  ;;  %v11835_v14 = vor.u32 %v16055_v1, %v11832_v60  ;;  %v11814_v41 = vld [vmem:[%s24251_s30 + $0x520] sm:$0xf]  ;;  %v16053_v58 = vld [vmem:[%s24251_s30 + $0x52c] sm:$0xf0]  ;;  %v16051_v61 = vld [vmem:[%s24251_s30 + $0x524] sm:$0xf] }
 0x1de   : > { %v18407_v9 = vpop.f32.mrf.mxu0  ;;  %v11815_v28 = vor.u32 %v16053_v58, %v11814_v41  ;;  %v16109_v60 = vld [vmem:[%s24251_s30 + $0x6ec] sm:$0xf0]  ;;  %v11798_v41 = vld [vmem:[%s24251_s30 + $0x500] sm:$0xf] }
 0x1df   : > { %24276 = vst [vmem:[#allocation27_spill] sm:$0xff] %v18407_v9  ;;  %2965 = vmatpush.bf16.msra.mxu1 %v11831_v42  ;;  %v12038_v42 = vld [vmem:[%s24251_s30 + $0x6e0] sm:$0xf]  ;;  %v16049_v58 = vld [vmem:[%s24251_s30 + $0x50c] sm:$0xf0] }
 0x1e1   : > { %v2314_v46 = vpop.f32.mrf.mxu2  ;;  %3022 = vmatpush.bf16.msrb.mxu0 %v11835_v14  ;;  %v12039_v14 = vor.u32 %v16109_v60, %v12038_v42  ;;  %v2300_v52 = vpop.f32.mrf.mxu1  ;;  %v12022_v60 = vld [vmem:[%s24251_s30 + $0x6c0] sm:$0xf] }
 0x1e2   : > { %v18421_v38 = vadd.f32 %v2314_v46, %v2296_v10  ;;  %v11816_v10 = vld [vmem:[%s24251_s30 + $0x530] sm:$0xf0] }
 0x1e3   : > { %v18423_v59 = vpop.f32.mrf.mxu3  ;;  %v11819_v1 = vor.u32 %v16051_v61, %v11816_v10  ;;  %2966 = vmatpush.bf16.msra.mxu1 %v11815_v28  ;;  %v16047_v61 = vld [vmem:[%s24251_s30 + $0x504] sm:$0xf]  ;;  %2979 = vmatpush.bf16.msra.mxu2 %v12039_v14  ;;  %v11799_v10 = vor.u32 %v16049_v58, %v11798_v41  ;;  %v11800_v28 = vld [vmem:[%s24251_s30 + $0x510] sm:$0xf0] }
 0x1e4   : > { %24277 = vst [vmem:[#allocation28_spill] sm:$0xff] %v18423_v59  ;;  %v11803_v42 = vor.u32 %v16047_v61, %v11800_v28  ;;  %v16107_v41 = vld [vmem:[%s24251_s30 + $0x6e4] sm:$0xf] }
 0x1e5   : > { %3023 = vmatpush.bf16.msrb.mxu0 %v11819_v1 }
 0x1e6   : > { %v2281_v46 = vpop.f32.mrf.mxu0 }
 0x1e7   : > { %v2282_v59 = vadd.f32 %v2281_v46, %v18290_v8  ;;  %v16105_v46 = vld [vmem:[%s24251_s30 + $0x6cc] sm:$0xf0]  ;;  %2967 = vmatpush.bf16.msra.mxu1 %v11799_v10  ;;  %v16110_v10 = vld [vmem:[%s24251_s30 + $0x6f4] sm:$0xf0] }
 0x1e8   : > { %v12023_v22 = vor.u32 %v16105_v46, %v12022_v60  ;;  %v16101_v60 = vld [vmem:[%s24251_s30 + $0x6ac] sm:$0xf0] }
 0x1e9   : > { %v18456_v8 = vpop.f32.mrf.mxu2  ;;  %v2301_v1 = vadd.f32 %v2300_v52, %v2282_v59  ;;  %3024 = vmatpush.bf16.msrb.mxu0 %v11803_v42  ;;  %v12040_v52 = vld [vmem:[%s24251_s30 + $0x6f0] sm:$0xf0]  ;;  %v12046_v59 = vld [vmem:[%s24251_s30 + $0x6e8] sm:$0xf]  ;;  %v12006_v42 = vld [vmem:[%s24251_s30 + $0x6a0] sm:$0xf] }
 0x1ea   : > { %24278 = vst [vmem:[#allocation29_spill] sm:$0xff] %v18456_v8  ;;  %2980 = vmatpush.bf16.msra.mxu2 %v12023_v22  ;;  %v12043_v61 = vor.u32 %v16107_v41, %v12040_v52  ;;  %v12047_v28 = vor.u32 %v16110_v10, %v12046_v59  ;;  %v12102_v22 = vld [vmem:[%s24251_s30 + $0x760] sm:$0xf]  ;;  %v16103_v52 = vld [vmem:[%s24251_s30 + $0x6c4] sm:$0xf] }
 0x1eb   : > { %v2262_v14 = vpop.f32.mrf.mxu3  ;;  %v12024_v59 = vld [vmem:[%s24251_s30 + $0x6d0] sm:$0xf0]  ;;  %v11990_v8 = vld [vmem:[%s24251_s30 + $0x680] sm:$0xf] }
 0x1ec   : > { %v18474_v58 = vadd.f32 %v2262_v14, %v18360_v63  ;;  %3036 = vmatpush.bf16.msrb.mxu1 %v12043_v61  ;;  %v12007_v63 = vor.u32 %v16101_v60, %v12006_v42  ;;  %v16125_v14 = vld [vmem:[%s24251_s30 + $0x76c] sm:$0x30]  ;;  %v12030_v61 = vld [vmem:[%s24251_s30 + $0x6c8] sm:$0xf]  ;;  %v12027_v10 = vor.u32 %v16103_v52, %v12024_v59  ;;  %v16106_v42 = vld [vmem:[%s24251_s30 + $0x6d4] sm:$0xf0]  ;;  %v11991_v52 = vor.u32 %v16097_v5, %v11990_v8 }
 0x1ed   : > { %3093 = vmatpush.bf16.msra.mxu0 %v12047_v28  ;;  %v12103_v41 = vor.u32 %v16125_v14, %v12102_v22  ;;  %v18505_v28 = vpop.f32.mrf.mxu1  ;;  %v12031_v14 = vor.u32 %v16106_v42, %v12030_v61  ;;  %v16121_v61 = vld [vmem:[%s24251_s30 + $0x74c] sm:$0xf0]  ;;  %v16099_v42 = vld [vmem:[%s24251_s30 + $0x6a4] sm:$0xf]  ;;  %v12008_v5 = vld [vmem:[%s24251_s30 + $0x6b0] sm:$0xf0] }
 0x1ee   : > { %v18485_v46 = vpop.f32.mrf.mxu0  ;;  %2981 = vmatpush.bf16.msra.mxu2 %v12007_v63  ;;  %24280 = vst [vmem:[#allocation31_spill] sm:$0xff] %v18505_v28  ;;  %v12014_v8 = vld [vmem:[%s24251_s30 + $0x6a8] sm:$0xf]  ;;  %v12070_v28 = vld [vmem:[%s24251_s30 + $0x720] sm:$0xf] }
 0x1ef   : > { %24279 = vst [vmem:[#allocation30_spill] sm:$0xff] %v18485_v46  ;;  %v2949_v22 = vsel %vm1498_vm3, %v12103_v41, 0  ;;  %v12086_v41 = vld [vmem:[%s24251_s30 + $0x740] sm:$0xf] }
 0x1f0   : > { %3002 = vmatpush.bf16.msra.mxu3 %v2949_v22  ;;  %3037 = vmatpush.bf16.msrb.mxu1 %v12027_v10  ;;  %v16102_v10 = vld [vmem:[%s24251_s30 + $0x6b4] sm:$0xf0] }
 0x1f1   : > { %v2319_v60 = vpop.f32.mrf.mxu2  ;;  %3094 = vmatpush.bf16.msra.mxu0 %v12031_v14  ;;  %v12015_v22 = vor.u32 %v16102_v10, %v12014_v8  ;;  %v11974_v14 = vld [vmem:[%s24251_s30 + $0x660] sm:$0xf]  ;;  %v11998_v10 = vld [vmem:[%s24251_s30 + $0x688] sm:$0xf] }
 0x1f2   : > { %v18514_v63 = vadd.f32 %v2319_v60, %v2301_v1  ;;  %2982 = vmatpush.bf16.msra.mxu2 %v11991_v52  ;;  %v12087_v1 = vor.u32 %v16121_v61, %v12086_v41  ;;  %v12011_v60 = vor.u32 %v16099_v42, %v12008_v5  ;;  %v16093_v52 = vld [vmem:[%s24251_s30 + $0x66c] sm:$0xf0]  ;;  %v16095_v5 = vld [vmem:[%s24251_s30 + $0x684] sm:$0xf] }
 0x1f3   : > { %v18516_v59 = vpop.f32.mrf.mxu3  ;;  %v11975_v61 = vor.u32 %v16093_v52, %v11974_v14  ;;  %v16117_v42 = vld [vmem:[%s24251_s30 + $0x72c] sm:$0xf0] }
 0x1f4   : > { %24281 = vst [vmem:[#allocation32_spill] sm:$0xff] %v18516_v59  ;;  %3003 = vmatpush.bf16.msra.mxu3 %v12087_v1  ;;  %3038 = vmatpush.bf16.msrb.mxu1 %v12011_v60  ;;  %v12071_v8 = vor.u32 %v16117_v42, %v12070_v28  ;;  %v11992_v1 = vld [vmem:[%s24251_s30 + $0x690] sm:$0xf0]  ;;  %v16098_v60 = vld [vmem:[%s24251_s30 + $0x694] sm:$0xf0] }
 0x1f5   : > { %3095 = vmatpush.bf16.msra.mxu0 %v12015_v22  ;;  %v11995_v14 = vor.u32 %v16095_v5, %v11992_v1  ;;  %v11999_v52 = vor.u32 %v16098_v60, %v11998_v10  ;;  %v11958_v28 = vld [vmem:[%s24251_s30 + $0x640] sm:$0xf]  ;;  %v2371_v59 = vpop.f32.mrf.mxu1  ;;  %v16113_v5 = vld [vmem:[%s24251_s30 + $0x70c] sm:$0xf0]  ;;  %v16091_v1 = vld [vmem:[%s24251_s30 + $0x664] sm:$0xf] }
 0x1f6   : > { %v2352_v41 = vpop.f32.mrf.mxu0  ;;  %2983 = vmatpush.bf16.msra.mxu2 %v11975_v61  ;;  %v16089_v61 = vld [vmem:[%s24251_s30 + $0x64c] sm:$0xf0]  ;;  %v11976_v60 = vld [vmem:[%s24251_s30 + $0x670] sm:$0xf0] }
 0x1f7   : > { %v11959_v42 = vor.u32 %v16089_v61, %v11958_v28  ;;  %v11979_v28 = vor.u32 %v16091_v1, %v11976_v60  ;;  %v16087_v1 = vld [vmem:[%s24251_s30 + $0x644] sm:$0xf]  ;;  %v11960_v60 = vld [vmem:[%s24251_s30 + $0x650] sm:$0xf0] }
 0x1f8   : > { %3004 = vmatpush.bf16.msra.mxu3 %v12071_v8  ;;  %3039 = vmatpush.bf16.msrb.mxu1 %v11995_v14  ;;  %v11982_v14 = vld [vmem:[%s24251_s30 + $0x668] sm:$0xf] }
 0x1f9   : > { %v18560_v22 = vpop.f32.mrf.mxu2  ;;  %3096 = vmatpush.bf16.msra.mxu0 %v11999_v52  ;;  %v16094_v52 = vld [vmem:[%s24251_s30 + $0x674] sm:$0xf0] }
 0x1fa   : > { %24282 = vst [vmem:[#allocation33_spill] sm:$0xff] %v18560_v22  ;;  %v12054_v22 = vld [vmem:[%s24251_s30 + $0x700] sm:$0xf]  ;;  %2984 = vmatpush.bf16.msra.mxu2 %v11959_v42  ;;  %v11983_v61 = vor.u32 %v16094_v52, %v11982_v14  ;;  %v11918_v14 = vld [vmem:[%s24251_s30 + $0x5e8] sm:$0xf] }
 0x1fb   : > { %v2333_v11 = vpop.f32.mrf.mxu3  ;;  %v12055_v8 = vor.u32 %v16113_v5, %v12054_v22 }
 0x1fc   : > { %v2334_v10 = vadd.f32 %v2333_v11, %v18302_v0  ;;  %v11942_v0 = vld [vmem:[%s24251_s30 + $0x620] sm:$0xf]  ;;  %v16085_v11 = vld [vmem:[%s24251_s30 + $0x62c] sm:$0xf0]  ;;  %3040 = vmatpush.bf16.msrb.mxu1 %v11979_v28  ;;  %v16090_v28 = vld [vmem:[%s24251_s30 + $0x654] sm:$0xf0] }
 0x1fd   : > { %3005 = vmatpush.bf16.msra.mxu3 %v12055_v8  ;;  %v11943_v5 = vor.u32 %v16085_v11, %v11942_v0  ;;  %3097 = vmatpush.bf16.msra.mxu0 %v11983_v61  ;;  %v11966_v8 = vld [vmem:[%s24251_s30 + $0x648] sm:$0xf] }
 0x1fe   : > { %v2353_v22 = vadd.f32 %v2352_v41, %v2334_v10  ;;  %v18593_v42 = vpop.f32.mrf.mxu0  ;;  %v11963_v41 = vor.u32 %v16087_v1, %v11960_v60  ;;  %v16078_v10 = vld [vmem:[%s24251_s30 + $0x5f4] sm:$0xf0]  ;;  %v11967_v11 = vor.u32 %v16090_v28, %v11966_v8  ;;  %v16083_v60 = vld [vmem:[%s24251_s30 + $0x624] sm:$0xf]  ;;  %v11950_v28 = vld [vmem:[%s24251_s30 + $0x628] sm:$0xf] }
 0x1ff   : > { %24283 = vst [vmem:[#allocation34_spill] sm:$0xff] %v18593_v42  ;;  %2985 = vmatpush.bf16.msra.mxu2 %v11943_v5  ;;  %v11919_v0 = vor.u32 %v16078_v10, %v11918_v14  ;;  %v11944_v14 = vld [vmem:[%s24251_s30 + $0x630] sm:$0xf0]  ;;  %v11902_v10 = vld [vmem:[%s24251_s30 + $0x5c8] sm:$0xf] }
 0x200   : > { %v18604_v52 = vadd.f32 %v2371_v59, %v2353_v22  ;;  %v11926_v59 = vld [vmem:[%s24251_s30 + $0x600] sm:$0xf]  ;;  %v16081_v22 = vld [vmem:[%s24251_s30 + $0x60c] sm:$0xf0]  ;;  %3041 = vmatpush.bf16.msrb.mxu1 %v11963_v41  ;;  %v11947_v8 = vor.u32 %v16083_v60, %v11944_v14  ;;  %v16074_v41 = vld [vmem:[%s24251_s30 + $0x5d4] sm:$0xf0] }
 0x201   : > { %v2411_v61 = vpop.f32.mrf.mxu2  ;;  %v11927_v5 = vor.u32 %v16081_v22, %v11926_v59  ;;  %3074 = vmatpush.bf16.msrb.mxu3 %v11919_v0  ;;  %3098 = vmatpush.bf16.msra.mxu0 %v11967_v11  ;;  %v16086_v0 = vld [vmem:[%s24251_s30 + $0x634] sm:$0xf0]  ;;  %v18641_v59 = vpop.f32.mrf.mxu1  ;;  %v11903_v22 = vor.u32 %v16074_v41, %v11902_v10  ;;  %v16079_v11 = vld [vmem:[%s24251_s30 + $0x604] sm:$0xf]  ;;  %v11886_v60 = vld [vmem:[%s24251_s30 + $0x5a8] sm:$0xf] }
 0x202   : > { %24285 = vst [vmem:[#allocation36_spill] sm:$0xff] %v18641_v59  ;;  %v11951_v42 = vor.u32 %v16086_v0, %v11950_v28  ;;  %v16070_v10 = vld [vmem:[%s24251_s30 + $0x5b4] sm:$0xf0]  ;;  %v11934_v41 = vld [vmem:[%s24251_s30 + $0x608] sm:$0xf] }
 0x203   : > { %v18621_v1 = vpop.f32.mrf.mxu3  ;;  %2986 = vmatpush.bf16.msra.mxu2 %v11927_v5  ;;  %v11928_v5 = vld [vmem:[%s24251_s30 + $0x610] sm:$0xf0]  ;;  %v16082_v28 = vld [vmem:[%s24251_s30 + $0x614] sm:$0xf0]  ;;  %v11887_v0 = vor.u32 %v16070_v10, %v11886_v60 }
 0x204   : > { %24284 = vst [vmem:[#allocation35_spill] sm:$0xff] %v18621_v1  ;;  %3042 = vmatpush.bf16.msrb.mxu1 %v11947_v8  ;;  %v11931_v14 = vor.u32 %v16079_v11, %v11928_v5  ;;  %v11935_v46 = vor.u32 %v16082_v28, %v11934_v41  ;;  %v16066_v11 = vld [vmem:[%s24251_s30 + $0x594] sm:$0xf0] }
 0x205   : > { %3075 = vmatpush.bf16.msrb.mxu3 %v11903_v22  ;;  %3099 = vmatpush.bf16.msra.mxu0 %v11951_v42  ;;  %v11870_v22 = vld [vmem:[%s24251_s30 + $0x588] sm:$0xf]  ;;  %v16062_v10 = vld [vmem:[%s24251_s30 + $0x574] sm:$0xf0] }
 0x206   : > { %v2357_v1 = vpop.f32.mrf.mxu0  ;;  %v11871_v42 = vor.u32 %v16066_v11, %v11870_v22  ;;  %v16123_v22 = vld [vmem:[%s24251_s30 + $0x764] sm:$0xf]  ;;  %v12104_v11 = vld [vmem:[%s24251_s30 + $0x770] sm:$0x30] }
 0x208   : > { %3043 = vmatpush.bf16.msrb.mxu1 %v11931_v14  ;;  %v11854_v14 = vld [vmem:[%s24251_s30 + $0x568] sm:$0xf] }
 0x209   : > { %v2413_v59 = vpop.f32.mrf.mxu2  ;;  %3076 = vmatpush.bf16.msrb.mxu3 %v11887_v0  ;;  %3100 = vmatpush.bf16.msra.mxu0 %v11935_v46  ;;  %v2376_v60 = vpop.f32.mrf.mxu1  ;;  %v11855_v41 = vor.u32 %v16062_v10, %v11854_v14  ;;  %v11838_v46 = vld [vmem:[%s24251_s30 + $0x548] sm:$0xf]  ;;  %v16119_v14 = vld [vmem:[%s24251_s30 + $0x744] sm:$0xf] }
 0x20a   : > { %v18661_v20 = vpack.c.bf16 %v2413_v59, %v2411_v61 }
 0x20b   : > { %v2338_v8 = vpop.f32.mrf.mxu3 }
 0x20c   : > { %v2339_v5 = vadd.f32 %v2338_v8, %v18315_v48  ;;  %2968 = vmatmul.bf16.vlgmr.msra.gmra.mxu1 %v18661_v20  ;;  %3025 = vmatmul.bf16.vlgmr.msrb.gmra.mxu0 %v18661_v20 }
 0x20d   : > { %3077 = vmatpush.bf16.msrb.mxu3 %v11871_v42 }
 0x20e   : > { %v2358_v61 = vadd.f32 %v2357_v1, %v2339_v5  ;;  %v18672_v59 = vpop.f32.mrf.mxu0  ;;  %v16058_v1 = vld [vmem:[%s24251_s30 + $0x554] sm:$0xf0]  ;;  %v12107_v5 = vor.u32 %v16123_v22, %v12104_v11 }
 0x20f   : > { %24286 = vst [vmem:[#allocation37_spill] sm:$0xff] %v18672_v59  ;;  %v11839_v8 = vor.u32 %v16058_v1, %v11838_v46  ;;  %v12088_v46 = vld [vmem:[%s24251_s30 + $0x750] sm:$0xf0]  ;;  %v12110_v59 = vld [vmem:[%s24251_s30 + $0x768] sm:$0xf] }
 0x210   : > { %v18680_v48 = vadd.f32 %v2376_v60, %v2358_v61  ;;  %v11822_v61 = vld [vmem:[%s24251_s30 + $0x528] sm:$0xf]  ;;  %v16054_v60 = vld [vmem:[%s24251_s30 + $0x534] sm:$0xf0]  ;;  %v2952_v10 = vsel %vm1498_vm3, %v12107_v5, 0  ;;  %v12091_v22 = vor.u32 %v16119_v14, %v12088_v46 }
 0x211   : > { %v2416_v28 = vpop.f32.mrf.mxu2  ;;  %3078 = vmatpush.bf16.msrb.mxu3 %v11855_v41  ;;  %v11823_v41 = vor.u32 %v16054_v60, %v11822_v61  ;;  %3059 = vmatpush.bf16.msrb.mxu2 %v2952_v10  ;;  %v16124_v5 = vld [vmem:[%s24251_s30 + $0x76c] sm:$0xf]  ;;  %v11806_v60 = vld [vmem:[%s24251_s30 + $0x508] sm:$0xf]  ;;  %v12112_v10 = vld [vmem:[%s24251_s30 + $0x778] sm:$0x30] }
 0x213   : > { %v18682_v0 = vpop.f32.mrf.mxu3 }
 0x214   : > { %24287 = vst [vmem:[#allocation38_spill] sm:$0xff] %v18682_v0  ;;  %v12072_v0 = vld [vmem:[%s24251_s30 + $0x730] sm:$0xf0] }
 0x215   : > { %3079 = vmatpush.bf16.msrb.mxu3 %v11839_v8  ;;  %v16126_v8 = vld [vmem:[%s24251_s30 + $0x774] sm:$0x30]  ;;  %3060 = vmatpush.bf16.msrb.mxu2 %v12091_v22 }
 0x216   : > { %v2449_v42 = vpop.f32.mrf.mxu0  ;;  %v12111_v14 = vor.u32 %v16126_v8, %v12110_v59 }
 0x218   : > { %v2955_v59 = vsel %vm1498_vm3, %v12111_v14, 0 }
 0x219   : > { %v2418_v1 = vpop.f32.mrf.mxu2  ;;  %3080 = vmatpush.bf16.msrb.mxu3 %v11823_v41  ;;  %v16115_v41 = vld [vmem:[%s24251_s30 + $0x724] sm:$0xf]  ;;  %3116 = vmatpush.bf16.msra.mxu1 %v2955_v59  ;;  %v16118_v59 = vld [vmem:[%s24251_s30 + $0x734] sm:$0xf0] }
 0x21a   : > { %v18709_v11 = vpack.c.bf16 %v2418_v1, %v2416_v28  ;;  %v16050_v28 = vld [vmem:[%s24251_s30 + $0x514] sm:$0xf0]  ;;  %v12115_v1 = vor.u32 %v16124_v5, %v12112_v10  ;;  %v12075_v8 = vor.u32 %v16115_v41, %v12072_v0  ;;  %v12094_v5 = vld [vmem:[%s24251_s30 + $0x748] sm:$0xf]  ;;  %v16108_v0 = vld [vmem:[%s24251_s30 + $0x6ec] sm:$0xf] }
 0x21b   : > { %v2430_v61 = vpop.f32.mrf.mxu3  ;;  %v11807_v46 = vor.u32 %v16050_v28, %v11806_v60  ;;  %v16122_v60 = vld [vmem:[%s24251_s30 + $0x754] sm:$0xf0]  ;;  %v16111_v10 = vld [vmem:[%s24251_s30 + $0x704] sm:$0xf] }
 0x21c   : > { %2973 = vmatmul.bf16.gmra.mxu1 %v18709_v11  ;;  %3030 = vmatmul.bf16.gmra.mxu0 %v18709_v11  ;;  %v2958_v37 = vsel %vm1498_vm3, %v12115_v1, 0  ;;  %v12095_v22 = vor.u32 %v16122_v60, %v12094_v5  ;;  %v12078_v1 = vld [vmem:[%s24251_s30 + $0x728] sm:$0xf]  ;;  %v12032_v5 = vld [vmem:[%s24251_s30 + $0x6d8] sm:$0xf0] }
 0x21d   : > { %3081 = vmatpush.bf16.msrb.mxu3 %v11807_v46  ;;  %3173 = vmatpush.bf16.msrb.mxu0 %v2958_v37  ;;  %v16120_v37 = vld [vmem:[%s24251_s30 + $0x74c] sm:$0xf]  ;;  %v12056_v46 = vld [vmem:[%s24251_s30 + $0x710] sm:$0xf0] }
 0x21e   : > { %v2451_v4 = vpop.f32.mrf.mxu0  ;;  %3061 = vmatpush.bf16.msrb.mxu2 %v12075_v8  ;;  %3117 = vmatpush.bf16.msra.mxu1 %v12095_v22  ;;  %v12059_v41 = vor.u32 %v16111_v10, %v12056_v46  ;;  %v16104_v8 = vld [vmem:[%s24251_s30 + $0x6cc] sm:$0xf] }
 0x21f   : > { %v18739_v18 = vpack.c.bf16 %v2451_v4, %v2449_v42  ;;  %v12048_v4 = vld [vmem:[%s24251_s30 + $0x6f8] sm:$0xf0]  ;;  %v16116_v22 = vld [vmem:[%s24251_s30 + $0x72c] sm:$0xf] }
 0x220   : > { %v12096_v42 = vld [vmem:[%s24251_s30 + $0x758] sm:$0xf0]  ;;  %v12051_v28 = vor.u32 %v16108_v0, %v12048_v4  ;;  %v12079_v0 = vor.u32 %v16118_v59, %v12078_v1  ;;  %v12035_v4 = vor.u32 %v16104_v8, %v12032_v5  ;;  %v16076_v46 = vld [vmem:[%s24251_s30 + $0x5ec] sm:$0xf] }
 0x221   : > { %12116 = vmatmul.msk.bf16.vlgmr.msra.gmra.mxu3 %vm1491_vm4, %v18739_v18  ;;  %v12099_v14 = vor.u32 %v16120_v37, %v12096_v42  ;;  %v12080_v37 = vld [vmem:[%s24251_s30 + $0x738] sm:$0xf0]  ;;  %v16100_v59 = vld [vmem:[%s24251_s30 + $0x6ac] sm:$0xf] }
 0x222   : > { %3150 = vmatpush.bf16.msra.mxu3 %v12051_v28  ;;  %v12083_v10 = vor.u32 %v16116_v22, %v12080_v37  ;;  %3062 = vmatpush.bf16.msrb.mxu2 %v12059_v41  ;;  %v11920_v28 = vld [vmem:[%s24251_s30 + $0x5f8] sm:$0xf0]  ;;  %v16114_v41 = vld [vmem:[%s24251_s30 + $0x714] sm:$0xf0] }
 0x223   : > { %v2432_v60 = vpop.f32.mrf.mxu3  ;;  %3174 = vmatpush.bf16.msrb.mxu0 %v12099_v14  ;;  %3118 = vmatpush.bf16.msra.mxu1 %v12079_v0  ;;  %v11923_v1 = vor.u32 %v16076_v46, %v11920_v28  ;;  %v12016_v5 = vld [vmem:[%s24251_s30 + $0x6b8] sm:$0xf0] }
 0x224   : > { %v18785_v42 = vpack.c.bf16 %v2432_v60, %v2430_v61  ;;  %v12062_v61 = vld [vmem:[%s24251_s30 + $0x708] sm:$0xf]  ;;  %v16112_v60 = vld [vmem:[%s24251_s30 + $0x70c] sm:$0xf]  ;;  %v12064_v0 = vld [vmem:[%s24251_s30 + $0x718] sm:$0xf0]  ;;  %v12019_v22 = vor.u32 %v16100_v59, %v12016_v5 }
 0x225   : > { %v12063_v8 = vor.u32 %v16114_v41, %v12062_v61  ;;  %v12067_v37 = vor.u32 %v16112_v60, %v12064_v0  ;;  %v16096_v61 = vld [vmem:[%s24251_s30 + $0x68c] sm:$0xf] }
 0x226   : > { %v2454_v14 = vpop.f32.mrf.mxu0  ;;  %2987 = vmatmul.bf16.vlgmr.msra.gmra.mxu2 %v18785_v42  ;;  %3151 = vmatpush.bf16.msra.mxu3 %v12035_v4  ;;  %v16072_v4 = vld [vmem:[%s24251_s30 + $0x5cc] sm:$0xf] }
 0x227   : > { %3175 = vmatpush.bf16.msrb.mxu0 %v12083_v10  ;;  %3131 = vmatpush.bf16.msra.mxu2 %v11923_v1  ;;  %v11904_v10 = vld [vmem:[%s24251_s30 + $0x5d8] sm:$0xf0]  ;;  %v16068_v59 = vld [vmem:[%s24251_s30 + $0x5ac] sm:$0xf] }
 0x228   : > { %v11907_v46 = vor.u32 %v16072_v4, %v11904_v10  ;;  %3119 = vmatpush.bf16.msra.mxu1 %v12063_v8  ;;  %v12000_v1 = vld [vmem:[%s24251_s30 + $0x698] sm:$0xf0]  ;;  %v16064_v10 = vld [vmem:[%s24251_s30 + $0x58c] sm:$0xf] }
 0x229   : > { %v12003_v41 = vor.u32 %v16096_v61, %v12000_v1  ;;  %v11888_v8 = vld [vmem:[%s24251_s30 + $0x5b8] sm:$0xf0] }
 0x22a   : > { %3152 = vmatpush.bf16.msra.mxu3 %v12019_v22  ;;  %v11891_v5 = vor.u32 %v16068_v59, %v11888_v8  ;;  %v16092_v22 = vld [vmem:[%s24251_s30 + $0x66c] sm:$0xf]  ;;  %v11968_v1 = vld [vmem:[%s24251_s30 + $0x658] sm:$0xf0] }
 0x22b   : > { %v2435_v28 = vpop.f32.mrf.mxu3  ;;  %3176 = vmatpush.bf16.msrb.mxu0 %v12067_v37  ;;  %3132 = vmatpush.bf16.msra.mxu2 %v11907_v46  ;;  %v11984_v37 = vld [vmem:[%s24251_s30 + $0x678] sm:$0xf0]  ;;  %v16088_v46 = vld [vmem:[%s24251_s30 + $0x64c] sm:$0xf] }
 0x22c   : > { %3044 = vmatmul.bf16.vlgmr.msrb.gmra.mxu1 %v18785_v42  ;;  %3101 = vmatmul.bf16.vlgmr.msra.gmra.mxu0 %v18785_v42  ;;  %v11987_v4 = vor.u32 %v16092_v22, %v11984_v37  ;;  %v11971_v59 = vor.u32 %v16088_v46, %v11968_v1  ;;  %v16084_v37 = vld [vmem:[%s24251_s30 + $0x62c] sm:$0xf]  ;;  %v11936_v1 = vld [vmem:[%s24251_s30 + $0x618] sm:$0xf0] }
 0x22d   : > { %3228 = vmatpush.bf16.msrb.mxu1 %v17015_v12 }
 0x22e   : > { %v2456_v60 = vpop.f32.mrf.mxu0  ;;  %3153 = vmatpush.bf16.msra.mxu3 %v12003_v41 }
 0x22f   : > { %v18833_v0 = vpack.c.bf16 %v2456_v60, %v2454_v14  ;;  %3133 = vmatpush.bf16.msra.mxu2 %v11891_v5  ;;  %v11872_v14 = vld [vmem:[%s24251_s30 + $0x598] sm:$0xf0]  ;;  %v16060_v5 = vld [vmem:[%s24251_s30 + $0x56c] sm:$0xf] }
 0x230   : > { %v11875_v61 = vor.u32 %v16064_v10, %v11872_v14  ;;  %v11856_v60 = vld [vmem:[%s24251_s30 + $0x578] sm:$0xf0] }
 0x231   : > { %12117 = vmatmul.msk.bf16.gmra.mxu3 %vm1491_vm4, %v18833_v0  ;;  %3229 = vmatpush.bf16.msrb.mxu1 %v17023_v16  ;;  %v11859_v22 = vor.u32 %v16060_v5, %v11856_v60  ;;  %v11840_v14 = vld [vmem:[%s24251_s30 + $0x558] sm:$0xf0] }
 0x232   : > { %3154 = vmatpush.bf16.msra.mxu3 %v11987_v4  ;;  %v11952_v4 = vld [vmem:[%s24251_s30 + $0x638] sm:$0xf0] }
 0x233   : > { %v2437_v41 = vpop.f32.mrf.mxu3  ;;  %3134 = vmatpush.bf16.msra.mxu2 %v11875_v61  ;;  %v11955_v10 = vor.u32 %v16084_v37, %v11952_v4  ;;  %v16080_v61 = vld [vmem:[%s24251_s30 + $0x60c] sm:$0xf]  ;;  %v11824_v5 = vld [vmem:[%s24251_s30 + $0x538] sm:$0xf0] }
 0x234   : > { %v2463_v8 = vpack.c.bf16 %v2437_v41, %v2435_v28  ;;  %v16056_v28 = vld [vmem:[%s24251_s30 + $0x54c] sm:$0xf]  ;;  %v11939_v41 = vor.u32 %v16080_v61, %v11936_v1  ;;  %v11808_v37 = vld [vmem:[%s24251_s30 + $0x518] sm:$0xf0] }
 0x235   : > { %3230 = vmatpush.bf16.msrb.mxu1 %v17036_v25  ;;  %v11843_v46 = vor.u32 %v16056_v28, %v11840_v14  ;;  %v12134_v28 = vld [vmem:[%s24250_s5 + $0x38] sm:$0xf] }
 0x236   : > { %2992 = vmatmul.bf16.gmra.mxu2 %v2463_v8  ;;  %3155 = vmatpush.bf16.msra.mxu3 %v11971_v59  ;;  %v16052_v59 = vld [vmem:[%s24251_s30 + $0x52c] sm:$0xf] }
 0x237   : > { %3135 = vmatpush.bf16.msra.mxu2 %v11859_v22  ;;  %v11827_v60 = vor.u32 %v16052_v59, %v11824_v5  ;;  %v16048_v22 = vld [vmem:[%s24251_s30 + $0x50c] sm:$0xf] }
 0x238   : > { %v11811_v4 = vor.u32 %v16048_v22, %v11808_v37 }
 0x239   : > { %3231 = vmatpush.bf16.msrb.mxu1 %v17052_v34 }
 0x23a   : > { %3156 = vmatpush.bf16.msra.mxu3 %v11955_v10  ;;  %v16128_v10 = vld [vmem:[%s24250_s5 + $0x38] sm:$0x10] }
 0x23b   : > { %3136 = vmatpush.bf16.msra.mxu2 %v11843_v46 }
 0x23c   : > { %3049 = vmatmul.bf16.gmra.mxu1 %v2463_v8  ;;  %3106 = vmatmul.bf16.gmra.mxu0 %v2463_v8 }
 0x23d   : > { %3232 = vmatpush.bf16.msrb.mxu1 %v17068_v43 }
 0x23e   : > { %3157 = vmatpush.bf16.msra.mxu3 %v11939_v41 }
 0x23f   : > { %3137 = vmatpush.bf16.msra.mxu2 %v11827_v60 }
 0x241   : > { %3082 = vmatmul.bf16.vlgmr.msrb.gmra.mxu3 %v18661_v20 }
 0x242   : > { %3266 = vmatpush.bf16.msrb.mxu3 %v17044_v30 }
 0x243   : > { %3138 = vmatpush.bf16.msra.mxu2 %v11811_v4 }
 0x246   : > { %12118 = vmatmul.msk.bf16.vlgmr.msrb.gmra.mxu2 %vm1491_vm4, %v18739_v18  ;;  %3267 = vmatpush.bf16.msrb.mxu3 %v17060_v39 }
 0x247   : > { %3247 = vmatpush.bf16.msrb.mxu2 %v17019_v15 }
 0x24a   : > { %3268 = vmatpush.bf16.msrb.mxu3 %v17073_v45 }
 0x24b   : > { %3248 = vmatpush.bf16.msrb.mxu2 %v17026_v17 }
 0x24c   : > { %12120 = vmatmul.msk.bf16.vlgmr.msra.gmra.mxu1 %vm1491_vm4, %v18739_v18  ;;  %12122 = vmatmul.msk.bf16.vlgmr.msrb.gmra.mxu0 %vm1491_vm4, %v18739_v18  ;;  %v16127_v18 = vld [vmem:[%s24250_s5 + $0x30] sm:$0xff] }
 0x24e   : > { %3269 = vmatpush.bf16.msrb.mxu3 %v17091_v50 }
 0x24f   : > { %3249 = vmatpush.bf16.msrb.mxu2 %v17039_v26 }
 0x251   : > { %3087 = vmatmul.bf16.gmra.mxu3 %v18709_v11 }
 0x252   : > { %3270 = vmatpush.bf16.msrb.mxu3 %v17102_v53 }
 0x253   : > { %3250 = vmatpush.bf16.msrb.mxu2 %v17055_v35 }
 0x256   : > { %12119 = vmatmul.msk.bf16.gmra.mxu2 %vm1491_vm4, %v18833_v0 }
 0x257   : > { %3251 = vmatpush.bf16.msrb.mxu2 %v17071_v44 }
 0x25c   : > { %12121 = vmatmul.msk.bf16.gmra.mxu1 %vm1491_vm4, %v18833_v0  ;;  %12123 = vmatmul.msk.bf16.gmra.mxu0 %vm1491_vm4, %v18833_v0 }
 0x261   : > { %3158 = vmatmul.bf16.vlgmr.msra.gmra.mxu3 %v18785_v42  ;;  %v12135_v42 = vor.u32 %v16128_v10, %v12134_v28 }
 0x266   : > { %3139 = vmatmul.bf16.vlgmr.msra.gmra.mxu2 %v18661_v20  ;;  %v18933_v20 = vpop.f32.mrf.mxu1 }
 0x267   : > { %24288 = vst [vmem:[#allocation39_spill] sm:$0xff] %v18933_v20  ;;  %v16155_v20 = vld [vmem:[%s24251_s30 + $0x84c] sm:$0xf0] }
 0x26c   : > { %12136 = vmatmul.msk.bf16.vlgmr.msrb.gmra.mxu1 %vm767_vm2, %v16127_v18 }
 0x271   : > { %3163 = vmatmul.bf16.gmra.mxu3 %v2463_v8 }
 0x276   : > { %3144 = vmatmul.bf16.gmra.mxu2 %v18709_v11 }
 0x27c   : > { %12137 = vmatmul.msk.bf16.gmra.mxu1 %vm767_vm2, %v12135_v42 }
 0x281   : > { %12140 = vmatmul.msk.bf16.vlgmr.msrb.gmra.mxu3 %vm767_vm2, %v16127_v18 }
 0x286   : > { %12138 = vmatmul.msk.bf16.vlgmr.msrb.gmra.mxu2 %vm767_vm2, %v16127_v18 }
 0x289   : > { %v2969_v0 = vpop.f32.mrf.mxu1  ;;  %v3026_v14 = vpop.f32.mrf.mxu0 }
 0x291   : > { %12141 = vmatmul.msk.bf16.gmra.mxu3 %vm767_vm2, %v12135_v42  ;;  %v18938_v8 = vpop.f32.mrf.mxu1  ;;  %v18941_v61 = vpop.f32.mrf.mxu0 }
 0x292   : > { %24289 = vst [vmem:[#allocation40_spill] sm:$0xff] %v18941_v61  ;;  %v12304_v61 = vld [vmem:[%s24251_s30 + $0x820] sm:$0xf] }
 0x296   : > { %12139 = vmatmul.msk.bf16.gmra.mxu2 %vm767_vm2, %v12135_v42  ;;  %v12336_v42 = vld [vmem:[%s24251_s30 + $0x860] sm:$0xf] }
 0x299   : > { %v2974_v46 = vpop.f32.mrf.mxu1  ;;  %v3031_v5 = vpop.f32.mrf.mxu0 }
 0x2a1   : > { %v18943_v11 = vpop.f32.mrf.mxu1 }
 0x2a4   : > { %v3007_v1 = vpop.f32.mrf.mxu3 }
 0x2a9   : > { %v2988_v41 = vpop.f32.mrf.mxu2  ;;  %v3045_v59 = vpop.f32.mrf.mxu1 }
 0x2aa   : > { %v2989_v60 = vadd.f32 %v2988_v41, %v2969_v0  ;;  %v18945_v22 = vadd.f32 %v3045_v59, %v3026_v14  ;;  %v16159_v0 = vld [vmem:[%s24251_s30 + $0x86c] sm:$0xf0]  ;;  %v16157_v14 = vld [vmem:[%s24251_s30 + $0x864] sm:$0xf]  ;;  %v12338_v59 = vld [vmem:[%s24251_s30 + $0x870] sm:$0xf0] }
 0x2ab   : > { %v12337_v41 = vor.u32 %v16159_v0, %v12336_v42  ;;  %v12322_v0 = vld [vmem:[%s24251_s30 + $0x850] sm:$0xf0] }
 0x2ac   : > { %v3008_v37 = vadd.f32 %v3007_v1, %v2989_v60  ;;  %v18947_v4 = vpop.f32.mrf.mxu3  ;;  %v18965_v1 = vpop.f32.mrf.mxu0  ;;  %v12341_v60 = vor.u32 %v16157_v14, %v12338_v59 }
 0x2ad   : > { %24291 = vst [vmem:[#allocation42_spill] sm:$0xff] %v18965_v1  ;;  %3783 = vmatpush.bf16.msra.mxu0 %v12337_v41  ;;  %v16153_v1 = vld [vmem:[%s24251_s30 + $0x844] sm:$0xf] }
 0x2ae   : > { %v18950_v18 = vadd.f32 %v3008_v37, %v18322_v6  ;;  %3840 = vmatpush.bf16.msra.mxu3 %v12341_v60  ;;  %v12320_v37 = vld [vmem:[%s24251_s30 + $0x840] sm:$0xf]  ;;  %v12325_v59 = vor.u32 %v16153_v1, %v12322_v0 }
 0x2af   : > { %v12321_v42 = vor.u32 %v16155_v20, %v12320_v37  ;;  %v16151_v20 = vld [vmem:[%s24251_s30 + $0x82c] sm:$0xf0]  ;;  %v16149_v37 = vld [vmem:[%s24251_s30 + $0x824] sm:$0xf] }
 0x2b1   : > { %v18952_v28 = vpop.f32.mrf.mxu2  ;;  %v18954_v10 = vpop.f32.mrf.mxu1  ;;  %3784 = vmatpush.bf16.msra.mxu0 %v12321_v42 }
 0x2b2   : > { %24290 = vst [vmem:[#allocation41_spill] sm:$0xff] %v18954_v10  ;;  %3841 = vmatpush.bf16.msra.mxu3 %v12325_v59  ;;  %v12290_v59 = vld [vmem:[%s24251_s30 + $0x810] sm:$0xf0] }
 0x2b4   : > { %v3012_v6 = vpop.f32.mrf.mxu3  ;;  %v3102_v42 = vpop.f32.mrf.mxu0 }
 0x2b9   : > { %v2993_v14 = vpop.f32.mrf.mxu2  ;;  %v3050_v41 = vpop.f32.mrf.mxu1 }
 0x2ba   : > { %v2994_v60 = vadd.f32 %v2993_v14, %v2974_v46  ;;  %v18982_v10 = vadd.f32 %v3050_v41, %v3031_v5  ;;  %v12305_v46 = vor.u32 %v16151_v20, %v12304_v61  ;;  %v12306_v5 = vld [vmem:[%s24251_s30 + $0x830] sm:$0xf0]  ;;  %v12288_v14 = vld [vmem:[%s24251_s30 + $0x800] sm:$0xf]  ;;  %v16145_v61 = vld [vmem:[%s24251_s30 + $0x804] sm:$0xf] }
 0x2bb   : > { %v12309_v1 = vor.u32 %v16149_v37, %v12306_v5  ;;  %v12272_v20 = vld [vmem:[%s24251_s30 + $0x7e0] sm:$0xf]  ;;  %v16143_v37 = vld [vmem:[%s24251_s30 + $0x7ec] sm:$0xf0] }
 0x2bc   : > { %v3013_v13 = vadd.f32 %v3012_v6, %v2994_v60  ;;  %v18993_v9 = vpop.f32.mrf.mxu3  ;;  %3785 = vmatpush.bf16.msra.mxu0 %v12305_v46  ;;  %v16147_v6 = vld [vmem:[%s24251_s30 + $0x80c] sm:$0xf0]  ;;  %v12293_v60 = vor.u32 %v16145_v61, %v12290_v59  ;;  %v16141_v46 = vld [vmem:[%s24251_s30 + $0x7e4] sm:$0xf] }
 0x2bd   : > { %3842 = vmatpush.bf16.msra.mxu3 %v12309_v1  ;;  %v12289_v41 = vor.u32 %v16147_v6, %v12288_v14  ;;  %v12273_v1 = vor.u32 %v16143_v37, %v12272_v20  ;;  %v12274_v14 = vld [vmem:[%s24251_s30 + $0x7f0] sm:$0xf0]  ;;  %v16139_v59 = vld [vmem:[%s24251_s30 + $0x7cc] sm:$0xf0]  ;;  %v19038_v20 = vpop.f32.mrf.mxu0 }
 0x2be   : > { %v18999_v0 = vadd.f32 %v3013_v13, %v18344_v54  ;;  %v12277_v61 = vor.u32 %v16141_v46, %v12274_v14  ;;  %24293 = vst [vmem:[#allocation44_spill] sm:$0xff] %v19038_v20 }
 0x2c0   : > { %3786 = vmatpush.bf16.msra.mxu0 %v12289_v41  ;;  %v12256_v41 = vld [vmem:[%s24251_s30 + $0x7c0] sm:$0xf] }
 0x2c1   : > { %v19013_v13 = vpop.f32.mrf.mxu2  ;;  %v19015_v54 = vpop.f32.mrf.mxu1  ;;  %3843 = vmatpush.bf16.msra.mxu3 %v12293_v60  ;;  %v16137_v60 = vld [vmem:[%s24251_s30 + $0x7c4] sm:$0xf]  ;;  %v12257_v37 = vor.u32 %v16139_v59, %v12256_v41  ;;  %v16135_v41 = vld [vmem:[%s24251_s30 + $0x7ac] sm:$0xf0] }
 0x2c2   : > { %24292 = vst [vmem:[#allocation43_spill] sm:$0xff] %v19015_v54  ;;  %v12240_v54 = vld [vmem:[%s24251_s30 + $0x7a0] sm:$0xf]  ;;  %v16133_v59 = vld [vmem:[%s24251_s30 + $0x7a4] sm:$0xf] }
 0x2c4   : > { %v3083_v5 = vpop.f32.mrf.mxu3  ;;  %3787 = vmatpush.bf16.msra.mxu0 %v12273_v1 }
 0x2c5   : > { %v3103_v6 = vadd.f32 %v3102_v42, %v3083_v5  ;;  %3844 = vmatpush.bf16.msra.mxu3 %v12277_v61  ;;  %v12258_v42 = vld [vmem:[%s24251_s30 + $0x7d0] sm:$0xf0] }
 0x2c6   : > { %v12261_v1 = vor.u32 %v16137_v60, %v12258_v42  ;;  %v12241_v60 = vor.u32 %v16135_v41, %v12240_v54  ;;  %v3107_v41 = vpop.f32.mrf.mxu0 }
 0x2c8   : > { %3788 = vmatpush.bf16.msra.mxu0 %v12257_v37  ;;  %v12242_v37 = vld [vmem:[%s24251_s30 + $0x7b0] sm:$0xf0] }
 0x2c9   : > { %v3064_v46 = vpop.f32.mrf.mxu2  ;;  %v3121_v5 = vpop.f32.mrf.mxu1  ;;  %3845 = vmatpush.bf16.msra.mxu3 %v12261_v1  ;;  %v12245_v42 = vor.u32 %v16133_v59, %v12242_v37  ;;  %v12464_v59 = vld [vmem:[%s24251_s30 + $0x960] sm:$0xf]  ;;  %v16189_v37 = vld [vmem:[%s24251_s30 + $0x964] sm:$0xf] }
 0x2ca   : > { %v3065_v14 = vadd.f32 %v3064_v46, %v18945_v22  ;;  %v3122_v61 = vadd.f32 %v3121_v5, %v3103_v6  ;;  %v12224_v46 = vld [vmem:[%s24251_s30 + $0x780] sm:$0xf]  ;;  %v12226_v5 = vld [vmem:[%s24251_s30 + $0x790] sm:$0xf0] }
 0x2cc   : > { %v19054_v20 = vadd.f32 %v3065_v14, %v18400_v24  ;;  %v19057_v22 = vadd.f32 %v3122_v61, %v18421_v38  ;;  %v19059_v6 = vpop.f32.mrf.mxu3  ;;  %3789 = vmatpush.bf16.msra.mxu0 %v12241_v60  ;;  %v16131_v24 = vld [vmem:[%s24251_s30 + $0x78c] sm:$0xf0]  ;;  %v16129_v38 = vld [vmem:[%s24251_s30 + $0x784] sm:$0xf] }
 0x2cd   : > { %24294 = vst [vmem:[#allocation45_spill] sm:$0xff] %v19059_v6  ;;  %3846 = vmatpush.bf16.msra.mxu3 %v12245_v42  ;;  %v12225_v54 = vor.u32 %v16131_v24, %v12224_v46  ;;  %v12229_v61 = vor.u32 %v16129_v38, %v12226_v5  ;;  %v16191_v60 = vld [vmem:[%s24251_s30 + $0x96c] sm:$0xf0]  ;;  %v12466_v24 = vld [vmem:[%s24251_s30 + $0x970] sm:$0xf0] }
 0x2ce   : > { %v12465_v46 = vor.u32 %v16191_v60, %v12464_v59  ;;  %v12472_v38 = vld [vmem:[%s24251_s30 + $0x968] sm:$0xf]  ;;  %v12448_v59 = vld [vmem:[%s24251_s30 + $0x940] sm:$0xf]  ;;  %v16187_v60 = vld [vmem:[%s24251_s30 + $0x94c] sm:$0xf0] }
 0x2cf   : > { %v12449_v6 = vor.u32 %v16187_v60, %v12448_v59  ;;  %v12432_v59 = vld [vmem:[%s24251_s30 + $0x920] sm:$0xf]  ;;  %v16183_v60 = vld [vmem:[%s24251_s30 + $0x92c] sm:$0xf0] }
 0x2d0   : > { %3790 = vmatpush.bf16.msra.mxu0 %v12225_v54  ;;  %v16192_v54 = vld [vmem:[%s24251_s30 + $0x974] sm:$0xf0]  ;;  %3802 = vmatpush.bf16.msra.mxu1 %v12465_v46 }
 0x2d1   : > { %v19076_v1 = vpop.f32.mrf.mxu2  ;;  %v19078_v14 = vpop.f32.mrf.mxu1  ;;  %3847 = vmatpush.bf16.msra.mxu3 %v12229_v61  ;;  %v12469_v61 = vor.u32 %v16189_v37, %v12466_v24  ;;  %v16188_v37 = vld [vmem:[%s24251_s30 + $0x954] sm:$0xf0] }
 0x2d2   : > { %24295 = vst [vmem:[#allocation46_spill] sm:$0xff] %v19076_v1  ;;  %v16185_v1 = vld [vmem:[%s24251_s30 + $0x944] sm:$0xf] }
 0x2d3   : > { %24296 = vst [vmem:[#allocation47_spill] sm:$0xff] %v19078_v14  ;;  %v12473_v14 = vor.u32 %v16192_v54, %v12472_v38 }
 0x2d4   : > { %v3088_v42 = vpop.f32.mrf.mxu3  ;;  %3859 = vmatpush.bf16.msrb.mxu0 %v12469_v61  ;;  %3803 = vmatpush.bf16.msra.mxu1 %v12449_v6 }
 0x2d5   : > { %v3108_v5 = vadd.f32 %v3107_v41, %v3088_v42  ;;  %3916 = vmatpush.bf16.msrb.mxu3 %v12473_v14  ;;  %v12450_v41 = vld [vmem:[%s24251_s30 + $0x950] sm:$0xf0]  ;;  %v12456_v14 = vld [vmem:[%s24251_s30 + $0x948] sm:$0xf] }
 0x2d6   : > { %v12453_v24 = vor.u32 %v16185_v1, %v12450_v41  ;;  %v12457_v38 = vor.u32 %v16188_v37, %v12456_v14  ;;  %v19126_v1 = vpop.f32.mrf.mxu0  ;;  %v12433_v41 = vor.u32 %v16183_v60, %v12432_v59  ;;  %v12434_v14 = vld [vmem:[%s24251_s30 + $0x930] sm:$0xf0]  ;;  %v12440_v37 = vld [vmem:[%s24251_s30 + $0x928] sm:$0xf] }
 0x2d7   : > { %24297 = vst [vmem:[#allocation48_spill] sm:$0xff] %v19126_v1 }
 0x2d8   : > { %3860 = vmatpush.bf16.msrb.mxu0 %v12453_v24  ;;  %v16207_v24 = vld [vmem:[%s24251_s30 + $0x9ec] sm:$0x30]  ;;  %3804 = vmatpush.bf16.msra.mxu1 %v12433_v41  ;;  %v12418_v41 = vld [vmem:[%s24251_s30 + $0x910] sm:$0xf0] }
 0x2d9   : > { %v3069_v42 = vpop.f32.mrf.mxu2  ;;  %v3126_v46 = vpop.f32.mrf.mxu1  ;;  %3917 = vmatpush.bf16.msrb.mxu3 %v12457_v38 }
 0x2da   : > { %v3070_v54 = vadd.f32 %v3069_v42, %v18982_v10  ;;  %v3127_v61 = vadd.f32 %v3126_v46, %v3108_v5  ;;  %v16184_v42 = vld [vmem:[%s24251_s30 + $0x934] sm:$0xf0] }
 0x2db   : > { %v12441_v46 = vor.u32 %v16184_v42, %v12440_v37 }
 0x2dc   : > { %v19129_v10 = vadd.f32 %v3070_v54, %v18474_v58  ;;  %v19132_v6 = vadd.f32 %v3127_v61, %v18514_v63  ;;  %v19134_v5 = vpop.f32.mrf.mxu3  ;;  %v12437_v58 = vor.u32 %v16181_v51, %v12434_v14  ;;  %v12528_v63 = vld [vmem:[%s24251_s30 + $0x9e0] sm:$0xf]  ;;  %v16179_v51 = vld [vmem:[%s24251_s30 + $0x90c] sm:$0xf0]  ;;  %v16177_v61 = vld [vmem:[%s24251_s30 + $0x904] sm:$0xf] }
 0x2dd   : > { %24298 = vst [vmem:[#allocation49_spill] sm:$0xff] %v19134_v5  ;;  %v12529_v38 = vor.u32 %v16207_v24, %v12528_v63  ;;  %3918 = vmatpush.bf16.msrb.mxu3 %v12441_v46  ;;  %v12416_v54 = vld [vmem:[%s24251_s30 + $0x900] sm:$0xf]  ;;  %v12424_v14 = vld [vmem:[%s24251_s30 + $0x908] sm:$0xf] }
 0x2de   : > { %3861 = vmatpush.bf16.msrb.mxu0 %v12437_v58  ;;  %v12417_v60 = vor.u32 %v16179_v51, %v12416_v54  ;;  %v12421_v58 = vor.u32 %v16177_v61, %v12418_v41  ;;  %v16180_v46 = vld [vmem:[%s24251_s30 + $0x914] sm:$0xf0]  ;;  %v12512_v63 = vld [vmem:[%s24251_s30 + $0x9c0] sm:$0xf]  ;;  %v16203_v24 = vld [vmem:[%s24251_s30 + $0x9cc] sm:$0xf0] }
 0x2df   : > { %v3772_v59 = vsel %vm1498_vm3, %v12529_v38, 0  ;;  %v12425_v38 = vor.u32 %v16180_v46, %v12424_v14  ;;  %v12513_v54 = vor.u32 %v16203_v24, %v12512_v63  ;;  %v12400_v51 = vld [vmem:[%s24251_s30 + $0x8e0] sm:$0xf]  ;;  %v16175_v61 = vld [vmem:[%s24251_s30 + $0x8ec] sm:$0xf0] }
 0x2e0   : > { %3825 = vmatpush.bf16.msra.mxu2 %v3772_v59  ;;  %3805 = vmatpush.bf16.msra.mxu1 %v12417_v60  ;;  %v16173_v59 = vld [vmem:[%s24251_s30 + $0x8e4] sm:$0xf]  ;;  %v12402_v60 = vld [vmem:[%s24251_s30 + $0x8f0] sm:$0xf0]  ;;  %v12408_v14 = vld [vmem:[%s24251_s30 + $0x8e8] sm:$0xf] }
 0x2e1   : > { %v19167_v37 = vpop.f32.mrf.mxu2  ;;  %v19169_v42 = vpop.f32.mrf.mxu1  ;;  %3919 = vmatpush.bf16.msrb.mxu3 %v12425_v38  ;;  %v12405_v46 = vor.u32 %v16173_v59, %v12402_v60  ;;  %v12496_v24 = vld [vmem:[%s24251_s30 + $0x9a0] sm:$0xf]  ;;  %v16199_v38 = vld [vmem:[%s24251_s30 + $0x9ac] sm:$0xf0]  ;;  %v16169_v59 = vld [vmem:[%s24251_s30 + $0x8c4] sm:$0xf] }
 0x2e2   : > { %24299 = vst [vmem:[#allocation50_spill] sm:$0xff] %v19167_v37  ;;  %3862 = vmatpush.bf16.msrb.mxu0 %v12421_v58  ;;  %v16176_v58 = vld [vmem:[%s24251_s30 + $0x8f4] sm:$0xf0]  ;;  %v12384_v37 = vld [vmem:[%s24251_s30 + $0x8c0] sm:$0xf] }
 0x2e3   : > { %24300 = vst [vmem:[#allocation51_spill] sm:$0xff] %v19169_v42  ;;  %v12401_v42 = vor.u32 %v16175_v61, %v12400_v51  ;;  %v12409_v63 = vor.u32 %v16176_v58, %v12408_v14  ;;  %v3178_v51 = vpop.f32.mrf.mxu0  ;;  %v12497_v61 = vor.u32 %v16199_v38, %v12496_v24  ;;  %v12392_v14 = vld [vmem:[%s24251_s30 + $0x8c8] sm:$0xf]  ;;  %v16172_v58 = vld [vmem:[%s24251_s30 + $0x8d4] sm:$0xf0] }
 0x2e4   : > { %v3159_v41 = vpop.f32.mrf.mxu3  ;;  %3826 = vmatpush.bf16.msra.mxu2 %v12513_v54  ;;  %v16171_v54 = vld [vmem:[%s24251_s30 + $0x8cc] sm:$0xf0]  ;;  %v12393_v1 = vor.u32 %v16172_v58, %v12392_v14  ;;  %v12376_v58 = vld [vmem:[%s24251_s30 + $0x8a8] sm:$0xf] }
 0x2e5   : > { %3806 = vmatpush.bf16.msra.mxu1 %v12401_v42  ;;  %3920 = vmatpush.bf16.msrb.mxu3 %v12409_v63  ;;  %v12385_v60 = vor.u32 %v16171_v54, %v12384_v37  ;;  %v12386_v42 = vld [vmem:[%s24251_s30 + $0x8d0] sm:$0xf0]  ;;  %v12480_v37 = vld [vmem:[%s24251_s30 + $0x980] sm:$0xf]  ;;  %v16195_v63 = vld [vmem:[%s24251_s30 + $0x98c] sm:$0xf0] }
 0x2e6   : > { %3863 = vmatpush.bf16.msrb.mxu0 %v12405_v46  ;;  %v12389_v38 = vor.u32 %v16169_v59, %v12386_v42  ;;  %v12481_v5 = vor.u32 %v16195_v63, %v12480_v37  ;;  %v16165_v59 = vld [vmem:[%s24251_s30 + $0x8a4] sm:$0xf] }
 0x2e8   : > { %3827 = vmatpush.bf16.msra.mxu2 %v12497_v61  ;;  %v16167_v61 = vld [vmem:[%s24251_s30 + $0x8ac] sm:$0xf0] }
 0x2e9   : > { %v3140_v46 = vpop.f32.mrf.mxu2  ;;  %v3234_v24 = vpop.f32.mrf.mxu1  ;;  %3807 = vmatpush.bf16.msra.mxu1 %v12385_v60  ;;  %3921 = vmatpush.bf16.msrb.mxu3 %v12393_v1  ;;  %v12370_v60 = vld [vmem:[%s24251_s30 + $0x8b0] sm:$0xf0]  ;;  %v12344_v1 = vld [vmem:[%s24251_s30 + $0x868] sm:$0xf] }
 0x2ea   : > { %v3160_v54 = vadd.f32 %v3159_v41, %v3140_v46  ;;  %3864 = vmatpush.bf16.msrb.mxu0 %v12389_v38  ;;  %v12369_v41 = vor.u32 %v16167_v61, %v12368_v2  ;;  %v16168_v46 = vld [vmem:[%s24251_s30 + $0x8b4] sm:$0xf0]  ;;  %v12373_v38 = vor.u32 %v16165_v59, %v12370_v60  ;;  %v16161_v61 = vld [vmem:[%s24251_s30 + $0x884] sm:$0xf] }
 0x2eb   : > { %v12377_v37 = vor.u32 %v16168_v46, %v12376_v58  ;;  %v16160_v2 = vld [vmem:[%s24251_s30 + $0x874] sm:$0xf0]  ;;  %v19266_v59 = vpop.f32.mrf.mxu0 }
 0x2ec   : > { %v3179_v42 = vadd.f32 %v3178_v51, %v3160_v54  ;;  %v19237_v14 = vpop.f32.mrf.mxu3  ;;  %3828 = vmatpush.bf16.msra.mxu2 %v12481_v5  ;;  %v12345_v63 = vor.u32 %v16160_v2, %v12344_v1  ;;  %v12352_v5 = vld [vmem:[%s24251_s30 + $0x880] sm:$0xf]  ;;  %v16163_v54 = vld [vmem:[%s24251_s30 + $0x88c] sm:$0xf0]  ;;  %24302 = vst [vmem:[#allocation53_spill] sm:$0xff] %v19266_v59 }
 0x2ed   : > { %24301 = vst [vmem:[#allocation52_spill] sm:$0xff] %v19237_v14  ;;  %3808 = vmatpush.bf16.msra.mxu1 %v12369_v41  ;;  %3922 = vmatpush.bf16.msrb.mxu3 %v12377_v37  ;;  %v12360_v41 = vld [vmem:[%s24251_s30 + $0x888] sm:$0xf]  ;;  %v16164_v60 = vld [vmem:[%s24251_s30 + $0x894] sm:$0xf0] }
 0x2ee   : > { %v19255_v51 = vadd.f32 %v3179_v42, %v18604_v52  ;;  %3865 = vmatpush.bf16.msrb.mxu0 %v12373_v38  ;;  %v12353_v52 = vor.u32 %v16163_v54, %v12352_v5  ;;  %v12354_v42 = vld [vmem:[%s24251_s30 + $0x890] sm:$0xf0]  ;;  %v12361_v1 = vor.u32 %v16164_v60, %v12360_v41  ;;  %v12328_v37 = vld [vmem:[%s24251_s30 + $0x848] sm:$0xf]  ;;  %v16156_v2 = vld [vmem:[%s24251_s30 + $0x854] sm:$0xf0] }
 0x2ef   : > { %v12357_v38 = vor.u32 %v16161_v61, %v12354_v42  ;;  %v12329_v5 = vor.u32 %v16156_v2, %v12328_v37  ;;  %v12312_v61 = vld [vmem:[%s24251_s30 + $0x828] sm:$0xf]  ;;  %v16152_v42 = vld [vmem:[%s24251_s30 + $0x834] sm:$0xf0] }
 0x2f0   : > { %3897 = vmatpush.bf16.msrb.mxu2 %v12345_v63  ;;  %v12296_v60 = vld [vmem:[%s24251_s30 + $0x808] sm:$0xf] }
 0x2f1   : > { %v19277_v58 = vpop.f32.mrf.mxu2  ;;  %v3236_v46 = vpop.f32.mrf.mxu1  ;;  %3809 = vmatpush.bf16.msra.mxu1 %v12353_v52  ;;  %3923 = vmatpush.bf16.msrb.mxu3 %v12361_v1 }
 0x2f2   : > { %24303 = vst [vmem:[#allocation54_spill] sm:$0xff] %v19277_v58  ;;  %v19285_v63 = vpack.c.bf16 %v3236_v46, %v3234_v24  ;;  %3866 = vmatpush.bf16.msrb.mxu0 %v12357_v38  ;;  %v12313_v24 = vor.u32 %v16152_v42, %v12312_v61  ;;  %v16148_v46 = vld [vmem:[%s24251_s30 + $0x814] sm:$0xf0]  ;;  %v12280_v61 = vld [vmem:[%s24251_s30 + $0x7e8] sm:$0xf] }
 0x2f3   : > { %v12297_v1 = vor.u32 %v16148_v46, %v12296_v60  ;;  %v3183_v37 = vpop.f32.mrf.mxu0  ;;  %v16144_v42 = vld [vmem:[%s24251_s30 + $0x7f4] sm:$0xf0] }
 0x2f4   : > { %v3164_v54 = vpop.f32.mrf.mxu3  ;;  %3791 = vmatmul.bf16.vlgmr.msra.gmra.mxu0 %v19285_v63  ;;  %3848 = vmatmul.bf16.vlgmr.msra.gmra.mxu3 %v19285_v63  ;;  %v12281_v59 = vor.u32 %v16144_v42, %v12280_v61  ;;  %v16140_v60 = vld [vmem:[%s24251_s30 + $0x7d4] sm:$0xf0]  ;;  %v12538_v61 = vld [vmem:[%s24251_s30 + $0x9f8] sm:$0x30] }
 0x2f5   : > { %3898 = vmatpush.bf16.msrb.mxu2 %v12329_v5 }
 0x2f9   : > { %v3145_v41 = vpop.f32.mrf.mxu2  ;;  %v3239_v52 = vpop.f32.mrf.mxu1  ;;  %3899 = vmatpush.bf16.msrb.mxu2 %v12313_v24 }
 0x2fa   : > { %v3165_v38 = vadd.f32 %v3164_v54, %v3145_v41  ;;  %v12264_v41 = vld [vmem:[%s24251_s30 + $0x7c8] sm:$0xf] }
 0x2fc   : > { %v3184_v2 = vadd.f32 %v3183_v37, %v3165_v38  ;;  %v19301_v5 = vpop.f32.mrf.mxu3  ;;  %v12265_v38 = vor.u32 %v16140_v60, %v12264_v41 }
 0x2fd   : > { %24304 = vst [vmem:[#allocation55_spill] sm:$0xff] %v19301_v5  ;;  %3900 = vmatpush.bf16.msrb.mxu2 %v12297_v1  ;;  %v12530_v1 = vld [vmem:[%s24251_s30 + $0x9f0] sm:$0x30] }
 0x2fe   : > { %v19310_v24 = vadd.f32 %v3184_v2, %v18680_v48  ;;  %v16205_v48 = vld [vmem:[%s24251_s30 + $0x9e4] sm:$0xf]  ;;  %v16208_v2 = vld [vmem:[%s24251_s30 + $0x9f4] sm:$0x30] }
 0x2ff   : > { %v12533_v37 = vor.u32 %v16205_v48, %v12530_v1  ;;  %v12248_v48 = vld [vmem:[%s24251_s30 + $0x7a8] sm:$0xf]  ;;  %v16136_v1 = vld [vmem:[%s24251_s30 + $0x7b4] sm:$0xf0] }
 0x300   : > { %v12249_v58 = vor.u32 %v16136_v1, %v12248_v48 }
 0x301   : > { %v19312_v14 = vpop.f32.mrf.mxu2  ;;  %v3241_v54 = vpop.f32.mrf.mxu1  ;;  %3901 = vmatpush.bf16.msrb.mxu2 %v12281_v59  ;;  %v12536_v59 = vld [vmem:[%s24251_s30 + $0x9e8] sm:$0xf]  ;;  %v3775_v60 = vsel %vm1498_vm3, %v12533_v37, 0 }
 0x302   : > { %24305 = vst [vmem:[#allocation56_spill] sm:$0xff] %v19312_v14  ;;  %v19320_v46 = vpack.c.bf16 %v3241_v54, %v3239_v52  ;;  %v16206_v52 = vld [vmem:[%s24251_s30 + $0x9ec] sm:$0xf]  ;;  %v12537_v54 = vor.u32 %v16208_v2, %v12536_v59  ;;  %3882 = vmatpush.bf16.msrb.mxu1 %v3775_v60  ;;  %v12514_v59 = vld [vmem:[%s24251_s30 + $0x9d0] sm:$0xf0] }
 0x303   : > { %v12541_v41 = vor.u32 %v16206_v52, %v12538_v61  ;;  %v12520_v2 = vld [vmem:[%s24251_s30 + $0x9c8] sm:$0xf]  ;;  %v16204_v52 = vld [vmem:[%s24251_s30 + $0x9d4] sm:$0xf0]  ;;  %v16202_v61 = vld [vmem:[%s24251_s30 + $0x9cc] sm:$0xf] }
 0x304   : > { %v3272_v42 = vpop.f32.mrf.mxu3  ;;  %3796 = vmatmul.bf16.gmra.mxu0 %v19320_v46  ;;  %3853 = vmatmul.bf16.gmra.mxu3 %v19320_v46  ;;  %v3778_v5 = vsel %vm1498_vm3, %v12537_v54, 0  ;;  %v12521_v54 = vor.u32 %v16204_v52, %v12520_v2  ;;  %v12504_v2 = vld [vmem:[%s24251_s30 + $0x9a8] sm:$0xf] }
 0x305   : > { %3902 = vmatpush.bf16.msrb.mxu2 %v12265_v38  ;;  %v3781_v14 = vsel %vm1498_vm3, %v12541_v41, 0  ;;  %v16201_v38 = vld [vmem:[%s24251_s30 + $0x9c4] sm:$0xf]  ;;  %3939 = vmatpush.bf16.msra.mxu0 %v3778_v5  ;;  %v12522_v41 = vld [vmem:[%s24251_s30 + $0x9d8] sm:$0xf0] }
 0x306   : > { %3996 = vmatpush.bf16.msra.mxu3 %v3781_v14  ;;  %v12517_v37 = vor.u32 %v16201_v38, %v12514_v59  ;;  %v12232_v14 = vld [vmem:[%s24251_s30 + $0x788] sm:$0xf]  ;;  %v16132_v5 = vld [vmem:[%s24251_s30 + $0x794] sm:$0xf0]  ;;  %v12525_v48 = vor.u32 %v16202_v61, %v12522_v41  ;;  %v16197_v38 = vld [vmem:[%s24251_s30 + $0x9a4] sm:$0xf] }
 0x307   : > { %v12233_v1 = vor.u32 %v16132_v5, %v12232_v14  ;;  %v12498_v59 = vld [vmem:[%s24251_s30 + $0x9b0] sm:$0xf0]  ;;  %v16198_v61 = vld [vmem:[%s24251_s30 + $0x9ac] sm:$0xf]  ;;  %v12506_v41 = vld [vmem:[%s24251_s30 + $0x9b8] sm:$0xf0] }
 0x308   : > { %3883 = vmatpush.bf16.msrb.mxu1 %v12517_v37  ;;  %v12501_v52 = vor.u32 %v16197_v38, %v12498_v59  ;;  %v12509_v29 = vor.u32 %v16198_v61, %v12506_v41  ;;  %v16190_v37 = vld [vmem:[%s24251_s30 + $0x96c] sm:$0xf]  ;;  %v12474_v38 = vld [vmem:[%s24251_s30 + $0x978] sm:$0xf0] }
 0x309   : > { %v3253_v60 = vpop.f32.mrf.mxu2  ;;  %3903 = vmatpush.bf16.msrb.mxu2 %v12249_v58  ;;  %v16200_v58 = vld [vmem:[%s24251_s30 + $0x9b4] sm:$0xf0]  ;;  %3940 = vmatpush.bf16.msra.mxu0 %v12521_v54  ;;  %v12477_v59 = vor.u32 %v16190_v37, %v12474_v38  ;;  %v12482_v54 = vld [vmem:[%s24251_s30 + $0x990] sm:$0xf0] }
 0x30a   : > { %3997 = vmatpush.bf16.msra.mxu3 %v12525_v48  ;;  %v12505_v14 = vor.u32 %v16200_v58, %v12504_v2  ;;  %v12488_v48 = vld [vmem:[%s24251_s30 + $0x988] sm:$0xf]  ;;  %v16196_v2 = vld [vmem:[%s24251_s30 + $0x994] sm:$0xf0]  ;;  %v12490_v58 = vld [vmem:[%s24251_s30 + $0x998] sm:$0xf0] }
 0x30b   : > { %v12489_v41 = vor.u32 %v16196_v2, %v12488_v48  ;;  %v16154_v2 = vld [vmem:[%s24251_s30 + $0x84c] sm:$0xf] }
 0x30c   : > { %v3274_v5 = vpop.f32.mrf.mxu3  ;;  %3884 = vmatpush.bf16.msrb.mxu1 %v12501_v52  ;;  %v16194_v52 = vld [vmem:[%s24251_s30 + $0x98c] sm:$0xf] }
 0x30d   : > { %v19393_v23 = vpack.c.bf16 %v3274_v5, %v3272_v42  ;;  %3904 = vmatpush.bf16.msrb.mxu2 %v12233_v1  ;;  %3941 = vmatpush.bf16.msra.mxu0 %v12505_v14  ;;  %v16193_v42 = vld [vmem:[%s24251_s30 + $0x984] sm:$0xf]  ;;  %v12458_v14 = vld [vmem:[%s24251_s30 + $0x958] sm:$0xf0]  ;;  %v12493_v37 = vor.u32 %v16194_v52, %v12490_v58 }
 0x30e   : > { %3998 = vmatpush.bf16.msra.mxu3 %v12509_v29  ;;  %v12485_v1 = vor.u32 %v16193_v42, %v12482_v54  ;;  %v16186_v29 = vld [vmem:[%s24251_s30 + $0x94c] sm:$0xf]  ;;  %v12346_v42 = vld [vmem:[%s24251_s30 + $0x878] sm:$0xf0] }
 0x30f   : > { %12542 = vmatmul.msk.bf16.vlgmr.msra.gmra.mxu2 %vm1491_vm4, %v19393_v23  ;;  %v12461_v38 = vor.u32 %v16186_v29, %v12458_v14  ;;  %v12330_v58 = vld [vmem:[%s24251_s30 + $0x858] sm:$0xf0]  ;;  %v16150_v14 = vld [vmem:[%s24251_s30 + $0x82c] sm:$0xf] }
 0x310   : > { %3885 = vmatpush.bf16.msrb.mxu1 %v12485_v1  ;;  %v12442_v1 = vld [vmem:[%s24251_s30 + $0x938] sm:$0xf0]  ;;  %v12333_v29 = vor.u32 %v16154_v2, %v12330_v58 }
 0x311   : > { %3973 = vmatpush.bf16.msra.mxu2 %v12477_v59  ;;  %v3255_v61 = vpop.f32.mrf.mxu2  ;;  %3942 = vmatpush.bf16.msra.mxu0 %v12489_v41  ;;  %v16158_v59 = vld [vmem:[%s24251_s30 + $0x86c] sm:$0xf]  ;;  %v12426_v41 = vld [vmem:[%s24251_s30 + $0x918] sm:$0xf0] }
 0x312   : > { %v19427_v5 = vpack.c.bf16 %v3255_v61, %v3253_v60  ;;  %v12349_v48 = vor.u32 %v16158_v59, %v12346_v42  ;;  %v16182_v60 = vld [vmem:[%s24251_s30 + $0x92c] sm:$0xf]  ;;  %3999 = vmatpush.bf16.msra.mxu3 %v12493_v37  ;;  %v12314_v37 = vld [vmem:[%s24251_s30 + $0x838] sm:$0xf0] }
 0x313   : > { %v12445_v52 = vor.u32 %v16182_v60, %v12442_v1  ;;  %v16178_v61 = vld [vmem:[%s24251_s30 + $0x90c] sm:$0xf]  ;;  %v12317_v42 = vor.u32 %v16150_v14, %v12314_v37  ;;  %v12410_v2 = vld [vmem:[%s24251_s30 + $0x8f8] sm:$0xf0] }
 0x314   : > { %v3277_v54 = vpop.f32.mrf.mxu3  ;;  %3810 = vmatmul.bf16.vlgmr.msra.gmra.mxu1 %v19427_v5  ;;  %3867 = vmatmul.bf16.vlgmr.msrb.gmra.mxu0 %v19427_v5  ;;  %v12429_v59 = vor.u32 %v16178_v61, %v12426_v41  ;;  %v16174_v1 = vld [vmem:[%s24251_s30 + $0x8ec] sm:$0xf] }
 0x315   : > { %3924 = vmatmul.bf16.vlgmr.msrb.gmra.mxu3 %v19427_v5  ;;  %3974 = vmatpush.bf16.msra.mxu2 %v12461_v38  ;;  %v12413_v58 = vor.u32 %v16174_v1, %v12410_v2  ;;  %v16170_v61 = vld [vmem:[%s24251_s30 + $0x8cc] sm:$0xf]  ;;  %v12378_v2 = vld [vmem:[%s24251_s30 + $0x8b8] sm:$0xf0] }
 0x316   : > { %3954 = vmatpush.bf16.msra.mxu1 %v12349_v48  ;;  %4051 = vmatpush.bf16.msrb.mxu0 %v17015_v12 }
 0x319   : > { %v3258_v38 = vpop.f32.mrf.mxu2  ;;  %3975 = vmatpush.bf16.msra.mxu2 %v12445_v52  ;;  %v16146_v52 = vld [vmem:[%s24251_s30 + $0x80c] sm:$0xf] }
 0x31a   : > { %3955 = vmatpush.bf16.msra.mxu1 %v12333_v29  ;;  %4052 = vmatpush.bf16.msrb.mxu0 %v17023_v16  ;;  %v12394_v29 = vld [vmem:[%s24251_s30 + $0x8d8] sm:$0xf0] }
 0x31b   : > { %v12397_v37 = vor.u32 %v16170_v61, %v12394_v29  ;;  %v16162_v61 = vld [vmem:[%s24251_s30 + $0x88c] sm:$0xf] }
 0x31c   : > { %v3279_v48 = vpop.f32.mrf.mxu3 }
 0x31d   : > { %v19464_v60 = vpack.c.bf16 %v3279_v48, %v3277_v54  ;;  %3976 = vmatpush.bf16.msra.mxu2 %v12429_v59  ;;  %v12298_v54 = vld [vmem:[%s24251_s30 + $0x818] sm:$0xf0] }
 0x31e   : > { %3956 = vmatpush.bf16.msra.mxu1 %v12317_v42  ;;  %4053 = vmatpush.bf16.msrb.mxu0 %v17036_v25  ;;  %v12301_v41 = vor.u32 %v16146_v52, %v12298_v54  ;;  %v16142_v42 = vld [vmem:[%s24251_s30 + $0x7ec] sm:$0xf]  ;;  %v12282_v48 = vld [vmem:[%s24251_s30 + $0x7f8] sm:$0xf0] }
 0x31f   : > { %12543 = vmatmul.msk.bf16.gmra.mxu2 %vm1491_vm4, %v19464_v60  ;;  %v12285_v1 = vor.u32 %v16142_v42, %v12282_v48  ;;  %v12266_v54 = vld [vmem:[%s24251_s30 + $0x7d8] sm:$0xf0] }
 0x321   : > { %v3260_v14 = vpop.f32.mrf.mxu2  ;;  %3977 = vmatpush.bf16.msra.mxu2 %v12413_v58  ;;  %v16138_v58 = vld [vmem:[%s24251_s30 + $0x7cc] sm:$0xf] }
 0x322   : > { %v3286_v59 = vpack.c.bf16 %v3260_v14, %v3258_v38  ;;  %3957 = vmatpush.bf16.msra.mxu1 %v12301_v41  ;;  %4054 = vmatpush.bf16.msrb.mxu0 %v17052_v34  ;;  %v16166_v38 = vld [vmem:[%s24251_s30 + $0x8ac] sm:$0xf]  ;;  %v12362_v41 = vld [vmem:[%s24251_s30 + $0x898] sm:$0xf0]  ;;  %v12269_v29 = vor.u32 %v16138_v58, %v12266_v54  ;;  %v12560_v58 = vld [vmem:[%s24250_s5 + $0x48] sm:$0xf] }
 0x323   : > { %v12381_v52 = vor.u32 %v16166_v38, %v12378_v2  ;;  %v16134_v14 = vld [vmem:[%s24251_s30 + $0x7ac] sm:$0xf]  ;;  %v12365_v42 = vor.u32 %v16162_v61, %v12362_v41  ;;  %v12234_v38 = vld [vmem:[%s24251_s30 + $0x798] sm:$0xf0] }
 0x324   : > { %3815 = vmatmul.bf16.gmra.mxu1 %v3286_v59  ;;  %3872 = vmatmul.bf16.gmra.mxu0 %v3286_v59 }
 0x325   : > { %3929 = vmatmul.bf16.gmra.mxu3 %v3286_v59  ;;  %3978 = vmatpush.bf16.msra.mxu2 %v12397_v37  ;;  %v12250_v37 = vld [vmem:[%s24251_s30 + $0x7b8] sm:$0xf0] }
 0x326   : > { %3958 = vmatpush.bf16.msra.mxu1 %v12285_v1  ;;  %4055 = vmatpush.bf16.msrb.mxu0 %v17068_v43  ;;  %v12253_v48 = vor.u32 %v16134_v14, %v12250_v37  ;;  %v16130_v1 = vld [vmem:[%s24251_s30 + $0x78c] sm:$0xf] }
 0x327   : > { %v12237_v2 = vor.u32 %v16130_v1, %v12234_v38 }
 0x329   : > { %3979 = vmatpush.bf16.msra.mxu2 %v12381_v52 }
 0x32a   : > { %3959 = vmatpush.bf16.msra.mxu1 %v12269_v29 }
 0x32d   : > { %3980 = vmatpush.bf16.msra.mxu2 %v12365_v42 }
 0x32e   : > { %3960 = vmatpush.bf16.msra.mxu1 %v12253_v48 }
 0x32f   : > { %3905 = vmatmul.bf16.vlgmr.msrb.gmra.mxu2 %v19285_v63 }
 0x331   : > { %4089 = vmatpush.bf16.msrb.mxu2 %v17044_v30 }
 0x332   : > { %3961 = vmatpush.bf16.msra.mxu1 %v12237_v2 }
 0x334   : > { %12544 = vmatmul.msk.bf16.vlgmr.msrb.gmra.mxu1 %vm1491_vm4, %v19393_v23  ;;  %12546 = vmatmul.msk.bf16.vlgmr.msra.gmra.mxu0 %vm1491_vm4, %v19393_v23 }
 0x335   : > { %12548 = vmatmul.msk.bf16.vlgmr.msra.gmra.mxu3 %vm1491_vm4, %v19393_v23  ;;  %4090 = vmatpush.bf16.msrb.mxu2 %v17060_v39  ;;  %v16209_v23 = vld [vmem:[%s24250_s5 + $0x40] sm:$0xff] }
 0x336   : > { %4070 = vmatpush.bf16.msrb.mxu1 %v17019_v15 }
 0x339   : > { %4091 = vmatpush.bf16.msrb.mxu2 %v17073_v45 }
 0x33a   : > { %4071 = vmatpush.bf16.msrb.mxu1 %v17026_v17 }
 0x33d   : > { %4092 = vmatpush.bf16.msrb.mxu2 %v17091_v50 }
 0x33e   : > { %4072 = vmatpush.bf16.msrb.mxu1 %v17039_v26 }
 0x33f   : > { %3910 = vmatmul.bf16.gmra.mxu2 %v19320_v46 }
 0x341   : > { %4093 = vmatpush.bf16.msrb.mxu2 %v17102_v53 }
 0x342   : > { %4073 = vmatpush.bf16.msrb.mxu1 %v17055_v35 }
 0x344   : > { %12545 = vmatmul.msk.bf16.gmra.mxu1 %vm1491_vm4, %v19464_v60  ;;  %12547 = vmatmul.msk.bf16.gmra.mxu0 %vm1491_vm4, %v19464_v60 }
 0x345   : > { %12549 = vmatmul.msk.bf16.gmra.mxu3 %vm1491_vm4, %v19464_v60  ;;  %v16210_v60 = vld [vmem:[%s24250_s5 + $0x48] sm:$0x10] }
 0x346   : > { %4074 = vmatpush.bf16.msrb.mxu1 %v17071_v44  ;;  %v12561_v52 = vor.u32 %v16210_v60, %v12560_v58 }
 0x34f   : > { %3981 = vmatmul.bf16.vlgmr.msra.gmra.mxu2 %v19427_v5  ;;  %v19563_v5 = vpop.f32.mrf.mxu0 }
 0x350   : > { %24306 = vst [vmem:[#allocation57_spill] sm:$0xff] %v19563_v5 }
 0x354   : > { %3962 = vmatmul.bf16.vlgmr.msra.gmra.mxu1 %v19285_v63  ;;  %12562 = vmatmul.msk.bf16.vlgmr.msrb.gmra.mxu0 %vm767_vm2, %v16209_v23 }
 0x35f   : > { %3986 = vmatmul.bf16.gmra.mxu2 %v3286_v59 }
 0x364   : > { %3967 = vmatmul.bf16.gmra.mxu1 %v19320_v46  ;;  %12563 = vmatmul.msk.bf16.gmra.mxu0 %vm767_vm2, %v12561_v52 }
 0x36f   : > { %12566 = vmatmul.msk.bf16.vlgmr.msrb.gmra.mxu2 %vm767_vm2, %v16209_v23 }
 0x371   : > { %v3792_v63 = vpop.f32.mrf.mxu0 }
 0x374   : > { %12564 = vmatmul.msk.bf16.vlgmr.msrb.gmra.mxu1 %vm767_vm2, %v16209_v23 }
 0x377   : > { %v3849_v61 = vpop.f32.mrf.mxu3 }
 0x379   : > { %v19567_v54 = vpop.f32.mrf.mxu0 }
 0x37f   : > { %12567 = vmatmul.msk.bf16.gmra.mxu2 %vm767_vm2, %v12561_v52  ;;  %v19573_v46 = vpop.f32.mrf.mxu3 }
 0x380   : > { %24307 = vst [vmem:[#allocation58_spill] sm:$0xff] %v19573_v46  ;;  %v12730_v46 = vld [vmem:[%s24251_s30 + $0xaa0] sm:$0xf] }
 0x381   : > { %v3797_v41 = vpop.f32.mrf.mxu0 }
 0x384   : > { %12565 = vmatmul.msk.bf16.gmra.mxu1 %vm767_vm2, %v12561_v52  ;;  %v12762_v52 = vld [vmem:[%s24251_s30 + $0xae0] sm:$0xf] }
 0x387   : > { %v3854_v1 = vpop.f32.mrf.mxu3 }
 0x389   : > { %v19571_v59 = vpop.f32.mrf.mxu0 }
 0x391   : > { %v3811_v29 = vpop.f32.mrf.mxu1  ;;  %v3868_v14 = vpop.f32.mrf.mxu0 }
 0x392   : > { %v3812_v37 = vadd.f32 %v3811_v29, %v3792_v63  ;;  %v3830_v42 = vpop.f32.mrf.mxu2  ;;  %v19575_v48 = vadd.f32 %v3868_v14, %v3849_v61  ;;  %v16241_v63 = vld [vmem:[%s24251_s30 + $0xaec] sm:$0xf0]  ;;  %v16239_v61 = vld [vmem:[%s24251_s30 + $0xae4] sm:$0xf]  ;;  %v12764_v29 = vld [vmem:[%s24251_s30 + $0xaf0] sm:$0xf0] }
 0x393   : > { %v12767_v14 = vor.u32 %v16239_v61, %v12764_v29  ;;  %v12748_v61 = vld [vmem:[%s24251_s30 + $0xad0] sm:$0xf0] }
 0x394   : > { %v3831_v38 = vadd.f32 %v3830_v42, %v3812_v37  ;;  %v19598_v37 = vpop.f32.mrf.mxu3  ;;  %v12746_v42 = vld [vmem:[%s24251_s30 + $0xac0] sm:$0xf] }
 0x395   : > { %24309 = vst [vmem:[#allocation60_spill] sm:$0xff] %v19598_v37  ;;  %4663 = vmatpush.bf16.msra.mxu2 %v12767_v14 }
 0x396   : > { %v19578_v2 = vadd.f32 %v3831_v38, %v18950_v18  ;;  %v12763_v18 = vor.u32 %v16241_v63, %v12762_v52  ;;  %v16237_v38 = vld [vmem:[%s24251_s30 + $0xacc] sm:$0xf0]  ;;  %v16235_v52 = vld [vmem:[%s24251_s30 + $0xac4] sm:$0xf] }
 0x397   : > { %v12747_v63 = vor.u32 %v16237_v38, %v12746_v42  ;;  %v12751_v14 = vor.u32 %v16235_v52, %v12748_v61  ;;  %v16233_v42 = vld [vmem:[%s24251_s30 + $0xaac] sm:$0xf0]  ;;  %v16231_v38 = vld [vmem:[%s24251_s30 + $0xaa4] sm:$0xf]  ;;  %v12714_v61 = vld [vmem:[%s24251_s30 + $0xa80] sm:$0xf] }
 0x398   : > { %4606 = vmatpush.bf16.msrb.mxu3 %v12763_v18  ;;  %v12731_v52 = vor.u32 %v16233_v42, %v12730_v46 }
 0x399   : > { %v19580_v23 = vpop.f32.mrf.mxu1  ;;  %v19582_v58 = vpop.f32.mrf.mxu0  ;;  %4664 = vmatpush.bf16.msra.mxu2 %v12751_v14 }
 0x39a   : > { %24308 = vst [vmem:[#allocation59_spill] sm:$0xff] %v19582_v58  ;;  %v19584_v60 = vpop.f32.mrf.mxu2 }
 0x39c   : > { %4607 = vmatpush.bf16.msrb.mxu3 %v12747_v63  ;;  %v3925_v46 = vpop.f32.mrf.mxu3 }
 0x3a0   : > { %4608 = vmatpush.bf16.msrb.mxu3 %v12731_v52  ;;  %v16225_v52 = vld [vmem:[%s24251_s30 + $0xa6c] sm:$0xf0] }
 0x3a1   : > { %v3816_v29 = vpop.f32.mrf.mxu1  ;;  %v3873_v18 = vpop.f32.mrf.mxu0 }
 0x3a2   : > { %v3817_v5 = vadd.f32 %v3816_v29, %v3797_v41  ;;  %v3835_v37 = vpop.f32.mrf.mxu2  ;;  %v19612_v58 = vadd.f32 %v3873_v18, %v3854_v1  ;;  %v12732_v41 = vld [vmem:[%s24251_s30 + $0xab0] sm:$0xf0]  ;;  %v16229_v29 = vld [vmem:[%s24251_s30 + $0xa8c] sm:$0xf0] }
 0x3a3   : > { %v12735_v1 = vor.u32 %v16231_v38, %v12732_v41  ;;  %v12698_v38 = vld [vmem:[%s24251_s30 + $0xa60] sm:$0xf]  ;;  %v16223_v41 = vld [vmem:[%s24251_s30 + $0xa64] sm:$0xf] }
 0x3a4   : > { %v3836_v32 = vadd.f32 %v3835_v37, %v3817_v5  ;;  %v16227_v5 = vld [vmem:[%s24251_s30 + $0xa84] sm:$0xf]  ;;  %v12715_v37 = vor.u32 %v16229_v29, %v12714_v61  ;;  %v12700_v61 = vld [vmem:[%s24251_s30 + $0xa70] sm:$0xf0] }
 0x3a5   : > { %4665 = vmatpush.bf16.msra.mxu2 %v12735_v1  ;;  %v12699_v1 = vor.u32 %v16225_v52, %v12698_v38  ;;  %v12703_v29 = vor.u32 %v16223_v41, %v12700_v61  ;;  %v12684_v38 = vld [vmem:[%s24251_s30 + $0xa50] sm:$0xf0]  ;;  %v19671_v61 = vpop.f32.mrf.mxu3 }
 0x3a6   : > { %v19627_v63 = vadd.f32 %v3836_v32, %v18999_v0  ;;  %v12716_v32 = vld [vmem:[%s24251_s30 + $0xa90] sm:$0xf0]  ;;  %4609 = vmatpush.bf16.msrb.mxu3 %v12715_v37  ;;  %v16221_v37 = vld [vmem:[%s24251_s30 + $0xa4c] sm:$0xf0]  ;;  %24312 = vst [vmem:[#allocation63_spill] sm:$0xff] %v19671_v61 }
 0x3a7   : > { %v12719_v14 = vor.u32 %v16227_v5, %v12716_v32  ;;  %v12682_v5 = vld [vmem:[%s24251_s30 + $0xa40] sm:$0xf]  ;;  %v16219_v32 = vld [vmem:[%s24251_s30 + $0xa44] sm:$0xf] }
 0x3a9   : > { %v19641_v0 = vpop.f32.mrf.mxu1  ;;  %v19643_v18 = vpop.f32.mrf.mxu0  ;;  %4666 = vmatpush.bf16.msra.mxu2 %v12719_v14  ;;  %v12683_v14 = vor.u32 %v16221_v37, %v12682_v5  ;;  %v16217_v5 = vld [vmem:[%s24251_s30 + $0xa2c] sm:$0xf0]  ;;  %v16215_v37 = vld [vmem:[%s24251_s30 + $0xa24] sm:$0xf] }
 0x3aa   : > { %24310 = vst [vmem:[#allocation61_spill] sm:$0xff] %v19643_v18  ;;  %v19645_v42 = vpop.f32.mrf.mxu2  ;;  %4610 = vmatpush.bf16.msrb.mxu3 %v12699_v1  ;;  %v12687_v1 = vor.u32 %v16219_v32, %v12684_v38 }
 0x3ab   : > { %24311 = vst [vmem:[#allocation62_spill] sm:$0xff] %v19645_v42 }
 0x3ad   : > { %4667 = vmatpush.bf16.msra.mxu2 %v12703_v29 }
 0x3ae   : > { %4611 = vmatpush.bf16.msrb.mxu3 %v12683_v14 }
 0x3b1   : > { %v3887_v52 = vpop.f32.mrf.mxu1  ;;  %v3944_v41 = vpop.f32.mrf.mxu0  ;;  %4668 = vmatpush.bf16.msra.mxu2 %v12687_v1 }
 0x3b2   : > { %v3888_v29 = vadd.f32 %v3887_v52, %v19575_v48  ;;  %v3906_v18 = vpop.f32.mrf.mxu2  ;;  %v12667_v48 = vor.u32 %v16217_v5, %v12666_v40  ;;  %v12650_v52 = vld [vmem:[%s24251_s30 + $0xa00] sm:$0xf]  ;;  %v16211_v40 = vld [vmem:[%s24251_s30 + $0xa04] sm:$0xf] }
 0x3b3   : > { %v3926_v56 = vadd.f32 %v3925_v46, %v3906_v18  ;;  %v12668_v46 = vld [vmem:[%s24251_s30 + $0xa30] sm:$0xf0] }
 0x3b4   : > { %v19684_v32 = vadd.f32 %v3888_v29, %v19054_v20  ;;  %v12671_v14 = vor.u32 %v16215_v37, %v12668_v46  ;;  %4612 = vmatpush.bf16.msrb.mxu3 %v12667_v48  ;;  %v16213_v20 = vld [vmem:[%s24251_s30 + $0xa0c] sm:$0xf0]  ;;  %v12890_v37 = vld [vmem:[%s24251_s30 + $0xbe0] sm:$0xf]  ;;  %v16271_v46 = vld [vmem:[%s24251_s30 + $0xbe4] sm:$0xf] }
 0x3b5   : > { %v3945_v18 = vadd.f32 %v3944_v41, %v3926_v56  ;;  %v12651_v1 = vor.u32 %v16213_v20, %v12650_v52  ;;  %v12652_v56 = vld [vmem:[%s24251_s30 + $0xa10] sm:$0xf0]  ;;  %v16273_v48 = vld [vmem:[%s24251_s30 + $0xbec] sm:$0xf0]  ;;  %v12898_v20 = vld [vmem:[%s24251_s30 + $0xbe8] sm:$0xf] }
 0x3b6   : > { %4669 = vmatpush.bf16.msra.mxu2 %v12671_v14  ;;  %v12655_v29 = vor.u32 %v16211_v40, %v12652_v56  ;;  %v12891_v14 = vor.u32 %v16273_v48, %v12890_v37  ;;  %v12892_v52 = vld [vmem:[%s24251_s30 + $0xbf0] sm:$0xf0]  ;;  %v16274_v40 = vld [vmem:[%s24251_s30 + $0xbf4] sm:$0xf0]  ;;  %v16269_v37 = vld [vmem:[%s24251_s30 + $0xbcc] sm:$0xf0] }
 0x3b7   : > { %v19690_v38 = vadd.f32 %v3945_v18, %v19057_v22  ;;  %v3930_v18 = vpop.f32.mrf.mxu3  ;;  %v12899_v56 = vor.u32 %v16274_v40, %v12898_v20  ;;  %v16267_v48 = vld [vmem:[%s24251_s30 + $0xbc4] sm:$0xf] }
 0x3b8   : > { %4613 = vmatpush.bf16.msrb.mxu3 %v12651_v1  ;;  %v12895_v1 = vor.u32 %v16271_v46, %v12892_v52  ;;  %4625 = vmatpush.bf16.msra.mxu0 %v12891_v14  ;;  %v12876_v46 = vld [vmem:[%s24251_s30 + $0xbd0] sm:$0xf0]  ;;  %v12882_v14 = vld [vmem:[%s24251_s30 + $0xbc8] sm:$0xf]  ;;  %v16270_v52 = vld [vmem:[%s24251_s30 + $0xbd4] sm:$0xf0] }
 0x3b9   : > { %v19704_v22 = vpop.f32.mrf.mxu1  ;;  %v19706_v41 = vpop.f32.mrf.mxu0 }
 0x3ba   : > { %24313 = vst [vmem:[#allocation64_spill] sm:$0xff] %v19704_v22  ;;  %v19708_v5 = vpop.f32.mrf.mxu2  ;;  %4670 = vmatpush.bf16.msra.mxu2 %v12655_v29  ;;  %v12874_v29 = vld [vmem:[%s24251_s30 + $0xbc0] sm:$0xf] }
 0x3bb   : > { %24314 = vst [vmem:[#allocation65_spill] sm:$0xff] %v19706_v41  ;;  %v12875_v41 = vor.u32 %v16269_v37, %v12874_v29  ;;  %v12858_v37 = vld [vmem:[%s24251_s30 + $0xba0] sm:$0xf] }
 0x3bc   : > { %24315 = vst [vmem:[#allocation66_spill] sm:$0xff] %v19708_v5  ;;  %4682 = vmatpush.bf16.msra.mxu3 %v12895_v1  ;;  %v12879_v1 = vor.u32 %v16267_v48, %v12876_v46  ;;  %v16265_v5 = vld [vmem:[%s24251_s30 + $0xbac] sm:$0xf0]  ;;  %v16263_v48 = vld [vmem:[%s24251_s30 + $0xba4] sm:$0xf] }
 0x3bd   : > { %4626 = vmatpush.bf16.msra.mxu0 %v12875_v41  ;;  %v12866_v41 = vld [vmem:[%s24251_s30 + $0xba8] sm:$0xf] }
 0x3be   : > { %4739 = vmatpush.bf16.msrb.mxu2 %v12899_v56  ;;  %v12883_v56 = vor.u32 %v16270_v52, %v12882_v14 }
 0x3c0   : > { %4683 = vmatpush.bf16.msra.mxu3 %v12879_v1  ;;  %v19768_v1 = vpop.f32.mrf.mxu3 }
 0x3c1   : > { %v3892_v20 = vpop.f32.mrf.mxu1  ;;  %v3949_v40 = vpop.f32.mrf.mxu0  ;;  %24316 = vst [vmem:[#allocation67_spill] sm:$0xff] %v19768_v1 }
 0x3c2   : > { %v3893_v22 = vadd.f32 %v3892_v20, %v19612_v58  ;;  %v3911_v61 = vpop.f32.mrf.mxu2  ;;  %4740 = vmatpush.bf16.msrb.mxu2 %v12883_v56  ;;  %v12859_v58 = vor.u32 %v16265_v5, %v12858_v37  ;;  %v16261_v5 = vld [vmem:[%s24251_s30 + $0xb8c] sm:$0xf0]  ;;  %v16262_v37 = vld [vmem:[%s24251_s30 + $0xb94] sm:$0xf0] }
 0x3c3   : > { %v3931_v29 = vadd.f32 %v3930_v18, %v3911_v61  ;;  %v12860_v61 = vld [vmem:[%s24251_s30 + $0xbb0] sm:$0xf0]  ;;  %v16266_v18 = vld [vmem:[%s24251_s30 + $0xbb4] sm:$0xf0] }
 0x3c4   : > { %v19757_v46 = vadd.f32 %v3893_v22, %v19129_v10  ;;  %v12863_v52 = vor.u32 %v16263_v48, %v12860_v61  ;;  %v12867_v20 = vor.u32 %v16266_v18, %v12866_v41  ;;  %4627 = vmatpush.bf16.msra.mxu0 %v12859_v58  ;;  %v12842_v22 = vld [vmem:[%s24251_s30 + $0xb80] sm:$0xf] }
 0x3c5   : > { %v3950_v14 = vadd.f32 %v3949_v40, %v3931_v29  ;;  %v16259_v40 = vld [vmem:[%s24251_s30 + $0xb84] sm:$0xf]  ;;  %v12843_v56 = vor.u32 %v16261_v5, %v12842_v22  ;;  %v12850_v29 = vld [vmem:[%s24251_s30 + $0xb88] sm:$0xf]  ;;  %v16257_v22 = vld [vmem:[%s24251_s30 + $0xb6c] sm:$0xf0] }
 0x3c6   : > { %4684 = vmatpush.bf16.msra.mxu3 %v12863_v52  ;;  %4741 = vmatpush.bf16.msrb.mxu2 %v12867_v20  ;;  %v12851_v41 = vor.u32 %v16262_v37, %v12850_v29  ;;  %v16289_v52 = vld [vmem:[%s24251_s30 + $0xc6c] sm:$0x30]  ;;  %v12826_v20 = vld [vmem:[%s24251_s30 + $0xb60] sm:$0xf]  ;;  %v12834_v29 = vld [vmem:[%s24251_s30 + $0xb68] sm:$0xf] }
 0x3c7   : > { %v19771_v10 = vadd.f32 %v3950_v14, %v19132_v6  ;;  %v12844_v6 = vld [vmem:[%s24251_s30 + $0xb90] sm:$0xf0]  ;;  %v12954_v14 = vld [vmem:[%s24251_s30 + $0xc60] sm:$0xf]  ;;  %v16258_v37 = vld [vmem:[%s24251_s30 + $0xb74] sm:$0xf0] }
 0x3c8   : > { %v12847_v61 = vor.u32 %v16259_v40, %v12844_v6  ;;  %4628 = vmatpush.bf16.msra.mxu0 %v12843_v56  ;;  %v12955_v5 = vor.u32 %v16289_v52, %v12954_v14  ;;  %v16255_v40 = vld [vmem:[%s24251_s30 + $0xb64] sm:$0xf]  ;;  %v12827_v56 = vor.u32 %v16257_v22, %v12826_v20  ;;  %v12828_v6 = vld [vmem:[%s24251_s30 + $0xb70] sm:$0xf0]  ;;  %v12835_v14 = vor.u32 %v16258_v37, %v12834_v29  ;;  %v12810_v52 = vld [vmem:[%s24251_s30 + $0xb40] sm:$0xf] }
 0x3c9   : > { %v19791_v48 = vpop.f32.mrf.mxu1  ;;  %v19793_v58 = vpop.f32.mrf.mxu0  ;;  %v16253_v20 = vld [vmem:[%s24251_s30 + $0xb4c] sm:$0xf0]  ;;  %v12938_v22 = vld [vmem:[%s24251_s30 + $0xc40] sm:$0xf] }
 0x3ca   : > { %24317 = vst [vmem:[#allocation68_spill] sm:$0xff] %v19791_v48  ;;  %v19795_v18 = vpop.f32.mrf.mxu2  ;;  %4685 = vmatpush.bf16.msra.mxu3 %v12847_v61  ;;  %4742 = vmatpush.bf16.msrb.mxu2 %v12851_v41  ;;  %v4595_v61 = vsel %vm1498_vm3, %v12955_v5, 0  ;;  %v12831_v41 = vor.u32 %v16255_v40, %v12828_v6  ;;  %v12811_v5 = vor.u32 %v16253_v20, %v12810_v52  ;;  %v16285_v40 = vld [vmem:[%s24251_s30 + $0xc4c] sm:$0xf0]  ;;  %v12812_v6 = vld [vmem:[%s24251_s30 + $0xb50] sm:$0xf0] }
 0x3cb   : > { %24318 = vst [vmem:[#allocation69_spill] sm:$0xff] %v19793_v58  ;;  %4648 = vmatpush.bf16.msra.mxu1 %v4595_v61  ;;  %v4001_v58 = vpop.f32.mrf.mxu3  ;;  %v12939_v61 = vor.u32 %v16285_v40, %v12938_v22  ;;  %v16254_v52 = vld [vmem:[%s24251_s30 + $0xb54] sm:$0xf0]  ;;  %v16249_v22 = vld [vmem:[%s24251_s30 + $0xb2c] sm:$0xf0] }
 0x3cc   : > { %24319 = vst [vmem:[#allocation70_spill] sm:$0xff] %v19795_v18  ;;  %4629 = vmatpush.bf16.msra.mxu0 %v12827_v56  ;;  %v16251_v56 = vld [vmem:[%s24251_s30 + $0xb44] sm:$0xf]  ;;  %v12794_v18 = vld [vmem:[%s24251_s30 + $0xb20] sm:$0xf] }
 0x3cd   : > { %v12922_v40 = vld [vmem:[%s24251_s30 + $0xc20] sm:$0xf] }
 0x3ce   : > { %4686 = vmatpush.bf16.msra.mxu3 %v12831_v41  ;;  %4743 = vmatpush.bf16.msrb.mxu2 %v12835_v14  ;;  %v12815_v41 = vor.u32 %v16251_v56, %v12812_v6  ;;  %v12818_v14 = vld [vmem:[%s24251_s30 + $0xb48] sm:$0xf]  ;;  %v12795_v6 = vor.u32 %v16249_v22, %v12794_v18  ;;  %v16250_v18 = vld [vmem:[%s24251_s30 + $0xb34] sm:$0xf0]  ;;  %v16245_v22 = vld [vmem:[%s24251_s30 + $0xb0c] sm:$0xf0] }
 0x3cf   : > { %v12819_v1 = vor.u32 %v16254_v52, %v12818_v14  ;;  %4649 = vmatpush.bf16.msra.mxu1 %v12939_v61  ;;  %v16247_v14 = vld [vmem:[%s24251_s30 + $0xb24] sm:$0xf]  ;;  %v12796_v52 = vld [vmem:[%s24251_s30 + $0xb30] sm:$0xf0] }
 0x3d0   : > { %4630 = vmatpush.bf16.msra.mxu0 %v12811_v5  ;;  %v16281_v5 = vld [vmem:[%s24251_s30 + $0xc2c] sm:$0xf0]  ;;  %v12799_v49 = vor.u32 %v16247_v14, %v12796_v52  ;;  %v12786_v52 = vld [vmem:[%s24251_s30 + $0xb08] sm:$0xf] }
 0x3d1   : > { %v3963_v29 = vpop.f32.mrf.mxu1  ;;  %v4057_v37 = vpop.f32.mrf.mxu0  ;;  %v12923_v48 = vor.u32 %v16281_v5, %v12922_v40  ;;  %v12906_v40 = vld [vmem:[%s24251_s30 + $0xc00] sm:$0xf] }
 0x3d2   : > { %v3982_v20 = vpop.f32.mrf.mxu2  ;;  %4687 = vmatpush.bf16.msra.mxu3 %v12815_v41  ;;  %4744 = vmatpush.bf16.msrb.mxu2 %v12819_v1  ;;  %v12778_v1 = vld [vmem:[%s24251_s30 + $0xb00] sm:$0xf] }
 0x3d3   : > { %v3983_v56 = vadd.f32 %v3982_v20, %v3963_v29  ;;  %v12802_v29 = vld [vmem:[%s24251_s30 + $0xb28] sm:$0xf]  ;;  %4650 = vmatpush.bf16.msra.mxu1 %v12923_v48  ;;  %v12780_v48 = vld [vmem:[%s24251_s30 + $0xb10] sm:$0xf0] }
 0x3d4   : > { %v12803_v41 = vor.u32 %v16250_v18, %v12802_v29  ;;  %4631 = vmatpush.bf16.msra.mxu0 %v12795_v6  ;;  %v16246_v29 = vld [vmem:[%s24251_s30 + $0xb14] sm:$0xf0]  ;;  %v19899_v18 = vpop.f32.mrf.mxu3 }
 0x3d5   : > { %v4002_v61 = vadd.f32 %v4001_v58, %v3983_v56  ;;  %v12779_v58 = vor.u32 %v16245_v22, %v12778_v1  ;;  %24321 = vst [vmem:[#allocation72_spill] sm:$0xff] %v19899_v18  ;;  %v12787_v1 = vor.u32 %v16246_v29, %v12786_v52  ;;  %v12770_v22 = vld [vmem:[%s24251_s30 + $0xae8] sm:$0xf]  ;;  %v16234_v52 = vld [vmem:[%s24251_s30 + $0xab4] sm:$0xf0] }
 0x3d6   : > { %4688 = vmatpush.bf16.msra.mxu3 %v12799_v49  ;;  %4745 = vmatpush.bf16.msrb.mxu2 %v12803_v41  ;;  %v16243_v49 = vld [vmem:[%s24251_s30 + $0xb04] sm:$0xf] }
 0x3d7   : > { %v19871_v20 = vadd.f32 %v4002_v61, %v19255_v51  ;;  %v16277_v51 = vld [vmem:[%s24251_s30 + $0xc0c] sm:$0xf0]  ;;  %v12783_v14 = vor.u32 %v16243_v49, %v12780_v48 }
 0x3d8   : > { %v12907_v5 = vor.u32 %v16277_v51, %v12906_v40  ;;  %4632 = vmatpush.bf16.msra.mxu0 %v12779_v58  ;;  %v16242_v40 = vld [vmem:[%s24251_s30 + $0xaf4] sm:$0xf0] }
 0x3d9   : > { %v19891_v56 = vpop.f32.mrf.mxu1  ;;  %v4059_v6 = vpop.f32.mrf.mxu0  ;;  %v12771_v51 = vor.u32 %v16242_v40, %v12770_v22  ;;  %v16238_v58 = vld [vmem:[%s24251_s30 + $0xad4] sm:$0xf0] }
 0x3da   : > { %24320 = vst [vmem:[#allocation71_spill] sm:$0xff] %v19891_v56  ;;  %v19901_v61 = vpop.f32.mrf.mxu2  ;;  %v19903_v41 = vpack.c.bf16 %v4059_v6, %v4057_v37  ;;  %4651 = vmatpush.bf16.msra.mxu1 %v12907_v5  ;;  %4689 = vmatpush.bf16.msra.mxu3 %v12783_v14  ;;  %v12754_v37 = vld [vmem:[%s24251_s30 + $0xac8] sm:$0xf]  ;;  %v16280_v56 = vld [vmem:[%s24251_s30 + $0xc2c] sm:$0xf] }
 0x3db   : > { %24322 = vst [vmem:[#allocation73_spill] sm:$0xff] %v19901_v61  ;;  %4746 = vmatpush.bf16.msrb.mxu2 %v12787_v1  ;;  %v12755_v49 = vor.u32 %v16238_v58, %v12754_v37  ;;  %v12738_v14 = vld [vmem:[%s24251_s30 + $0xaa8] sm:$0xf]  ;;  %v16230_v58 = vld [vmem:[%s24251_s30 + $0xa94] sm:$0xf0] }
 0x3dc   : > { %4614 = vmatmul.bf16.vlgmr.msrb.gmra.mxu3 %v19903_v41  ;;  %4671 = vmatmul.bf16.vlgmr.msra.gmra.mxu2 %v19903_v41  ;;  %v12739_v1 = vor.u32 %v16234_v52, %v12738_v14  ;;  %v4006_v22 = vpop.f32.mrf.mxu3  ;;  %v12722_v37 = vld [vmem:[%s24251_s30 + $0xa88] sm:$0xf]  ;;  %v12956_v14 = vld [vmem:[%s24251_s30 + $0xc70] sm:$0x30] }
 0x3dd   : > { %v12962_v52 = vld [vmem:[%s24251_s30 + $0xc68] sm:$0xf] }
 0x3de   : > { %4720 = vmatpush.bf16.msrb.mxu1 %v12771_v51 }
 0x3e1   : > { %v3968_v48 = vpop.f32.mrf.mxu1  ;;  %v4062_v6 = vpop.f32.mrf.mxu0 }
 0x3e2   : > { %v3987_v5 = vpop.f32.mrf.mxu2  ;;  %4721 = vmatpush.bf16.msrb.mxu1 %v12755_v49  ;;  %v12723_v49 = vor.u32 %v16230_v58, %v12722_v37  ;;  %v16288_v37 = vld [vmem:[%s24251_s30 + $0xc6c] sm:$0xf]  ;;  %v12964_v58 = vld [vmem:[%s24251_s30 + $0xc78] sm:$0x30] }
 0x3e3   : > { %v3988_v29 = vadd.f32 %v3987_v5, %v3968_v48 }
 0x3e5   : > { %v4007_v40 = vadd.f32 %v4006_v22, %v3988_v29 }
 0x3e6   : > { %4722 = vmatpush.bf16.msrb.mxu1 %v12739_v1  ;;  %v12706_v1 = vld [vmem:[%s24251_s30 + $0xa68] sm:$0xf] }
 0x3e7   : > { %v19926_v51 = vadd.f32 %v4007_v40, %v19310_v24  ;;  %v16287_v24 = vld [vmem:[%s24251_s30 + $0xc64] sm:$0xf] }
 0x3e8   : > { %v12959_v29 = vor.u32 %v16287_v24, %v12956_v14  ;;  %v12967_v24 = vor.u32 %v16288_v37, %v12964_v58  ;;  %v16283_v14 = vld [vmem:[%s24251_s30 + $0xc44] sm:$0xf] }
 0x3e9   : > { %v19934_v18 = vpop.f32.mrf.mxu1  ;;  %v4064_v61 = vpop.f32.mrf.mxu0 }
 0x3ea   : > { %24323 = vst [vmem:[#allocation74_spill] sm:$0xff] %v19934_v18  ;;  %v19936_v48 = vpop.f32.mrf.mxu2  ;;  %v19938_v5 = vpack.c.bf16 %v4064_v61, %v4062_v6  ;;  %4723 = vmatpush.bf16.msrb.mxu1 %v12723_v49  ;;  %v16226_v61 = vld [vmem:[%s24251_s30 + $0xa74] sm:$0xf0]  ;;  %v4598_v49 = vsel %vm1498_vm3, %v12959_v29, 0  ;;  %v4604_v37 = vsel %vm1498_vm3, %v12967_v24, 0 }
 0x3eb   : > { %24324 = vst [vmem:[#allocation75_spill] sm:$0xff] %v19936_v48  ;;  %v16290_v6 = vld [vmem:[%s24251_s30 + $0xc74] sm:$0x30]  ;;  %v12707_v22 = vor.u32 %v16226_v61, %v12706_v1  ;;  %v12940_v1 = vld [vmem:[%s24251_s30 + $0xc50] sm:$0xf0]  ;;  %4705 = vmatpush.bf16.msrb.mxu0 %v4598_v49  ;;  %4819 = vmatpush.bf16.msra.mxu2 %v4604_v37 }
 0x3ec   : > { %4619 = vmatmul.bf16.gmra.mxu3 %v19938_v5  ;;  %4676 = vmatmul.bf16.gmra.mxu2 %v19938_v5  ;;  %v12963_v40 = vor.u32 %v16290_v6, %v12962_v52  ;;  %v12943_v61 = vor.u32 %v16283_v14, %v12940_v1  ;;  %v12690_v6 = vld [vmem:[%s24251_s30 + $0xa48] sm:$0xf]  ;;  %v16222_v29 = vld [vmem:[%s24251_s30 + $0xa54] sm:$0xf0]  ;;  %v16284_v14 = vld [vmem:[%s24251_s30 + $0xc4c] sm:$0xf] }
 0x3ed   : > { %v12691_v58 = vor.u32 %v16222_v29, %v12690_v6  ;;  %v12946_v49 = vld [vmem:[%s24251_s30 + $0xc48] sm:$0xf]  ;;  %v12948_v1 = vld [vmem:[%s24251_s30 + $0xc58] sm:$0xf0]  ;;  %v16279_v24 = vld [vmem:[%s24251_s30 + $0xc24] sm:$0xf] }
 0x3ee   : > { %4724 = vmatpush.bf16.msrb.mxu1 %v12707_v22  ;;  %v4601_v52 = vsel %vm1498_vm3, %v12963_v40, 0  ;;  %v16286_v22 = vld [vmem:[%s24251_s30 + $0xc54] sm:$0xf0]  ;;  %v12951_v6 = vor.u32 %v16284_v14, %v12948_v1  ;;  %v12924_v29 = vld [vmem:[%s24251_s30 + $0xc30] sm:$0xf0] }
 0x3ef   : > { %4762 = vmatpush.bf16.msrb.mxu3 %v4601_v52  ;;  %v12947_v40 = vor.u32 %v16286_v22, %v12946_v49  ;;  %v12674_v37 = vld [vmem:[%s24251_s30 + $0xa28] sm:$0xf]  ;;  %v16218_v49 = vld [vmem:[%s24251_s30 + $0xa34] sm:$0xf0]  ;;  %4706 = vmatpush.bf16.msrb.mxu0 %v12943_v61  ;;  %v12927_v48 = vor.u32 %v16279_v24, %v12924_v29  ;;  %v12932_v61 = vld [vmem:[%s24251_s30 + $0xc38] sm:$0xf0] }
 0x3f0   : > { %v12675_v18 = vor.u32 %v16218_v49, %v12674_v37  ;;  %v12930_v14 = vld [vmem:[%s24251_s30 + $0xc28] sm:$0xf]  ;;  %v16282_v1 = vld [vmem:[%s24251_s30 + $0xc34] sm:$0xf0]  ;;  %v12908_v24 = vld [vmem:[%s24251_s30 + $0xc10] sm:$0xf0]  ;;  %4820 = vmatpush.bf16.msra.mxu2 %v12951_v6  ;;  %v12935_v29 = vor.u32 %v16280_v56, %v12932_v61 }
 0x3f1   : > { %v4076_v52 = vpop.f32.mrf.mxu1  ;;  %v12931_v27 = vor.u32 %v16282_v1, %v12930_v14  ;;  %v12658_v37 = vld [vmem:[%s24251_s30 + $0xa08] sm:$0xf]  ;;  %v16278_v14 = vld [vmem:[%s24251_s30 + $0xc14] sm:$0xf0]  ;;  %v16276_v61 = vld [vmem:[%s24251_s30 + $0xc0c] sm:$0xf] }
 0x3f2   : > { %v4095_v22 = vpop.f32.mrf.mxu2  ;;  %4725 = vmatpush.bf16.msrb.mxu1 %v12691_v58  ;;  %v16275_v58 = vld [vmem:[%s24251_s30 + $0xc04] sm:$0xf]  ;;  %v12914_v49 = vld [vmem:[%s24251_s30 + $0xc08] sm:$0xf] }
 0x3f3   : > { %4763 = vmatpush.bf16.msrb.mxu3 %v12947_v40  ;;  %v16214_v40 = vld [vmem:[%s24251_s30 + $0xa14] sm:$0xf0]  ;;  %4707 = vmatpush.bf16.msrb.mxu0 %v12927_v48  ;;  %v12911_v6 = vor.u32 %v16275_v58, %v12908_v24  ;;  %v12915_v1 = vor.u32 %v16278_v14, %v12914_v49  ;;  %v12772_v58 = vld [vmem:[%s24251_s30 + $0xaf8] sm:$0xf0]  ;;  %v16232_v14 = vld [vmem:[%s24251_s30 + $0xaac] sm:$0xf] }
 0x3f4   : > { %v12659_v56 = vor.u32 %v16214_v40, %v12658_v37  ;;  %4821 = vmatpush.bf16.msra.mxu2 %v12935_v29  ;;  %v12756_v24 = vld [vmem:[%s24251_s30 + $0xad8] sm:$0xf0]  ;;  %v16268_v29 = vld [vmem:[%s24251_s30 + $0xbcc] sm:$0xf] }
 0x3f5   : > { %v12884_v40 = vld [vmem:[%s24251_s30 + $0xbd8] sm:$0xf0] }
 0x3f6   : > { %4726 = vmatpush.bf16.msrb.mxu1 %v12675_v18  ;;  %v12919_v18 = vor.u32 %v16276_v61, %v12916_v7  ;;  %v12887_v49 = vor.u32 %v16268_v29, %v12884_v40 }
 0x3f7   : > { %4764 = vmatpush.bf16.msrb.mxu3 %v12931_v27  ;;  %4708 = vmatpush.bf16.msrb.mxu0 %v12911_v6  ;;  %v16240_v27 = vld [vmem:[%s24251_s30 + $0xaec] sm:$0xf]  ;;  %v12740_v6 = vld [vmem:[%s24251_s30 + $0xab8] sm:$0xf0] }
 0x3f8   : > { %v12775_v7 = vor.u32 %v16240_v27, %v12772_v58  ;;  %4822 = vmatpush.bf16.msra.mxu2 %v12919_v18  ;;  %v12743_v27 = vor.u32 %v16232_v14, %v12740_v6  ;;  %v16224_v14 = vld [vmem:[%s24251_s30 + $0xa6c] sm:$0xf]  ;;  %v12708_v6 = vld [vmem:[%s24251_s30 + $0xa78] sm:$0xf0] }
 0x3f9   : > { %v4078_v33 = vpop.f32.mrf.mxu1 }
 0x3fa   : > { %v20041_v47 = vpack.c.bf16 %v4078_v33, %v4076_v52  ;;  %v4097_v42 = vpop.f32.mrf.mxu2  ;;  %4727 = vmatpush.bf16.msrb.mxu1 %v12659_v56  ;;  %v16272_v33 = vld [vmem:[%s24251_s30 + $0xbec] sm:$0xf] }
 0x3fb   : > { %v20043_v48 = vpack.c.bf16 %v4097_v42, %v4095_v22  ;;  %4765 = vmatpush.bf16.msrb.mxu3 %v12915_v1  ;;  %v12900_v42 = vld [vmem:[%s24251_s30 + $0xbf8] sm:$0xf0]  ;;  %v16236_v22 = vld [vmem:[%s24251_s30 + $0xacc] sm:$0xf] }
 0x3fc   : > { %4633 = vmatmul.bf16.vlgmr.msra.gmra.mxu0 %v20041_v47  ;;  %4690 = vmatmul.bf16.vlgmr.msra.gmra.mxu3 %v20041_v47  ;;  %v12903_v52 = vor.u32 %v16272_v33, %v12900_v42  ;;  %v12759_v37 = vor.u32 %v16236_v22, %v12756_v24  ;;  %v16264_v56 = vld [vmem:[%s24251_s30 + $0xbac] sm:$0xf]  ;;  %v12868_v1 = vld [vmem:[%s24251_s30 + $0xbb8] sm:$0xf0] }
 0x3fd   : > { %12968 = vmatmul.msk.bf16.vlgmr.msra.gmra.mxu1 %vm1491_vm4, %v20043_v48  ;;  %4747 = vmatmul.bf16.vlgmr.msrb.gmra.mxu2 %v20041_v47  ;;  %v12871_v58 = vor.u32 %v16264_v56, %v12868_v1  ;;  %v16228_v33 = vld [vmem:[%s24251_s30 + $0xa8c] sm:$0xf]  ;;  %v12711_v1 = vor.u32 %v16224_v14, %v12708_v6 }
 0x3fe   : > { %4777 = vmatpush.bf16.msra.mxu0 %v12775_v7  ;;  %4796 = vmatpush.bf16.msra.mxu1 %v12903_v52  ;;  %v12724_v7 = vld [vmem:[%s24251_s30 + $0xa98] sm:$0xf0]  ;;  %v16260_v42 = vld [vmem:[%s24251_s30 + $0xb8c] sm:$0xf] }
 0x3ff   : > { %4874 = vmatpush.bf16.msra.mxu3 %v17015_v12  ;;  %v12852_v52 = vld [vmem:[%s24251_s30 + $0xb98] sm:$0xf0]  ;;  %v12727_v22 = vor.u32 %v16228_v33, %v12724_v7  ;;  %v16256_v56 = vld [vmem:[%s24251_s30 + $0xb6c] sm:$0xf] }
 0x400   : > { %v12855_v24 = vor.u32 %v16260_v42, %v12852_v52  ;;  %v16252_v33 = vld [vmem:[%s24251_s30 + $0xb4c] sm:$0xf]  ;;  %v12820_v42 = vld [vmem:[%s24251_s30 + $0xb58] sm:$0xf0] }
 0x401   : > { %v4081_v61 = vpop.f32.mrf.mxu1  ;;  %v12823_v52 = vor.u32 %v16252_v33, %v12820_v42  ;;  %v12986_v33 = vld [vmem:[%s24250_s5 + $0x58] sm:$0xf] }
 0x402   : > { %v4100_v18 = vpop.f32.mrf.mxu2  ;;  %4778 = vmatpush.bf16.msra.mxu0 %v12759_v37  ;;  %4797 = vmatpush.bf16.msra.mxu1 %v12887_v49 }
 0x403   : > { %4875 = vmatpush.bf16.msra.mxu3 %v17023_v16 }
 0x406   : > { %4779 = vmatpush.bf16.msra.mxu0 %v12743_v27  ;;  %4798 = vmatpush.bf16.msra.mxu1 %v12871_v58  ;;  %v16220_v27 = vld [vmem:[%s24251_s30 + $0xa4c] sm:$0xf]  ;;  %v12692_v58 = vld [vmem:[%s24251_s30 + $0xa58] sm:$0xf0] }
 0x407   : > { %4876 = vmatpush.bf16.msra.mxu3 %v17036_v25  ;;  %v12695_v7 = vor.u32 %v16220_v27, %v12692_v58 }
 0x409   : > { %v4083_v29 = vpop.f32.mrf.mxu1 }
 0x40a   : > { %v20101_v37 = vpack.c.bf16 %v4083_v29, %v4081_v61  ;;  %v4102_v40 = vpop.f32.mrf.mxu2  ;;  %4780 = vmatpush.bf16.msra.mxu0 %v12727_v22  ;;  %4799 = vmatpush.bf16.msra.mxu1 %v12855_v24  ;;  %v12836_v61 = vld [vmem:[%s24251_s30 + $0xb78] sm:$0xf0]  ;;  %v16216_v22 = vld [vmem:[%s24251_s30 + $0xa2c] sm:$0xf] }
 0x40b   : > { %v4110_v49 = vpack.c.bf16 %v4102_v40, %v4100_v18  ;;  %4877 = vmatpush.bf16.msra.mxu3 %v17052_v34  ;;  %v12839_v18 = vor.u32 %v16256_v56, %v12836_v61  ;;  %v12676_v24 = vld [vmem:[%s24251_s30 + $0xa38] sm:$0xf0]  ;;  %v16248_v29 = vld [vmem:[%s24251_s30 + $0xb2c] sm:$0xf] }
 0x40c   : > { %4638 = vmatmul.bf16.gmra.mxu0 %v20101_v37  ;;  %4695 = vmatmul.bf16.gmra.mxu3 %v20101_v37  ;;  %v12804_v40 = vld [vmem:[%s24251_s30 + $0xb38] sm:$0xf0]  ;;  %v12679_v14 = vor.u32 %v16216_v22, %v12676_v24  ;;  %v16212_v56 = vld [vmem:[%s24251_s30 + $0xa0c] sm:$0xf] }
 0x40d   : > { %12969 = vmatmul.msk.bf16.gmra.mxu1 %vm1491_vm4, %v4110_v49  ;;  %4752 = vmatmul.bf16.gmra.mxu2 %v20101_v37  ;;  %v12807_v6 = vor.u32 %v16248_v29, %v12804_v40  ;;  %v16244_v61 = vld [vmem:[%s24251_s30 + $0xb0c] sm:$0xf] }
 0x40e   : > { %4781 = vmatpush.bf16.msra.mxu0 %v12711_v1  ;;  %4800 = vmatpush.bf16.msra.mxu1 %v12839_v18  ;;  %v12660_v1 = vld [vmem:[%s24251_s30 + $0xa18] sm:$0xf0] }
 0x40f   : > { %4878 = vmatpush.bf16.msra.mxu3 %v17068_v43  ;;  %v12788_v18 = vld [vmem:[%s24251_s30 + $0xb18] sm:$0xf0]  ;;  %v12663_v27 = vor.u32 %v16212_v56, %v12660_v1 }
 0x410   : > { %v12791_v58 = vor.u32 %v16244_v61, %v12788_v18 }
 0x412   : > { %4782 = vmatpush.bf16.msra.mxu0 %v12695_v7  ;;  %4801 = vmatpush.bf16.msra.mxu1 %v12823_v52 }
 0x416   : > { %4783 = vmatpush.bf16.msra.mxu0 %v12679_v14  ;;  %4802 = vmatpush.bf16.msra.mxu1 %v12807_v6 }
 0x41a   : > { %4784 = vmatpush.bf16.msra.mxu0 %v12663_v27  ;;  %4803 = vmatpush.bf16.msra.mxu1 %v12791_v58 }
 0x41c   : > { %12970 = vmatmul.msk.bf16.vlgmr.msrb.gmra.mxu0 %vm1491_vm4, %v20043_v48  ;;  %12972 = vmatmul.msk.bf16.vlgmr.msrb.gmra.mxu3 %vm1491_vm4, %v20043_v48 }
 0x41d   : > { %4728 = vmatmul.bf16.vlgmr.msrb.gmra.mxu1 %v19903_v41  ;;  %12974 = vmatmul.msk.bf16.vlgmr.msra.gmra.mxu2 %vm1491_vm4, %v20043_v48  ;;  %v16291_v48 = vld [vmem:[%s24250_s5 + $0x50] sm:$0xff] }
 0x41e   : > { %4893 = vmatpush.bf16.msrb.mxu0 %v17019_v15  ;;  %4912 = vmatpush.bf16.msrb.mxu1 %v17044_v30 }
 0x422   : > { %4894 = vmatpush.bf16.msrb.mxu0 %v17026_v17  ;;  %4913 = vmatpush.bf16.msrb.mxu1 %v17060_v39 }
 0x426   : > { %4895 = vmatpush.bf16.msrb.mxu0 %v17039_v26  ;;  %4914 = vmatpush.bf16.msrb.mxu1 %v17073_v45 }
 0x42a   : > { %4896 = vmatpush.bf16.msrb.mxu0 %v17055_v35  ;;  %4915 = vmatpush.bf16.msrb.mxu1 %v17091_v50 }
 0x42c   : > { %12971 = vmatmul.msk.bf16.gmra.mxu0 %vm1491_vm4, %v4110_v49  ;;  %12973 = vmatmul.msk.bf16.gmra.mxu3 %vm1491_vm4, %v4110_v49 }
 0x42d   : > { %4733 = vmatmul.bf16.gmra.mxu1 %v19938_v5  ;;  %12975 = vmatmul.msk.bf16.gmra.mxu2 %vm1491_vm4, %v4110_v49  ;;  %v16292_v49 = vld [vmem:[%s24250_s5 + $0x58] sm:$0x10] }
 0x42e   : > { %4897 = vmatpush.bf16.msrb.mxu0 %v17071_v44  ;;  %4916 = vmatpush.bf16.msrb.mxu1 %v17102_v53  ;;  %v12987_v7 = vor.u32 %v16292_v49, %v12986_v33  ;;  %v13188_v49 = vld [vmem:[%s24251_s30 + $0xd60] sm:$0xf] }
 0x43c   : > { %4785 = vmatmul.bf16.vlgmr.msra.gmra.mxu0 %v19903_v41  ;;  %12988 = vmatmul.msk.bf16.vlgmr.msra.gmra.mxu3 %vm767_vm2, %v16291_v48  ;;  %v20193_v41 = vpop.f32.mrf.mxu3 }
 0x43d   : > { %4804 = vmatmul.bf16.vlgmr.msra.gmra.mxu1 %v20041_v47  ;;  %24325 = vst [vmem:[#allocation76_spill] sm:$0xff] %v20193_v41  ;;  %v16319_v41 = vld [vmem:[%s24251_s30 + $0xd4c] sm:$0xf0] }
 0x44c   : > { %4790 = vmatmul.bf16.gmra.mxu0 %v19938_v5  ;;  %12989 = vmatmul.msk.bf16.gmra.mxu3 %vm767_vm2, %v12987_v7 }
 0x44d   : > { %4809 = vmatmul.bf16.gmra.mxu1 %v20101_v37 }
 0x45c   : > { %12990 = vmatmul.msk.bf16.vlgmr.msrb.gmra.mxu0 %vm767_vm2, %v16291_v48 }
 0x45d   : > { %12992 = vmatmul.msk.bf16.vlgmr.msrb.gmra.mxu1 %vm767_vm2, %v16291_v48 }
 0x45f   : > { %v4615_v47 = vpop.f32.mrf.mxu3  ;;  %v4672_v52 = vpop.f32.mrf.mxu2 }
 0x467   : > { %v20197_v42 = vpop.f32.mrf.mxu3  ;;  %v20201_v5 = vpop.f32.mrf.mxu2 }
 0x468   : > { %24326 = vst [vmem:[#allocation77_spill] sm:$0xff] %v20201_v5  ;;  %v13108_v5 = vld [vmem:[%s24251_s30 + $0xcc0] sm:$0xf] }
 0x46c   : > { %12991 = vmatmul.msk.bf16.gmra.mxu0 %vm767_vm2, %v12987_v7 }
 0x46d   : > { %12993 = vmatmul.msk.bf16.gmra.mxu1 %vm767_vm2, %v12987_v7  ;;  %v16321_v7 = vld [vmem:[%s24251_s30 + $0xd64] sm:$0xf] }
 0x46f   : > { %v4620_v22 = vpop.f32.mrf.mxu3  ;;  %v4677_v14 = vpop.f32.mrf.mxu2 }
 0x477   : > { %v20203_v24 = vpop.f32.mrf.mxu3  ;;  %v20212_v58 = vpop.f32.mrf.mxu2 }
 0x478   : > { %24327 = vst [vmem:[#allocation78_spill] sm:$0xff] %v20203_v24 }
 0x479   : > { %v4634_v37 = vpop.f32.mrf.mxu0  ;;  %24328 = vst [vmem:[#allocation79_spill] sm:$0xff] %v20212_v58 }
 0x47a   : > { %v4635_v29 = vadd.f32 %v4634_v37, %v4615_v47  ;;  %v4653_v40 = vpop.f32.mrf.mxu1 }
 0x47c   : > { %v4654_v6 = vadd.f32 %v4653_v40, %v4635_v29  ;;  %v13190_v29 = vld [vmem:[%s24251_s30 + $0xd70] sm:$0xf0] }
 0x47d   : > { %v13193_v40 = vor.u32 %v16321_v7, %v13190_v29 }
 0x47e   : > { %v20206_v56 = vadd.f32 %v4654_v6, %v19578_v2  ;;  %v16323_v2 = vld [vmem:[%s24251_s30 + $0xd6c] sm:$0xf0] }
 0x47f   : > { %v4691_v1 = vpop.f32.mrf.mxu3  ;;  %v13189_v37 = vor.u32 %v16323_v2, %v13188_v49  ;;  %5486 = vmatpush.bf16.msra.mxu1 %v13193_v40  ;;  %v13174_v2 = vld [vmem:[%s24251_s30 + $0xd50] sm:$0xf0]  ;;  %v13156_v40 = vld [vmem:[%s24251_s30 + $0xd20] sm:$0xf] }
 0x480   : > { %v4692_v61 = vadd.f32 %v4691_v1, %v4672_v52  ;;  %v13172_v1 = vld [vmem:[%s24251_s30 + $0xd40] sm:$0xf] }
 0x481   : > { %v20208_v18 = vpop.f32.mrf.mxu0  ;;  %5429 = vmatpush.bf16.msrb.mxu2 %v13189_v37  ;;  %v13173_v49 = vor.u32 %v16319_v41, %v13172_v1  ;;  %v16313_v41 = vld [vmem:[%s24251_s30 + $0xd24] sm:$0xf]  ;;  %v13158_v1 = vld [vmem:[%s24251_s30 + $0xd30] sm:$0xf0] }
 0x482   : > { %v20210_v27 = vpop.f32.mrf.mxu1 }
 0x485   : > { %5430 = vmatpush.bf16.msrb.mxu2 %v13173_v49  ;;  %v13140_v49 = vld [vmem:[%s24251_s30 + $0xd00] sm:$0xf] }
 0x487   : > { %v20214_v48 = vpop.f32.mrf.mxu3 }
 0x488   : > { %24329 = vst [vmem:[#allocation80_spill] sm:$0xff] %v20214_v48 }
 0x489   : > { %v4639_v33 = vpop.f32.mrf.mxu0 }
 0x48a   : > { %v4640_v47 = vadd.f32 %v4639_v33, %v4620_v22  ;;  %v4658_v52 = vpop.f32.mrf.mxu1  ;;  %v16317_v22 = vld [vmem:[%s24251_s30 + $0xd44] sm:$0xf] }
 0x48c   : > { %v4659_v6 = vadd.f32 %v4658_v52, %v4640_v47  ;;  %v13177_v47 = vor.u32 %v16317_v22, %v13174_v2  ;;  %v4748_v52 = vpop.f32.mrf.mxu2  ;;  %v13161_v22 = vor.u32 %v16313_v41, %v13158_v1  ;;  %v16311_v2 = vld [vmem:[%s24251_s30 + $0xd0c] sm:$0xf0]  ;;  %v13124_v1 = vld [vmem:[%s24251_s30 + $0xce0] sm:$0xf] }
 0x48e   : > { %v20238_v33 = vadd.f32 %v4659_v6, %v19627_v63  ;;  %5487 = vmatpush.bf16.msra.mxu1 %v13177_v47  ;;  %v16315_v63 = vld [vmem:[%s24251_s30 + $0xd2c] sm:$0xf0]  ;;  %v13141_v47 = vor.u32 %v16311_v2, %v13140_v49  ;;  %v16305_v49 = vld [vmem:[%s24251_s30 + $0xce4] sm:$0xf] }
 0x48f   : > { %v4696_v7 = vpop.f32.mrf.mxu3 }
 0x490   : > { %v20243_v37 = vadd.f32 %v4696_v7, %v4677_v14  ;;  %v13157_v14 = vor.u32 %v16315_v63, %v13156_v40  ;;  %v16309_v7 = vld [vmem:[%s24251_s30 + $0xd04] sm:$0xf]  ;;  %v13142_v40 = vld [vmem:[%s24251_s30 + $0xd10] sm:$0xf0] }
 0x491   : > { %v20245_v29 = vpop.f32.mrf.mxu0  ;;  %v13145_v41 = vor.u32 %v16309_v7, %v13142_v40 }
 0x492   : > { %24330 = vst [vmem:[#allocation81_spill] sm:$0xff] %v20245_v29  ;;  %v20256_v6 = vpop.f32.mrf.mxu1  ;;  %5431 = vmatpush.bf16.msrb.mxu2 %v13157_v14  ;;  %5488 = vmatpush.bf16.msra.mxu1 %v13161_v22  ;;  %v16307_v22 = vld [vmem:[%s24251_s30 + $0xcec] sm:$0xf0] }
 0x493   : > { %24331 = vst [vmem:[#allocation82_spill] sm:$0xff] %v20256_v6  ;;  %v13125_v7 = vor.u32 %v16307_v22, %v13124_v1 }
 0x494   : > { %v20284_v2 = vpop.f32.mrf.mxu2 }
 0x495   : > { %24333 = vst [vmem:[#allocation84_spill] sm:$0xff] %v20284_v2  ;;  %v16347_v2 = vld [vmem:[%s24251_s30 + $0xe2c] sm:$0xf0] }
 0x496   : > { %5432 = vmatpush.bf16.msrb.mxu2 %v13141_v47  ;;  %5489 = vmatpush.bf16.msra.mxu1 %v13145_v41  ;;  %v13126_v47 = vld [vmem:[%s24251_s30 + $0xcf0] sm:$0xf0] }
 0x497   : > { %v20273_v63 = vpop.f32.mrf.mxu3  ;;  %v13129_v41 = vor.u32 %v16305_v49, %v13126_v47  ;;  %v13092_v49 = vld [vmem:[%s24251_s30 + $0xca0] sm:$0xf] }
 0x498   : > { %24332 = vst [vmem:[#allocation83_spill] sm:$0xff] %v20273_v63 }
 0x499   : > { %v4710_v14 = vpop.f32.mrf.mxu0 }
 0x49a   : > { %v4711_v58 = vadd.f32 %v4710_v14, %v4692_v61  ;;  %v4729_v63 = vpop.f32.mrf.mxu1  ;;  %5433 = vmatpush.bf16.msrb.mxu2 %v13125_v7  ;;  %5490 = vmatpush.bf16.msra.mxu1 %v13129_v41  ;;  %v16303_v61 = vld [vmem:[%s24251_s30 + $0xccc] sm:$0xf0]  ;;  %v16301_v14 = vld [vmem:[%s24251_s30 + $0xcc4] sm:$0xf] }
 0x49b   : > { %v4749_v40 = vadd.f32 %v4748_v52, %v4729_v63  ;;  %v13109_v1 = vor.u32 %v16303_v61, %v13108_v5  ;;  %v16299_v7 = vld [vmem:[%s24251_s30 + $0xcac] sm:$0xf0]  ;;  %v16297_v5 = vld [vmem:[%s24251_s30 + $0xca4] sm:$0xf]  ;;  %v13094_v61 = vld [vmem:[%s24251_s30 + $0xcb0] sm:$0xf0] }
 0x49c   : > { %v20290_v48 = vadd.f32 %v4711_v58, %v19684_v32  ;;  %v13110_v32 = vld [vmem:[%s24251_s30 + $0xcd0] sm:$0xf0]  ;;  %v13093_v41 = vor.u32 %v16299_v7, %v13092_v49  ;;  %v16293_v49 = vld [vmem:[%s24251_s30 + $0xc84] sm:$0xf] }
 0x49d   : > { %v13113_v52 = vor.u32 %v16301_v14, %v13110_v32  ;;  %v13097_v14 = vor.u32 %v16297_v5, %v13094_v61  ;;  %v16355_v32 = vld [vmem:[%s24251_s30 + $0xe6c] sm:$0xf0]  ;;  %v13078_v5 = vld [vmem:[%s24251_s30 + $0xc90] sm:$0xf0] }
 0x49e   : > { %5434 = vmatpush.bf16.msrb.mxu2 %v13109_v1  ;;  %v13316_v1 = vld [vmem:[%s24251_s30 + $0xe60] sm:$0xf]  ;;  %v13081_v61 = vor.u32 %v16293_v49, %v13078_v5 }
 0x49f   : > { %v4767_v58 = vpop.f32.mrf.mxu3  ;;  %5491 = vmatpush.bf16.msra.mxu1 %v13113_v52  ;;  %v13076_v52 = vld [vmem:[%s24251_s30 + $0xc80] sm:$0xf] }
 0x4a0   : > { %v4768_v63 = vadd.f32 %v4767_v58, %v4749_v40  ;;  %v4753_v58 = vpop.f32.mrf.mxu2 }
 0x4a1   : > { %v20304_v22 = vpop.f32.mrf.mxu0 }
 0x4a2   : > { %24334 = vst [vmem:[#allocation85_spill] sm:$0xff] %v20304_v22  ;;  %v20316_v47 = vadd.f32 %v4768_v63, %v19690_v38  ;;  %v20318_v40 = vpop.f32.mrf.mxu1  ;;  %5435 = vmatpush.bf16.msrb.mxu2 %v13093_v41  ;;  %v13317_v38 = vor.u32 %v16355_v32, %v13316_v1  ;;  %v16295_v63 = vld [vmem:[%s24251_s30 + $0xc8c] sm:$0xf0] }
 0x4a3   : > { %24335 = vst [vmem:[#allocation86_spill] sm:$0xff] %v20318_v40  ;;  %5492 = vmatpush.bf16.msra.mxu1 %v13097_v14  ;;  %v13077_v7 = vor.u32 %v16295_v63, %v13076_v52  ;;  %v13300_v14 = vld [vmem:[%s24251_s30 + $0xe40] sm:$0xf]  ;;  %v16351_v1 = vld [vmem:[%s24251_s30 + $0xe4c] sm:$0xf0] }
 0x4a4   : > { %5448 = vmatpush.bf16.msrb.mxu3 %v13317_v38  ;;  %v13301_v32 = vor.u32 %v16351_v1, %v13300_v14  ;;  %v16353_v38 = vld [vmem:[%s24251_s30 + $0xe64] sm:$0xf]  ;;  %v13318_v52 = vld [vmem:[%s24251_s30 + $0xe70] sm:$0xf0]  ;;  %v13324_v63 = vld [vmem:[%s24251_s30 + $0xe68] sm:$0xf] }
 0x4a6   : > { %5436 = vmatpush.bf16.msrb.mxu2 %v13077_v7  ;;  %v13321_v7 = vor.u32 %v16353_v38, %v13318_v52 }
 0x4a7   : > { %v20341_v41 = vpop.f32.mrf.mxu3  ;;  %5493 = vmatpush.bf16.msra.mxu1 %v13081_v61  ;;  %v16356_v61 = vld [vmem:[%s24251_s30 + $0xe74] sm:$0xf0] }
 0x4a8   : > { %24336 = vst [vmem:[#allocation87_spill] sm:$0xff] %v20341_v41  ;;  %5449 = vmatpush.bf16.msrb.mxu3 %v13301_v32  ;;  %v13325_v1 = vor.u32 %v16356_v61, %v13324_v63  ;;  %v13284_v41 = vld [vmem:[%s24251_s30 + $0xe20] sm:$0xf]  ;;  %v13308_v32 = vld [vmem:[%s24251_s30 + $0xe48] sm:$0xf]  ;;  %v20380_v38 = vpop.f32.mrf.mxu2 }
 0x4a9   : > { %v4715_v22 = vpop.f32.mrf.mxu0  ;;  %24337 = vst [vmem:[#allocation88_spill] sm:$0xff] %v20380_v38  ;;  %v13268_v63 = vld [vmem:[%s24251_s30 + $0xe00] sm:$0xf] }
 0x4aa   : > { %v4716_v49 = vadd.f32 %v4715_v22, %v20243_v37  ;;  %v4734_v5 = vpop.f32.mrf.mxu1  ;;  %5505 = vmatpush.bf16.msra.mxu2 %v13321_v7  ;;  %v13285_v37 = vor.u32 %v16347_v2, %v13284_v41  ;;  %v16349_v22 = vld [vmem:[%s24251_s30 + $0xe44] sm:$0xf]  ;;  %v16352_v2 = vld [vmem:[%s24251_s30 + $0xe54] sm:$0xf0] }
 0x4ab   : > { %v4754_v14 = vadd.f32 %v4753_v58, %v4734_v5  ;;  %5562 = vmatpush.bf16.msrb.mxu1 %v13325_v1  ;;  %v13302_v58 = vld [vmem:[%s24251_s30 + $0xe50] sm:$0xf0]  ;;  %v13309_v52 = vor.u32 %v16352_v2, %v13308_v32  ;;  %v16345_v1 = vld [vmem:[%s24251_s30 + $0xe24] sm:$0xf]  ;;  %v13380_v2 = vld [vmem:[%s24251_s30 + $0xee0] sm:$0xf] }
 0x4ac   : > { %v20369_v40 = vadd.f32 %v4716_v49, %v19757_v46  ;;  %5450 = vmatpush.bf16.msrb.mxu3 %v13285_v37  ;;  %v13305_v46 = vor.u32 %v16349_v22, %v13302_v58  ;;  %v16343_v49 = vld [vmem:[%s24251_s30 + $0xe0c] sm:$0xf0]  ;;  %v13286_v37 = vld [vmem:[%s24251_s30 + $0xe30] sm:$0xf0]  ;;  %v13292_v22 = vld [vmem:[%s24251_s30 + $0xe28] sm:$0xf] }
 0x4ad   : > { %v13269_v7 = vor.u32 %v16343_v49, %v13268_v63  ;;  %v13289_v32 = vor.u32 %v16345_v1, %v13286_v37  ;;  %v16339_v63 = vld [vmem:[%s24251_s30 + $0xdec] sm:$0xf0]  ;;  %v16341_v1 = vld [vmem:[%s24251_s30 + $0xe04] sm:$0xf]  ;;  %v13270_v37 = vld [vmem:[%s24251_s30 + $0xe10] sm:$0xf0] }
 0x4ae   : > { %5506 = vmatpush.bf16.msra.mxu2 %v13305_v46  ;;  %v16348_v46 = vld [vmem:[%s24251_s30 + $0xe34] sm:$0xf0] }
 0x4af   : > { %v4772_v41 = vpop.f32.mrf.mxu3  ;;  %5563 = vmatpush.bf16.msrb.mxu1 %v13309_v52  ;;  %v13293_v52 = vor.u32 %v16348_v46, %v13292_v22  ;;  %v13273_v22 = vor.u32 %v16341_v1, %v13270_v37  ;;  %v13276_v46 = vld [vmem:[%s24251_s30 + $0xe08] sm:$0xf] }
 0x4b0   : > { %v4773_v5 = vadd.f32 %v4772_v41, %v4754_v14  ;;  %5451 = vmatpush.bf16.msrb.mxu3 %v13269_v7  ;;  %v16371_v41 = vld [vmem:[%s24251_s30 + $0xeec] sm:$0x30] }
 0x4b1   : > { %v20391_v61 = vpop.f32.mrf.mxu0  ;;  %v13381_v49 = vor.u32 %v16371_v41, %v13380_v2 }
 0x4b2   : > { %24338 = vst [vmem:[#allocation89_spill] sm:$0xff] %v20391_v61  ;;  %v20403_v58 = vadd.f32 %v4773_v5, %v19771_v10  ;;  %v20405_v14 = vpop.f32.mrf.mxu1  ;;  %v13252_v10 = vld [vmem:[%s24251_s30 + $0xde0] sm:$0xf]  ;;  %5507 = vmatpush.bf16.msra.mxu2 %v13289_v32  ;;  %v16344_v32 = vld [vmem:[%s24251_s30 + $0xe14] sm:$0xf0] }
 0x4b3   : > { %24339 = vst [vmem:[#allocation90_spill] sm:$0xff] %v20405_v14  ;;  %v13253_v5 = vor.u32 %v16339_v63, %v13252_v10  ;;  %5564 = vmatpush.bf16.msrb.mxu1 %v13293_v52  ;;  %v5418_v7 = vsel %vm1498_vm3, %v13381_v49, 0  ;;  %v13277_v41 = vor.u32 %v16344_v32, %v13276_v46  ;;  %v13236_v52 = vld [vmem:[%s24251_s30 + $0xdc0] sm:$0xf]  ;;  %v16335_v10 = vld [vmem:[%s24251_s30 + $0xdcc] sm:$0xf0]  ;;  %v4824_v49 = vpop.f32.mrf.mxu2 }
 0x4b4   : > { %5471 = vmatpush.bf16.msra.mxu0 %v5418_v7  ;;  %v13364_v63 = vld [vmem:[%s24251_s30 + $0xec0] sm:$0xf]  ;;  %v16367_v7 = vld [vmem:[%s24251_s30 + $0xecc] sm:$0xf0]  ;;  %v16337_v46 = vld [vmem:[%s24251_s30 + $0xde4] sm:$0xf] }
 0x4b5   : > { %5452 = vmatpush.bf16.msrb.mxu3 %v13253_v5  ;;  %v13237_v5 = vor.u32 %v16335_v10, %v13236_v52  ;;  %v13365_v37 = vor.u32 %v16367_v7, %v13364_v63  ;;  %v13254_v32 = vld [vmem:[%s24251_s30 + $0xdf0] sm:$0xf0]  ;;  %v13220_v63 = vld [vmem:[%s24251_s30 + $0xda0] sm:$0xf]  ;;  %v16331_v7 = vld [vmem:[%s24251_s30 + $0xdac] sm:$0xf0] }
 0x4b6   : > { %5508 = vmatpush.bf16.msra.mxu2 %v13273_v22  ;;  %v13260_v22 = vld [vmem:[%s24251_s30 + $0xde8] sm:$0xf]  ;;  %v13257_v10 = vor.u32 %v16337_v46, %v13254_v32  ;;  %v13221_v38 = vor.u32 %v16331_v7, %v13220_v63  ;;  %v16363_v46 = vld [vmem:[%s24251_s30 + $0xeac] sm:$0xf0]  ;;  %v16333_v32 = vld [vmem:[%s24251_s30 + $0xdc4] sm:$0xf] }
 0x4b7   : > { %v20435_v2 = vpop.f32.mrf.mxu3  ;;  %5565 = vmatpush.bf16.msrb.mxu1 %v13277_v41  ;;  %v16340_v41 = vld [vmem:[%s24251_s30 + $0xdf4] sm:$0xf0] }
 0x4b8   : > { %24340 = vst [vmem:[#allocation91_spill] sm:$0xff] %v20435_v2  ;;  %5472 = vmatpush.bf16.msra.mxu0 %v13365_v37  ;;  %v13261_v61 = vor.u32 %v16340_v41, %v13260_v22  ;;  %v13244_v37 = vld [vmem:[%s24251_s30 + $0xdc8] sm:$0xf]  ;;  %v16336_v22 = vld [vmem:[%s24251_s30 + $0xdd4] sm:$0xf0] }
 0x4b9   : > { %v4786_v1 = vpop.f32.mrf.mxu0  ;;  %5453 = vmatpush.bf16.msrb.mxu3 %v13237_v5  ;;  %v13348_v5 = vld [vmem:[%s24251_s30 + $0xea0] sm:$0xf]  ;;  %v13245_v63 = vor.u32 %v16336_v22, %v13244_v37 }
 0x4ba   : > { %v4805_v52 = vpop.f32.mrf.mxu1  ;;  %5509 = vmatpush.bf16.msra.mxu2 %v13257_v10  ;;  %v13349_v14 = vor.u32 %v16363_v46, %v13348_v5  ;;  %v13204_v5 = vld [vmem:[%s24251_s30 + $0xd80] sm:$0xf]  ;;  %v16327_v46 = vld [vmem:[%s24251_s30 + $0xd8c] sm:$0xf0] }
 0x4bb   : > { %v4806_v2 = vadd.f32 %v4805_v52, %v4786_v1  ;;  %v13238_v1 = vld [vmem:[%s24251_s30 + $0xdd0] sm:$0xf0]  ;;  %5566 = vmatpush.bf16.msrb.mxu1 %v13261_v61  ;;  %v13332_v61 = vld [vmem:[%s24251_s30 + $0xe80] sm:$0xf]  ;;  %v20511_v37 = vpop.f32.mrf.mxu2 }
 0x4bc   : > { %v13241_v41 = vor.u32 %v16333_v32, %v13238_v1  ;;  %5473 = vmatpush.bf16.msra.mxu0 %v13349_v14  ;;  %v13222_v32 = vld [vmem:[%s24251_s30 + $0xdb0] sm:$0xf0]  ;;  %v13228_v1 = vld [vmem:[%s24251_s30 + $0xda8] sm:$0xf]  ;;  %24342 = vst [vmem:[#allocation93_spill] sm:$0xff] %v20511_v37 }
 0x4bd   : > { %v4825_v52 = vadd.f32 %v4824_v49, %v4806_v2  ;;  %5454 = vmatpush.bf16.msrb.mxu3 %v13221_v38  ;;  %v13205_v2 = vor.u32 %v16327_v46, %v13204_v5  ;;  %v16329_v49 = vld [vmem:[%s24251_s30 + $0xda4] sm:$0xf]  ;;  %v13196_v5 = vld [vmem:[%s24251_s30 + $0xd68] sm:$0xf]  ;;  %v16324_v46 = vld [vmem:[%s24251_s30 + $0xd74] sm:$0xf0] }
 0x4be   : > { %5510 = vmatpush.bf16.msra.mxu2 %v13241_v41  ;;  %v16332_v41 = vld [vmem:[%s24251_s30 + $0xdb4] sm:$0xf0] }
 0x4bf   : > { %v20486_v10 = vadd.f32 %v4825_v52, %v19871_v20  ;;  %v4880_v7 = vpop.f32.mrf.mxu3  ;;  %v16359_v20 = vld [vmem:[%s24251_s30 + $0xe8c] sm:$0xf0]  ;;  %5567 = vmatpush.bf16.msrb.mxu1 %v13245_v63  ;;  %v13225_v52 = vor.u32 %v16329_v49, %v13222_v32  ;;  %v13229_v63 = vor.u32 %v16332_v41, %v13228_v1  ;;  %v16328_v32 = vld [vmem:[%s24251_s30 + $0xd94] sm:$0xf0]  ;;  %v13180_v41 = vld [vmem:[%s24251_s30 + $0xd48] sm:$0xf] }
 0x4c0   : > { %v13333_v14 = vor.u32 %v16359_v20, %v13332_v61  ;;  %v13197_v61 = vor.u32 %v16324_v46, %v13196_v5  ;;  %v13206_v20 = vld [vmem:[%s24251_s30 + $0xd90] sm:$0xf0]  ;;  %v16312_v37 = vld [vmem:[%s24251_s30 + $0xd14] sm:$0xf0] }
 0x4c1   : > { %v20500_v38 = vpop.f32.mrf.mxu0  ;;  %5455 = vmatpush.bf16.msrb.mxu3 %v13205_v2  ;;  %v16325_v2 = vld [vmem:[%s24251_s30 + $0xd84] sm:$0xf] }
 0x4c2   : > { %24341 = vst [vmem:[#allocation92_spill] sm:$0xff] %v20500_v38  ;;  %v20513_v22 = vpop.f32.mrf.mxu1  ;;  %5474 = vmatpush.bf16.msra.mxu0 %v13333_v14  ;;  %5511 = vmatpush.bf16.msra.mxu2 %v13225_v52  ;;  %v13212_v14 = vld [vmem:[%s24251_s30 + $0xd88] sm:$0xf]  ;;  %v13209_v49 = vor.u32 %v16325_v2, %v13206_v20 }
 0x4c3   : > { %24343 = vst [vmem:[#allocation94_spill] sm:$0xff] %v20513_v22  ;;  %5568 = vmatpush.bf16.msrb.mxu1 %v13229_v63  ;;  %v13213_v52 = vor.u32 %v16328_v32, %v13212_v14  ;;  %v16320_v63 = vld [vmem:[%s24251_s30 + $0xd54] sm:$0xf0]  ;;  %v13164_v20 = vld [vmem:[%s24251_s30 + $0xd28] sm:$0xf] }
 0x4c4   : > { %v13181_v46 = vor.u32 %v16320_v63, %v13180_v41  ;;  %v16316_v14 = vld [vmem:[%s24251_s30 + $0xd34] sm:$0xf0]  ;;  %v13148_v63 = vld [vmem:[%s24251_s30 + $0xd08] sm:$0xf] }
 0x4c5   : > { %v13149_v22 = vor.u32 %v16312_v37, %v13148_v63  ;;  %v16308_v37 = vld [vmem:[%s24251_s30 + $0xcf4] sm:$0xf0] }
 0x4c6   : > { %5543 = vmatpush.bf16.msrb.mxu0 %v13197_v61  ;;  %5512 = vmatpush.bf16.msra.mxu2 %v13209_v49  ;;  %v4829_v49 = vpop.f32.mrf.mxu2 }
 0x4c7   : > { %v4882_v1 = vpop.f32.mrf.mxu3  ;;  %5569 = vmatpush.bf16.msrb.mxu1 %v13213_v52 }
 0x4c8   : > { %v20542_v5 = vpack.c.bf16 %v4882_v1, %v4880_v7  ;;  %v13165_v7 = vor.u32 %v16316_v14, %v13164_v20  ;;  %v13132_v20 = vld [vmem:[%s24251_s30 + $0xce8] sm:$0xf] }
 0x4c9   : > { %v4791_v61 = vpop.f32.mrf.mxu0  ;;  %v13133_v14 = vor.u32 %v16308_v37, %v13132_v20  ;;  %v13388_v20 = vld [vmem:[%s24251_s30 + $0xee8] sm:$0xf]  ;;  %v16372_v37 = vld [vmem:[%s24251_s30 + $0xef4] sm:$0x30] }
 0x4ca   : > { %v4810_v2 = vpop.f32.mrf.mxu1  ;;  %5437 = vmatmul.bf16.vlgmr.msrb.gmra.mxu2 %v20542_v5  ;;  %5494 = vmatmul.bf16.vlgmr.msra.gmra.mxu1 %v20542_v5 }
 0x4cb   : > { %v4811_v32 = vadd.f32 %v4810_v2, %v4791_v61  ;;  %5544 = vmatpush.bf16.msrb.mxu0 %v13181_v46  ;;  %v13382_v61 = vld [vmem:[%s24251_s30 + $0xef0] sm:$0x30] }
 0x4cd   : > { %v4830_v1 = vadd.f32 %v4829_v49, %v4811_v32  ;;  %v13116_v49 = vld [vmem:[%s24251_s30 + $0xcc8] sm:$0xf] }
 0x4cf   : > { %v20553_v52 = vadd.f32 %v4830_v1, %v19926_v51  ;;  %v4885_v41 = vpop.f32.mrf.mxu3  ;;  %5545 = vmatpush.bf16.msrb.mxu0 %v13165_v7  ;;  %v16369_v51 = vld [vmem:[%s24251_s30 + $0xee4] sm:$0xf]  ;;  %v16304_v1 = vld [vmem:[%s24251_s30 + $0xcd4] sm:$0xf0] }
 0x4d0   : > { %v13385_v2 = vor.u32 %v16369_v51, %v13382_v61  ;;  %v16365_v7 = vld [vmem:[%s24251_s30 + $0xec4] sm:$0xf]  ;;  %v13117_v61 = vor.u32 %v16304_v1, %v13116_v49  ;;  %v13350_v49 = vld [vmem:[%s24251_s30 + $0xeb0] sm:$0xf0]  ;;  %v13100_v1 = vld [vmem:[%s24251_s30 + $0xca8] sm:$0xf] }
 0x4d1   : > { %v20561_v38 = vpop.f32.mrf.mxu0 }
 0x4d2   : > { %24344 = vst [vmem:[#allocation95_spill] sm:$0xff] %v20561_v38  ;;  %v20563_v46 = vpop.f32.mrf.mxu1  ;;  %v5421_v32 = vsel %vm1498_vm3, %v13385_v2, 0  ;;  %v13389_v38 = vor.u32 %v16372_v37, %v13388_v20  ;;  %v16300_v37 = vld [vmem:[%s24251_s30 + $0xcb4] sm:$0xf0] }
 0x4d3   : > { %24345 = vst [vmem:[#allocation96_spill] sm:$0xff] %v20563_v46  ;;  %5546 = vmatpush.bf16.msrb.mxu0 %v13149_v22  ;;  %v13366_v22 = vld [vmem:[%s24251_s30 + $0xed0] sm:$0xf0]  ;;  %5528 = vmatpush.bf16.msra.mxu3 %v5421_v32  ;;  %v16370_v32 = vld [vmem:[%s24251_s30 + $0xeec] sm:$0xf]  ;;  %v13101_v6 = vor.u32 %v16300_v37, %v13100_v1 }
 0x4d4   : > { %v13369_v51 = vor.u32 %v16365_v7, %v13366_v22  ;;  %v16361_v22 = vld [vmem:[%s24251_s30 + $0xea4] sm:$0xf]  ;;  %v16296_v37 = vld [vmem:[%s24251_s30 + $0xc94] sm:$0xf0] }
 0x4d5   : > { %v13353_v20 = vor.u32 %v16361_v22, %v13350_v49  ;;  %v13374_v22 = vld [vmem:[%s24251_s30 + $0xed8] sm:$0xf0]  ;;  %v16357_v49 = vld [vmem:[%s24251_s30 + $0xe84] sm:$0xf] }
 0x4d7   : > { %v4887_v63 = vpop.f32.mrf.mxu3  ;;  %5547 = vmatpush.bf16.msrb.mxu0 %v13133_v14  ;;  %v13390_v14 = vld [vmem:[%s24251_s30 + $0xef8] sm:$0x30]  ;;  %5529 = vmatpush.bf16.msra.mxu3 %v13369_v51  ;;  %v16368_v51 = vld [vmem:[%s24251_s30 + $0xed4] sm:$0xf0] }
 0x4d8   : > { %v20590_v2 = vpack.c.bf16 %v4887_v63, %v4885_v41  ;;  %v13393_v7 = vor.u32 %v16370_v32, %v13390_v14  ;;  %v5424_v63 = vsel %vm1498_vm3, %v13389_v38, 0  ;;  %v13372_v32 = vld [vmem:[%s24251_s30 + $0xec8] sm:$0xf]  ;;  %v16366_v38 = vld [vmem:[%s24251_s30 + $0xecc] sm:$0xf] }
 0x4d9   : > { %v4899_v46 = vpop.f32.mrf.mxu0  ;;  %5585 = vmatpush.bf16.msrb.mxu2 %v5424_v63  ;;  %v13377_v1 = vor.u32 %v16366_v38, %v13374_v22  ;;  %v13084_v63 = vld [vmem:[%s24251_s30 + $0xc88] sm:$0xf]  ;;  %v16364_v38 = vld [vmem:[%s24251_s30 + $0xeb4] sm:$0xf0]  ;;  %v16362_v22 = vld [vmem:[%s24251_s30 + $0xeac] sm:$0xf] }
 0x4da   : > { %v4918_v41 = vpop.f32.mrf.mxu1  ;;  %5442 = vmatmul.bf16.gmra.mxu2 %v20590_v2  ;;  %5499 = vmatmul.bf16.gmra.mxu1 %v20590_v2  ;;  %v5427_v14 = vsel %vm1498_vm3, %v13393_v7, 0  ;;  %v13334_v7 = vld [vmem:[%s24251_s30 + $0xe90] sm:$0xf0] }
 0x4db   : > { %5548 = vmatpush.bf16.msrb.mxu0 %v13117_v61  ;;  %5642 = vmatpush.bf16.msra.mxu1 %v5427_v14  ;;  %v13373_v61 = vor.u32 %v16368_v51, %v13372_v32  ;;  %v13356_v32 = vld [vmem:[%s24251_s30 + $0xea8] sm:$0xf]  ;;  %v13337_v14 = vor.u32 %v16357_v49, %v13334_v7  ;;  %v13085_v51 = vor.u32 %v16296_v37, %v13084_v63  ;;  %v16322_v63 = vld [vmem:[%s24251_s30 + $0xd6c] sm:$0xf]  ;;  %v13198_v37 = vld [vmem:[%s24251_s30 + $0xd78] sm:$0xf0] }
 0x4dc   : > { %5530 = vmatpush.bf16.msra.mxu3 %v13353_v20  ;;  %v13357_v29 = vor.u32 %v16364_v38, %v13356_v32  ;;  %v13361_v20 = vor.u32 %v16362_v22, %v13358_v62  ;;  %v13201_v62 = vor.u32 %v16322_v63, %v13198_v37  ;;  %v13182_v38 = vld [vmem:[%s24251_s30 + $0xd58] sm:$0xf0] }
 0x4dd   : > { %5586 = vmatpush.bf16.msrb.mxu2 %v13373_v61  ;;  %v16354_v61 = vld [vmem:[%s24251_s30 + $0xe6c] sm:$0xf]  ;;  %v13310_v63 = vld [vmem:[%s24251_s30 + $0xe58] sm:$0xf0] }
 0x4df   : > { %5549 = vmatpush.bf16.msrb.mxu0 %v13101_v6  ;;  %5643 = vmatpush.bf16.msra.mxu1 %v13377_v1  ;;  %v16360_v1 = vld [vmem:[%s24251_s30 + $0xe94] sm:$0xf0] }
 0x4e0   : > { %5531 = vmatpush.bf16.msra.mxu3 %v13337_v14  ;;  %v13342_v14 = vld [vmem:[%s24251_s30 + $0xe98] sm:$0xf0] }
 0x4e1   : > { %v4901_v24 = vpop.f32.mrf.mxu0  ;;  %5587 = vmatpush.bf16.msrb.mxu2 %v13357_v29  ;;  %v16358_v29 = vld [vmem:[%s24251_s30 + $0xe8c] sm:$0xf] }
 0x4e2   : > { %v20656_v6 = vpack.c.bf16 %v4901_v24, %v4899_v46  ;;  %v4920_v49 = vpop.f32.mrf.mxu1  ;;  %v13326_v24 = vld [vmem:[%s24251_s30 + $0xe78] sm:$0xf0]  ;;  %v13345_v22 = vor.u32 %v16358_v29, %v13342_v14 }
 0x4e3   : > { %v20658_v7 = vpack.c.bf16 %v4920_v49, %v4918_v41  ;;  %5550 = vmatpush.bf16.msrb.mxu0 %v13085_v51  ;;  %5644 = vmatpush.bf16.msra.mxu1 %v13361_v20  ;;  %v13329_v46 = vor.u32 %v16354_v61, %v13326_v24  ;;  %v13340_v41 = vld [vmem:[%s24251_s30 + $0xe88] sm:$0xf]  ;;  %v16318_v51 = vld [vmem:[%s24251_s30 + $0xd4c] sm:$0xf]  ;;  %v13294_v29 = vld [vmem:[%s24251_s30 + $0xe38] sm:$0xf0] }
 0x4e4   : > { %5456 = vmatmul.bf16.vlgmr.msrb.gmra.mxu3 %v20656_v6  ;;  %v13341_v32 = vor.u32 %v16360_v1, %v13340_v41  ;;  %v13185_v20 = vor.u32 %v16318_v51, %v13182_v38  ;;  %v16350_v49 = vld [vmem:[%s24251_s30 + $0xe4c] sm:$0xf]  ;;  %v13150_v51 = vld [vmem:[%s24251_s30 + $0xd18] sm:$0xf0] }
 0x4e5   : > { %13394 = vmatmul.msk.bf16.vlgmr.msra.gmra.mxu0 %vm1491_vm4, %v20658_v7  ;;  %5600 = vmatpush.bf16.msrb.mxu3 %v13201_v62  ;;  %v13313_v37 = vor.u32 %v16350_v49, %v13310_v63  ;;  %v16314_v24 = vld [vmem:[%s24251_s30 + $0xd2c] sm:$0xf] }
 0x4e6   : > { %5588 = vmatpush.bf16.msrb.mxu2 %v13341_v32  ;;  %v16346_v41 = vld [vmem:[%s24251_s30 + $0xe2c] sm:$0xf] }
 0x4e7   : > { %5619 = vmatpush.bf16.msra.mxu0 %v13329_v46  ;;  %5645 = vmatpush.bf16.msra.mxu1 %v13345_v22  ;;  %v13166_v46 = vld [vmem:[%s24251_s30 + $0xd38] sm:$0xf0]  ;;  %v16310_v32 = vld [vmem:[%s24251_s30 + $0xd0c] sm:$0xf]  ;;  %v13297_v14 = vor.u32 %v16346_v41, %v13294_v29 }
 0x4e8   : > { %v13169_v1 = vor.u32 %v16314_v24, %v13166_v46  ;;  %v16342_v38 = vld [vmem:[%s24251_s30 + $0xe0c] sm:$0xf]  ;;  %v13278_v22 = vld [vmem:[%s24251_s30 + $0xe18] sm:$0xf0] }
 0x4e9   : > { %v4904_v61 = vpop.f32.mrf.mxu0  ;;  %5601 = vmatpush.bf16.msrb.mxu3 %v13185_v20  ;;  %v13153_v20 = vor.u32 %v16310_v32, %v13150_v51  ;;  %v13281_v49 = vor.u32 %v16342_v38, %v13278_v22  ;;  %v16306_v41 = vld [vmem:[%s24251_s30 + $0xcec] sm:$0xf]  ;;  %v13118_v32 = vld [vmem:[%s24251_s30 + $0xcd8] sm:$0xf0] }
 0x4ea   : > { %v4923_v62 = vpop.f32.mrf.mxu1  ;;  %5513 = vmatmul.bf16.vlgmr.msra.gmra.mxu2 %v20656_v6  ;;  %5570 = vmatmul.bf16.vlgmr.msrb.gmra.mxu1 %v20656_v6  ;;  %v16302_v29 = vld [vmem:[%s24251_s30 + $0xccc] sm:$0xf]  ;;  %v13246_v51 = vld [vmem:[%s24251_s30 + $0xdd8] sm:$0xf0] }
 0x4eb   : > { %5620 = vmatpush.bf16.msra.mxu0 %v13313_v37  ;;  %5697 = vmatpush.bf16.msra.mxu2 %v17015_v12  ;;  %v13134_v12 = vld [vmem:[%s24251_s30 + $0xcf8] sm:$0xf0]  ;;  %v16298_v22 = vld [vmem:[%s24251_s30 + $0xcac] sm:$0xf] }
 0x4ed   : > { %5602 = vmatpush.bf16.msrb.mxu3 %v13169_v1  ;;  %v16338_v1 = vld [vmem:[%s24251_s30 + $0xdec] sm:$0xf] }
 0x4ef   : > { %5621 = vmatpush.bf16.msra.mxu0 %v13297_v14  ;;  %5698 = vmatpush.bf16.msra.mxu2 %v17023_v16  ;;  %v13137_v16 = vor.u32 %v16306_v41, %v13134_v12  ;;  %v16334_v14 = vld [vmem:[%s24251_s30 + $0xdcc] sm:$0xf]  ;;  %v13086_v12 = vld [vmem:[%s24251_s30 + $0xc98] sm:$0xf0] }
 0x4f0   : > { %v13249_v38 = vor.u32 %v16334_v14, %v13246_v51 }
 0x4f1   : > { %v4906_v63 = vpop.f32.mrf.mxu0  ;;  %5603 = vmatpush.bf16.msrb.mxu3 %v13153_v20  ;;  %v13102_v20 = vld [vmem:[%s24251_s30 + $0xcb8] sm:$0xf0] }
 0x4f2   : > { %v20727_v37 = vpack.c.bf16 %v4906_v63, %v4904_v61  ;;  %v4925_v24 = vpop.f32.mrf.mxu1  ;;  %v13262_v61 = vld [vmem:[%s24251_s30 + $0xdf8] sm:$0xf0]  ;;  %v13105_v63 = vor.u32 %v16298_v22, %v13102_v20 }
 0x4f3   : > { %v4933_v46 = vpack.c.bf16 %v4925_v24, %v4923_v62  ;;  %5622 = vmatpush.bf16.msra.mxu0 %v13281_v49  ;;  %5699 = vmatpush.bf16.msra.mxu2 %v17036_v25  ;;  %v13265_v62 = vor.u32 %v16338_v1, %v13262_v61  ;;  %v13121_v25 = vor.u32 %v16302_v29, %v13118_v32  ;;  %v16330_v49 = vld [vmem:[%s24251_s30 + $0xdac] sm:$0xf] }
 0x4f4   : > { %5461 = vmatmul.bf16.gmra.mxu3 %v20727_v37  ;;  %v16294_v24 = vld [vmem:[%s24251_s30 + $0xc8c] sm:$0xf] }
 0x4f5   : > { %13395 = vmatmul.msk.bf16.gmra.mxu0 %vm1491_vm4, %v4933_v46  ;;  %5604 = vmatpush.bf16.msrb.mxu3 %v13137_v16  ;;  %v16326_v1 = vld [vmem:[%s24251_s30 + $0xd8c] sm:$0xf]  ;;  %v13214_v16 = vld [vmem:[%s24251_s30 + $0xd98] sm:$0xf0]  ;;  %v13089_v61 = vor.u32 %v16294_v24, %v13086_v12 }
 0x4f7   : > { %5623 = vmatpush.bf16.msra.mxu0 %v13265_v62  ;;  %5700 = vmatpush.bf16.msra.mxu2 %v17052_v34  ;;  %v13230_v34 = vld [vmem:[%s24251_s30 + $0xdb8] sm:$0xf0]  ;;  %v13217_v62 = vor.u32 %v16326_v1, %v13214_v16 }
 0x4f8   : > { %v13233_v41 = vor.u32 %v16330_v49, %v13230_v34  ;;  %v13614_v49 = vld [vmem:[%s24251_s30 + $0xfe0] sm:$0xf] }
 0x4f9   : > { %5605 = vmatpush.bf16.msrb.mxu3 %v13121_v25 }
 0x4fa   : > { %5518 = vmatmul.bf16.gmra.mxu2 %v20727_v37  ;;  %5575 = vmatmul.bf16.gmra.mxu1 %v20727_v37 }
 0x4fb   : > { %5624 = vmatpush.bf16.msra.mxu0 %v13249_v38  ;;  %5701 = vmatpush.bf16.msra.mxu2 %v17068_v43 }
 0x4fd   : > { %5606 = vmatpush.bf16.msrb.mxu3 %v13105_v63  ;;  %v16405_v63 = vld [vmem:[%s24251_s30 + $0xfec] sm:$0xf0] }
 0x4fe   : > { %v13615_v24 = vor.u32 %v16405_v63, %v13614_v49  ;;  %v13566_v63 = vld [vmem:[%s24251_s30 + $0xf80] sm:$0xf] }
 0x4ff   : > { %5625 = vmatpush.bf16.msra.mxu0 %v13233_v41  ;;  %v13616_v41 = vld [vmem:[%s24251_s30 + $0xff0] sm:$0xf0] }
 0x500   : > { %6252 = vmatpush.bf16.msrb.mxu1 %v13615_v24 }
 0x501   : > { %5607 = vmatpush.bf16.msrb.mxu3 %v13089_v61  ;;  %v13598_v61 = vld [vmem:[%s24251_s30 + $0xfc0] sm:$0xf] }
 0x503   : > { %5626 = vmatpush.bf16.msra.mxu0 %v13217_v62  ;;  %v16401_v62 = vld [vmem:[%s24251_s30 + $0xfcc] sm:$0xf0] }
 0x504   : > { %13396 = vmatmul.msk.bf16.vlgmr.msra.gmra.mxu3 %vm1491_vm4, %v20658_v7 }
 0x505   : > { %5551 = vmatmul.bf16.vlgmr.msrb.gmra.mxu0 %v20542_v5  ;;  %5716 = vmatpush.bf16.msra.mxu3 %v17019_v15  ;;  %v16373_v15 = vld [vmem:[%s24250_s5 + $0x60] sm:$0xff] }
 0x507   : > { %5735 = vmatpush.bf16.msrb.mxu0 %v17044_v30 }
 0x509   : > { %5717 = vmatpush.bf16.msra.mxu3 %v17026_v17  ;;  %v13412_v17 = vld [vmem:[%s24250_s5 + $0x68] sm:$0xf] }
 0x50a   : > { %13398 = vmatmul.msk.bf16.vlgmr.msrb.gmra.mxu2 %vm1491_vm4, %v20658_v7  ;;  %13400 = vmatmul.msk.bf16.vlgmr.msra.gmra.mxu1 %vm1491_vm4, %v20658_v7 }
 0x50b   : > { %5736 = vmatpush.bf16.msrb.mxu0 %v17060_v39 }
 0x50d   : > { %5718 = vmatpush.bf16.msra.mxu3 %v17039_v26  ;;  %v16374_v26 = vld [vmem:[%s24250_s5 + $0x68] sm:$0x10] }
 0x50e   : > { %v13413_v30 = vor.u32 %v16374_v26, %v13412_v17  ;;  %v13599_v26 = vor.u32 %v16401_v62, %v13598_v61 }
 0x50f   : > { %5737 = vmatpush.bf16.msrb.mxu0 %v17073_v45 }
 0x510   : > { %6253 = vmatpush.bf16.msrb.mxu1 %v13599_v26  ;;  %v16389_v26 = vld [vmem:[%s24251_s30 + $0xf6c] sm:$0xf0] }
 0x511   : > { %5719 = vmatpush.bf16.msra.mxu3 %v17055_v35  ;;  %v20821_v35 = vpop.f32.mrf.mxu2 }
 0x512   : > { %24346 = vst [vmem:[#allocation97_spill] sm:$0xff] %v20821_v35 }
 0x513   : > { %5738 = vmatpush.bf16.msrb.mxu0 %v17091_v50 }
 0x514   : > { %13397 = vmatmul.msk.bf16.gmra.mxu3 %vm1491_vm4, %v4933_v46 }
 0x515   : > { %5556 = vmatmul.bf16.gmra.mxu0 %v20590_v2  ;;  %5720 = vmatpush.bf16.msra.mxu3 %v17071_v44 }
 0x517   : > { %5739 = vmatpush.bf16.msrb.mxu0 %v17102_v53 }
 0x51a   : > { %13399 = vmatmul.msk.bf16.gmra.mxu2 %vm1491_vm4, %v4933_v46  ;;  %13401 = vmatmul.msk.bf16.gmra.mxu1 %vm1491_vm4, %v4933_v46 }
 0x524   : > { %5608 = vmatmul.bf16.vlgmr.msrb.gmra.mxu3 %v20542_v5 }
 0x525   : > { %5627 = vmatmul.bf16.vlgmr.msra.gmra.mxu0 %v20656_v6 }
 0x52a   : > { %13414 = vmatmul.msk.bf16.vlgmr.msra.gmra.mxu2 %vm767_vm2, %v16373_v15 }
 0x534   : > { %5613 = vmatmul.bf16.gmra.mxu3 %v20590_v2 }
 0x535   : > { %5632 = vmatmul.bf16.gmra.mxu0 %v20727_v37 }
 0x53a   : > { %13415 = vmatmul.msk.bf16.gmra.mxu2 %vm767_vm2, %v13413_v30 }
 0x544   : > { %13416 = vmatmul.msk.bf16.vlgmr.msra.gmra.mxu3 %vm767_vm2, %v16373_v15 }
 0x545   : > { %13418 = vmatmul.msk.bf16.vlgmr.msrb.gmra.mxu0 %vm767_vm2, %v16373_v15  ;;  %v16399_v15 = vld [vmem:[%s24251_s30 + $0xfc4] sm:$0xf] }
 0x547   : > { %v5495_v43 = vpop.f32.mrf.mxu1 }
 0x54d   : > { %v5438_v39 = vpop.f32.mrf.mxu2 }
 0x54f   : > { %v20828_v50 = vpop.f32.mrf.mxu1 }
 0x554   : > { %13417 = vmatmul.msk.bf16.gmra.mxu3 %vm767_vm2, %v13413_v30 }
 0x555   : > { %13419 = vmatmul.msk.bf16.gmra.mxu0 %vm767_vm2, %v13413_v30  ;;  %v20826_v44 = vpop.f32.mrf.mxu2  ;;  %v13600_v30 = vld [vmem:[%s24251_s30 + $0xfd0] sm:$0xf0] }
 0x557   : > { %v5500_v7 = vpop.f32.mrf.mxu1 }
 0x55d   : > { %v5443_v45 = vpop.f32.mrf.mxu2 }
 0x55f   : > { %v20839_v38 = vpop.f32.mrf.mxu1 }
 0x562   : > { %v5476_v53 = vpop.f32.mrf.mxu0 }
 0x565   : > { %v20830_v5 = vpop.f32.mrf.mxu2 }
 0x567   : > { %v5457_v2 = vpop.f32.mrf.mxu3 }
 0x568   : > { %v5458_v6 = vadd.f32 %v5457_v2, %v5438_v39  ;;  %v5571_v39 = vpop.f32.mrf.mxu1 }
 0x56a   : > { %v5477_v37 = vadd.f32 %v5476_v53, %v5458_v6  ;;  %v20832_v46 = vpop.f32.mrf.mxu0  ;;  %v13582_v6 = vld [vmem:[%s24251_s30 + $0xfa0] sm:$0xf] }
 0x56c   : > { %v20835_v29 = vadd.f32 %v5477_v37, %v20206_v56  ;;  %v16403_v56 = vld [vmem:[%s24251_s30 + $0xfe4] sm:$0xf] }
 0x56d   : > { %v5514_v32 = vpop.f32.mrf.mxu2  ;;  %v13619_v12 = vor.u32 %v16403_v56, %v13616_v41  ;;  %v16395_v37 = vld [vmem:[%s24251_s30 + $0xfa4] sm:$0xf]  ;;  %v16393_v56 = vld [vmem:[%s24251_s30 + $0xf8c] sm:$0xf0]  ;;  %v13568_v41 = vld [vmem:[%s24251_s30 + $0xf90] sm:$0xf0] }
 0x56e   : > { %v5515_v14 = vadd.f32 %v5514_v32, %v5495_v43  ;;  %v13567_v24 = vor.u32 %v16393_v56, %v13566_v63 }
 0x56f   : > { %v20837_v51 = vpop.f32.mrf.mxu3  ;;  %6309 = vmatpush.bf16.msra.mxu0 %v13619_v12 }
 0x570   : > { %v20902_v61 = vpop.f32.mrf.mxu1 }
 0x572   : > { %v5481_v25 = vpop.f32.mrf.mxu0 }
 0x575   : > { %v20841_v22 = vpop.f32.mrf.mxu2 }
 0x577   : > { %v5462_v20 = vpop.f32.mrf.mxu3 }
 0x578   : > { %v5463_v34 = vadd.f32 %v5462_v20, %v5443_v45  ;;  %v13603_v45 = vor.u32 %v16399_v15, %v13600_v30  ;;  %v13550_v15 = vld [vmem:[%s24251_s30 + $0xf60] sm:$0xf]  ;;  %v16387_v30 = vld [vmem:[%s24251_s30 + $0xf64] sm:$0xf] }
 0x57a   : > { %v5482_v1 = vadd.f32 %v5481_v25, %v5463_v34  ;;  %v20855_v16 = vpop.f32.mrf.mxu0  ;;  %6310 = vmatpush.bf16.msra.mxu0 %v13603_v45  ;;  %v16391_v34 = vld [vmem:[%s24251_s30 + $0xf84] sm:$0xf]  ;;  %v13552_v45 = vld [vmem:[%s24251_s30 + $0xf70] sm:$0xf0] }
 0x57c   : > { %v20867_v17 = vadd.f32 %v5482_v1, %v20238_v33  ;;  %v16397_v33 = vld [vmem:[%s24251_s30 + $0xfac] sm:$0xf0]  ;;  %v13571_v1 = vor.u32 %v16391_v34, %v13568_v41 }
 0x57d   : > { %v5519_v43 = vpop.f32.mrf.mxu2  ;;  %v13583_v32 = vor.u32 %v16397_v33, %v13582_v6  ;;  %v13555_v6 = vor.u32 %v16387_v30, %v13552_v45  ;;  %v16381_v41 = vld [vmem:[%s24251_s30 + $0xf2c] sm:$0xf0] }
 0x57e   : > { %v20872_v53 = vadd.f32 %v5519_v43, %v5500_v7  ;;  %v13584_v7 = vld [vmem:[%s24251_s30 + $0xfb0] sm:$0xf0]  ;;  %v13551_v43 = vor.u32 %v16389_v26, %v13550_v15  ;;  %v5576_v26 = vpop.f32.mrf.mxu1 }
 0x57f   : > { %v20874_v2 = vpop.f32.mrf.mxu3  ;;  %v13587_v25 = vor.u32 %v16395_v37, %v13584_v7  ;;  %6254 = vmatpush.bf16.msrb.mxu1 %v13583_v32  ;;  %v13534_v32 = vld [vmem:[%s24251_s30 + $0xf40] sm:$0xf]  ;;  %v16383_v7 = vld [vmem:[%s24251_s30 + $0xf44] sm:$0xf]  ;;  %v13520_v15 = vld [vmem:[%s24251_s30 + $0xf30] sm:$0xf0] }
 0x581   : > { %6311 = vmatpush.bf16.msra.mxu0 %v13587_v25 }
 0x582   : > { %v5552_v20 = vpop.f32.mrf.mxu0 }
 0x583   : > { %v5572_v49 = vadd.f32 %v5571_v39, %v5552_v20  ;;  %6255 = vmatpush.bf16.msrb.mxu1 %v13567_v24  ;;  %v13518_v24 = vld [vmem:[%s24251_s30 + $0xf20] sm:$0xf] }
 0x585   : > { %v20900_v12 = vpop.f32.mrf.mxu2  ;;  %6312 = vmatpush.bf16.msra.mxu0 %v13571_v1  ;;  %v16379_v1 = vld [vmem:[%s24251_s30 + $0xf24] sm:$0xf] }
 0x586   : > { %v13523_v30 = vor.u32 %v16379_v1, %v13520_v15  ;;  %v13744_v15 = vld [vmem:[%s24251_s30 + $0x10f0] sm:$0xf0] }
 0x587   : > { %v5533_v62 = vpop.f32.mrf.mxu3  ;;  %6256 = vmatpush.bf16.msrb.mxu1 %v13551_v43  ;;  %v16437_v43 = vld [vmem:[%s24251_s30 + $0x10ec] sm:$0xf0] }
 0x588   : > { %v5534_v39 = vadd.f32 %v5533_v62, %v5515_v14  ;;  %v16385_v14 = vld [vmem:[%s24251_s30 + $0xf4c] sm:$0xf0] }
 0x589   : > { %6313 = vmatpush.bf16.msra.mxu0 %v13555_v6  ;;  %v13535_v25 = vor.u32 %v16385_v14, %v13534_v32  ;;  %v13502_v32 = vld [vmem:[%s24251_s30 + $0xf00] sm:$0xf]  ;;  %v16377_v14 = vld [vmem:[%s24251_s30 + $0xf0c] sm:$0xf0] }
 0x58a   : > { %v20917_v33 = vadd.f32 %v5534_v39, %v20290_v48  ;;  %v20919_v37 = vpop.f32.mrf.mxu0  ;;  %v13536_v48 = vld [vmem:[%s24251_s30 + $0xf50] sm:$0xf0]  ;;  %v13742_v39 = vld [vmem:[%s24251_s30 + $0x10e0] sm:$0xf] }
 0x58b   : > { %v13539_v63 = vor.u32 %v16383_v7, %v13536_v48  ;;  %6257 = vmatpush.bf16.msrb.mxu1 %v13535_v25  ;;  %v13743_v6 = vor.u32 %v16437_v43, %v13742_v39  ;;  %v16375_v7 = vld [vmem:[%s24251_s30 + $0xf04] sm:$0xf]  ;;  %v13503_v25 = vor.u32 %v16377_v14, %v13502_v32  ;;  %v13504_v48 = vld [vmem:[%s24251_s30 + $0xf10] sm:$0xf0]  ;;  %v16438_v43 = vld [vmem:[%s24251_s30 + $0x10f4] sm:$0xf0] }
 0x58c   : > { %24347 = vst [vmem:[#allocation98_spill] sm:$0xff] %v20917_v33  ;;  %v16429_v32 = vld [vmem:[%s24251_s30 + $0x10ac] sm:$0xf0] }
 0x58d   : > { %v5590_v20 = vpop.f32.mrf.mxu2  ;;  %6314 = vmatpush.bf16.msra.mxu0 %v13539_v63  ;;  %6271 = vmatpush.bf16.msrb.mxu2 %v13743_v6  ;;  %v13507_v63 = vor.u32 %v16375_v7, %v13504_v48  ;;  %v13710_v6 = vld [vmem:[%s24251_s30 + $0x10a0] sm:$0xf]  ;;  %v16453_v48 = vld [vmem:[%s24251_s30 + $0x116c] sm:$0x30] }
 0x58e   : > { %v5591_v56 = vadd.f32 %v5590_v20, %v5572_v49  ;;  %v13519_v49 = vor.u32 %v16381_v41, %v13518_v24  ;;  %v16433_v24 = vld [vmem:[%s24251_s30 + $0x10cc] sm:$0xf0] }
 0x58f   : > { %v20933_v34 = vpop.f32.mrf.mxu3 }
 0x590   : > { %v20945_v62 = vadd.f32 %v5591_v56, %v20316_v47  ;;  %6258 = vmatpush.bf16.msrb.mxu1 %v13519_v49  ;;  %v13726_v56 = vld [vmem:[%s24251_s30 + $0x10c0] sm:$0xf]  ;;  %v16435_v49 = vld [vmem:[%s24251_s30 + $0x10e4] sm:$0xf] }
 0x591   : > { %6315 = vmatpush.bf16.msra.mxu0 %v13523_v30  ;;  %v13727_v41 = vor.u32 %v16433_v24, %v13726_v56  ;;  %v13747_v39 = vor.u32 %v16435_v49, %v13744_v15  ;;  %v13728_v24 = vld [vmem:[%s24251_s30 + $0x10d0] sm:$0xf0]  ;;  %v16434_v49 = vld [vmem:[%s24251_s30 + $0x10d4] sm:$0xf0] }
 0x592   : > { %24348 = vst [vmem:[#allocation99_spill] sm:$0xff] %v20945_v62  ;;  %v5557_v45 = vpop.f32.mrf.mxu0 }
 0x593   : > { %v5577_v47 = vadd.f32 %v5576_v26, %v5557_v45  ;;  %v13750_v26 = vld [vmem:[%s24251_s30 + $0x10e8] sm:$0xf]  ;;  %6272 = vmatpush.bf16.msrb.mxu2 %v13727_v41 }
 0x594   : > { %6259 = vmatpush.bf16.msrb.mxu1 %v13503_v25  ;;  %v13751_v45 = vor.u32 %v16438_v43, %v13750_v26  ;;  %v13806_v25 = vld [vmem:[%s24251_s30 + $0x1160] sm:$0xf]  ;;  %v13734_v41 = vld [vmem:[%s24251_s30 + $0x10c8] sm:$0xf]  ;;  %v16425_v43 = vld [vmem:[%s24251_s30 + $0x108c] sm:$0xf0] }
 0x595   : > { %v20968_v20 = vpop.f32.mrf.mxu2  ;;  %6316 = vmatpush.bf16.msra.mxu0 %v13507_v63  ;;  %v21006_v63 = vpop.f32.mrf.mxu1  ;;  %v13807_v56 = vor.u32 %v16453_v48, %v13806_v25  ;;  %v16449_v25 = vld [vmem:[%s24251_s30 + $0x114c] sm:$0xf0]  ;;  %v16427_v48 = vld [vmem:[%s24251_s30 + $0x10a4] sm:$0xf] }
 0x597   : > { %v5538_v1 = vpop.f32.mrf.mxu3  ;;  %v6241_v26 = vsel %vm1498_vm3, %v13807_v56, 0 }
 0x598   : > { %v5539_v30 = vadd.f32 %v5538_v1, %v20872_v53  ;;  %6328 = vmatpush.bf16.msra.mxu1 %v13747_v39  ;;  %v13711_v53 = vor.u32 %v16429_v32, %v13710_v6  ;;  %v13694_v39 = vld [vmem:[%s24251_s30 + $0x1080] sm:$0xf]  ;;  %6294 = vmatpush.bf16.msrb.mxu3 %v6241_v26 }
 0x599   : > { %6385 = vmatpush.bf16.msrb.mxu0 %v13751_v45  ;;  %v13695_v6 = vor.u32 %v16425_v43, %v13694_v39  ;;  %v13774_v39 = vld [vmem:[%s24251_s30 + $0x1120] sm:$0xf]  ;;  %v16445_v43 = vld [vmem:[%s24251_s30 + $0x112c] sm:$0xf0] }
 0x59a   : > { %v20996_v14 = vadd.f32 %v5539_v30, %v20369_v40  ;;  %v20998_v7 = vpop.f32.mrf.mxu0  ;;  %v16431_v40 = vld [vmem:[%s24251_s30 + $0x10c4] sm:$0xf]  ;;  %6273 = vmatpush.bf16.msrb.mxu2 %v13711_v53  ;;  %v13735_v30 = vor.u32 %v16434_v49, %v13734_v41  ;;  %v13790_v53 = vld [vmem:[%s24251_s30 + $0x1140] sm:$0xf]  ;;  %v16430_v41 = vld [vmem:[%s24251_s30 + $0x10b4] sm:$0xf0] }
 0x59b   : > { %v13731_v1 = vor.u32 %v16431_v40, %v13728_v24  ;;  %v13791_v56 = vor.u32 %v16449_v25, %v13790_v53  ;;  %v13712_v40 = vld [vmem:[%s24251_s30 + $0x10b0] sm:$0xf0]  ;;  %v13718_v24 = vld [vmem:[%s24251_s30 + $0x10a8] sm:$0xf] }
 0x59c   : > { %v13719_v49 = vor.u32 %v16430_v41, %v13718_v24  ;;  %v13696_v53 = vld [vmem:[%s24251_s30 + $0x1090] sm:$0xf0]  ;;  %v13702_v25 = vld [vmem:[%s24251_s30 + $0x1088] sm:$0xf] }
 0x59d   : > { %v5595_v15 = vpop.f32.mrf.mxu2  ;;  %6329 = vmatpush.bf16.msra.mxu1 %v13731_v1  ;;  %6386 = vmatpush.bf16.msrb.mxu0 %v13735_v30  ;;  %v13715_v1 = vor.u32 %v16427_v48, %v13712_v40  ;;  %v16426_v48 = vld [vmem:[%s24251_s30 + $0x1094] sm:$0xf0] }
 0x59e   : > { %v5596_v45 = vadd.f32 %v5595_v15, %v5577_v47  ;;  %6274 = vmatpush.bf16.msrb.mxu2 %v13695_v6  ;;  %v16421_v15 = vld [vmem:[%s24251_s30 + $0x106c] sm:$0xf0]  ;;  %6295 = vmatpush.bf16.msrb.mxu3 %v13791_v56  ;;  %v13775_v6 = vor.u32 %v16445_v43, %v13774_v39  ;;  %v5647_v56 = vpop.f32.mrf.mxu1  ;;  %v13703_v41 = vor.u32 %v16426_v48, %v13702_v25  ;;  %v16419_v43 = vld [vmem:[%s24251_s30 + $0x1064] sm:$0xf]  ;;  %v13686_v25 = vld [vmem:[%s24251_s30 + $0x1068] sm:$0xf] }
 0x59f   : > { %v21027_v32 = vpop.f32.mrf.mxu3  ;;  %v16441_v39 = vld [vmem:[%s24251_s30 + $0x110c] sm:$0xf0]  ;;  %v16422_v48 = vld [vmem:[%s24251_s30 + $0x1074] sm:$0xf0] }
 0x5a0   : > { %v21039_v47 = vadd.f32 %v5596_v45, %v20403_v58  ;;  %v13678_v58 = vld [vmem:[%s24251_s30 + $0x1060] sm:$0xf]  ;;  %v16423_v45 = vld [vmem:[%s24251_s30 + $0x1084] sm:$0xf] }
 0x5a1   : > { %v13679_v30 = vor.u32 %v16421_v15, %v13678_v58  ;;  %6330 = vmatpush.bf16.msra.mxu1 %v13715_v1  ;;  %6387 = vmatpush.bf16.msrb.mxu0 %v13719_v49  ;;  %v13699_v24 = vor.u32 %v16423_v45, %v13696_v53  ;;  %v13662_v1 = vld [vmem:[%s24251_s30 + $0x1040] sm:$0xf]  ;;  %v16417_v49 = vld [vmem:[%s24251_s30 + $0x104c] sm:$0xf0] }
 0x5a2   : > { %v5628_v26 = vpop.f32.mrf.mxu0  ;;  %6296 = vmatpush.bf16.msrb.mxu3 %v13775_v6  ;;  %v13663_v58 = vor.u32 %v16417_v49, %v13662_v1  ;;  %v13680_v6 = vld [vmem:[%s24251_s30 + $0x1070] sm:$0xf0]  ;;  %v16413_v1 = vld [vmem:[%s24251_s30 + $0x102c] sm:$0xf0] }
 0x5a3   : > { %6275 = vmatpush.bf16.msrb.mxu2 %v13679_v30  ;;  %v13758_v30 = vld [vmem:[%s24251_s30 + $0x1100] sm:$0xf] }
 0x5a4   : > { %v13759_v53 = vor.u32 %v16441_v39, %v13758_v30  ;;  %v16415_v30 = vld [vmem:[%s24251_s30 + $0x1044] sm:$0xf]  ;;  %v13664_v39 = vld [vmem:[%s24251_s30 + $0x1050] sm:$0xf0] }
 0x5a5   : > { %v21074_v40 = vpop.f32.mrf.mxu2  ;;  %6331 = vmatpush.bf16.msra.mxu1 %v13699_v24  ;;  %6388 = vmatpush.bf16.msrb.mxu0 %v13703_v41  ;;  %v13683_v24 = vor.u32 %v16419_v43, %v13680_v6  ;;  %v13687_v41 = vor.u32 %v16422_v48, %v13686_v25  ;;  %v13622_v43 = vld [vmem:[%s24251_s30 + $0xfe8] sm:$0xf]  ;;  %v16418_v25 = vld [vmem:[%s24251_s30 + $0x1054] sm:$0xf0] }
 0x5a6   : > { %24349 = vst [vmem:[#allocation100_spill] sm:$0xff] %v21074_v40  ;;  %6297 = vmatpush.bf16.msrb.mxu3 %v13759_v53  ;;  %v16406_v53 = vld [vmem:[%s24251_s30 + $0xff4] sm:$0xf0]  ;;  %v13670_v6 = vld [vmem:[%s24251_s30 + $0x1048] sm:$0xf] }
 0x5a7   : > { %v5609_v15 = vpop.f32.mrf.mxu3  ;;  %6276 = vmatpush.bf16.msrb.mxu2 %v13663_v58 }
 0x5a8   : > { %v5629_v45 = vadd.f32 %v5628_v26, %v5609_v15  ;;  %v13646_v26 = vld [vmem:[%s24251_s30 + $0x1020] sm:$0xf] }
 0x5a9   : > { %v13647_v15 = vor.u32 %v16413_v1, %v13646_v26  ;;  %6332 = vmatpush.bf16.msra.mxu1 %v13683_v24  ;;  %6389 = vmatpush.bf16.msrb.mxu0 %v13687_v41  ;;  %v13623_v24 = vor.u32 %v16406_v53, %v13622_v43  ;;  %v13671_v41 = vor.u32 %v16418_v25, %v13670_v6  ;;  %v16409_v26 = vld [vmem:[%s24251_s30 + $0x100c] sm:$0xf0]  ;;  %v13606_v43 = vld [vmem:[%s24251_s30 + $0xfc8] sm:$0xf]  ;;  %v16414_v25 = vld [vmem:[%s24251_s30 + $0x1034] sm:$0xf0] }
 0x5aa   : > { %v5648_v49 = vadd.f32 %v5647_v56, %v5629_v45  ;;  %v21106_v58 = vpop.f32.mrf.mxu0  ;;  %v13667_v45 = vor.u32 %v16415_v30, %v13664_v39  ;;  %v16411_v30 = vld [vmem:[%s24251_s30 + $0x1024] sm:$0xf]  ;;  %v13648_v39 = vld [vmem:[%s24251_s30 + $0x1030] sm:$0xf0]  ;;  %v13654_v6 = vld [vmem:[%s24251_s30 + $0x1028] sm:$0xf] }
 0x5ab   : > { %24350 = vst [vmem:[#allocation101_spill] sm:$0xff] %v21106_v58  ;;  %6277 = vmatpush.bf16.msrb.mxu2 %v13647_v15  ;;  %6366 = vmatpush.bf16.msra.mxu3 %v13623_v24  ;;  %v13651_v53 = vor.u32 %v16411_v30, %v13648_v39  ;;  %v13590_v30 = vld [vmem:[%s24251_s30 + $0xfa8] sm:$0xf] }
 0x5ac   : > { %v21118_v56 = vadd.f32 %v5648_v49, %v20486_v10  ;;  %v13630_v10 = vld [vmem:[%s24251_s30 + $0x1000] sm:$0xf]  ;;  %v21135_v49 = vpop.f32.mrf.mxu1 }
 0x5ad   : > { %v5703_v48 = vpop.f32.mrf.mxu2  ;;  %v13631_v1 = vor.u32 %v16409_v26, %v13630_v10  ;;  %24352 = vst [vmem:[#allocation103_spill] sm:$0xff] %v21135_v49  ;;  %6333 = vmatpush.bf16.msra.mxu1 %v13667_v45  ;;  %6390 = vmatpush.bf16.msrb.mxu0 %v13671_v41  ;;  %v16402_v45 = vld [vmem:[%s24251_s30 + $0xfd4] sm:$0xf0]  ;;  %v13655_v10 = vor.u32 %v16414_v25, %v13654_v6  ;;  %v16407_v41 = vld [vmem:[%s24251_s30 + $0x1004] sm:$0xf] }
 0x5ae   : > { %24351 = vst [vmem:[#allocation102_spill] sm:$0xff] %v21118_v56  ;;  %v13607_v24 = vor.u32 %v16402_v45, %v13606_v43  ;;  %v16398_v43 = vld [vmem:[%s24251_s30 + $0xfb4] sm:$0xf0]  ;;  %v13638_v45 = vld [vmem:[%s24251_s30 + $0x1008] sm:$0xf] }
 0x5af   : > { %v21137_v15 = vpop.f32.mrf.mxu3  ;;  %6278 = vmatpush.bf16.msrb.mxu2 %v13631_v1  ;;  %v13632_v1 = vld [vmem:[%s24251_s30 + $0x1010] sm:$0xf0]  ;;  %v16410_v6 = vld [vmem:[%s24251_s30 + $0x1014] sm:$0xf0]  ;;  %v13591_v25 = vor.u32 %v16398_v43, %v13590_v30 }
 0x5b0   : > { %24353 = vst [vmem:[#allocation104_spill] sm:$0xff] %v21137_v15  ;;  %6367 = vmatpush.bf16.msra.mxu3 %v13607_v24  ;;  %v13635_v39 = vor.u32 %v16407_v41, %v13632_v1  ;;  %v13639_v49 = vor.u32 %v16410_v6, %v13638_v45  ;;  %v13574_v24 = vld [vmem:[%s24251_s30 + $0xf88] sm:$0xf]  ;;  %v16394_v41 = vld [vmem:[%s24251_s30 + $0xf94] sm:$0xf0] }
 0x5b1   : > { %6334 = vmatpush.bf16.msra.mxu1 %v13651_v53  ;;  %6391 = vmatpush.bf16.msrb.mxu0 %v13655_v10  ;;  %v13575_v10 = vor.u32 %v16394_v41, %v13574_v24  ;;  %v16390_v43 = vld [vmem:[%s24251_s30 + $0xf74] sm:$0xf0]  ;;  %v16451_v41 = vld [vmem:[%s24251_s30 + $0x1164] sm:$0xf] }
 0x5b2   : > { %v5633_v26 = vpop.f32.mrf.mxu0 }
 0x5b4   : > { %6368 = vmatpush.bf16.msra.mxu3 %v13591_v25  ;;  %v5652_v30 = vpop.f32.mrf.mxu1 }
 0x5b5   : > { %v5705_v35 = vpop.f32.mrf.mxu2  ;;  %6335 = vmatpush.bf16.msra.mxu1 %v13635_v39  ;;  %6392 = vmatpush.bf16.msrb.mxu0 %v13639_v49  ;;  %v13558_v39 = vld [vmem:[%s24251_s30 + $0xf68] sm:$0xf] }
 0x5b6   : > { %v21175_v56 = vpack.c.bf16 %v5705_v35, %v5703_v48  ;;  %v13559_v45 = vor.u32 %v16390_v43, %v13558_v39  ;;  %v13542_v49 = vld [vmem:[%s24251_s30 + $0xf48] sm:$0xf]  ;;  %v16447_v39 = vld [vmem:[%s24251_s30 + $0x1144] sm:$0xf] }
 0x5b7   : > { %v5614_v53 = vpop.f32.mrf.mxu3 }
 0x5b8   : > { %v5634_v1 = vadd.f32 %v5633_v26, %v5614_v53  ;;  %6260 = vmatmul.bf16.vlgmr.msrb.gmra.mxu1 %v21175_v56  ;;  %6317 = vmatmul.bf16.vlgmr.msra.gmra.mxu0 %v21175_v56  ;;  %v16386_v53 = vld [vmem:[%s24251_s30 + $0xf54] sm:$0xf0] }
 0x5b9   : > { %6369 = vmatpush.bf16.msra.mxu3 %v13575_v10  ;;  %v13543_v24 = vor.u32 %v16386_v53, %v13542_v49  ;;  %v13792_v49 = vld [vmem:[%s24251_s30 + $0x1150] sm:$0xf0] }
 0x5ba   : > { %v5653_v35 = vadd.f32 %v5652_v30, %v5634_v1  ;;  %v21185_v48 = vpop.f32.mrf.mxu0  ;;  %v13526_v30 = vld [vmem:[%s24251_s30 + $0xf28] sm:$0xf] }
 0x5bb   : > { %24354 = vst [vmem:[#allocation105_spill] sm:$0xff] %v21185_v48  ;;  %v13776_v48 = vld [vmem:[%s24251_s30 + $0x1130] sm:$0xf0] }
 0x5bc   : > { %v21194_v26 = vadd.f32 %v5653_v35, %v20553_v52  ;;  %v13808_v52 = vld [vmem:[%s24251_s30 + $0x1170] sm:$0x30]  ;;  %v16382_v35 = vld [vmem:[%s24251_s30 + $0xf34] sm:$0xf0] }
 0x5bd   : > { %v5708_v6 = vpop.f32.mrf.mxu2  ;;  %6370 = vmatpush.bf16.msra.mxu3 %v13559_v45  ;;  %v13811_v1 = vor.u32 %v16451_v41, %v13808_v52  ;;  %v13527_v45 = vor.u32 %v16382_v35, %v13526_v30  ;;  %v13795_v41 = vor.u32 %v16447_v39, %v13792_v49  ;;  %v13510_v35 = vld [vmem:[%s24251_s30 + $0xf08] sm:$0xf] }
 0x5be   : > { %24355 = vst [vmem:[#allocation106_spill] sm:$0xff] %v21194_v26  ;;  %v13814_v26 = vld [vmem:[%s24251_s30 + $0x1168] sm:$0xf] }
 0x5bf   : > { %v21196_v25 = vpop.f32.mrf.mxu3  ;;  %v6244_v43 = vsel %vm1498_vm3, %v13811_v1, 0  ;;  %v16452_v1 = vld [vmem:[%s24251_s30 + $0x116c] sm:$0xf] }
 0x5c0   : > { %24356 = vst [vmem:[#allocation107_spill] sm:$0xff] %v21196_v25  ;;  %6351 = vmatpush.bf16.msra.mxu2 %v6244_v43  ;;  %v13816_v43 = vld [vmem:[%s24251_s30 + $0x1178] sm:$0x30] }
 0x5c1   : > { %6371 = vmatpush.bf16.msra.mxu3 %v13543_v24  ;;  %v16454_v24 = vld [vmem:[%s24251_s30 + $0x1174] sm:$0x30] }
 0x5c2   : > { %v5741_v10 = vpop.f32.mrf.mxu0  ;;  %v13815_v39 = vor.u32 %v16454_v24, %v13814_v26 }
 0x5c4   : > { %6352 = vmatpush.bf16.msra.mxu2 %v13795_v41  ;;  %v6247_v26 = vsel %vm1498_vm3, %v13815_v39, 0 }
 0x5c5   : > { %v5710_v53 = vpop.f32.mrf.mxu2  ;;  %6372 = vmatpush.bf16.msra.mxu3 %v13527_v45  ;;  %v16443_v45 = vld [vmem:[%s24251_s30 + $0x1124] sm:$0xf]  ;;  %6408 = vmatpush.bf16.msrb.mxu1 %v6247_v26  ;;  %v16446_v26 = vld [vmem:[%s24251_s30 + $0x1134] sm:$0xf0] }
 0x5c6   : > { %v21223_v52 = vpack.c.bf16 %v5710_v53, %v5708_v6  ;;  %v16378_v6 = vld [vmem:[%s24251_s30 + $0xf14] sm:$0xf0]  ;;  %v13819_v53 = vor.u32 %v16452_v1, %v13816_v43  ;;  %v13779_v24 = vor.u32 %v16443_v45, %v13776_v48  ;;  %v13798_v1 = vld [vmem:[%s24251_s30 + $0x1148] sm:$0xf]  ;;  %v16436_v48 = vld [vmem:[%s24251_s30 + $0x10ec] sm:$0xf] }
 0x5c7   : > { %v5722_v30 = vpop.f32.mrf.mxu3  ;;  %v13511_v49 = vor.u32 %v16378_v6, %v13510_v35  ;;  %v16450_v35 = vld [vmem:[%s24251_s30 + $0x1154] sm:$0xf0]  ;;  %v16439_v43 = vld [vmem:[%s24251_s30 + $0x1104] sm:$0xf] }
 0x5c8   : > { %6265 = vmatmul.bf16.gmra.mxu1 %v21223_v52  ;;  %6322 = vmatmul.bf16.gmra.mxu0 %v21223_v52  ;;  %v6250_v58 = vsel %vm1498_vm3, %v13819_v53, 0  ;;  %v13799_v41 = vor.u32 %v16450_v35, %v13798_v1  ;;  %v13782_v53 = vld [vmem:[%s24251_s30 + $0x1128] sm:$0xf]  ;;  %v13736_v1 = vld [vmem:[%s24251_s30 + $0x10d8] sm:$0xf0] }
 0x5c9   : > { %6373 = vmatpush.bf16.msra.mxu3 %v13511_v49  ;;  %6465 = vmatpush.bf16.msra.mxu0 %v6250_v58  ;;  %v16448_v58 = vld [vmem:[%s24251_s30 + $0x114c] sm:$0xf]  ;;  %v13760_v49 = vld [vmem:[%s24251_s30 + $0x1110] sm:$0xf0] }
 0x5ca   : > { %v5743_v25 = vpop.f32.mrf.mxu0  ;;  %6353 = vmatpush.bf16.msra.mxu2 %v13779_v24  ;;  %6409 = vmatpush.bf16.msrb.mxu1 %v13799_v41  ;;  %v13763_v45 = vor.u32 %v16439_v43, %v13760_v49  ;;  %v16432_v24 = vld [vmem:[%s24251_s30 + $0x10cc] sm:$0xf] }
 0x5cb   : > { %v21253_v15 = vpack.c.bf16 %v5743_v25, %v5741_v10  ;;  %v13752_v25 = vld [vmem:[%s24251_s30 + $0x10f8] sm:$0xf0]  ;;  %v16444_v41 = vld [vmem:[%s24251_s30 + $0x112c] sm:$0xf] }
 0x5cc   : > { %v13800_v10 = vld [vmem:[%s24251_s30 + $0x1158] sm:$0xf0]  ;;  %v13755_v6 = vor.u32 %v16436_v48, %v13752_v25  ;;  %v13783_v48 = vor.u32 %v16446_v26, %v13782_v53  ;;  %v13739_v25 = vor.u32 %v16432_v24, %v13736_v1  ;;  %v16404_v49 = vld [vmem:[%s24251_s30 + $0xfec] sm:$0xf] }
 0x5cd   : > { %13820 = vmatmul.msk.bf16.vlgmr.msrb.gmra.mxu3 %vm1491_vm4, %v21253_v15  ;;  %v13803_v39 = vor.u32 %v16448_v58, %v13800_v10  ;;  %v13784_v58 = vld [vmem:[%s24251_s30 + $0x1138] sm:$0xf0]  ;;  %v16428_v26 = vld [vmem:[%s24251_s30 + $0x10ac] sm:$0xf] }
 0x5ce   : > { %6442 = vmatpush.bf16.msrb.mxu3 %v13755_v6  ;;  %v13787_v43 = vor.u32 %v16444_v41, %v13784_v58  ;;  %6354 = vmatpush.bf16.msra.mxu2 %v13763_v45  ;;  %v13624_v6 = vld [vmem:[%s24251_s30 + $0xff8] sm:$0xf0]  ;;  %v16442_v45 = vld [vmem:[%s24251_s30 + $0x1114] sm:$0xf0] }
 0x5cf   : > { %v5724_v35 = vpop.f32.mrf.mxu3  ;;  %6466 = vmatpush.bf16.msra.mxu0 %v13803_v39  ;;  %6410 = vmatpush.bf16.msrb.mxu1 %v13783_v48  ;;  %v13627_v53 = vor.u32 %v16404_v49, %v13624_v6  ;;  %v13720_v1 = vld [vmem:[%s24251_s30 + $0x10b8] sm:$0xf0] }
 0x5d0   : > { %v21299_v10 = vpack.c.bf16 %v5724_v35, %v5722_v30  ;;  %v13766_v30 = vld [vmem:[%s24251_s30 + $0x1108] sm:$0xf]  ;;  %v16440_v35 = vld [vmem:[%s24251_s30 + $0x110c] sm:$0xf]  ;;  %v13768_v48 = vld [vmem:[%s24251_s30 + $0x1118] sm:$0xf0]  ;;  %v13723_v41 = vor.u32 %v16428_v26, %v13720_v1 }
 0x5d1   : > { %v13767_v24 = vor.u32 %v16442_v45, %v13766_v30  ;;  %v13771_v58 = vor.u32 %v16440_v35, %v13768_v48  ;;  %v16424_v30 = vld [vmem:[%s24251_s30 + $0x108c] sm:$0xf] }
 0x5d2   : > { %v5746_v39 = vpop.f32.mrf.mxu0  ;;  %6279 = vmatmul.bf16.vlgmr.msrb.gmra.mxu2 %v21299_v10  ;;  %6443 = vmatpush.bf16.msrb.mxu3 %v13739_v25  ;;  %v16400_v25 = vld [vmem:[%s24251_s30 + $0xfcc] sm:$0xf] }
 0x5d3   : > { %6467 = vmatpush.bf16.msra.mxu0 %v13787_v43  ;;  %6423 = vmatpush.bf16.msrb.mxu2 %v13627_v53  ;;  %v13608_v43 = vld [vmem:[%s24251_s30 + $0xfd8] sm:$0xf0]  ;;  %v16396_v26 = vld [vmem:[%s24251_s30 + $0xfac] sm:$0xf] }
 0x5d4   : > { %v13611_v49 = vor.u32 %v16400_v25, %v13608_v43  ;;  %6411 = vmatpush.bf16.msrb.mxu1 %v13767_v24  ;;  %v13704_v53 = vld [vmem:[%s24251_s30 + $0x1098] sm:$0xf0]  ;;  %v16392_v43 = vld [vmem:[%s24251_s30 + $0xf8c] sm:$0xf] }
 0x5d5   : > { %v13707_v45 = vor.u32 %v16424_v30, %v13704_v53  ;;  %v13592_v24 = vld [vmem:[%s24251_s30 + $0xfb8] sm:$0xf0] }
 0x5d6   : > { %6444 = vmatpush.bf16.msrb.mxu3 %v13723_v41  ;;  %v13595_v1 = vor.u32 %v16396_v26, %v13592_v24  ;;  %v16420_v41 = vld [vmem:[%s24251_s30 + $0x106c] sm:$0xf]  ;;  %v13672_v53 = vld [vmem:[%s24251_s30 + $0x1058] sm:$0xf0] }
 0x5d7   : > { %v5727_v6 = vpop.f32.mrf.mxu3  ;;  %6468 = vmatpush.bf16.msra.mxu0 %v13771_v58  ;;  %6424 = vmatpush.bf16.msrb.mxu2 %v13611_v49  ;;  %v13688_v58 = vld [vmem:[%s24251_s30 + $0x1078] sm:$0xf0]  ;;  %v16416_v49 = vld [vmem:[%s24251_s30 + $0x104c] sm:$0xf] }
 0x5d8   : > { %6336 = vmatmul.bf16.vlgmr.msra.gmra.mxu1 %v21299_v10  ;;  %6393 = vmatmul.bf16.vlgmr.msrb.gmra.mxu0 %v21299_v10  ;;  %v13691_v25 = vor.u32 %v16420_v41, %v13688_v58  ;;  %v13675_v26 = vor.u32 %v16416_v49, %v13672_v53  ;;  %v16412_v58 = vld [vmem:[%s24251_s30 + $0x102c] sm:$0xf]  ;;  %v13640_v53 = vld [vmem:[%s24251_s30 + $0x1018] sm:$0xf0] }
 0x5da   : > { %v5748_v35 = vpop.f32.mrf.mxu0  ;;  %6445 = vmatpush.bf16.msrb.mxu3 %v13707_v45 }
 0x5db   : > { %v5756_v48 = vpack.c.bf16 %v5748_v35, %v5746_v39  ;;  %6425 = vmatpush.bf16.msrb.mxu2 %v13595_v1  ;;  %v13576_v39 = vld [vmem:[%s24251_s30 + $0xf98] sm:$0xf0]  ;;  %v16388_v1 = vld [vmem:[%s24251_s30 + $0xf6c] sm:$0xf] }
 0x5dc   : > { %v13579_v30 = vor.u32 %v16392_v43, %v13576_v39  ;;  %v13560_v35 = vld [vmem:[%s24251_s30 + $0xf78] sm:$0xf0] }
 0x5dd   : > { %13821 = vmatmul.msk.bf16.gmra.mxu3 %vm1491_vm4, %v5756_v48  ;;  %v13563_v41 = vor.u32 %v16388_v1, %v13560_v35  ;;  %v13544_v39 = vld [vmem:[%s24251_s30 + $0xf58] sm:$0xf0] }
 0x5de   : > { %6446 = vmatpush.bf16.msrb.mxu3 %v13691_v25  ;;  %v13656_v25 = vld [vmem:[%s24251_s30 + $0x1038] sm:$0xf0] }
 0x5df   : > { %v5729_v45 = vpop.f32.mrf.mxu3  ;;  %6426 = vmatpush.bf16.msrb.mxu2 %v13579_v30  ;;  %v13659_v43 = vor.u32 %v16412_v58, %v13656_v25  ;;  %v16408_v30 = vld [vmem:[%s24251_s30 + $0x100c] sm:$0xf]  ;;  %v13528_v1 = vld [vmem:[%s24251_s30 + $0xf38] sm:$0xf0] }
 0x5e0   : > { %v5755_v24 = vpack.c.bf16 %v5729_v45, %v5727_v6  ;;  %v16384_v6 = vld [vmem:[%s24251_s30 + $0xf4c] sm:$0xf]  ;;  %v13643_v45 = vor.u32 %v16408_v30, %v13640_v53  ;;  %v13512_v58 = vld [vmem:[%s24251_s30 + $0xf18] sm:$0xf0] }
 0x5e1   : > { %v13547_v49 = vor.u32 %v16384_v6, %v13544_v39  ;;  %v21415_v6 = vpop.f32.mrf.mxu1 }
 0x5e2   : > { %6284 = vmatmul.bf16.gmra.mxu2 %v5755_v24  ;;  %6447 = vmatpush.bf16.msrb.mxu3 %v13675_v26  ;;  %v16380_v26 = vld [vmem:[%s24251_s30 + $0xf2c] sm:$0xf]  ;;  %24357 = vst [vmem:[#allocation108_spill] sm:$0xff] %v21415_v6  ;;  %v24413_v6 = vld [vmem:[#allocation46_spill] sm:$0xff] }
 0x5e3   : > { %6427 = vmatpush.bf16.msrb.mxu2 %v13563_v41  ;;  %v13531_v35 = vor.u32 %v16380_v26, %v13528_v1  ;;  %v16376_v41 = vld [vmem:[%s24251_s30 + $0xf0c] sm:$0xf] }
 0x5e4   : > { %v13515_v25 = vor.u32 %v16376_v41, %v13512_v58  ;;  %v4637_v41 = vadd.f32 %v20208_v18, %v20197_v42 }
 0x5e6   : > { %6448 = vmatpush.bf16.msrb.mxu3 %v13659_v43 }
 0x5e7   : > { %6428 = vmatpush.bf16.msrb.mxu2 %v13547_v49 }
 0x5e8   : > { %6341 = vmatmul.bf16.gmra.mxu1 %v5755_v24  ;;  %6398 = vmatmul.bf16.gmra.mxu0 %v5755_v24 }
 0x5ea   : > { %6449 = vmatpush.bf16.msrb.mxu3 %v13643_v45 }
 0x5eb   : > { %6429 = vmatpush.bf16.msrb.mxu2 %v13531_v35 }
 0x5ed   : > { %6374 = vmatmul.bf16.vlgmr.msra.gmra.mxu3 %v21175_v56 }
 0x5ef   : > { %6430 = vmatpush.bf16.msrb.mxu2 %v13515_v25  ;;  %v21454_v25 = vld [vmem:[%s24360_s25] sm:$0xf]  ;;  %s654_s25 = scalar_lea.vmem %s24230_s21, %s24480_s27 }
 0x5f0   : > { %24361 = vst [vmem:[#allocation110_spill] sm:$0xff] %v21454_v25 }
 0x5f2   : > { %13822 = vmatmul.msk.bf16.vlgmr.msra.gmra.mxu2 %vm1491_vm4, %v21253_v15 }
 0x5f8   : > { %13824 = vmatmul.msk.bf16.vlgmr.msrb.gmra.mxu1 %vm1491_vm4, %v21253_v15  ;;  %13826 = vmatmul.msk.bf16.vlgmr.msra.gmra.mxu0 %vm1491_vm4, %v21253_v15 }
 0x5fd   : > { %6379 = vmatmul.bf16.gmra.mxu3 %v21223_v52 }
 0x602   : > { %13823 = vmatmul.msk.bf16.gmra.mxu2 %vm1491_vm4, %v5756_v48 }
 0x608   : > { %13825 = vmatmul.msk.bf16.gmra.mxu1 %vm1491_vm4, %v5756_v48  ;;  %13827 = vmatmul.msk.bf16.gmra.mxu0 %vm1491_vm4, %v5756_v48  ;;  %v3814_v48 = vadd.f32 %v19580_v23, %v19567_v54 }
 0x60d   : > { %6450 = vmatmul.bf16.vlgmr.msrb.gmra.mxu3 %v21299_v10  ;;  %v2165_v10 = vadd.f32 %v18311_v57, %v18240_v21  ;;  %v21440_v21 = vld [vmem:[%s24358_s1] sm:$0xf] }
 0x60e   : > { %24359 = vst [vmem:[#allocation109_spill] sm:$0xff] %v21440_v21  ;;  %v21449_v18 = vperm.slane %v21440_v21, 0  ;;  %v24432_v21 = vld [vmem:[#allocation87_spill] sm:$0xff] }
 0x612   : > { %6431 = vmatmul.bf16.vlgmr.msrb.gmra.mxu2 %v21175_v56  ;;  %v2991_v56 = vadd.f32 %v18952_v28, %v18938_v8  ;;  %v5460_v8 = vadd.f32 %v20837_v51, %v20826_v44 }
 0x614   : > { %v3010_v35 = vadd.f32 %v18947_v4, %v2991_v56  ;;  %v4656_v4 = vadd.f32 %v20210_v27, %v4637_v41 }
 0x61d   : > { %6455 = vmatmul.bf16.gmra.mxu3 %v5755_v24 }
 0x622   : > { %6436 = vmatmul.bf16.gmra.mxu2 %v21223_v52  ;;  %v2184_v52 = vadd.f32 %v18326_v31, %v2165_v10  ;;  %v3833_v31 = vadd.f32 %v19584_v60, %v3814_v48  ;;  %v5479_v60 = vadd.f32 %v20832_v46, %v5460_v8  ;;  %v2996_v46 = vadd.f32 %v19013_v13, %v18943_v11 }
 0x624   : > { %v2203_v57 = vadd.f32 %v18324_v36, %v2184_v52 }
 0x626   : > { %v3192_v23 = vadd.f32 %v3010_v35, %v2203_v57  ;;  %v3819_v57 = vadd.f32 %v19641_v0, %v19571_v59  ;;  %v5465_v59 = vadd.f32 %v20874_v2, %v20830_v5  ;;  %v24370_v2 = vld [vmem:[#allocation3_spill] sm:$0xff] }
 0x628   : > { %v4015_v36 = vadd.f32 %v3833_v31, %v3192_v23  ;;  %v5484_v5 = vadd.f32 %v20855_v16, %v5465_v59 }
 0x62a   : > { %v4838_v51 = vadd.f32 %v4656_v4, %v4015_v36  ;;  %v24365_v4 = vld [vmem:[#allocation24_spill] sm:$0xff] }
 0x62c   : > { %v5661_v56 = vadd.f32 %v5479_v60, %v4838_v51 }
 0x635   : > { %v6261_v43 = vpop.f32.mrf.mxu1  ;;  %v21417_v15 = vpop.f32.mrf.mxu0 }
 0x63d   : > { %v6263_v39 = vpop.f32.mrf.mxu1  ;;  %v21419_v30 = vpop.f32.mrf.mxu0 }
 0x645   : > { %v6266_v49 = vpop.f32.mrf.mxu1  ;;  %v21430_v24 = vpop.f32.mrf.mxu0 }
 0x64d   : > { %v21421_v53 = vpop.f32.mrf.mxu1 }
 0x650   : > { %v6299_v45 = vpop.f32.mrf.mxu3 }
 0x655   : > { %v6280_v26 = vpop.f32.mrf.mxu2  ;;  %v21432_v1 = vpop.f32.mrf.mxu1 }
 0x656   : > { %v6281_v58 = vadd.f32 %v6280_v26, %v6261_v43  ;;  %v2170_v26 = vadd.f32 %v18320_v55, %v18259_v3  ;;  %v24364_v3 = vld [vmem:[#allocation81_spill] sm:$0xff] }
 0x658   : > { %v6300_v28 = vadd.f32 %v6299_v45, %v6281_v58  ;;  %v6301_v54 = vpop.f32.mrf.mxu3  ;;  %v21459_v45 = vpop.f32.mrf.mxu0  ;;  %v2189_v58 = vadd.f32 %v18362_v19, %v2170_v26  ;;  %v24366_v19 = vld [vmem:[#allocation62_spill] sm:$0xff]  ;;  %v24368_v26 = vld [vmem:[#allocation9_spill] sm:$0xff] }
 0x659   : > { %24362 = vst [vmem:[#allocation111_spill] sm:$0xff] %v21459_v45  ;;  %v3838_v36 = vadd.f32 %v24366_v19, %v3819_v57  ;;  %v24416_v45 = vld [vmem:[#allocation51_spill] sm:$0xff] }
 0x65a   : > { %v6480_v42 = vadd.f32 %v6300_v28, %v20835_v29  ;;  %v21463_v29 = vperm.slane %v21454_v25, 0 }
 0x65c   : > { %v6506_v27 = vmul.f32 %v21449_v18, %v6480_v42  ;;  %v2208_v42 = vadd.f32 %v24365_v4, %v2189_v58  ;;  %v24378_v4 = vld [vmem:[#allocation13_spill] sm:$0xff] }
 0x65d   : > { %v6282_v43 = vpop.f32.mrf.mxu2  ;;  %v21457_v44 = vpop.f32.mrf.mxu1 }
 0x65e   : > { %v6283_v10 = vadd.f32 %v6282_v43, %v6263_v39  ;;  %v6532_v35 = vadd.f32 %v21463_v29, %v6506_v27  ;;  %v3015_v39 = vadd.f32 %v18993_v9, %v2996_v46  ;;  %v24367_v27 = vld [vmem:[#allocation82_spill] sm:$0xff]  ;;  %v24369_v46 = vld [vmem:[#allocation5_spill] sm:$0xff] }
 0x660   : > { %v6302_v52 = vadd.f32 %v6301_v54, %v6283_v10  ;;  %v6304_v48 = vpop.f32.mrf.mxu3  ;;  %v24363_v54 = vld [vmem:[#allocation78_spill] sm:$0xff]  ;;  %v6564_v23 = vmul.f32 0.01, %v6532_v35  ;;  %vm6548_vm5 = vcmp.ge.f32.partialorder %v6532_v35, 0.0  ;;  %v21484_v0 = vpop.f32.mrf.mxu0  ;;  %v3200_v51 = vadd.f32 %v3015_v39, %v2208_v42  ;;  %v24379_v42 = vld [vmem:[#allocation7_spill] sm:$0xff] }
 0x661   : > { %v4642_v55 = vadd.f32 %v24364_v3, %v24363_v54  ;;  %v24373_v54 = vld [vmem:[#allocation8_spill] sm:$0xff]  ;;  %v1661_v19 = vadd.f32 %v24379_v42, %v24378_v4  ;;  %v24389_v4 = vld [vmem:[#allocation26_spill] sm:$0xff] }
 0x662   : > { %v6484_v41 = vadd.f32 %v6302_v52, %v5661_v56  ;;  %v4023_v57 = vadd.f32 %v3838_v36, %v3200_v51  ;;  %v24374_v3 = vld [vmem:[#allocation12_spill] sm:$0xff]  ;;  %v24381_v51 = vld [vmem:[#allocation27_spill] sm:$0xff] }
 0x663   : > { %v4661_v10 = vadd.f32 %v24367_v27, %v4642_v55 }
 0x664   : > { %v6510_v31 = vmul.f32 %v21449_v18, %v6484_v41  ;;  %v1656_v41 = vadd.f32 %v24369_v46, %v24368_v26  ;;  %v24383_v26 = vld [vmem:[#allocation16_spill] sm:$0xff] }
 0x665   : > { %v6285_v8 = vpop.f32.mrf.mxu2  ;;  %v21475_v28 = vpop.f32.mrf.mxu1  ;;  %v4846_v36 = vadd.f32 %v4661_v10, %v4023_v57  ;;  %v1680_v46 = vadd.f32 %v24383_v26, %v1661_v19  ;;  %v24386_v57 = vld [vmem:[#allocation22_spill] sm:$0xff]  ;;  %v24391_v19 = vld [vmem:[#allocation25_spill] sm:$0xff] }
 0x666   : > { %v6536_v11 = vadd.f32 %v21463_v29, %v6510_v31  ;;  %v6286_v13 = vadd.f32 %v6285_v8, %v6266_v49  ;;  %v6580_v49 = vsel %vm6548_vm5, %v6532_v35, %v6564_v23  ;;  %v24371_v31 = vld [vmem:[#allocation6_spill] sm:$0xff]  ;;  %v1675_v55 = vadd.f32 %v24374_v3, %v1656_v41  ;;  %v24385_v3 = vld [vmem:[#allocation11_spill] sm:$0xff] }
 0x667   : > { %v1599_v8 = vadd.f32 %v24371_v31, %v24370_v2  ;;  %v5669_v41 = vadd.f32 %v5484_v5, %v4846_v36 }
 0x668   : > { %vm6552_vm6 = vcmp.ge.f32.partialorder %v6536_v11, 0.0  ;;  %v6568_v9 = vmul.f32 0.01, %v6536_v11  ;;  %v6305_v60 = vadd.f32 %v6304_v48, %v6286_v13  ;;  %v6306_v43 = vpop.f32.mrf.mxu3  ;;  %v24372_v48 = vld [vmem:[#allocation4_spill] sm:$0xff]  ;;  %v24375_v13 = vld [vmem:[#allocation18_spill] sm:$0xff]  ;;  %v2279_v27 = vadd.f32 %v24381_v51, %v1675_v55 }
 0x669   : > { %v1604_v39 = vadd.f32 %v24373_v54, %v24372_v48  ;;  %v24384_v48 = vld [vmem:[#allocation19_spill] sm:$0xff] }
 0x66a   : > { %v6488_v56 = vadd.f32 %v6305_v60, %v20867_v17  ;;  %v6584_v52 = vsel %vm6552_vm6, %v6536_v11, %v6568_v9  ;;  %v24376_v17 = vld [vmem:[#allocation17_spill] sm:$0xff]  ;;  %v24380_v9 = vld [vmem:[#allocation10_spill] sm:$0xff]  ;;  %v2298_v5 = vadd.f32 %v24389_v4, %v2279_v27 }
 0x66b   : > { %v21490_v58 = vpack.c.bf16 %v6584_v52, %v6580_v49  ;;  %v1713_v35 = vadd.f32 %v24376_v17, %v24375_v13  ;;  %v1618_v60 = vadd.f32 %v24380_v9, %v1599_v8  ;;  %v24382_v49 = vld [vmem:[#allocation14_spill] sm:$0xff]  ;;  %v21516_v17 = vpop.f32.mrf.mxu0 }
 0x66c   : > { %v6514_v16 = vmul.f32 %v21449_v18, %v6488_v56  ;;  %v1623_v52 = vadd.f32 %v24382_v49, %v1604_v39  ;;  %v24387_v13 = vld [vmem:[#allocation30_spill] sm:$0xff]  ;;  %v24388_v39 = vld [vmem:[#allocation23_spill] sm:$0xff] }
 0x66d   : > { %v6287_v23 = vpop.f32.mrf.mxu2  ;;  %v21500_v11 = vpop.f32.mrf.mxu1  ;;  %v2222_v54 = vadd.f32 %v24384_v48, %v1618_v60  ;;  %v1732_v10 = vadd.f32 %v24385_v3, %v1713_v35  ;;  %v24392_v35 = vld [vmem:[#allocation28_spill] sm:$0xff]  ;;  %v24393_v60 = vld [vmem:[#allocation29_spill] sm:$0xff]  ;;  %v24396_v48 = vld [vmem:[#allocation34_spill] sm:$0xff] }
 0x66e   : > { %24377 = vst [vmem:[#allocation78_spill] sm:$0xff] %v21500_v11  ;;  %v6288_v59 = vadd.f32 %v6287_v23, %v21421_v53  ;;  %v2227_v56 = vadd.f32 %v24386_v57, %v1623_v52  ;;  %v2284_v53 = vadd.f32 %v24387_v13, %v1680_v46  ;;  %v6540_v8 = vadd.f32 %v21463_v29, %v6514_v16  ;;  %v24394_v16 = vld [vmem:[#allocation32_spill] sm:$0xff]  ;;  %v24395_v46 = vld [vmem:[#allocation31_spill] sm:$0xff]  ;;  %v24399_v57 = vld [vmem:[#allocation41_spill] sm:$0xff] }
 0x66f   : > { %v2241_v23 = vadd.f32 %v24388_v39, %v2222_v54  ;;  %v2317_v51 = vadd.f32 %v24393_v60, %v2298_v5  ;;  %v24400_v13 = vld [vmem:[#allocation54_spill] sm:$0xff] }
 0x670   : > { %v6307_v2 = vadd.f32 %v6306_v43, %v6288_v59  ;;  %v21510_v31 = vpop.f32.mrf.mxu3  ;;  %v24390_v43 = vld [vmem:[#allocation35_spill] sm:$0xff]  ;;  %v2246_v36 = vadd.f32 %v24391_v19, %v2227_v56  ;;  %v6572_v27 = vmul.f32 0.01, %v6540_v8  ;;  %vm6556_vm8 = vcmp.ge.f32.partialorder %v6540_v8, 0.0  ;;  %v24402_v5 = vld [vmem:[#allocation42_spill] sm:$0xff]  ;;  %v24404_v19 = vld [vmem:[#allocation45_spill] sm:$0xff] }
 0x671   : > { %v2336_v42 = vadd.f32 %v24390_v43, %v1732_v10  ;;  %v2260_v9 = vadd.f32 %v24392_v35, %v2241_v23  ;;  %v24398_v10 = vld [vmem:[#allocation40_spill] sm:$0xff]  ;;  %v24408_v60 = vld [vmem:[#allocation66_spill] sm:$0xff] }
 0x672   : > { %v6492_v55 = vadd.f32 %v6307_v2, %v5669_v41  ;;  %v2265_v26 = vadd.f32 %v24394_v16, %v2246_v36  ;;  %v2303_v41 = vadd.f32 %v24395_v46, %v2284_v53  ;;  %v3048_v56 = vadd.f32 %v24399_v57, %v24398_v10  ;;  %v24403_v53 = vld [vmem:[#allocation43_spill] sm:$0xff]  ;;  %v24415_v11 = vld [vmem:[#allocation50_spill] sm:$0xff] }
 0x673   : > { %v2355_v54 = vadd.f32 %v24396_v48, %v2336_v42  ;;  %v3053_v43 = vadd.f32 %v24403_v53, %v24402_v5  ;;  %v24406_v42 = vld [vmem:[#allocation49_spill] sm:$0xff]  ;;  %v24409_v16 = vld [vmem:[#allocation63_spill] sm:$0xff]  ;;  %v24410_v48 = vld [vmem:[#allocation58_spill] sm:$0xff] }
 0x674   : > { %v6518_v59 = vmul.f32 %v21449_v18, %v6492_v55  ;;  %v24397_v18 = vmov 65535   ;;  %v24401_v55 = vld [vmem:[#allocation52_spill] sm:$0xff]  ;;  %v3928_v46 = vadd.f32 %v24409_v16, %v24408_v60  ;;  %v24411_v10 = vld [vmem:[#allocation59_spill] sm:$0xff]  ;;  %v3067_v25 = vadd.f32 %v24413_v6, %v3048_v56  ;;  %v24419_v16 = vld [vmem:[#allocation61_spill] sm:$0xff] }
 0x675   : > { %v21526_v49 = vpop.f32.mrf.mxu2  ;;  %v21528_v52 = vpop.f32.mrf.mxu1  ;;  %v6617_v3 = vsel %vm6615_vm7, 4294967295, %v24397_v18  ;;  %v3162_v39 = vadd.f32 %v24401_v55, %v24400_v13  ;;  %v3871_v57 = vadd.f32 %v24411_v10, %v24410_v48  ;;  %v6588_v18 = vsel %vm6556_vm8, %v6540_v8, %v6572_v27  ;;  %v24414_v5 = vld [vmem:[#allocation47_spill] sm:$0xff]  ;;  %v24418_v60 = vld [vmem:[#allocation60_spill] sm:$0xff]  ;;  %v24424_v56 = vld [vmem:[#allocation86_spill] sm:$0xff] }
 0x676   : > { %v6544_v2 = vadd.f32 %v21463_v29, %v6518_v59  ;;  %v24405_v29 = vld [vmem:[#allocation44_spill] sm:$0xff]  ;;  %v21550_v55 = vsel %vm6616_vm9, %v6617_v3, 0  ;;  %v3876_v33 = vadd.f32 %v24419_v16, %v24418_v60  ;;  %v6399_v27 = vpop.f32.mrf.mxu0  ;;  %v24429_v60 = vld [vmem:[#allocation70_spill] sm:$0xff]  ;;  %v24430_v16 = vld [vmem:[#allocation67_spill] sm:$0xff] }
 0x677   : > { %v3105_v36 = vadd.f32 %v24405_v29, %v24404_v19  ;;  %v24407_v59 = vld [vmem:[#allocation48_spill] sm:$0xff]  ;;  %24412 = vst [vmem:[#allocation81_spill] sm:$0xff] %v21550_v55  ;;  %v3072_v19 = vadd.f32 %v24415_v11, %v3053_v43 }
 0x678   : > { %vm6560_vm10 = vcmp.ge.f32.partialorder %v6544_v2, 0.0  ;;  %v6576_v23 = vmul.f32 0.01, %v6544_v2  ;;  %v6377_v4 = vpop.f32.mrf.mxu3  ;;  %v3110_v35 = vadd.f32 %v24407_v59, %v24406_v42  ;;  %v24417_v59 = vld [vmem:[#allocation53_spill] sm:$0xff]  ;;  %v24420_v48 = vld [vmem:[#allocation64_spill] sm:$0xff] }
 0x679   : > { %v3124_v53 = vadd.f32 %v24414_v5, %v3105_v36  ;;  %v3181_v62 = vadd.f32 %v24417_v59, %v3162_v39  ;;  %v3890_v8 = vadd.f32 %v24420_v48, %v3871_v57  ;;  %v24423_v10 = vld [vmem:[#allocation80_spill] sm:$0xff]  ;;  %v24426_v39 = vld [vmem:[#allocation33_spill] sm:$0xff]  ;;  %v3193_v48 = vadd.f32 %v3067_v25, %v2260_v9 }
 0x67a   : > { %v6592_v13 = vsel %vm6560_vm10, %v6544_v2, %v6576_v23  ;;  %v3129_v42 = vadd.f32 %v24416_v45, %v3110_v35  ;;  %v24421_v2 = vld [vmem:[#allocation65_spill] sm:$0xff]  ;;  %v24425_v36 = vld [vmem:[#allocation84_spill] sm:$0xff]  ;;  %v2322_v43 = vadd.f32 %v24426_v39, %v2303_v41  ;;  %v5517_v9 = vadd.f32 %v20841_v22, %v20828_v50 }
 0x67b   : > { %v6600_v29 = vpack.c.bf16 %v6592_v13, %v6588_v18  ;;  %v3947_v3 = vadd.f32 %v24421_v2, %v3928_v46  ;;  %v24422_v23 = vld [vmem:[#allocation77_spill] sm:$0xff]  ;;  %v4751_v5 = vadd.f32 %v24425_v36, %v24424_v56  ;;  %v24427_v35 = vld [vmem:[#allocation36_spill] sm:$0xff]  ;;  %v3933_v46 = vadd.f32 %v24430_v16, %v24429_v60  ;;  %v24435_v60 = vld [vmem:[#allocation83_spill] sm:$0xff] }
 0x67c   : > { %v4694_v6 = vadd.f32 %v24423_v10, %v24422_v23  ;;  %v2374_v13 = vadd.f32 %v24427_v35, %v2355_v54  ;;  %v24428_v59 = vld [vmem:[#allocation68_spill] sm:$0xff]  ;;  %v3194_v2 = vadd.f32 %v3124_v53, %v2317_v51  ;;  %v24431_v23 = vld [vmem:[#allocation85_spill] sm:$0xff]  ;;  %v3201_v36 = vadd.f32 %v3072_v19, %v2265_v26  ;;  %v24436_v53 = vld [vmem:[#allocation90_spill] sm:$0xff] }
 0x67d   : > { %v6358_v11 = vpop.f32.mrf.mxu2  ;;  %v6415_v18 = vpop.f32.mrf.mxu1  ;;  %v21566_v45 = vand.u32 %v21550_v55, %v6600_v29  ;;  %v3895_v57 = vadd.f32 %v24428_v59, %v3876_v33  ;;  %v4770_v56 = vadd.f32 %v24432_v21, %v4751_v5  ;;  %v3202_v55 = vadd.f32 %v3129_v42, %v2322_v43  ;;  %v24433_v33 = vld [vmem:[#allocation69_spill] sm:$0xff]  ;;  %v24434_v59 = vld [vmem:[#allocation79_spill] sm:$0xff] }
 0x67e   : > { %v4713_v10 = vadd.f32 %v24431_v23, %v4694_v6  ;;  %v21576_v40 = vadd.f32 %v3181_v62, %v2374_v13  ;;  %v4016_v41 = vadd.f32 %v3890_v8, %v3193_v48  ;;  %v4017_v54 = vadd.f32 %v3947_v3, %v3194_v2  ;;  %v24437_v6 = vld [vmem:[#allocation88_spill] sm:$0xff]  ;;  %v13830_v19 = vld [vmem:[%s24438_s28] sm:$0xf]  ;;  %v16455_v42 = vld [vmem:[%s24438_s28] sm:$0x30] }
 0x67f   : > { %6637 = vmatpush.bf16.msra.mxu1 %v21566_v45  ;;  %v4024_v39 = vadd.f32 %v3895_v57, %v3201_v36  ;;  %v3952_v35 = vadd.f32 %v24433_v33, %v3933_v46  ;;  %v4699_v25 = vadd.f32 %v24435_v60, %v24434_v59  ;;  %v4756_v26 = vadd.f32 %v24437_v6, %v24436_v53  ;;  %v24440_v16 = vld [vmem:[#allocation91_spill] sm:$0xff]  ;;  %v24442_v23 = vld [vmem:[#allocation73_spill] sm:$0xff] }
 0x680   : > { %v6380_v29 = vpop.f32.mrf.mxu3  ;;  %v4839_v51 = vadd.f32 %v4713_v10, %v4016_v41  ;;  %v4840_v21 = vadd.f32 %v4770_v56, %v4017_v54  ;;  %v5574_v62 = vadd.f32 %v20902_v61, %v20919_v37  ;;  %v5536_v50 = vadd.f32 %v20933_v34, %v5517_v9  ;;  %v24441_v2 = vld [vmem:[#allocation71_spill] sm:$0xff] }
 0x681   : > { %v6343_v22 = vadd.f32 %v21475_v28, %v21430_v24  ;;  %v6400_v8 = vadd.f32 %v6399_v27, %v6380_v29  ;;  %v21597_v3 = vor.u32 %v16455_v42, %v13830_v19  ;;  %v6338_v37 = vadd.f32 %v21432_v1, %v21417_v15  ;;  %v24446_v33 = vld [vmem:[#allocation99_spill] sm:$0xff] }
 0x682   : > { %v5593_v61 = vadd.f32 %v20968_v20, %v5574_v62  ;;  %v6340_v5 = vadd.f32 %v21457_v44, %v21419_v30  ;;  %v6395_v34 = vadd.f32 %v21484_v0, %v21510_v31  ;;  %v6397_v57 = vadd.f32 %v21516_v17, %v6377_v4  ;;  %v24439_v20 = vld [vmem:[#allocation89_spill] sm:$0xff]  ;;  %v6401_v44 = vpop.f32.mrf.mxu0  ;;  %v24447_v60 = vld [vmem:[#allocation111_spill] sm:$0xff]  ;;  %v24451_v62 = vld [vmem:[#allocation94_spill] sm:$0xff] }
 0x683   : > { %6638 = vmatpush.bf16.msra.mxu1 %v21490_v58  ;;  %v4718_v27 = vadd.f32 %v24439_v20, %v4699_v25  ;;  %v4775_v15 = vadd.f32 %v24440_v16, %v4756_v26  ;;  %v5522_v30 = vadd.f32 %v20900_v12, %v20839_v38  ;;  %v5579_v1 = vadd.f32 %v21006_v63, %v20998_v7  ;;  %v24443_v63 = vld [vmem:[#allocation100_spill] sm:$0xff] }
 0x684   : > { %v6357_v0 = vadd.f32 %v21526_v49, %v6338_v37  ;;  %v6414_v31 = vadd.f32 %v21528_v52, %v6395_v34  ;;  %v6359_v17 = vadd.f32 %v6358_v11, %v6340_v5  ;;  %v6416_v4 = vadd.f32 %v6415_v18, %v6397_v57  ;;  %v24444_v52 = vld [vmem:[#allocation109_spill] sm:$0xff]  ;;  %v24450_v26 = vld [vmem:[#allocation92_spill] sm:$0xff] }
 0x685   : > { %v6361_v43 = vpop.f32.mrf.mxu2  ;;  %v6418_v13 = vpop.f32.mrf.mxu1  ;;  %v4025_v48 = vadd.f32 %v3952_v35, %v3202_v55  ;;  %v3985_v10 = vadd.f32 %v24442_v23, %v24441_v2  ;;  %v5662_v38 = vadd.f32 %v5536_v50, %v4839_v51  ;;  %v5663_v12 = vadd.f32 %v5593_v61, %v4840_v21  ;;  %v24445_v55 = vld [vmem:[#allocation98_spill] sm:$0xff] }
 0x686   : > { %v6362_v24 = vadd.f32 %v6361_v43, %v6343_v22  ;;  %v6419_v28 = vadd.f32 %v6418_v13, %v6400_v8  ;;  %13832 = vmatmul.msk.bf16.vlgmr.msra.gmra.mxu1 %vm6611_vm11, %v21597_v3  ;;  %v5541_v7 = vadd.f32 %v21027_v32, %v5522_v30  ;;  %v5598_v29 = vadd.f32 %v24443_v63, %v5579_v1  ;;  %v24452_v22 = vld [vmem:[#allocation110_spill] sm:$0xff]  ;;  %v24453_v30 = vld [vmem:[#allocation21_spill] sm:$0xff]  ;;  %v24454_v1 = vld [vmem:[#allocation20_spill] sm:$0xff] }
 0x687   : > { %v4847_v49 = vadd.f32 %v4718_v27, %v4024_v39  ;;  %v4848_v41 = vadd.f32 %v4775_v15, %v4025_v48  ;;  %v6499_v11 = vperm.slane %v24444_v52, 1  ;;  %v6500_v18 = vperm.slane %v24444_v52, 2  ;;  %v24449_v39 = vld [vmem:[#allocation72_spill] sm:$0xff] }
 0x688   : > { %v6382_v46 = vpop.f32.mrf.mxu3  ;;  %v6489_v56 = vadd.f32 %v6362_v24, %v20996_v14  ;;  %v6490_v36 = vadd.f32 %v6419_v28, %v21039_v47  ;;  %v6481_v54 = vadd.f32 %v6357_v0, %v24445_v55  ;;  %v6482_v35 = vadd.f32 %v6414_v31, %v24446_v33  ;;  %v24448_v47 = vld [vmem:[#allocation78_spill] sm:$0xff]  ;;  %v24455_v31 = vld [vmem:[#allocation93_spill] sm:$0xff] }
 0x689   : > { %v6485_v59 = vadd.f32 %v6359_v17, %v5662_v38  ;;  %v6486_v14 = vadd.f32 %v6416_v4, %v5663_v12  ;;  %v6345_v25 = vadd.f32 %v24448_v47, %v24447_v60  ;;  %v6402_v32 = vadd.f32 %v6401_v44, %v6382_v46  ;;  %v24456_v4 = vld [vmem:[#allocation104_spill] sm:$0xff]  ;;  %v24457_v46 = vld [vmem:[#allocation101_spill] sm:$0xff] }
 0x68a   : > { %v6515_v9 = vmul.f32 %v6499_v11, %v6489_v56  ;;  %v6516_v51 = vmul.f32 %v6500_v18, %v6490_v36  ;;  %v4004_v6 = vadd.f32 %v24449_v39, %v3985_v10  ;;  %v4808_v19 = vadd.f32 %v24451_v62, %v24450_v26  ;;  %v6470_v28 = vpop.f32.mrf.mxu0 }
 0x68b   : > { %v5670_v42 = vadd.f32 %v5541_v7, %v4847_v49  ;;  %v5671_v50 = vadd.f32 %v5598_v29, %v4848_v41  ;;  %v6525_v8 = vperm.slane %v24452_v22, 1  ;;  %v6526_v61 = vperm.slane %v24452_v22, 2 }
 0x68c   : > { %v6507_v43 = vmul.f32 %v6499_v11, %v6481_v54  ;;  %v6508_v13 = vmul.f32 %v6500_v18, %v6482_v35  ;;  %v6511_v34 = vmul.f32 %v6499_v11, %v6485_v59  ;;  %v6512_v57 = vmul.f32 %v6500_v18, %v6486_v14 }
 0x68d   : > { %v6363_v21 = vpop.f32.mrf.mxu2  ;;  %v6420_v53 = vpop.f32.mrf.mxu1  ;;  %v6541_v20 = vadd.f32 %v6525_v8, %v6515_v9  ;;  %v6542_v27 = vadd.f32 %v6526_v61, %v6516_v51  ;;  %v1718_v44 = vadd.f32 %v24454_v1, %v24453_v30  ;;  %v4018_v0 = vadd.f32 %v4004_v6, %v21576_v40  ;;  %v24458_v51 = vld [vmem:[#allocation102_spill] sm:$0xff]  ;;  %v24463_v1 = vld [vmem:[#allocation56_spill] sm:$0xff] }
 0x68e   : > { %v6364_v37 = vadd.f32 %v6363_v21, %v6345_v25  ;;  %v6421_v5 = vadd.f32 %v6420_v53, %v6402_v32  ;;  %v4827_v17 = vadd.f32 %v24455_v31, %v4808_v19  ;;  %v5631_v48 = vadd.f32 %v24457_v46, %v24456_v4  ;;  %v24459_v21 = vld [vmem:[#allocation103_spill] sm:$0xff]  ;;  %v24460_v19 = vld [vmem:[#allocation81_spill] sm:$0xff] }
 0x68f   : > { %v21641_v10 = vperm.slane %v24444_v52, 3  ;;  %v6533_v56 = vadd.f32 %v6525_v8, %v6507_v43  ;;  %v6534_v36 = vadd.f32 %v6526_v61, %v6508_v13  ;;  %v6537_v38 = vadd.f32 %v6525_v8, %v6511_v34  ;;  %v13840_v31 = vld [vmem:[%s24438_s28 + $0x8] sm:$0xf]  ;;  %v24465_v46 = vld [vmem:[#allocation37_spill] sm:$0xff] }
 0x690   : > { %v6451_v24 = vpop.f32.mrf.mxu3  ;;  %v6493_v16 = vadd.f32 %v6364_v37, %v5670_v42  ;;  %v6494_v15 = vadd.f32 %v6421_v5, %v5671_v50  ;;  %v6538_v12 = vadd.f32 %v6526_v61, %v6512_v57  ;;  %v6573_v7 = vmul.f32 0.01, %v6541_v20  ;;  %v24462_v57 = vld [vmem:[#allocation38_spill] sm:$0xff] }
 0x691   : > { %v6574_v63 = vmul.f32 0.01, %v6542_v27  ;;  %vm6557_vm12 = vcmp.ge.f32.partialorder %v6541_v20, 0.0  ;;  %vm6558_vm13 = vcmp.ge.f32.partialorder %v6542_v27, 0.0  ;;  %v21644_v55 = vperm.slane %v24452_v22, 3  ;;  %v24461_v22 = vld [vmem:[#allocation15_spill] sm:$0xff] }
 0x692   : > { %v6519_v2 = vmul.f32 %v6499_v11, %v6493_v16  ;;  %v6520_v23 = vmul.f32 %v6500_v18, %v6494_v15  ;;  %vm6553_vm0 = vcmp.ge.f32.partialorder %v6537_v38, 0.0  ;;  %v6569_v18 = vmul.f32 0.01, %v6537_v38  ;;  %v6472_v26 = vpop.f32.mrf.mxu0 }
 0x693   : > { %v6570_v54 = vmul.f32 0.01, %v6538_v12  ;;  %v6589_v35 = vsel %vm6557_vm12, %v6541_v20, %v6573_v7  ;;  %v6590_v59 = vsel %vm6558_vm13, %v6542_v27, %v6574_v63  ;;  %vm6554_vm1 = vcmp.ge.f32.partialorder %v6538_v12, 0.0  ;;  %v24468_v7 = vld [vmem:[#allocation57_spill] sm:$0xff] }
 0x694   : > { %v6545_v29 = vadd.f32 %v6525_v8, %v6519_v2  ;;  %v6546_v49 = vadd.f32 %v6526_v61, %v6520_v23  ;;  %v5650_v53 = vadd.f32 %v24459_v21, %v5631_v48  ;;  %vm6549_vm2 = vcmp.ge.f32.partialorder %v6533_v56, 0.0  ;;  %v24466_v2 = vld [vmem:[#allocation74_spill] sm:$0xff]  ;;  %v24467_v23 = vld [vmem:[#allocation75_spill] sm:$0xff]  ;;  %v24475_v21 = vld [vmem:[#allocation97_spill] sm:$0xff] }
 0x695   : > { %v6432_v41 = vpop.f32.mrf.mxu2  ;;  %v6565_v39 = vmul.f32 0.01, %v6533_v56  ;;  %v6566_v6 = vmul.f32 0.01, %v6534_v36  ;;  %vm6550_vm4 = vcmp.ge.f32.partialorder %v6534_v36, 0.0  ;;  %v1737_v8 = vadd.f32 %v24461_v22, %v1718_v44  ;;  %v24464_v44 = vld [vmem:[#allocation55_spill] sm:$0xff] }
 0x696   : > { %v6452_v40 = vadd.f32 %v6451_v24, %v6432_v41  ;;  %vm6561_vm14 = vcmp.ge.f32.partialorder %v6545_v29, 0.0  ;;  %v6577_v11 = vmul.f32 0.01, %v6545_v29  ;;  %vm6562_vm15 = vcmp.ge.f32.partialorder %v6546_v49, 0.0  ;;  %v24469_v41 = vld [vmem:[#allocation95_spill] sm:$0xff] }
 0x697   : > { %v6578_v52 = vmul.f32 0.01, %v6546_v49  ;;  %v6585_v61 = vsel %vm6553_vm0, %v6537_v38, %v6569_v18  ;;  %v6586_v37 = vsel %vm6554_vm1, %v6538_v12, %v6570_v54  ;;  %v4841_v43 = vadd.f32 %v4827_v17, %v4018_v0  ;;  %v16506_v17 = vld [vmem:[%s24438_s28 + $0x8] sm:$0x30] }
 0x698   : > { %v6471_v33 = vadd.f32 %v6470_v28, %v6452_v40  ;;  %v6593_v14 = vsel %vm6561_vm14, %v6545_v29, %v6577_v11  ;;  %v6453_v47 = vpop.f32.mrf.mxu3  ;;  %v2341_v24 = vadd.f32 %v24462_v57, %v1737_v8  ;;  %v6581_v28 = vsel %vm6549_vm2, %v6533_v56, %v6565_v39  ;;  %v24470_v40 = vld [vmem:[#allocation96_spill] sm:$0xff]  ;;  %v24476_v39 = vld [vmem:[#allocation106_spill] sm:$0xff] }
 0x699   : > { %v6594_v60 = vsel %vm6562_vm15, %v6546_v49, %v6578_v52  ;;  %v6601_v25 = vpack.c.bf16 %v6593_v14, %v6589_v35  ;;  %v6582_v20 = vsel %vm6550_vm4, %v6534_v36, %v6566_v6  ;;  %v5664_v27 = vadd.f32 %v5650_v53, %v4841_v43 }
 0x69a   : > { %v6602_v9 = vpack.c.bf16 %v6594_v60, %v6590_v59  ;;  %v6483_v32 = vadd.f32 %v6471_v33, %v24458_v51  ;;  %v21663_v15 = vpack.c.bf16 %v6585_v61, %v6581_v28  ;;  %v21665_v30 = vpack.c.bf16 %v6586_v37, %v6582_v20  ;;  %v6475_v29 = vpop.f32.mrf.mxu0  ;;  %v24471_v33 = vld [vmem:[#allocation39_spill] sm:$0xff]  ;;  %v24472_v59 = vld [vmem:[#allocation76_spill] sm:$0xff] }
 0x69b   : > { %v21650_v42 = vand.u32 %v24460_v19, %v6601_v25  ;;  %v3167_v0 = vadd.f32 %v24464_v44, %v24463_v1  ;;  %v2360_v48 = vadd.f32 %v24465_v46, %v2341_v24  ;;  %v3990_v56 = vadd.f32 %v24467_v23, %v24466_v2  ;;  %v24473_v60 = vld [vmem:[#allocation107_spill] sm:$0xff]  ;;  %v24477_v61 = vld [vmem:[#allocation108_spill] sm:$0xff]  ;;  %v16520_v46 = vld [vmem:[%s24215_s6 + $0x1f4] sm:$0xf0] }
 0x69c   : > { %v6509_v62 = vmul.f32 %v21641_v10, %v6483_v32  ;;  %v21653_v50 = vand.u32 %v24460_v19, %v6602_v9  ;;  %v21684_v12 = vor.u32 %v16506_v17, %v13840_v31  ;;  %v4813_v11 = vadd.f32 %v24470_v40, %v24469_v41  ;;  %v13954_v31 = vld [vmem:[%s24215_s6 + $0x200] sm:$0xf]  ;;  %v16522_v17 = vld [vmem:[%s24215_s6 + $0x204] sm:$0xf0]  ;;  %v16536_v41 = vld [vmem:[%s24215_s6 + $0x274] sm:$0xf0] }
 0x69d   : > { %v6434_v5 = vpop.f32.mrf.mxu2  ;;  %6651 = vmatpush.bf16.msra.mxu2 %v21650_v42  ;;  %v3186_v63 = vadd.f32 %v24468_v7, %v3167_v0  ;;  %v2379_v35 = vadd.f32 %v24471_v33, %v2360_v48  ;;  %v4009_v14 = vadd.f32 %v24472_v59, %v3990_v56  ;;  %v14018_v2 = vld [vmem:[%s24215_s6 + $0x280] sm:$0xf]  ;;  %v16538_v23 = vld [vmem:[%s24215_s6 + $0x284] sm:$0xf0]  ;;  %vm7113_vm10 = vcmask 130048  }
 0x69e   : > { %v6535_v13 = vadd.f32 %v21644_v55, %v6509_v62  ;;  %v6454_v34 = vadd.f32 %v6453_v47, %v6434_v5  ;;  %6665 = vmatpush.bf16.msra.mxu3 %v21653_v50  ;;  %6786 = vmatpush.bf16.msrb.mxu0 %v21653_v50  ;;  %v24474_v47 = vld [vmem:[#allocation105_spill] sm:$0xff]  ;;  %v4832_v53 = vadd.f32 %v24475_v21, %v4813_v11  ;;  %v16518_v7 = vld [vmem:[%s24215_s6 + $0x1e4] sm:$0xf0]  ;;  %v14082_v59 = vld [vmem:[%s24215_s6 + $0x300] sm:$0xf]  ;;  %vm9346_vm14 = vcmask 392192  }
 0x69f   : > { %v5636_v25 = vadd.f32 %v24474_v47, %v24473_v60  ;;  %v3203_v32 = vadd.f32 %v3186_v63, %v2379_v35  ;;  %v14019_v63 = vor.u32 %v16538_v23, %v14018_v2  ;;  %v16534_v33 = vld [vmem:[%s24215_s6 + $0x264] sm:$0xf0]  ;;  %v16516_v35 = vld [vmem:[%s24215_s6 + $0x1d4] sm:$0xf0]  ;;  %v14058_v23 = vld [vmem:[%s24215_s6 + $0x2d0] sm:$0xf] }
 0x6a0   : > { %v6473_v16 = vadd.f32 %v6472_v26, %v6454_v34  ;;  %v6456_v36 = vpop.f32.mrf.mxu3  ;;  %v6567_v52 = vmul.f32 0.01, %v6535_v13  ;;  %vm6551_vm5 = vcmp.ge.f32.partialorder %v6535_v13, 0.0  ;;  %v16532_v21 = vld [vmem:[%s24215_s6 + $0x254] sm:$0xf0]  ;;  %vm9847_vm4 = vcmask 72704  }
 0x6a1   : > { %6652 = vmatpush.bf16.msra.mxu2 %v21663_v15  ;;  %v4026_v8 = vadd.f32 %v4009_v14, %v3203_v32  ;;  %v5655_v37 = vadd.f32 %v24477_v61, %v5636_v25  ;;  %v16554_v14 = vld [vmem:[%s24215_s6 + $0x304] sm:$0xf0]  ;;  %v14074_v25 = vld [vmem:[%s24215_s6 + $0x2f0] sm:$0xf] }
 0x6a2   : > { %v6487_v4 = vadd.f32 %v6473_v16, %v5664_v27  ;;  %6666 = vmatpush.bf16.msra.mxu3 %v21665_v30  ;;  %6787 = vmatpush.bf16.msrb.mxu0 %v21665_v30  ;;  %v6583_v26 = vsel %vm6551_vm5, %v6535_v13, %v6567_v52  ;;  %v6477_v20 = vpop.f32.mrf.mxu0  ;;  %v14083_v60 = vor.u32 %v16554_v14, %v14082_v59  ;;  %v13994_v32 = vld [vmem:[%s24215_s6 + $0x250] sm:$0xf]  ;;  %v16530_v61 = vld [vmem:[%s24215_s6 + $0x244] sm:$0xf0]  ;;  %v16553_v14 = vld [vmem:[%s24215_s6 + $0x304] sm:$0xf] }
 0x6a3   : > { %v4849_v57 = vadd.f32 %v4832_v53, %v4026_v8  ;;  %v13986_v8 = vld [vmem:[%s24215_s6 + $0x240] sm:$0xf]  ;;  %v16526_v2 = vld [vmem:[%s24215_s6 + $0x224] sm:$0xf0] }
 0x6a4   : > { %v6513_v38 = vmul.f32 %v21641_v10, %v6487_v4  ;;  %13833 = vmatmul.msk.bf16.vlgmr.msra.gmra.mxu2 %vm6611_vm11, %v21597_v3  ;;  %v13955_v4 = vor.u32 %v16522_v17, %v13954_v31  ;;  %v14066_v31 = vld [vmem:[%s24215_s6 + $0x2e0] sm:$0xf] }
 0x6a5   : > { %6758 = vmatpush.bf16.msrb.mxu2 %v21566_v45  ;;  %13834 = vmatmul.msk.bf16.vlgmr.msra.gmra.mxu3 %vm6611_vm11, %v21597_v3  ;;  %v6437_v49 = vpop.f32.mrf.mxu2  ;;  %v5672_v27 = vadd.f32 %v5655_v37, %v4849_v57  ;;  %v13914_v37 = vld [vmem:[%s24215_s6 + $0x1b0] sm:$0xf]  ;;  %v13906_v57 = vld [vmem:[%s24215_s6 + $0x1a0] sm:$0xf] }
 0x6a6   : > { %6772 = vmatpush.bf16.msrb.mxu3 %v21650_v42  ;;  %v6539_v18 = vadd.f32 %v21644_v55, %v6513_v38  ;;  %v6457_v54 = vadd.f32 %v6456_v36, %v6437_v49  ;;  %13844 = vmatmul.msk.bf16.vlgmr.msrb.gmra.mxu0 %vm6611_vm11, %v21684_v12  ;;  %v13938_v38 = vld [vmem:[%s24215_s6 + $0x1e0] sm:$0xf] }
 0x6a7   : > { %v13939_v52 = vor.u32 %v16518_v7, %v13938_v38  ;;  %7145 = vmatpush.bf16.msra.mxu0 %v14083_v60  ;;  %v16533_v38 = vld [vmem:[%s24215_s6 + $0x264] sm:$0xf]  ;;  %v14004_v7 = vld [vmem:[%s24215_s6 + $0x268] sm:$0xf0] }
 0x6a8   : > { %vm6555_vm6 = vcmp.ge.f32.partialorder %v6539_v18, 0.0  ;;  %v6571_v9 = vmul.f32 0.01, %v6539_v18  ;;  %v6476_v51 = vadd.f32 %v6475_v29, %v6457_v54  ;;  %v6458_v43 = vpop.f32.mrf.mxu3  ;;  %v14010_v29 = vld [vmem:[%s24215_s6 + $0x270] sm:$0xf] }
 0x6a9   : > { %6759 = vmatpush.bf16.msrb.mxu2 %v21490_v58  ;;  %v14011_v40 = vor.u32 %v16536_v41, %v14010_v29  ;;  %v14002_v54 = vld [vmem:[%s24215_s6 + $0x260] sm:$0xf]  ;;  %v14007_v29 = vor.u32 %v16533_v38, %v14004_v7  ;;  %v16524_v41 = vld [vmem:[%s24215_s6 + $0x214] sm:$0xf0]  ;;  %v14084_v60 = vld [vmem:[%s24215_s6 + $0x308] sm:$0xf0] }
 0x6aa   : > { %6773 = vmatpush.bf16.msrb.mxu3 %v21663_v15  ;;  %v6491_v6 = vadd.f32 %v6476_v51, %v24476_v39  ;;  %v6587_v62 = vsel %vm6555_vm6, %v6539_v18, %v6571_v9  ;;  %v13930_v18 = vld [vmem:[%s24215_s6 + $0x1d0] sm:$0xf]  ;;  %v14003_v47 = vor.u32 %v16534_v33, %v14002_v54  ;;  %v16552_v9 = vld [vmem:[%s24215_s6 + $0x2f4] sm:$0xf0]  ;;  %v13922_v39 = vld [vmem:[%s24215_s6 + $0x1c0] sm:$0xf] }
 0x6ab   : > { %v21704_v22 = vpack.c.bf16 %v6587_v62, %v6583_v26  ;;  %v13931_v51 = vor.u32 %v16516_v35, %v13930_v18  ;;  %v14075_v53 = vor.u32 %v16552_v9, %v14074_v25  ;;  %v13995_v26 = vor.u32 %v16532_v21, %v13994_v32  ;;  %v16546_v18 = vld [vmem:[%s24215_s6 + $0x2c4] sm:$0xf0]  ;;  %v16531_v54 = vld [vmem:[%s24215_s6 + $0x254] sm:$0xf]  ;;  %v13996_v33 = vld [vmem:[%s24215_s6 + $0x258] sm:$0xf0] }
 0x6ac   : > { %v6517_v5 = vmul.f32 %v21641_v10, %v6491_v6  ;;  %v16514_v6 = vld [vmem:[%s24215_s6 + $0x1c4] sm:$0xf0]  ;;  %v13999_v59 = vor.u32 %v16531_v54, %v13996_v33  ;;  %v14087_v25 = vor.u32 %v16553_v14, %v14084_v60  ;;  %v16544_v9 = vld [vmem:[%s24215_s6 + $0x2b4] sm:$0xf0]  ;;  %v13988_v32 = vld [vmem:[%s24215_s6 + $0x248] sm:$0xf0] }
 0x6ad   : > { %v6439_v34 = vpop.f32.mrf.mxu2  ;;  %7117 = vmatpush.bf16.msra.mxu2 %v13955_v4  ;;  %v13923_v62 = vor.u32 %v16514_v6, %v13922_v39  ;;  %7146 = vmatpush.bf16.msra.mxu0 %v14075_v53  ;;  %v14012_v4 = vld [vmem:[%s24215_s6 + $0x278] sm:$0xf0]  ;;  %v16551_v39 = vld [vmem:[%s24215_s6 + $0x2f4] sm:$0xf]  ;;  %v16545_v38 = vld [vmem:[%s24215_s6 + $0x2c4] sm:$0xf] }
 0x6ae   : > { %v6543_v24 = vadd.f32 %v21644_v55, %v6517_v5  ;;  %v6459_v28 = vadd.f32 %v6458_v43, %v6439_v34  ;;  %7131 = vmatpush.bf16.msra.mxu3 %v14019_v63  ;;  %v16512_v5 = vld [vmem:[%s24215_s6 + $0x1b4] sm:$0xf0]  ;;  %v13987_v43 = vor.u32 %v16530_v61, %v13986_v8  ;;  %v14076_v6 = vld [vmem:[%s24215_s6 + $0x2f8] sm:$0xf0]  ;;  %v16542_v8 = vld [vmem:[%s24215_s6 + $0x2a4] sm:$0xf0] }
 0x6af   : > { %v13915_v34 = vor.u32 %v16512_v5, %v13914_v37  ;;  %v16527_v61 = vld [vmem:[%s24215_s6 + $0x234] sm:$0xf]  ;;  %v13980_v5 = vld [vmem:[%s24215_s6 + $0x238] sm:$0xf0]  ;;  %v14052_v7 = vld [vmem:[%s24215_s6 + $0x2c8] sm:$0xf0] }
 0x6b0   : > { %v6478_v16 = vadd.f32 %v6477_v20, %v6459_v28  ;;  %v6575_v44 = vmul.f32 0.01, %v6543_v24  ;;  %vm6559_vm7 = vcmp.ge.f32.partialorder %v6543_v24, 0.0  ;;  %v13898_v28 = vld [vmem:[%s24215_s6 + $0x190] sm:$0xf]  ;;  %vm10348_vm6 = vcmask 916480  }
 0x6b1   : > { %v16508_v20 = vld [vmem:[%s24215_s6 + $0x194] sm:$0xf0]  ;;  %v14156_v33 = vld [vmem:[%s24215_s6 + $0x70] sm:$0xf]  ;;  %v16517_v60 = vld [vmem:[%s24215_s6 + $0x1e4] sm:$0xf] }
 0x6b2   : > { %v6495_v1 = vadd.f32 %v6478_v16, %v5672_v27  ;;  %v6591_v56 = vsel %vm6559_vm7, %v6543_v24, %v6575_v44  ;;  %7132 = vmatpush.bf16.msra.mxu3 %v14011_v40  ;;  %v16537_v27 = vld [vmem:[%s24215_s6 + $0x284] sm:$0xf]  ;;  %v14020_v16 = vld [vmem:[%s24215_s6 + $0x288] sm:$0xf0]  ;;  %v13978_v44 = vld [vmem:[%s24215_s6 + $0x230] sm:$0xf] }
 0x6b3   : > { %v14050_v40 = vld [vmem:[%s24215_s6 + $0x2c0] sm:$0xf]  ;;  %v16471_v14 = vld [vmem:[%s24215_s6 + $0x74] sm:$0xf0] }
 0x6b4   : > { %v6521_v13 = vmul.f32 %v21641_v10, %v6495_v1  ;;  %13842 = vmatmul.msk.bf16.vlgmr.msrb.gmra.mxu2 %vm6611_vm11, %v21684_v12  ;;  %v13946_v10 = vld [vmem:[%s24215_s6 + $0x1f0] sm:$0xf]  ;;  %v13899_v1 = vor.u32 %v16508_v20, %v13898_v28  ;;  %v14051_v35 = vor.u32 %v16546_v18, %v14050_v40  ;;  %v16540_v28 = vld [vmem:[%s24215_s6 + $0x294] sm:$0xf0]  ;;  %v16525_v20 = vld [vmem:[%s24215_s6 + $0x224] sm:$0xf] }
 0x6b5   : > { %13843 = vmatmul.msk.bf16.vlgmr.msrb.gmra.mxu3 %vm6611_vm11, %v21684_v12  ;;  %v13947_v48 = vor.u32 %v16520_v46, %v13946_v10  ;;  %v16550_v10 = vld [vmem:[%s24215_s6 + $0x2e4] sm:$0xf0]  ;;  %v14044_v18 = vld [vmem:[%s24215_s6 + $0x2b8] sm:$0xf0] }
 0x6b6   : > { %v6547_v0 = vadd.f32 %v21644_v55, %v6521_v13  ;;  %7133 = vmatpush.bf16.msra.mxu3 %v14003_v47  ;;  %v14023_v13 = vor.u32 %v16537_v27, %v14020_v16  ;;  %v14067_v46 = vor.u32 %v16550_v10, %v14066_v31  ;;  %v14042_v47 = vld [vmem:[%s24215_s6 + $0x2b0] sm:$0xf]  ;;  %v13972_v27 = vld [vmem:[%s24215_s6 + $0x228] sm:$0xf0]  ;;  %v16547_v16 = vld [vmem:[%s24215_s6 + $0x2d4] sm:$0xf] }
 0x6b7   : > { %7118 = vmatpush.bf16.msra.mxu2 %v13947_v48  ;;  %v13970_v48 = vld [vmem:[%s24215_s6 + $0x220] sm:$0xf]  ;;  %v14043_v21 = vor.u32 %v16544_v9, %v14042_v47  ;;  %v14090_v31 = vld [vmem:[%s24215_s6 + $0x310] sm:$0xf]  ;;  %v16555_v10 = vld [vmem:[%s24215_s6 + $0x314] sm:$0xf] }
 0x6b8   : > { %vm6563_vm8 = vcmp.ge.f32.partialorder %v6547_v0, 0.0  ;;  %v6579_v55 = vmul.f32 0.01, %v6547_v0  ;;  %7147 = vmatpush.bf16.msra.mxu0 %v14067_v46  ;;  %v16521_v46 = vld [vmem:[%s24215_s6 + $0x204] sm:$0xf] }
 0x6b9   : > { %v13940_v47 = vld [vmem:[%s24215_s6 + $0x1e8] sm:$0xf0]  ;;  %v16541_v9 = vld [vmem:[%s24215_s6 + $0x2a4] sm:$0xf] }
 0x6ba   : > { %v6595_v36 = vsel %vm6563_vm8, %v6547_v0, %v6579_v55  ;;  %7134 = vmatpush.bf16.msra.mxu3 %v13995_v26  ;;  %v16528_v0 = vld [vmem:[%s24215_s6 + $0x234] sm:$0xf0]  ;;  %v14079_v26 = vor.u32 %v16551_v39, %v14076_v6  ;;  %v14148_v39 = vld [vmem:[%s24215_s6 + $0x60] sm:$0xf]  ;;  %vm10805_vm8 = vcmask 516096  }
 0x6bb   : > { %v6603_v49 = vpack.c.bf16 %v6595_v36, %v6591_v56  ;;  %7119 = vmatpush.bf16.msra.mxu2 %v13939_v52  ;;  %v13979_v17 = vor.u32 %v16528_v0, %v13978_v44  ;;  %v13971_v56 = vor.u32 %v16526_v2, %v13970_v48  ;;  %v16548_v36 = vld [vmem:[%s24215_s6 + $0x2d4] sm:$0xf0]  ;;  %v13975_v44 = vor.u32 %v16525_v20, %v13972_v27  ;;  %v16513_v20 = vld [vmem:[%s24215_s6 + $0x1c4] sm:$0xf]  ;;  %v13924_v27 = vld [vmem:[%s24215_s6 + $0x1c8] sm:$0xf0] }
 0x6bc   : > { %v14059_v63 = vor.u32 %v16548_v36, %v14058_v23  ;;  %v16523_v23 = vld [vmem:[%s24215_s6 + $0x214] sm:$0xf] }
 0x6bd   : > { %v21746_v11 = vand.u32 %v24460_v19, %v6603_v49  ;;  %v13962_v49 = vld [vmem:[%s24215_s6 + $0x210] sm:$0xf] }
 0x6be   : > { %7135 = vmatpush.bf16.msra.mxu3 %v13987_v43  ;;  %7148 = vmatpush.bf16.msra.mxu0 %v14059_v63  ;;  %v13963_v52 = vor.u32 %v16524_v41, %v13962_v49  ;;  %v16549_v43 = vld [vmem:[%s24215_s6 + $0x2e4] sm:$0xf]  ;;  %v16519_v49 = vld [vmem:[%s24215_s6 + $0x1f4] sm:$0xf]  ;;  %v13948_v41 = vld [vmem:[%s24215_s6 + $0x1f8] sm:$0xf0] }
 0x6bf   : > { %6679 = vmatpush.bf16.msrb.mxu1 %v21746_v11  ;;  %7120 = vmatpush.bf16.msra.mxu2 %v13931_v51  ;;  %v16529_v51 = vld [vmem:[%s24215_s6 + $0x244] sm:$0xf]  ;;  %v13951_v40 = vor.u32 %v16519_v49, %v13948_v41  ;;  %v16503_v49 = vld [vmem:[%s24215_s6 + $0x174] sm:$0xf0]  ;;  %v14292_v41 = vld [vmem:[%s24215_s6 + $0x180] sm:$0xf] }
 0x6c0   : > { %v13991_v53 = vor.u32 %v16529_v51, %v13988_v32  ;;  %v14036_v51 = vld [vmem:[%s24215_s6 + $0x2a8] sm:$0xf0] }
 0x6c1   : > { %v14039_v32 = vor.u32 %v16541_v9, %v14036_v51  ;;  %v14276_v51 = vld [vmem:[%s24215_s6 + $0x160] sm:$0xf] }
 0x6c2   : > { %7136 = vmatpush.bf16.msra.mxu3 %v13979_v17  ;;  %7149 = vmatpush.bf16.msra.mxu0 %v14051_v35  ;;  %v16556_v17 = vld [vmem:[%s24215_s6 + $0x314] sm:$0xf0] }
 0x6c3   : > { %6680 = vmatpush.bf16.msrb.mxu1 %v21704_v22  ;;  %7121 = vmatpush.bf16.msra.mxu2 %v13923_v62  ;;  %v14034_v62 = vld [vmem:[%s24215_s6 + $0x2a0] sm:$0xf] }
 0x6c4   : > { %v14035_v37 = vor.u32 %v16542_v8, %v14034_v62  ;;  %v16515_v62 = vld [vmem:[%s24215_s6 + $0x1d4] sm:$0xf]  ;;  %v13932_v8 = vld [vmem:[%s24215_s6 + $0x1d8] sm:$0xf0] }
 0x6c6   : > { %13835 = vmatmul.msk.bf16.vlgmr.msrb.gmra.mxu1 %vm6611_vm11, %v21597_v3  ;;  %v16510_v3 = vld [vmem:[%s24215_s6 + $0x1a4] sm:$0xf0]  ;;  %7137 = vmatpush.bf16.msra.mxu3 %v13971_v56  ;;  %v13964_v56 = vld [vmem:[%s24215_s6 + $0x218] sm:$0xf0] }
 0x6c7   : > { %6800 = vmatpush.bf16.msra.mxu1 %v21746_v11  ;;  %7122 = vmatpush.bf16.msra.mxu2 %v13915_v34  ;;  %v13907_v24 = vor.u32 %v16510_v3, %v13906_v57  ;;  %v14068_v34 = vld [vmem:[%s24215_s6 + $0x2e8] sm:$0xf0]  ;;  %v13983_v57 = vor.u32 %v16527_v61, %v13980_v5  ;;  %v13967_v36 = vor.u32 %v16523_v23, %v13964_v56  ;;  %v14028_v5 = vld [vmem:[%s24215_s6 + $0x298] sm:$0xf0] }
 0x6c8   : > { %7150 = vmatpush.bf16.msra.mxu0 %v14043_v21  ;;  %v14071_v3 = vor.u32 %v16549_v43, %v14068_v34  ;;  %v13935_v61 = vor.u32 %v16515_v62, %v13932_v8  ;;  %v13908_v23 = vld [vmem:[%s24215_s6 + $0x1a8] sm:$0xf0]  ;;  %v14268_v8 = vld [vmem:[%s24215_s6 + $0x150] sm:$0xf] }
 0x6ca   : > { %7138 = vmatpush.bf16.msra.mxu3 %v13963_v52  ;;  %v16543_v52 = vld [vmem:[%s24215_s6 + $0x2b4] sm:$0xf] }
 0x6cb   : > { %6801 = vmatpush.bf16.msra.mxu1 %v21704_v22  ;;  %7123 = vmatpush.bf16.msra.mxu2 %v13907_v24  ;;  %v14026_v24 = vld [vmem:[%s24215_s6 + $0x290] sm:$0xf]  ;;  %v14047_v54 = vor.u32 %v16543_v52, %v14044_v18  ;;  %v14116_v18 = vld [vmem:[%s24215_s6 + $0x20] sm:$0xf] }
 0x6cc   : > { %7151 = vmatpush.bf16.msra.mxu0 %v14035_v37  ;;  %v16539_v37 = vld [vmem:[%s24215_s6 + $0x294] sm:$0xf] }
 0x6cd   : > { %v14031_v43 = vor.u32 %v16539_v37, %v14028_v5  ;;  %v14100_v5 = vld [vmem:[%s24215_s6] sm:$0xf] }
 0x6ce   : > { %7201 = vmatpush.bf16.msrb.mxu3 %v14087_v25  ;;  %v13943_v25 = vor.u32 %v16517_v60, %v13940_v47 }
 0x6cf   : > { %7124 = vmatpush.bf16.msra.mxu2 %v13899_v1  ;;  %v14060_v1 = vld [vmem:[%s24215_s6 + $0x2d8] sm:$0xf0] }
 0x6d0   : > { %v14063_v0 = vor.u32 %v16547_v16, %v14060_v1  ;;  %v13927_v1 = vor.u32 %v16513_v20, %v13924_v27 }
 0x6d2   : > { %7202 = vmatpush.bf16.msrb.mxu3 %v14079_v26  ;;  %v16469_v26 = vld [vmem:[%s24215_s6 + $0x64] sm:$0xf0] }
 0x6d3   : > { %7187 = vmatpush.bf16.msrb.mxu2 %v14023_v13  ;;  %v14027_v13 = vor.u32 %v16540_v28, %v14026_v24  ;;  %v14149_v34 = vor.u32 %v16469_v26, %v14148_v39  ;;  %v16467_v28 = vld [vmem:[%s24215_s6 + $0x54] sm:$0xf0] }
 0x6d4   : > { %v16459_v39 = vld [vmem:[%s24215_s6 + $0x14] sm:$0xf0] }
 0x6d5   : > { %7152 = vmatpush.bf16.msra.mxu0 %v14027_v13 }
 0x6d6   : > { %13845 = vmatmul.msk.bf16.vlgmr.msra.gmra.mxu1 %vm6611_vm11, %v21684_v12  ;;  %v16535_v12 = vld [vmem:[%s24215_s6 + $0x274] sm:$0xf]  ;;  %7203 = vmatpush.bf16.msrb.mxu3 %v14071_v3 }
 0x6d7   : > { %v14015_v55 = vor.u32 %v16535_v12, %v14012_v4  ;;  %v14091_v12 = vor.u32 %v16556_v17, %v14090_v31  ;;  %v14092_v4 = vld [vmem:[%s24215_s6 + $0x318] sm:$0xf0]  ;;  %v16511_v31 = vld [vmem:[%s24215_s6 + $0x1b4] sm:$0xf] }
 0x6d8   : > { %v14095_v48 = vor.u32 %v16555_v10, %v14092_v4  ;;  %v13916_v17 = vld [vmem:[%s24215_s6 + $0x1b8] sm:$0xf0]  ;;  %v14124_v4 = vld [vmem:[%s24215_s6 + $0x30] sm:$0xf] }
 0x6d9   : > { %7188 = vmatpush.bf16.msrb.mxu2 %v14015_v55  ;;  %v13956_v55 = vld [vmem:[%s24215_s6 + $0x208] sm:$0xf0]  ;;  %7166 = vmatpush.bf16.msrb.mxu1 %v14091_v12  ;;  %v13919_v10 = vor.u32 %v16511_v31, %v13916_v17  ;;  %v14158_v31 = vld [vmem:[%s24215_s6 + $0x78] sm:$0xf0] }
 0x6da   : > { %7204 = vmatpush.bf16.msrb.mxu3 %v14063_v0  ;;  %v13959_v2 = vor.u32 %v16521_v46, %v13956_v55  ;;  %7222 = vmatpush.bf16.msrb.mxu0 %v14095_v48  ;;  %v16465_v0 = vld [vmem:[%s24215_s6 + $0x44] sm:$0xf0]  ;;  %v16463_v48 = vld [vmem:[%s24215_s6 + $0x34] sm:$0xf0] }
 0x6dd   : > { %7189 = vmatpush.bf16.msrb.mxu2 %v14007_v29  ;;  %7173 = vmatpush.bf16.msra.mxu1 %v13959_v2  ;;  %v14055_v29 = vor.u32 %v16545_v38, %v14052_v7  ;;  %v16509_v2 = vld [vmem:[%s24215_s6 + $0x1a4] sm:$0xf]  ;;  %v14125_v38 = vor.u32 %v16463_v48, %v14124_v4  ;;  %v14284_v7 = vld [vmem:[%s24215_s6 + $0x170] sm:$0xf]  ;;  %v16493_v4 = vld [vmem:[%s24215_s6 + $0x124] sm:$0xf0] }
 0x6de   : > { %v13911_v56 = vor.u32 %v16509_v2, %v13908_v23  ;;  %v14285_v60 = vor.u32 %v16503_v49, %v14284_v7  ;;  %v16466_v7 = vld [vmem:[%s24215_s6 + $0x54] sm:$0xf] }
 0x6df   : > { %7205 = vmatpush.bf16.msrb.mxu3 %v14055_v29  ;;  %v13900_v29 = vld [vmem:[%s24215_s6 + $0x198] sm:$0xf0] }
 0x6e1   : > { %7190 = vmatpush.bf16.msrb.mxu2 %v13999_v59  ;;  %7174 = vmatpush.bf16.msra.mxu1 %v13951_v40  ;;  %v16505_v40 = vld [vmem:[%s24215_s6 + $0x184] sm:$0xf0] }
 0x6e2   : > { %v14293_v47 = vor.u32 %v16505_v40, %v14292_v41  ;;  %v14228_v40 = vld [vmem:[%s24215_s6 + $0x100] sm:$0xf] }
 0x6e3   : > { %7206 = vmatpush.bf16.msrb.mxu3 %v14047_v54  ;;  %v16461_v54 = vld [vmem:[%s24215_s6 + $0x24] sm:$0xf0] }
 0x6e5   : > { %7191 = vmatpush.bf16.msrb.mxu2 %v13991_v53  ;;  %v14157_v53 = vor.u32 %v16471_v14, %v14156_v33  ;;  %7175 = vmatpush.bf16.msra.mxu1 %v13943_v25 }
 0x6e7   : > { %7207 = vmatpush.bf16.msrb.mxu3 %v14039_v32  ;;  %v16501_v32 = vld [vmem:[%s24215_s6 + $0x164] sm:$0xf0] }
 0x6e8   : > { %v14277_v62 = vor.u32 %v16501_v32, %v14276_v51 }
 0x6e9   : > { %7192 = vmatpush.bf16.msrb.mxu2 %v13983_v57  ;;  %v14140_v57 = vld [vmem:[%s24215_s6 + $0x50] sm:$0xf]  ;;  %7176 = vmatpush.bf16.msra.mxu1 %v13935_v61  ;;  %v16499_v61 = vld [vmem:[%s24215_s6 + $0x154] sm:$0xf0] }
 0x6ea   : > { %v14141_v13 = vor.u32 %v16467_v28, %v14140_v57  ;;  %v14260_v57 = vld [vmem:[%s24215_s6 + $0x140] sm:$0xf]  ;;  %v16497_v28 = vld [vmem:[%s24215_s6 + $0x144] sm:$0xf0] }
 0x6eb   : > { %7208 = vmatpush.bf16.msrb.mxu3 %v14031_v43  ;;  %v16457_v43 = vld [vmem:[%s24215_s6 + $0x4] sm:$0xf0] }
 0x6ec   : > { %v14101_v20 = vor.u32 %v16457_v43, %v14100_v5  ;;  %v14214_v5 = vld [vmem:[%s24215_s6 + $0xe8] sm:$0xf0]  ;;  %v16462_v43 = vld [vmem:[%s24215_s6 + $0x34] sm:$0xf] }
 0x6ed   : > { %7193 = vmatpush.bf16.msrb.mxu2 %v13975_v44  ;;  %v14132_v44 = vld [vmem:[%s24215_s6 + $0x40] sm:$0xf]  ;;  %7177 = vmatpush.bf16.msra.mxu1 %v13927_v1  ;;  %v14261_v1 = vor.u32 %v16497_v28, %v14260_v57 }
 0x6ee   : > { %v14133_v12 = vor.u32 %v16465_v0, %v14132_v44  ;;  %v16495_v44 = vld [vmem:[%s24215_s6 + $0x134] sm:$0xf0]  ;;  %v16470_v0 = vld [vmem:[%s24215_s6 + $0x74] sm:$0xf] }
 0x6f1   : > { %7194 = vmatpush.bf16.msrb.mxu2 %v13967_v36  ;;  %7178 = vmatpush.bf16.msra.mxu1 %v13919_v10  ;;  %v14161_v10 = vor.u32 %v16470_v0, %v14158_v31  ;;  %v16482_v0 = vld [vmem:[%s24215_s6 + $0xd4] sm:$0xf]  ;;  %v14206_v31 = vld [vmem:[%s24215_s6 + $0xd8] sm:$0xf0] }
 0x6f5   : > { %7179 = vmatpush.bf16.msra.mxu1 %v13911_v56  ;;  %v14236_v56 = vld [vmem:[%s24215_s6 + $0x110] sm:$0xf] }
 0x703   : > { %v22037_v16 = vpop.f32.mrf.mxu1 }
 0x70b   : > { %v22063_v36 = vpop.f32.mrf.mxu1 }
 0x723   : > { %v6789_v63 = vpop.f32.mrf.mxu0 }
 0x727   : > { %v21981_v35 = vpop.f32.mrf.mxu2 }
 0x728   : > { %v21983_v59 = vpop.f32.mrf.mxu3 }
 0x72b   : > { %v6791_v21 = vpop.f32.mrf.mxu0 }
 0x72c   : > { %v22003_v6 = vpack.c.bf16 %v6791_v21, %v6789_v63  ;;  %v16507_v63 = vld [vmem:[%s24215_s6 + $0x194] sm:$0xf]  ;;  %v14117_v21 = vor.u32 %v16461_v54, %v14116_v18  ;;  %v14222_v18 = vld [vmem:[%s24215_s6 + $0xf8] sm:$0xf0]  ;;  %v16489_v54 = vld [vmem:[%s24215_s6 + $0x104] sm:$0xf0] }
 0x72d   : > { %v13903_v52 = vor.u32 %v16507_v63, %v13900_v29  ;;  %v14220_v63 = vld [vmem:[%s24215_s6 + $0xf0] sm:$0xf]  ;;  %v16487_v29 = vld [vmem:[%s24215_s6 + $0xf4] sm:$0xf0] }
 0x72e   : > { %7153 = vmatmul.bf16.vlgmr.msra.gmra.mxu0 %v22003_v6  ;;  %v14221_v51 = vor.u32 %v16487_v29, %v14220_v63  ;;  %v16478_v63 = vld [vmem:[%s24215_s6 + $0xb4] sm:$0xf]  ;;  %v14190_v29 = vld [vmem:[%s24215_s6 + $0xb8] sm:$0xf0] }
 0x72f   : > { %7482 = vmatpush.bf16.msra.mxu0 %v14157_v53  ;;  %v22024_v3 = vpop.f32.mrf.mxu2  ;;  %7180 = vmatpush.bf16.msra.mxu1 %v13903_v52  ;;  %v14108_v53 = vld [vmem:[%s24215_s6 + $0x10] sm:$0xf]  ;;  %v16486_v52 = vld [vmem:[%s24215_s6 + $0xf4] sm:$0xf] }
 0x730   : > { %v22026_v24 = vpop.f32.mrf.mxu3  ;;  %v14109_v37 = vor.u32 %v16459_v39, %v14108_v53  ;;  %v14225_v32 = vor.u32 %v16486_v52, %v14222_v18  ;;  %v14229_v53 = vor.u32 %v16489_v54, %v14228_v40  ;;  %v6687_v52 = vpack.c.bf16 %v22063_v36, %v22037_v16  ;;  %v14180_v54 = vld [vmem:[%s24215_s6 + $0xa0] sm:$0xf]  ;;  %v14182_v16 = vld [vmem:[%s24215_s6 + $0xa8] sm:$0xf0] }
 0x731   : > { %v14193_v18 = vor.u32 %v16478_v63, %v14190_v29  ;;  %v14418_v63 = vld [vmem:[%s24215_s6 + $0x390] sm:$0xf]  ;;  %v16573_v29 = vld [vmem:[%s24215_s6 + $0x394] sm:$0xf0] }
 0x733   : > { %7483 = vmatpush.bf16.msra.mxu0 %v14149_v34  ;;  %v14269_v34 = vor.u32 %v16499_v61, %v14268_v8  ;;  %v16485_v8 = vld [vmem:[%s24215_s6 + $0xe4] sm:$0xf0] }
 0x737   : > { %7484 = vmatpush.bf16.msra.mxu0 %v14141_v13  ;;  %v6761_v46 = vpop.f32.mrf.mxu2  ;;  %v14252_v13 = vld [vmem:[%s24215_s6 + $0x130] sm:$0xf] }
 0x738   : > { %v6775_v55 = vpop.f32.mrf.mxu3  ;;  %v14253_v17 = vor.u32 %v16495_v44, %v14252_v13  ;;  %v22221_v13 = vpack.c.bf16 %v22026_v24, %v21983_v59  ;;  %v14118_v59 = vld [vmem:[%s24215_s6 + $0x28] sm:$0xf0] }
 0x73b   : > { %7485 = vmatpush.bf16.msra.mxu0 %v14133_v12  ;;  %v14244_v12 = vld [vmem:[%s24215_s6 + $0x120] sm:$0xf] }
 0x73c   : > { %v14245_v2 = vor.u32 %v16493_v4, %v14244_v12  ;;  %v14209_v12 = vor.u32 %v16482_v0, %v14206_v31  ;;  %v14304_v0 = vld [vmem:[%s24438_s28 + $0x10] sm:$0xf]  ;;  %v16557_v31 = vld [vmem:[%s24438_s28 + $0x10] sm:$0x30] }
 0x73f   : > { %7486 = vmatpush.bf16.msra.mxu0 %v14125_v38  ;;  %v6763_v33 = vpop.f32.mrf.mxu2  ;;  %v16491_v38 = vld [vmem:[%s24215_s6 + $0x114] sm:$0xf0] }
 0x740   : > { %v6777_v14 = vpop.f32.mrf.mxu3  ;;  %v22089_v25 = vpack.c.bf16 %v6763_v33, %v6761_v46  ;;  %v16468_v46 = vld [vmem:[%s24215_s6 + $0x64] sm:$0xf]  ;;  %v14237_v49 = vor.u32 %v16491_v38, %v14236_v56  ;;  %v14188_v38 = vld [vmem:[%s24215_s6 + $0xb0] sm:$0xf] }
 0x741   : > { %v6809_v9 = vpack.c.bf16 %v6777_v14, %v6775_v55  ;;  %v14150_v55 = vld [vmem:[%s24215_s6 + $0x68] sm:$0xf0]  ;;  %v16464_v33 = vld [vmem:[%s24215_s6 + $0x44] sm:$0xf] }
 0x742   : > { %7125 = vmatmul.bf16.vlgmr.msra.gmra.mxu2 %v22089_v25  ;;  %v14153_v23 = vor.u32 %v16468_v46, %v14150_v55  ;;  %v14134_v14 = vld [vmem:[%s24215_s6 + $0x48] sm:$0xf0]  ;;  %v16480_v46 = vld [vmem:[%s24215_s6 + $0xc4] sm:$0xf] }
 0x743   : > { %7139 = vmatmul.bf16.vlgmr.msra.gmra.mxu3 %v6809_v9  ;;  %v22104_v26 = vpop.f32.mrf.mxu1  ;;  %7510 = vmatpush.bf16.msra.mxu2 %v14285_v60  ;;  %v16504_v60 = vld [vmem:[%s24215_s6 + $0x184] sm:$0xf]  ;;  %v14137_v39 = vor.u32 %v16464_v33, %v14134_v14  ;;  %v14198_v55 = vld [vmem:[%s24215_s6 + $0xc8] sm:$0xf0]  ;;  %v16477_v33 = vld [vmem:[%s24215_s6 + $0xa4] sm:$0xf0] }
 0x744   : > { %7531 = vmatpush.bf16.msra.mxu3 %v14293_v47  ;;  %7487 = vmatpush.bf16.msra.mxu0 %v14117_v21  ;;  %v14294_v47 = vld [vmem:[%s24215_s6 + $0x188] sm:$0xf0]  ;;  %v14201_v56 = vor.u32 %v16480_v46, %v14198_v55  ;;  %v14181_v36 = vor.u32 %v16477_v33, %v14180_v54  ;;  %v16492_v46 = vld [vmem:[%s24215_s6 + $0x124] sm:$0xf]  ;;  %v14474_v54 = vld [vmem:[%s24215_s6 + $0x400] sm:$0xf] }
 0x745   : > { %v14297_v61 = vor.u32 %v16504_v60, %v14294_v47  ;;  %v16476_v60 = vld [vmem:[%s24215_s6 + $0xa4] sm:$0xf]  ;;  %v14246_v55 = vld [vmem:[%s24215_s6 + $0x128] sm:$0xf0]  ;;  %v16587_v33 = vld [vmem:[%s24215_s6 + $0x404] sm:$0xf0] }
 0x746   : > { %v14185_v47 = vor.u32 %v16476_v60, %v14182_v16  ;;  %v14475_v60 = vor.u32 %v16587_v33, %v14474_v54  ;;  %v14402_v16 = vld [vmem:[%s24215_s6 + $0x370] sm:$0xf] }
 0x747   : > { %7511 = vmatpush.bf16.msra.mxu2 %v14277_v62  ;;  %v14212_v62 = vld [vmem:[%s24215_s6 + $0xe0] sm:$0xf]  ;;  %v14546_v33 = vld [vmem:[%s24215_s6 + $0x490] sm:$0xf] }
 0x748   : > { %7488 = vmatpush.bf16.msra.mxu0 %v14109_v37  ;;  %v16484_v37 = vld [vmem:[%s24215_s6 + $0xe4] sm:$0xf]  ;;  %v14213_v57 = vor.u32 %v16485_v8, %v14212_v62  ;;  %v16473_v62 = vld [vmem:[%s24215_s6 + $0x84] sm:$0xf0] }
 0x749   : > { %v14217_v28 = vor.u32 %v16484_v37, %v14214_v5  ;;  %v16472_v8 = vld [vmem:[%s24215_s6 + $0x84] sm:$0xf]  ;;  %v16502_v37 = vld [vmem:[%s24215_s6 + $0x174] sm:$0xf]  ;;  %v14286_v5 = vld [vmem:[%s24215_s6 + $0x178] sm:$0xf0] }
 0x74b   : > { %v22124_v27 = vpop.f32.mrf.mxu1  ;;  %7512 = vmatpush.bf16.msra.mxu2 %v14269_v34  ;;  %v14126_v34 = vld [vmem:[%s24215_s6 + $0x38] sm:$0xf0] }
 0x74c   : > { %7489 = vmatpush.bf16.msra.mxu0 %v14101_v20  ;;  %v14204_v20 = vld [vmem:[%s24215_s6 + $0xd0] sm:$0xf]  ;;  %v14129_v44 = vor.u32 %v16462_v43, %v14126_v34 }
 0x74f   : > { %7513 = vmatpush.bf16.msra.mxu2 %v14261_v1  ;;  %v16483_v1 = vld [vmem:[%s24215_s6 + $0xd4] sm:$0xf0] }
 0x750   : > { %v14205_v24 = vor.u32 %v16483_v1, %v14204_v20  ;;  %v14278_v20 = vld [vmem:[%s24215_s6 + $0x168] sm:$0xf0]  ;;  %v6688_v1 = vpack.c.bf16 %v22024_v3, %v21981_v35  ;;  %v14270_v35 = vld [vmem:[%s24215_s6 + $0x158] sm:$0xf0]  ;;  %v14305_v3 = vor.u32 %v16557_v31, %v14304_v0 }
 0x752   : > { %7195 = vmatmul.bf16.vlgmr.msrb.gmra.mxu2 %v6809_v9 }
 0x753   : > { %7209 = vmatmul.bf16.vlgmr.msrb.gmra.mxu3 %v22003_v6  ;;  %v6803_v48 = vpop.f32.mrf.mxu1  ;;  %7514 = vmatpush.bf16.msra.mxu2 %v14253_v17  ;;  %v14142_v6 = vld [vmem:[%s24215_s6 + $0x58] sm:$0xf0]  ;;  %v6690_v17 = vpack.c.bf16 %v22124_v27, %v22104_v26  ;;  %v14196_v26 = vld [vmem:[%s24215_s6 + $0xc0] sm:$0xf]  ;;  %v16481_v27 = vld [vmem:[%s24215_s6 + $0xc4] sm:$0xf0] }
 0x754   : > { %7538 = vmatpush.bf16.msrb.mxu3 %v14161_v10  ;;  %v14145_v41 = vor.u32 %v16466_v7, %v14142_v6  ;;  %v16460_v10 = vld [vmem:[%s24215_s6 + $0x24] sm:$0xf]  ;;  %v16479_v7 = vld [vmem:[%s24215_s6 + $0xb4] sm:$0xf0] }
 0x755   : > { %v14121_v4 = vor.u32 %v16460_v10, %v14118_v59  ;;  %v14189_v40 = vor.u32 %v16479_v7, %v14188_v38  ;;  %v16496_v59 = vld [vmem:[%s24215_s6 + $0x144] sm:$0xf]  ;;  %v14230_v7 = vld [vmem:[%s24215_s6 + $0x108] sm:$0xf0] }
 0x756   : > { %v16488_v38 = vld [vmem:[%s24215_s6 + $0x104] sm:$0xf] }
 0x757   : > { %7515 = vmatpush.bf16.msra.mxu2 %v14245_v2  ;;  %v14110_v2 = vld [vmem:[%s24215_s6 + $0x18] sm:$0xf0] }
 0x758   : > { %7539 = vmatpush.bf16.msrb.mxu3 %v14153_v23  ;;  %v14197_v23 = vor.u32 %v16481_v27, %v14196_v26  ;;  %v16494_v26 = vld [vmem:[%s24215_s6 + $0x134] sm:$0xf]  ;;  %v14254_v27 = vld [vmem:[%s24215_s6 + $0x138] sm:$0xf0] }
 0x75b   : > { %v6805_v9 = vpop.f32.mrf.mxu1  ;;  %7516 = vmatpush.bf16.msra.mxu2 %v14237_v49  ;;  %v16456_v49 = vld [vmem:[%s24215_s6 + $0x4] sm:$0xf] }
 0x75c   : > { %7540 = vmatpush.bf16.msrb.mxu3 %v14145_v41  ;;  %v6811_v21 = vpack.c.bf16 %v6805_v9, %v6803_v48  ;;  %v16458_v48 = vld [vmem:[%s24215_s6 + $0x14] sm:$0xf]  ;;  %v14102_v41 = vld [vmem:[%s24215_s6 + $0x8] sm:$0xf0]  ;;  %v14172_v9 = vld [vmem:[%s24215_s6 + $0x90] sm:$0xf] }
 0x75d   : > { %v14113_v6 = vor.u32 %v16458_v48, %v14110_v2  ;;  %v14105_v14 = vor.u32 %v16456_v49, %v14102_v41  ;;  %v14249_v48 = vor.u32 %v16492_v46, %v14246_v55  ;;  %v16490_v2 = vld [vmem:[%s24215_s6 + $0x114] sm:$0xf]  ;;  %v14482_v49 = vld [vmem:[%s24215_s6 + $0x410] sm:$0xf]  ;;  %v14419_v41 = vor.u32 %v16573_v29, %v14418_v63  ;;  %v16577_v55 = vld [vmem:[%s24215_s6 + $0x3b4] sm:$0xf0] }
 0x75e   : > { %14096 = vmatmul.msk.bf16.vlgmr.msrb.gmra.mxu1 %vm7113_vm10, %v6811_v21  ;;  %14097 = vmatmul.msk.bf16.vlgmr.msrb.gmra.mxu0 %vm7113_vm10, %v6811_v21  ;;  %v16588_v29 = vld [vmem:[%s24215_s6 + $0x414] sm:$0xf] }
 0x75f   : > { %7496 = vmatpush.bf16.msrb.mxu1 %v14221_v51  ;;  %7552 = vmatpush.bf16.msrb.mxu0 %v14225_v32  ;;  %v16475_v51 = vld [vmem:[%s24215_s6 + $0x94] sm:$0xf0]  ;;  %v16474_v32 = vld [vmem:[%s24215_s6 + $0x94] sm:$0xf] }
 0x760   : > { %7517 = vmatpush.bf16.msra.mxu2 %v14229_v53  ;;  %7541 = vmatpush.bf16.msrb.mxu3 %v14137_v39  ;;  %v14173_v21 = vor.u32 %v16475_v51, %v14172_v9  ;;  %v14164_v39 = vld [vmem:[%s24215_s6 + $0x80] sm:$0xf]  ;;  %v16585_v51 = vld [vmem:[%s24215_s6 + $0x3f4] sm:$0xf0] }
 0x761   : > { %v14165_v43 = vor.u32 %v16473_v62, %v14164_v39  ;;  %v16583_v39 = vld [vmem:[%s24215_s6 + $0x3e4] sm:$0xf0] }
 0x763   : > { %7497 = vmatpush.bf16.msrb.mxu1 %v14213_v57  ;;  %7518 = vmatmul.bf16.vlgmr.msra.gmra.mxu2 %v22221_v13  ;;  %v14289_v57 = vor.u32 %v16502_v37, %v14286_v5  ;;  %v14386_v5 = vld [vmem:[%s24215_s6 + $0x350] sm:$0xf] }
 0x764   : > { %7587 = vmatpush.bf16.msrb.mxu2 %v14297_v61  ;;  %14298 = vmatmul.msk.bf16.vlgmr.msra.gmra.mxu3 %vm7113_vm10, %v6690_v17  ;;  %v14166_v61 = vld [vmem:[%s24215_s6 + $0x88] sm:$0xf0] }
 0x765   : > { %7553 = vmatpush.bf16.msrb.mxu0 %v14217_v28  ;;  %7542 = vmatpush.bf16.msrb.mxu3 %v14129_v44  ;;  %v14169_v34 = vor.u32 %v16472_v8, %v14166_v61  ;;  %v16500_v28 = vld [vmem:[%s24215_s6 + $0x164] sm:$0xf] }
 0x766   : > { %v14281_v44 = vor.u32 %v16500_v28, %v14278_v20  ;;  %v16581_v20 = vld [vmem:[%s24215_s6 + $0x3d4] sm:$0xf0] }
 0x767   : > { %7498 = vmatpush.bf16.msrb.mxu1 %v14205_v24  ;;  %v14262_v24 = vld [vmem:[%s24215_s6 + $0x148] sm:$0xf0] }
 0x768   : > { %7611 = vmatpush.bf16.msra.mxu2 %v21566_v45 }
 0x769   : > { %7554 = vmatpush.bf16.msrb.mxu0 %v14209_v12  ;;  %7543 = vmatpush.bf16.msrb.mxu3 %v14121_v4  ;;  %v14265_v12 = vor.u32 %v16496_v59, %v14262_v24  ;;  %v14257_v4 = vor.u32 %v16494_v26, %v14254_v27  ;;  %v14370_v26 = vld [vmem:[%s24215_s6 + $0x330] sm:$0xf]  ;;  %v16561_v27 = vld [vmem:[%s24215_s6 + $0x334] sm:$0xf0] }
 0x76a   : > { %v14371_v46 = vor.u32 %v16561_v27, %v14370_v26  ;;  %v16599_v26 = vld [vmem:[%s24215_s6 + $0x464] sm:$0xf0] }
 0x76b   : > { %7499 = vmatpush.bf16.msrb.mxu1 %v14197_v23  ;;  %v14238_v23 = vld [vmem:[%s24215_s6 + $0x118] sm:$0xf0] }
 0x76c   : > { %7612 = vmatpush.bf16.msra.mxu2 %v21490_v58 }
 0x76d   : > { %7555 = vmatpush.bf16.msrb.mxu0 %v14201_v56  ;;  %7544 = vmatpush.bf16.msrb.mxu3 %v14113_v6  ;;  %v14241_v56 = vor.u32 %v16490_v2, %v14238_v23  ;;  %v14233_v6 = vor.u32 %v16488_v38, %v14230_v7  ;;  %v16559_v2 = vld [vmem:[%s24215_s6 + $0x324] sm:$0xf0] }
 0x76e   : > { %7181 = vmatmul.bf16.vlgmr.msra.gmra.mxu1 %v22089_v25  ;;  %7490 = vmatmul.bf16.vlgmr.msra.gmra.mxu0 %v6687_v52  ;;  %v14174_v25 = vld [vmem:[%s24215_s6 + $0x98] sm:$0xf0]  ;;  %v16575_v38 = vld [vmem:[%s24215_s6 + $0x3a4] sm:$0xf0] }
 0x76f   : > { %7500 = vmatpush.bf16.msrb.mxu1 %v14189_v40  ;;  %v14177_v53 = vor.u32 %v16474_v32, %v14174_v25  ;;  %v14410_v40 = vld [vmem:[%s24215_s6 + $0x380] sm:$0xf]  ;;  %v16567_v25 = vld [vmem:[%s24215_s6 + $0x364] sm:$0xf0] }
 0x770   : > { %v14394_v32 = vld [vmem:[%s24215_s6 + $0x360] sm:$0xf] }
 0x771   : > { %7556 = vmatpush.bf16.msrb.mxu0 %v14193_v18  ;;  %7545 = vmatpush.bf16.msrb.mxu3 %v14105_v14  ;;  %v14395_v62 = vor.u32 %v16567_v25, %v14394_v32  ;;  %v14538_v32 = vld [vmem:[%s24215_s6 + $0x480] sm:$0xf]  ;;  %v16603_v25 = vld [vmem:[%s24215_s6 + $0x484] sm:$0xf0] }
 0x773   : > { %7501 = vmatpush.bf16.msrb.mxu1 %v14181_v36  ;;  %14299 = vmatmul.msk.bf16.vlgmr.msrb.gmra.mxu2 %vm7113_vm10, %v6690_v17  ;;  %v16498_v17 = vld [vmem:[%s24215_s6 + $0x154] sm:$0xf]  ;;  %v16569_v36 = vld [vmem:[%s24215_s6 + $0x374] sm:$0xf0] }
 0x774   : > { %7546 = vmatmul.bf16.vlgmr.msrb.gmra.mxu3 %v6687_v52  ;;  %v14273_v10 = vor.u32 %v16498_v17, %v14270_v35  ;;  %v16571_v52 = vld [vmem:[%s24215_s6 + $0x384] sm:$0xf0]  ;;  %7969 = vmatpush.bf16.msrb.mxu2 %v14419_v41  ;;  %v14403_v9 = vor.u32 %v16569_v36, %v14402_v16  ;;  %v14442_v17 = vld [vmem:[%s24215_s6 + $0x3c0] sm:$0xf]  ;;  %v16604_v41 = vld [vmem:[%s24215_s6 + $0x494] sm:$0xf] }
 0x775   : > { %7625 = vmatpush.bf16.msra.mxu3 %v21650_v42  ;;  %7557 = vmatpush.bf16.msrb.mxu0 %v14185_v47  ;;  %v14411_v14 = vor.u32 %v16571_v52, %v14410_v40  ;;  %v14466_v47 = vld [vmem:[%s24215_s6 + $0x3f0] sm:$0xf]  ;;  %v16579_v35 = vld [vmem:[%s24215_s6 + $0x3c4] sm:$0xf0]  ;;  %v14548_v40 = vld [vmem:[%s24215_s6 + $0x498] sm:$0xf0] }
 0x776   : > { %v14443_v59 = vor.u32 %v16579_v35, %v14442_v17  ;;  %v14551_v52 = vor.u32 %v16604_v41, %v14548_v40  ;;  %v16586_v16 = vld [vmem:[%s24215_s6 + $0x404] sm:$0xf]  ;;  %v14476_v36 = vld [vmem:[%s24215_s6 + $0x408] sm:$0xf0] }
 0x777   : > { %7502 = vmatpush.bf16.msrb.mxu1 %v14173_v21  ;;  %v14467_v21 = vor.u32 %v16585_v51, %v14466_v47  ;;  %v16602_v47 = vld [vmem:[%s24215_s6 + $0x484] sm:$0xf]  ;;  %v14540_v51 = vld [vmem:[%s24215_s6 + $0x488] sm:$0xf0] }
 0x778   : > { %7970 = vmatpush.bf16.msrb.mxu2 %v14411_v14  ;;  %v16605_v14 = vld [vmem:[%s24215_s6 + $0x494] sm:$0xf0]  ;;  %v14460_v17 = vld [vmem:[%s24215_s6 + $0x3e8] sm:$0xf0]  ;;  %v16598_v35 = vld [vmem:[%s24215_s6 + $0x464] sm:$0xf] }
 0x779   : > { %7626 = vmatpush.bf16.msra.mxu3 %v21663_v15  ;;  %7558 = vmatpush.bf16.msrb.mxu0 %v14177_v53  ;;  %v14458_v53 = vld [vmem:[%s24215_s6 + $0x3e0] sm:$0xf]  ;;  %v16578_v40 = vld [vmem:[%s24215_s6 + $0x3c4] sm:$0xf] }
 0x77a   : > { %v14459_v8 = vor.u32 %v16583_v39, %v14458_v53  ;;  %v14539_v53 = vor.u32 %v16603_v25, %v14538_v32  ;;  %v16576_v25 = vld [vmem:[%s24215_s6 + $0x3b4] sm:$0xf] }
 0x77b   : > { %7503 = vmatpush.bf16.msrb.mxu1 %v14165_v43  ;;  %v16565_v43 = vld [vmem:[%s24215_s6 + $0x354] sm:$0xf0] }
 0x77c   : > { %7971 = vmatpush.bf16.msrb.mxu2 %v14403_v9  ;;  %v14387_v28 = vor.u32 %v16565_v43, %v14386_v5  ;;  %v14479_v9 = vor.u32 %v16586_v16, %v14476_v36  ;;  %v14506_v16 = vld [vmem:[%s24215_s6 + $0x440] sm:$0xf]  ;;  %v16595_v36 = vld [vmem:[%s24215_s6 + $0x444] sm:$0xf0] }
 0x77d   : > { %7559 = vmatpush.bf16.msrb.mxu0 %v14169_v34  ;;  %v14450_v34 = vld [vmem:[%s24215_s6 + $0x3d0] sm:$0xf] }
 0x77e   : > { %7504 = vmatmul.bf16.vlgmr.msrb.gmra.mxu1 %v6688_v1  ;;  %v14451_v31 = vor.u32 %v16581_v20, %v14450_v34  ;;  %v14532_v34 = vld [vmem:[%s24215_s6 + $0x478] sm:$0xf0] }
 0x77f   : > { %7566 = vmatpush.bf16.msra.mxu1 %v14289_v57 }
 0x780   : > { %7560 = vmatmul.bf16.vlgmr.msrb.gmra.mxu0 %v6688_v1  ;;  %7972 = vmatpush.bf16.msrb.mxu2 %v14395_v62  ;;  %v14378_v1 = vld [vmem:[%s24215_s6 + $0x340] sm:$0xf] }
 0x781   : > { %7639 = vmatpush.bf16.msra.mxu0 %v21653_v50 }
 0x783   : > { %7567 = vmatpush.bf16.msra.mxu1 %v14281_v44  ;;  %14306 = vmatmul.msk.bf16.vlgmr.msra.gmra.mxu2 %vm6611_vm11, %v14305_v3  ;;  %v16563_v44 = vld [vmem:[%s24215_s6 + $0x344] sm:$0xf0] }
 0x784   : > { %14307 = vmatmul.msk.bf16.vlgmr.msra.gmra.mxu3 %vm6611_vm11, %v14305_v3  ;;  %7973 = vmatpush.bf16.msrb.mxu2 %v14387_v28 }
 0x785   : > { %7640 = vmatpush.bf16.msra.mxu0 %v21665_v30 }
 0x787   : > { %7568 = vmatpush.bf16.msra.mxu1 %v14273_v10  ;;  %v14379_v10 = vor.u32 %v16563_v44, %v14378_v1  ;;  %v14530_v1 = vld [vmem:[%s24215_s6 + $0x470] sm:$0xf]  ;;  %v16601_v44 = vld [vmem:[%s24215_s6 + $0x474] sm:$0xf0] }
 0x789   : > { %7974 = vmatpush.bf16.msrb.mxu2 %v14379_v10  ;;  %v14524_v10 = vld [vmem:[%s24215_s6 + $0x468] sm:$0xf0] }
 0x78a   : > { %v14527_v27 = vor.u32 %v16598_v35, %v14524_v10 }
 0x78b   : > { %7569 = vmatpush.bf16.msra.mxu1 %v14265_v12 }
 0x78d   : > { %7975 = vmatpush.bf16.msrb.mxu2 %v14371_v46 }
 0x78f   : > { %7570 = vmatpush.bf16.msra.mxu1 %v14257_v4  ;;  %v14434_v4 = vld [vmem:[%s24215_s6 + $0x3b0] sm:$0xf] }
 0x790   : > { %14308 = vmatmul.msk.bf16.vlgmr.msra.gmra.mxu0 %vm6611_vm11, %v14305_v3  ;;  %v14435_v23 = vor.u32 %v16577_v55, %v14434_v4 }
 0x793   : > { %7571 = vmatpush.bf16.msra.mxu1 %v14249_v48  ;;  %v14362_v48 = vld [vmem:[%s24215_s6 + $0x320] sm:$0xf] }
 0x794   : > { %v14363_v7 = vor.u32 %v16559_v2, %v14362_v48  ;;  %v16580_v48 = vld [vmem:[%s24215_s6 + $0x3d4] sm:$0xf]  ;;  %v14452_v2 = vld [vmem:[%s24215_s6 + $0x3d8] sm:$0xf0] }
 0x796   : > { %7976 = vmatpush.bf16.msrb.mxu2 %v14363_v7 }
 0x797   : > { %7572 = vmatpush.bf16.msra.mxu1 %v14241_v56  ;;  %v14426_v56 = vld [vmem:[%s24215_s6 + $0x3a0] sm:$0xf] }
 0x79b   : > { %7573 = vmatpush.bf16.msra.mxu1 %v14233_v6  ;;  %v14427_v6 = vor.u32 %v16575_v38, %v14426_v56  ;;  %v14455_v56 = vor.u32 %v16580_v48, %v14452_v2  ;;  %v14516_v38 = vld [vmem:[%s24215_s6 + $0x458] sm:$0xf0]  ;;  %v14554_v48 = vld [vmem:[%s24215_s6 + $0x4a0] sm:$0xf]  ;;  %v16607_v2 = vld [vmem:[%s24215_s6 + $0x4a4] sm:$0xf0] }
 0x79e   : > { %7574 = vmatmul.bf16.vlgmr.msra.gmra.mxu1 %v22221_v13  ;;  %v16589_v13 = vld [vmem:[%s24215_s6 + $0x414] sm:$0xf0] }
 0x79f   : > { %7653 = vmatpush.bf16.msrb.mxu1 %v21746_v11  ;;  %v14483_v18 = vor.u32 %v16589_v13, %v14482_v49  ;;  %v14484_v49 = vld [vmem:[%s24215_s6 + $0x418] sm:$0xf0] }
 0x7a0   : > { %v14487_v13 = vor.u32 %v16588_v29, %v14484_v49  ;;  %v14514_v29 = vld [vmem:[%s24215_s6 + $0x450] sm:$0xf]  ;;  %v16597_v49 = vld [vmem:[%s24215_s6 + $0x454] sm:$0xf0] }
 0x7a1   : > { %7983 = vmatpush.bf16.msrb.mxu3 %v14483_v18 }
 0x7a2   : > { %8039 = vmatpush.bf16.msra.mxu2 %v14487_v13  ;;  %v14515_v13 = vor.u32 %v16597_v49, %v14514_v29 }
 0x7a3   : > { %7654 = vmatpush.bf16.msrb.mxu1 %v21704_v22 }
 0x7a5   : > { %7984 = vmatpush.bf16.msrb.mxu3 %v14475_v60  ;;  %v14547_v60 = vor.u32 %v16605_v14, %v14546_v33  ;;  %v16594_v33 = vld [vmem:[%s24215_s6 + $0x444] sm:$0xf] }
 0x7a6   : > { %8040 = vmatpush.bf16.msra.mxu2 %v14479_v9  ;;  %v14507_v9 = vor.u32 %v16595_v36, %v14506_v16 }
 0x7a7   : > { %7997 = vmatpush.bf16.msrb.mxu0 %v14547_v60  ;;  %v14508_v60 = vld [vmem:[%s24215_s6 + $0x448] sm:$0xf0] }
 0x7a9   : > { %7985 = vmatpush.bf16.msrb.mxu3 %v14467_v21  ;;  %v14543_v21 = vor.u32 %v16602_v47, %v14540_v51  ;;  %v14511_v47 = vor.u32 %v16594_v33, %v14508_v60  ;;  %v14412_v60 = vld [vmem:[%s24215_s6 + $0x388] sm:$0xf0] }
 0x7ab   : > { %v7154_v0 = vpop.f32.mrf.mxu0  ;;  %7998 = vmatpush.bf16.msrb.mxu0 %v14539_v53  ;;  %v16592_v53 = vld [vmem:[%s24215_s6 + $0x434] sm:$0xf] }
 0x7ad   : > { %7986 = vmatpush.bf16.msrb.mxu3 %v14459_v8  ;;  %v16584_v8 = vld [vmem:[%s24215_s6 + $0x3f4] sm:$0xf] }
 0x7ae   : > { %14309 = vmatmul.msk.bf16.vlgmr.msrb.gmra.mxu1 %vm6611_vm11, %v14305_v3 }
 0x7b1   : > { %7987 = vmatpush.bf16.msrb.mxu3 %v14451_v31  ;;  %v16582_v31 = vld [vmem:[%s24215_s6 + $0x3e4] sm:$0xf] }
 0x7b3   : > { %v22484_v63 = vpop.f32.mrf.mxu0 }
 0x7b5   : > { %7988 = vmatpush.bf16.msrb.mxu3 %v14443_v59  ;;  %v14522_v59 = vld [vmem:[%s24215_s6 + $0x460] sm:$0xf] }
 0x7b6   : > { %v14523_v4 = vor.u32 %v16599_v26, %v14522_v59  ;;  %v14490_v59 = vld [vmem:[%s24215_s6 + $0x420] sm:$0xf]  ;;  %v16591_v26 = vld [vmem:[%s24215_s6 + $0x424] sm:$0xf0] }
 0x7b9   : > { %7989 = vmatpush.bf16.msrb.mxu3 %v14435_v23  ;;  %v16596_v23 = vld [vmem:[%s24215_s6 + $0x454] sm:$0xf] }
 0x7ba   : > { %v14519_v7 = vor.u32 %v16596_v23, %v14516_v38  ;;  %v14555_v23 = vor.u32 %v16607_v2, %v14554_v48  ;;  %v14420_v38 = vld [vmem:[%s24215_s6 + $0x398] sm:$0xf0] }
 0x7bc   : > { %8018 = vmatpush.bf16.msra.mxu1 %v14555_v23 }
 0x7bd   : > { %7990 = vmatpush.bf16.msrb.mxu3 %v14427_v6 }
 0x7c1   : > { %8053 = vmatpush.bf16.msra.mxu3 %v14551_v52  ;;  %v14444_v52 = vld [vmem:[%s24215_s6 + $0x3c8] sm:$0xf0] }
 0x7c2   : > { %v14447_v14 = vor.u32 %v16578_v40, %v14444_v52 }
 0x7c5   : > { %v7126_v61 = vpop.f32.mrf.mxu2  ;;  %8054 = vmatpush.bf16.msra.mxu3 %v14543_v21  ;;  %v14436_v21 = vld [vmem:[%s24215_s6 + $0x3b8] sm:$0xf0] }
 0x7c6   : > { %v7140_v37 = vpop.f32.mrf.mxu3 }
 0x7c7   : > { %v7141_v57 = vadd.f32 %v7140_v37, %v7126_v61  ;;  %v14468_v61 = vld [vmem:[%s24215_s6 + $0x3f8] sm:$0xf0]  ;;  %v16600_v37 = vld [vmem:[%s24215_s6 + $0x474] sm:$0xf] }
 0x7c8   : > { %v14471_v43 = vor.u32 %v16584_v8, %v14468_v61  ;;  %v14439_v61 = vor.u32 %v16576_v25, %v14436_v21 }
 0x7c9   : > { %v7155_v3 = vadd.f32 %v7154_v0, %v7141_v57  ;;  %v14535_v57 = vor.u32 %v16600_v37, %v14532_v34  ;;  %v14531_v0 = vor.u32 %v16601_v44, %v14530_v1  ;;  %v14500_v37 = vld [vmem:[%s24215_s6 + $0x438] sm:$0xf0]  ;;  %v14498_v1 = vld [vmem:[%s24215_s6 + $0x430] sm:$0xf] }
 0x7ca   : > { %8041 = vmatpush.bf16.msra.mxu2 %v14471_v43  ;;  %v14503_v43 = vor.u32 %v16592_v53, %v14500_v37  ;;  %v16566_v37 = vld [vmem:[%s24215_s6 + $0x364] sm:$0xf] }
 0x7cb   : > { %8055 = vmatpush.bf16.msra.mxu3 %v14535_v57  ;;  %7999 = vmatpush.bf16.msrb.mxu0 %v14531_v0  ;;  %v16574_v0 = vld [vmem:[%s24215_s6 + $0x3a4] sm:$0xf] }
 0x7cd   : > { %v22456_v24 = vpop.f32.mrf.mxu2 }
 0x7ce   : > { %v22458_v12 = vpop.f32.mrf.mxu3 }
 0x7cf   : > { %8056 = vmatpush.bf16.msra.mxu3 %v14527_v27  ;;  %8000 = vmatpush.bf16.msrb.mxu0 %v14523_v4 }
 0x7d3   : > { %8057 = vmatpush.bf16.msra.mxu3 %v14519_v7  ;;  %8001 = vmatpush.bf16.msrb.mxu0 %v14515_v13  ;;  %v16606_v7 = vld [vmem:[%s24215_s6 + $0x4a4] sm:$0xf]  ;;  %v14556_v13 = vld [vmem:[%s24215_s6 + $0x4a8] sm:$0xf0] }
 0x7d4   : > { %v14559_v52 = vor.u32 %v16606_v7, %v14556_v13 }
 0x7d5   : > { %v22498_v18 = vpop.f32.mrf.mxu2 }
 0x7d6   : > { %v22500_v54 = vpop.f32.mrf.mxu3 }
 0x7d7   : > { %8058 = vmatpush.bf16.msra.mxu3 %v14511_v47  ;;  %8002 = vmatpush.bf16.msrb.mxu0 %v14507_v9 }
 0x7db   : > { %v7168_v39 = vpop.f32.mrf.mxu1  ;;  %v22526_v62 = vpop.f32.mrf.mxu0  ;;  %8059 = vmatpush.bf16.msra.mxu3 %v14503_v43  ;;  %v14396_v43 = vld [vmem:[%s24215_s6 + $0x368] sm:$0xf0] }
 0x7dc   : > { %v7169_v5 = vadd.f32 %v7168_v39, %v7155_v3  ;;  %v14463_v3 = vor.u32 %v16582_v31, %v14460_v17  ;;  %v16590_v31 = vld [vmem:[%s24215_s6 + $0x424] sm:$0xf] }
 0x7dd   : > { %v22540_v28 = vpop.f32.mrf.mxu2 }
 0x7de   : > { %v22542_v20 = vpop.f32.mrf.mxu3  ;;  %8042 = vmatpush.bf16.msra.mxu2 %v14463_v3  ;;  %v14492_v3 = vld [vmem:[%s24215_s6 + $0x428] sm:$0xf0] }
 0x7df   : > { %v14495_v10 = vor.u32 %v16590_v31, %v14492_v3  ;;  %v14380_v31 = vld [vmem:[%s24215_s6 + $0x348] sm:$0xf0]  ;;  %v14372_v3 = vld [vmem:[%s24215_s6 + $0x338] sm:$0xf0] }
 0x7e1   : > { %8060 = vmatpush.bf16.msra.mxu3 %v14495_v10 }
 0x7e2   : > { %8043 = vmatpush.bf16.msra.mxu2 %v14455_v56  ;;  %v16572_v56 = vld [vmem:[%s24215_s6 + $0x394] sm:$0xf] }
 0x7e3   : > { %v22568_v46 = vpop.f32.mrf.mxu1  ;;  %v22570_v55 = vpop.f32.mrf.mxu0  ;;  %v14423_v49 = vor.u32 %v16572_v56, %v14420_v38  ;;  %v16558_v56 = vld [vmem:[%s24215_s6 + $0x324] sm:$0xf]  ;;  %v14364_v38 = vld [vmem:[%s24215_s6 + $0x328] sm:$0xf0] }
 0x7e4   : > { %v14367_v7 = vor.u32 %v16558_v56, %v14364_v38  ;;  %v16623_v56 = vld [vmem:[%s24215_s6 + $0x524] sm:$0xf]  ;;  %v14682_v38 = vld [vmem:[%s24215_s6 + $0x528] sm:$0xf0] }
 0x7e5   : > { %8025 = vmatpush.bf16.msrb.mxu1 %v14423_v49 }
 0x7e6   : > { %v22584_v6 = vpop.f32.mrf.mxu2  ;;  %8044 = vmatpush.bf16.msra.mxu2 %v14447_v14  ;;  %v16570_v14 = vld [vmem:[%s24215_s6 + $0x384] sm:$0xf] }
 0x7e7   : > { %v22592_v41 = vpop.f32.mrf.mxu3  ;;  %v14415_v16 = vor.u32 %v16570_v14, %v14412_v60 }
 0x7e9   : > { %8026 = vmatpush.bf16.msrb.mxu1 %v14415_v16  ;;  %v14566_v16 = vld [vmem:[%s24438_s28 + $0x18] sm:$0xf] }
 0x7ea   : > { %8045 = vmatpush.bf16.msra.mxu2 %v14439_v61 }
 0x7eb   : > { %v7182_v51 = vpop.f32.mrf.mxu1  ;;  %v7491_v32 = vpop.f32.mrf.mxu0 }
 0x7ec   : > { %v7197_v39 = vadd.f32 %v22498_v18, %v7182_v51  ;;  %v7492_v8 = vadd.f32 %v7491_v32, %v7169_v5  ;;  %v16593_v18 = vld [vmem:[%s24215_s6 + $0x434] sm:$0xf0]  ;;  %v16568_v51 = vld [vmem:[%s24215_s6 + $0x374] sm:$0xf]  ;;  %v14404_v32 = vld [vmem:[%s24215_s6 + $0x378] sm:$0xf0] }
 0x7ed   : > { %v14499_v44 = vor.u32 %v16593_v18, %v14498_v1  ;;  %v14407_v21 = vor.u32 %v16568_v51, %v14404_v32  ;;  %v14388_v1 = vld [vmem:[%s24215_s6 + $0x358] sm:$0xf0]  ;;  %v16624_v32 = vld [vmem:[%s24215_s6 + $0x524] sm:$0xf0] }
 0x7ee   : > { %v7211_v34 = vadd.f32 %v22500_v54, %v7197_v39  ;;  %v22626_v57 = vpop.f32.mrf.mxu2  ;;  %v14428_v54 = vld [vmem:[%s24215_s6 + $0x3a8] sm:$0xf0] }
 0x7ef   : > { %v22634_v5 = vpop.f32.mrf.mxu3  ;;  %v14431_v35 = vor.u32 %v16574_v0, %v14428_v54  ;;  %8003 = vmatpush.bf16.msrb.mxu0 %v14499_v44  ;;  %8027 = vmatpush.bf16.msrb.mxu1 %v14407_v21  ;;  %v16562_v54 = vld [vmem:[%s24215_s6 + $0x344] sm:$0xf]  ;;  %v14672_v21 = vld [vmem:[%s24215_s6 + $0x510] sm:$0xf] }
 0x7f0   : > { %v7225_v17 = vadd.f32 %v22526_v62, %v7211_v34  ;;  %v14491_v62 = vor.u32 %v16591_v26, %v14490_v59  ;;  %v14399_v34 = vor.u32 %v16566_v37, %v14396_v43  ;;  %v14664_v43 = vld [vmem:[%s24215_s6 + $0x500] sm:$0xf] }
 0x7f1   : > { %8046 = vmatpush.bf16.msra.mxu2 %v14431_v35  ;;  %v16560_v35 = vld [vmem:[%s24215_s6 + $0x334] sm:$0xf] }
 0x7f2   : > { %v14375_v59 = vor.u32 %v16560_v35, %v14372_v3  ;;  %v16616_v35 = vld [vmem:[%s24215_s6 + $0x4e4] sm:$0xf0]  ;;  %v14744_v3 = vld [vmem:[%s24215_s6 + $0x5a0] sm:$0xf] }
 0x7f3   : > { %v22655_v27 = vpop.f32.mrf.mxu1  ;;  %v22657_v4 = vpop.f32.mrf.mxu0  ;;  %8004 = vmatpush.bf16.msrb.mxu0 %v14491_v62  ;;  %8028 = vmatpush.bf16.msrb.mxu1 %v14399_v34  ;;  %v16620_v34 = vld [vmem:[%s24215_s6 + $0x504] sm:$0xf0] }
 0x7f6   : > { %v22674_v29 = vpop.f32.mrf.mxu2 }
 0x7f7   : > { %v7547_v40 = vpop.f32.mrf.mxu3  ;;  %8074 = vmatpush.bf16.msra.mxu0 %v14559_v52 }
 0x7f8   : > { %v7548_v33 = vadd.f32 %v7547_v40, %v7225_v17  ;;  %v14383_v17 = vor.u32 %v16562_v54, %v14380_v31  ;;  %v16656_v54 = vld [vmem:[%s24215_s6 + $0x624] sm:$0xf0] }
 0x7fb   : > { %v7505_v36 = vpop.f32.mrf.mxu1 }
 0x7fc   : > { %v7506_v47 = vadd.f32 %v7505_v36, %v7492_v8  ;;  %v16608_v36 = vld [vmem:[%s24438_s28 + $0x18] sm:$0x30] }
 0x7fd   : > { %v7561_v9 = vpop.f32.mrf.mxu0 }
 0x7fe   : > { %v7562_v25 = vadd.f32 %v7561_v9, %v7548_v33  ;;  %v7520_v53 = vadd.f32 %v22584_v6, %v7506_v47  ;;  %v22692_v39 = vpop.f32.mrf.mxu2  ;;  %v16564_v6 = vld [vmem:[%s24215_s6 + $0x354] sm:$0xf]  ;;  %v14567_v47 = vor.u32 %v16608_v36, %v14566_v16  ;;  %v14736_v16 = vld [vmem:[%s24215_s6 + $0x590] sm:$0xf] }
 0x7ff   : > { %v22694_v61 = vpop.f32.mrf.mxu3 }
 0x800   : > { %v22697_v8 = vadd.f32 %v22592_v41, %v7520_v53  ;;  %v14391_v41 = vor.u32 %v16564_v6, %v14388_v1  ;;  %v16622_v53 = vld [vmem:[%s24215_s6 + $0x514] sm:$0xf0]  ;;  %v14665_v6 = vor.u32 %v16620_v34, %v14664_v43  ;;  %v14656_v1 = vld [vmem:[%s24215_s6 + $0x4f0] sm:$0xf]  ;;  %v16612_v43 = vld [vmem:[%s24215_s6 + $0x4c4] sm:$0xf0] }
 0x801   : > { %v14673_v37 = vor.u32 %v16622_v53, %v14672_v21  ;;  %v16652_v21 = vld [vmem:[%s24215_s6 + $0x604] sm:$0xf0]  ;;  %v14632_v53 = vld [vmem:[%s24215_s6 + $0x4c0] sm:$0xf] }
 0x802   : > { %8029 = vmatpush.bf16.msrb.mxu1 %v14391_v41  ;;  %v16618_v41 = vld [vmem:[%s24215_s6 + $0x4f4] sm:$0xf0]  ;;  %v14728_v34 = vld [vmem:[%s24215_s6 + $0x580] sm:$0xf] }
 0x803   : > { %v22725_v2 = vpop.f32.mrf.mxu1 }
 0x805   : > { %v22711_v18 = vpop.f32.mrf.mxu0 }
 0x806   : > { %v7614_v44 = vpop.f32.mrf.mxu2  ;;  %8030 = vmatpush.bf16.msrb.mxu1 %v14383_v17  ;;  %v14648_v17 = vld [vmem:[%s24215_s6 + $0x4e0] sm:$0xf] }
 0x807   : > { %v7628_v0 = vpop.f32.mrf.mxu3 }
 0x80a   : > { %8031 = vmatpush.bf16.msrb.mxu1 %v14375_v59  ;;  %v16640_v59 = vld [vmem:[%s24215_s6 + $0x5a4] sm:$0xf0] }
 0x80d   : > { %v7642_v10 = vpop.f32.mrf.mxu0 }
 0x80e   : > { %v7616_v26 = vpop.f32.mrf.mxu2  ;;  %8032 = vmatpush.bf16.msrb.mxu1 %v14367_v7  ;;  %v14800_v7 = vld [vmem:[%s24215_s6 + $0x610] sm:$0xf] }
 0x80f   : > { %v7661_v62 = vpack.c.bf16 %v7616_v26, %v7614_v44  ;;  %v7630_v48 = vpop.f32.mrf.mxu3  ;;  %v14657_v44 = vor.u32 %v16618_v41, %v14656_v1  ;;  %v14816_v26 = vld [vmem:[%s24215_s6 + $0x630] sm:$0xf]  ;;  %v14633_v1 = vor.u32 %v16612_v43, %v14632_v53  ;;  %v16646_v53 = vld [vmem:[%s24215_s6 + $0x5d4] sm:$0xf0] }
 0x810   : > { %v7662_v23 = vpack.c.bf16 %v7630_v48, %v7628_v0  ;;  %v14808_v0 = vld [vmem:[%s24215_s6 + $0x620] sm:$0xf]  ;;  %v14745_v48 = vor.u32 %v16640_v59, %v14744_v3  ;;  %v14624_v3 = vld [vmem:[%s24215_s6 + $0x4b0] sm:$0xf] }
 0x811   : > { %7977 = vmatmul.bf16.vlgmr.msrb.gmra.mxu2 %v7661_v62  ;;  %v14809_v31 = vor.u32 %v16656_v54, %v14808_v0  ;;  %v14666_v0 = vld [vmem:[%s24215_s6 + $0x508] sm:$0xf0]  ;;  %v14784_v54 = vld [vmem:[%s24215_s6 + $0x5f0] sm:$0xf] }
 0x812   : > { %7991 = vmatmul.bf16.vlgmr.msrb.gmra.mxu3 %v7662_v23  ;;  %8130 = vmatpush.bf16.msrb.mxu2 %v21653_v50  ;;  %v14720_v59 = vld [vmem:[%s24215_s6 + $0x570] sm:$0xf] }
 0x813   : > { %8144 = vmatpush.bf16.msrb.mxu3 %v21746_v11 }
 0x815   : > { %v7644_v49 = vpop.f32.mrf.mxu0 }
 0x816   : > { %v7663_v13 = vpack.c.bf16 %v7644_v49, %v7642_v10  ;;  %8131 = vmatpush.bf16.msrb.mxu2 %v21665_v30  ;;  %v14649_v10 = vor.u32 %v16616_v35, %v14648_v17  ;;  %v14685_v49 = vor.u32 %v16623_v56, %v14682_v38  ;;  %v16650_v17 = vld [vmem:[%s24215_s6 + $0x5f4] sm:$0xf0] }
 0x817   : > { %8145 = vmatpush.bf16.msrb.mxu3 %v21704_v22  ;;  %v14785_v35 = vor.u32 %v16650_v17, %v14784_v54  ;;  %v14642_v54 = vld [vmem:[%s24215_s6 + $0x4d8] sm:$0xf0] }
 0x818   : > { %8005 = vmatmul.bf16.vlgmr.msrb.gmra.mxu0 %v7663_v13 }
 0x819   : > { %8102 = vmatpush.bf16.msrb.mxu0 %v21566_v45 }
 0x81b   : > { %v7575_v40 = vpop.f32.mrf.mxu1 }
 0x81c   : > { %v7576_v52 = vadd.f32 %v7575_v40, %v7562_v25 }
 0x81d   : > { %8103 = vmatpush.bf16.msrb.mxu0 %v21490_v58 }
 0x81e   : > { %v22739_v33 = vadd.f32 %v22674_v29, %v7576_v52  ;;  %v14680_v29 = vld [vmem:[%s24215_s6 + $0x520] sm:$0xf]  ;;  %v14640_v52 = vld [vmem:[%s24215_s6 + $0x4d0] sm:$0xf] }
 0x81f   : > { %v14681_v25 = vor.u32 %v16624_v32, %v14680_v29 }
 0x821   : > { %8047 = vmatmul.bf16.vlgmr.msra.gmra.mxu2 %v7662_v23 }
 0x822   : > { %8061 = vmatmul.bf16.vlgmr.msra.gmra.mxu3 %v7663_v13  ;;  %8488 = vmatpush.bf16.msra.mxu2 %v14809_v31  ;;  %v16654_v13 = vld [vmem:[%s24215_s6 + $0x614] sm:$0xf0] }
 0x823   : > { %v22742_v14 = vpop.f32.mrf.mxu1  ;;  %v14801_v40 = vor.u32 %v16654_v13, %v14800_v7  ;;  %v16639_v7 = vld [vmem:[%s24215_s6 + $0x5a4] sm:$0xf]  ;;  %v14776_v13 = vld [vmem:[%s24215_s6 + $0x5e0] sm:$0xf] }
 0x826   : > { %8489 = vmatpush.bf16.msra.mxu2 %v14801_v40 }
 0x82b   : > { %v7656_v60 = vpop.f32.mrf.mxu1 }
 0x831   : > { %14570 = vmatmul.msk.bf16.vlgmr.msrb.gmra.mxu2 %vm6611_vm11, %v14567_v47 }
 0x832   : > { %14571 = vmatmul.msk.bf16.vlgmr.msrb.gmra.mxu3 %vm6611_vm11, %v14567_v47 }
 0x833   : > { %v7658_v9 = vpop.f32.mrf.mxu1 }
 0x834   : > { %v7664_v51 = vpack.c.bf16 %v7658_v9, %v7656_v60  ;;  %v16614_v60 = vld [vmem:[%s24215_s6 + $0x4d4] sm:$0xf0]  ;;  %v16621_v9 = vld [vmem:[%s24215_s6 + $0x514] sm:$0xf] }
 0x835   : > { %v14641_v36 = vor.u32 %v16614_v60, %v14640_v52  ;;  %v16648_v52 = vld [vmem:[%s24215_s6 + $0x5e4] sm:$0xf0] }
 0x836   : > { %14560 = vmatmul.msk.bf16.vlgmr.msra.gmra.mxu1 %vm7113_vm10, %v7664_v51  ;;  %14561 = vmatmul.msk.bf16.vlgmr.msra.gmra.mxu0 %vm7113_vm10, %v7664_v51  ;;  %v14674_v51 = vld [vmem:[%s24215_s6 + $0x518] sm:$0xf0]  ;;  %v14777_v60 = vor.u32 %v16648_v52, %v14776_v13  ;;  %v14634_v13 = vld [vmem:[%s24215_s6 + $0x4c8] sm:$0xf0] }
 0x837   : > { %8116 = vmatpush.bf16.msra.mxu1 %v21650_v42  ;;  %8460 = vmatpush.bf16.msra.mxu0 %v14681_v25  ;;  %v14677_v32 = vor.u32 %v16621_v9, %v14674_v51  ;;  %v14792_v25 = vld [vmem:[%s24215_s6 + $0x600] sm:$0xf]  ;;  %v16615_v9 = vld [vmem:[%s24215_s6 + $0x4e4] sm:$0xf]  ;;  %v14650_v51 = vld [vmem:[%s24215_s6 + $0x4e8] sm:$0xf0] }
 0x83b   : > { %8117 = vmatpush.bf16.msra.mxu1 %v21663_v15  ;;  %8461 = vmatpush.bf16.msra.mxu0 %v14673_v37  ;;  %v14793_v37 = vor.u32 %v16652_v21, %v14792_v25  ;;  %v14738_v25 = vld [vmem:[%s24215_s6 + $0x598] sm:$0xf0]  ;;  %v14768_v21 = vld [vmem:[%s24215_s6 + $0x5d0] sm:$0xf] }
 0x83c   : > { %v14769_v43 = vor.u32 %v16646_v53, %v14768_v21  ;;  %v16609_v53 = vld [vmem:[%s24215_s6 + $0x4b4] sm:$0xf] }
 0x83d   : > { %8490 = vmatpush.bf16.msra.mxu2 %v14793_v37 }
 0x83f   : > { %8462 = vmatpush.bf16.msra.mxu0 %v14665_v6  ;;  %v16636_v6 = vld [vmem:[%s24215_s6 + $0x584] sm:$0xf0] }
 0x840   : > { %v14729_v41 = vor.u32 %v16636_v6, %v14728_v34  ;;  %v14704_v6 = vld [vmem:[%s24215_s6 + $0x550] sm:$0xf] }
 0x841   : > { %8491 = vmatpush.bf16.msra.mxu2 %v14785_v35 }
 0x843   : > { %8463 = vmatpush.bf16.msra.mxu0 %v14657_v44  ;;  %v16619_v44 = vld [vmem:[%s24215_s6 + $0x504] sm:$0xf] }
 0x844   : > { %v14669_v31 = vor.u32 %v16619_v44, %v14666_v0  ;;  %v16613_v0 = vld [vmem:[%s24215_s6 + $0x4d4] sm:$0xf] }
 0x845   : > { %8492 = vmatpush.bf16.msra.mxu2 %v14777_v60  ;;  %v14645_v35 = vor.u32 %v16613_v0, %v14642_v54  ;;  %v14722_v60 = vld [vmem:[%s24215_s6 + $0x578] sm:$0xf0]  ;;  %v16657_v54 = vld [vmem:[%s24215_s6 + $0x634] sm:$0xf] }
 0x846   : > { %8033 = vmatmul.bf16.vlgmr.msrb.gmra.mxu1 %v7661_v62  ;;  %14568 = vmatmul.msk.bf16.vlgmr.msrb.gmra.mxu0 %vm6611_vm11, %v14567_v47  ;;  %v16658_v62 = vld [vmem:[%s24215_s6 + $0x634] sm:$0xf0] }
 0x847   : > { %v14817_v23 = vor.u32 %v16658_v62, %v14816_v26  ;;  %8464 = vmatpush.bf16.msra.mxu0 %v14649_v10  ;;  %8474 = vmatpush.bf16.msrb.mxu1 %v14745_v48  ;;  %v16610_v10 = vld [vmem:[%s24215_s6 + $0x4b4] sm:$0xf0]  ;;  %v16617_v48 = vld [vmem:[%s24215_s6 + $0x4f4] sm:$0xf] }
 0x848   : > { %v14625_v26 = vor.u32 %v16610_v10, %v14624_v3  ;;  %v16634_v62 = vld [vmem:[%s24215_s6 + $0x574] sm:$0xf0]  ;;  %v14730_v3 = vld [vmem:[%s24215_s6 + $0x588] sm:$0xf0]  ;;  %v14760_v10 = vld [vmem:[%s24215_s6 + $0x5c0] sm:$0xf] }
 0x849   : > { %8509 = vmatpush.bf16.msra.mxu3 %v14817_v23  ;;  %v14658_v23 = vld [vmem:[%s24215_s6 + $0x4f8] sm:$0xf0]  ;;  %v14721_v56 = vor.u32 %v16634_v62, %v14720_v59  ;;  %8493 = vmatpush.bf16.msra.mxu2 %v14769_v43  ;;  %v16644_v59 = vld [vmem:[%s24215_s6 + $0x5c4] sm:$0xf0]  ;;  %v16631_v43 = vld [vmem:[%s24215_s6 + $0x564] sm:$0xf] }
 0x84a   : > { %v14661_v38 = vor.u32 %v16617_v48, %v14658_v23  ;;  %v14761_v48 = vor.u32 %v16644_v59, %v14760_v10  ;;  %v16653_v10 = vld [vmem:[%s24215_s6 + $0x614] sm:$0xf] }
 0x84b   : > { %8465 = vmatpush.bf16.msra.mxu0 %v14641_v36  ;;  %v16632_v36 = vld [vmem:[%s24215_s6 + $0x564] sm:$0xf0] }
 0x84d   : > { %8516 = vmatpush.bf16.msrb.mxu3 %v14685_v49  ;;  %v14746_v49 = vld [vmem:[%s24215_s6 + $0x5a8] sm:$0xf0]  ;;  %8494 = vmatpush.bf16.msra.mxu2 %v14761_v48 }
 0x84e   : > { %v14749_v40 = vor.u32 %v16639_v7, %v14746_v49  ;;  %v16611_v49 = vld [vmem:[%s24215_s6 + $0x4c4] sm:$0xf] }
 0x84f   : > { %8466 = vmatpush.bf16.msra.mxu0 %v14633_v1  ;;  %v16630_v1 = vld [vmem:[%s24215_s6 + $0x554] sm:$0xf0]  ;;  %v14637_v52 = vor.u32 %v16611_v49, %v14634_v13  ;;  %v16651_v49 = vld [vmem:[%s24215_s6 + $0x604] sm:$0xf] }
 0x850   : > { %v14705_v44 = vor.u32 %v16630_v1, %v14704_v6  ;;  %v14714_v6 = vld [vmem:[%s24215_s6 + $0x568] sm:$0xf0]  ;;  %v16655_v1 = vld [vmem:[%s24215_s6 + $0x624] sm:$0xf] }
 0x851   : > { %8517 = vmatpush.bf16.msrb.mxu3 %v14677_v32  ;;  %v14653_v32 = vor.u32 %v16615_v9, %v14650_v51 }
 0x853   : > { %8467 = vmatpush.bf16.msra.mxu0 %v14625_v26 }
 0x855   : > { %8518 = vmatpush.bf16.msrb.mxu3 %v14669_v31  ;;  %v16635_v31 = vld [vmem:[%s24215_s6 + $0x584] sm:$0xf] }
 0x856   : > { %14569 = vmatmul.msk.bf16.vlgmr.msra.gmra.mxu1 %vm6611_vm11, %v14567_v47  ;;  %v16638_v47 = vld [vmem:[%s24215_s6 + $0x594] sm:$0xf0]  ;;  %v14733_v62 = vor.u32 %v16635_v31, %v14730_v3  ;;  %v14818_v31 = vld [vmem:[%s24215_s6 + $0x638] sm:$0xf0] }
 0x857   : > { %v14737_v29 = vor.u32 %v16638_v47, %v14736_v16  ;;  %v14712_v16 = vld [vmem:[%s24215_s6 + $0x560] sm:$0xf]  ;;  %8530 = vmatpush.bf16.msrb.mxu0 %v14749_v40  ;;  %v16633_v40 = vld [vmem:[%s24215_s6 + $0x574] sm:$0xf]  ;;  %v14706_v3 = vld [vmem:[%s24215_s6 + $0x558] sm:$0xf0] }
 0x858   : > { %v14713_v47 = vor.u32 %v16632_v36, %v14712_v16  ;;  %v14752_v16 = vld [vmem:[%s24215_s6 + $0x5b0] sm:$0xf]  ;;  %v16642_v36 = vld [vmem:[%s24215_s6 + $0x5b4] sm:$0xf0] }
 0x859   : > { %8475 = vmatpush.bf16.msrb.mxu1 %v14737_v29  ;;  %8519 = vmatpush.bf16.msrb.mxu3 %v14661_v38  ;;  %v16637_v29 = vld [vmem:[%s24215_s6 + $0x594] sm:$0xf]  ;;  %v16628_v38 = vld [vmem:[%s24215_s6 + $0x544] sm:$0xf0]  ;;  %v14753_v9 = vor.u32 %v16642_v36, %v14752_v16  ;;  %v14690_v36 = vld [vmem:[%s24215_s6 + $0x538] sm:$0xf0] }
 0x85a   : > { %v14741_v37 = vor.u32 %v16637_v29, %v14738_v25  ;;  %v14688_v29 = vld [vmem:[%s24215_s6 + $0x530] sm:$0xf]  ;;  %v16625_v16 = vld [vmem:[%s24215_s6 + $0x534] sm:$0xf] }
 0x85b   : > { %8495 = vmatpush.bf16.msra.mxu2 %v14753_v9  ;;  %v14693_v9 = vor.u32 %v16625_v16, %v14690_v36 }
 0x85c   : > { %8531 = vmatpush.bf16.msrb.mxu0 %v14741_v37  ;;  %v14626_v37 = vld [vmem:[%s24215_s6 + $0x4b8] sm:$0xf0] }
 0x85d   : > { %8476 = vmatpush.bf16.msrb.mxu1 %v14729_v41  ;;  %8520 = vmatpush.bf16.msrb.mxu3 %v14653_v32  ;;  %v16626_v32 = vld [vmem:[%s24215_s6 + $0x534] sm:$0xf0] }
 0x85e   : > { %v14689_v21 = vor.u32 %v16626_v32, %v14688_v29  ;;  %v14786_v29 = vld [vmem:[%s24215_s6 + $0x5f8] sm:$0xf0] }
 0x860   : > { %8532 = vmatpush.bf16.msrb.mxu0 %v14733_v62 }
 0x861   : > { %8477 = vmatpush.bf16.msrb.mxu1 %v14721_v56  ;;  %v14696_v56 = vld [vmem:[%s24215_s6 + $0x540] sm:$0xf]  ;;  %8521 = vmatpush.bf16.msrb.mxu3 %v14645_v35  ;;  %v16629_v35 = vld [vmem:[%s24215_s6 + $0x554] sm:$0xf] }
 0x862   : > { %v14697_v7 = vor.u32 %v16628_v38, %v14696_v56  ;;  %v14709_v59 = vor.u32 %v16629_v35, %v14706_v3  ;;  %v16627_v38 = vld [vmem:[%s24215_s6 + $0x544] sm:$0xf]  ;;  %v14762_v35 = vld [vmem:[%s24215_s6 + $0x5c8] sm:$0xf0] }
 0x865   : > { %8478 = vmatpush.bf16.msrb.mxu1 %v14713_v47  ;;  %v14725_v47 = vor.u32 %v16633_v40, %v14722_v60  ;;  %8522 = vmatpush.bf16.msrb.mxu3 %v14637_v52  ;;  %v14794_v40 = vld [vmem:[%s24215_s6 + $0x608] sm:$0xf0] }
 0x866   : > { %v14797_v52 = vor.u32 %v16651_v49, %v14794_v40 }
 0x867   : > { %8533 = vmatpush.bf16.msrb.mxu0 %v14725_v47  ;;  %v16649_v47 = vld [vmem:[%s24215_s6 + $0x5f4] sm:$0xf] }
 0x868   : > { %v14789_v32 = vor.u32 %v16649_v47, %v14786_v29 }
 0x869   : > { %8479 = vmatpush.bf16.msrb.mxu1 %v14705_v44  ;;  %v14717_v44 = vor.u32 %v16631_v43, %v14714_v6  ;;  %v14778_v43 = vld [vmem:[%s24215_s6 + $0x5e8] sm:$0xf0] }
 0x86b   : > { %8534 = vmatpush.bf16.msrb.mxu0 %v14717_v44  ;;  %v14770_v44 = vld [vmem:[%s24215_s6 + $0x5d8] sm:$0xf0] }
 0x86d   : > { %8480 = vmatpush.bf16.msrb.mxu1 %v14697_v7  ;;  %v14698_v7 = vld [vmem:[%s24215_s6 + $0x548] sm:$0xf0] }
 0x86e   : > { %v14701_v13 = vor.u32 %v16627_v38, %v14698_v7 }
 0x86f   : > { %8535 = vmatpush.bf16.msrb.mxu0 %v14709_v59 }
 0x871   : > { %8481 = vmatpush.bf16.msrb.mxu1 %v14689_v21 }
 0x873   : > { %8536 = vmatpush.bf16.msrb.mxu0 %v14701_v13 }
 0x877   : > { %8537 = vmatpush.bf16.msrb.mxu0 %v14693_v9 }
 0x894   : > { %v7978_v34 = vpop.f32.mrf.mxu2 }
 0x895   : > { %v7992_v41 = vpop.f32.mrf.mxu3  ;;  %v8006_v26 = vpop.f32.mrf.mxu0 }
 0x896   : > { %v7993_v17 = vadd.f32 %v7992_v41, %v7978_v34  ;;  %v14629_v34 = vor.u32 %v16609_v53, %v14626_v37  ;;  %v14810_v41 = vld [vmem:[%s24215_s6 + $0x628] sm:$0xf0]  ;;  %v16647_v37 = vld [vmem:[%s24215_s6 + $0x5e4] sm:$0xf] }
 0x897   : > { %v14813_v0 = vor.u32 %v16655_v1, %v14810_v41  ;;  %v16645_v41 = vld [vmem:[%s24215_s6 + $0x5d4] sm:$0xf] }
 0x898   : > { %v22944_v23 = vadd.f32 %v8006_v26, %v7993_v17  ;;  %v14821_v17 = vor.u32 %v16657_v54, %v14818_v31  ;;  %8523 = vmatpush.bf16.msrb.mxu3 %v14629_v34  ;;  %v14802_v26 = vld [vmem:[%s24215_s6 + $0x618] sm:$0xf0]  ;;  %v14781_v34 = vor.u32 %v16647_v37, %v14778_v43  ;;  %v14773_v54 = vor.u32 %v16645_v41, %v14770_v44  ;;  %v16673_v41 = vld [vmem:[%s24215_s6 + $0x6a4] sm:$0xf0]  ;;  %v14998_v44 = vld [vmem:[%s24215_s6 + $0x720] sm:$0xf] }
 0x899   : > { %8544 = vmatpush.bf16.msra.mxu1 %v14813_v0  ;;  %v14805_v62 = vor.u32 %v16653_v10, %v14802_v26 }
 0x89a   : > { %8565 = vmatpush.bf16.msrb.mxu2 %v14821_v17  ;;  %v16643_v17 = vld [vmem:[%s24215_s6 + $0x5c4] sm:$0xf] }
 0x89b   : > { %v14765_v59 = vor.u32 %v16643_v17, %v14762_v35  ;;  %v14926_v17 = vld [vmem:[%s24215_s6 + $0x690] sm:$0xf]  ;;  %v16671_v35 = vld [vmem:[%s24215_s6 + $0x694] sm:$0xf0] }
 0x89c   : > { %v22970_v51 = vpop.f32.mrf.mxu2 }
 0x89d   : > { %v22978_v25 = vpop.f32.mrf.mxu3  ;;  %8545 = vmatpush.bf16.msra.mxu1 %v14805_v62  ;;  %v23028_v60 = vpop.f32.mrf.mxu0  ;;  %v14754_v62 = vld [vmem:[%s24215_s6 + $0x5b8] sm:$0xf0] }
 0x8a1   : > { %8546 = vmatpush.bf16.msra.mxu1 %v14797_v52 }
 0x8a4   : > { %v8048_v48 = vpop.f32.mrf.mxu2 }
 0x8a5   : > { %v8062_v56 = vpop.f32.mrf.mxu3  ;;  %8547 = vmatpush.bf16.msra.mxu1 %v14789_v32 }
 0x8a9   : > { %8548 = vmatpush.bf16.msra.mxu1 %v14781_v34 }
 0x8ac   : > { %v23042_v21 = vpop.f32.mrf.mxu2 }
 0x8ad   : > { %v23044_v53 = vpop.f32.mrf.mxu3  ;;  %8549 = vmatpush.bf16.msra.mxu1 %v14773_v54 }
 0x8b1   : > { %8550 = vmatpush.bf16.msra.mxu1 %v14765_v59  ;;  %v16687_v59 = vld [vmem:[%s24215_s6 + $0x714] sm:$0xf0] }
 0x8b3   : > { %v8020_v6 = vpop.f32.mrf.mxu1  ;;  %v8076_v1 = vpop.f32.mrf.mxu0 }
 0x8b4   : > { %v8021_v0 = vadd.f32 %v8020_v6, %v22944_v23  ;;  %v8133_v3 = vpop.f32.mrf.mxu2  ;;  %v16691_v6 = vld [vmem:[%s24215_s6 + $0x734] sm:$0xf0] }
 0x8b5   : > { %v8147_v10 = vpop.f32.mrf.mxu3 }
 0x8b6   : > { %v23060_v31 = vadd.f32 %v8021_v0, %v22697_v8  ;;  %v16641_v8 = vld [vmem:[%s24215_s6 + $0x5b4] sm:$0xf] }
 0x8b7   : > { %v14757_v38 = vor.u32 %v16641_v8, %v14754_v62  ;;  %v14918_v62 = vld [vmem:[%s24215_s6 + $0x680] sm:$0xf] }
 0x8b9   : > { %8551 = vmatpush.bf16.msra.mxu1 %v14757_v38  ;;  %v16669_v38 = vld [vmem:[%s24215_s6 + $0x684] sm:$0xf0] }
 0x8bb   : > { %v23068_v26 = vpop.f32.mrf.mxu1  ;;  %v23070_v23 = vpop.f32.mrf.mxu0 }
 0x8bc   : > { %v8135_v7 = vpop.f32.mrf.mxu2 }
 0x8bd   : > { %v8154_v49 = vpack.c.bf16 %v8135_v7, %v8133_v3  ;;  %v8149_v13 = vpop.f32.mrf.mxu3  ;;  %v14990_v3 = vld [vmem:[%s24215_s6 + $0x710] sm:$0xf]  ;;  %v14982_v7 = vld [vmem:[%s24215_s6 + $0x700] sm:$0xf] }
 0x8be   : > { %v8155_v40 = vpack.c.bf16 %v8149_v13, %v8147_v10  ;;  %v14927_v10 = vor.u32 %v16671_v35, %v14926_v17  ;;  %v14991_v8 = vor.u32 %v16687_v59, %v14990_v3  ;;  %v16685_v13 = vld [vmem:[%s24215_s6 + $0x704] sm:$0xf0]  ;;  %v16703_v17 = vld [vmem:[%s24215_s6 + $0x794] sm:$0xf0]  ;;  %v14886_v3 = vld [vmem:[%s24215_s6 + $0x640] sm:$0xf] }
 0x8bf   : > { %8496 = vmatmul.bf16.vlgmr.msra.gmra.mxu2 %v8154_v49  ;;  %v14950_v59 = vld [vmem:[%s24215_s6 + $0x6c0] sm:$0xf] }
 0x8c0   : > { %14822 = vmatmul.msk.bf16.vlgmr.msra.gmra.mxu3 %vm7113_vm10, %v8155_v40  ;;  %8593 = vmatpush.bf16.msra.mxu2 %v21566_v45 }
 0x8c1   : > { %8607 = vmatpush.bf16.msra.mxu3 %v21650_v42  ;;  %v14828_v42 = vld [vmem:[%s24438_s28 + $0x20] sm:$0xf] }
 0x8c3   : > { %v8034_v52 = vpop.f32.mrf.mxu1  ;;  %v8105_v16 = vpop.f32.mrf.mxu0 }
 0x8c4   : > { %v8049_v36 = vadd.f32 %v8048_v48, %v8034_v52  ;;  %8594 = vmatpush.bf16.msra.mxu2 %v21490_v58  ;;  %v14910_v52 = vld [vmem:[%s24215_s6 + $0x670] sm:$0xf] }
 0x8c5   : > { %8608 = vmatpush.bf16.msra.mxu3 %v21663_v15  ;;  %v16659_v15 = vld [vmem:[%s24438_s28 + $0x20] sm:$0x30] }
 0x8c6   : > { %v8063_v47 = vadd.f32 %v8062_v56, %v8049_v36  ;;  %v14829_v48 = vor.u32 %v16659_v15, %v14828_v42  ;;  %v15006_v56 = vld [vmem:[%s24215_s6 + $0x730] sm:$0xf]  ;;  %v16665_v15 = vld [vmem:[%s24215_s6 + $0x664] sm:$0xf0] }
 0x8c7   : > { %v14974_v36 = vld [vmem:[%s24215_s6 + $0x6f0] sm:$0xf] }
 0x8c8   : > { %v8077_v9 = vadd.f32 %v8076_v1, %v8063_v47  ;;  %v15007_v1 = vor.u32 %v16691_v6, %v15006_v56  ;;  %v15062_v56 = vld [vmem:[%s24215_s6 + $0x7a0] sm:$0xf] }
 0x8ca   : > { %v23084_v29 = vadd.f32 %v8077_v9, %v22739_v33  ;;  %v16683_v9 = vld [vmem:[%s24215_s6 + $0x6f4] sm:$0xf0] }
 0x8cb   : > { %v23086_v32 = vpop.f32.mrf.mxu1  ;;  %v8107_v37 = vpop.f32.mrf.mxu0 }
 0x8cc   : > { %v8152_v43 = vpack.c.bf16 %v8107_v37, %v8105_v16  ;;  %v16667_v16 = vld [vmem:[%s24215_s6 + $0x674] sm:$0xf0]  ;;  %v14975_v37 = vor.u32 %v16683_v9, %v14974_v36  ;;  %v15046_v36 = vld [vmem:[%s24215_s6 + $0x780] sm:$0xf] }
 0x8cd   : > { %v14911_v47 = vor.u32 %v16667_v16, %v14910_v52  ;;  %v15072_v52 = vld [vmem:[%s24215_s6 + $0x7b8] sm:$0xf0] }
 0x8ce   : > { %8468 = vmatmul.bf16.vlgmr.msra.gmra.mxu0 %v8152_v43 }
 0x8cf   : > { %8621 = vmatpush.bf16.msra.mxu0 %v21653_v50  ;;  %14823 = vmatmul.msk.bf16.vlgmr.msrb.gmra.mxu2 %vm7113_vm10, %v8155_v40  ;;  %v14942_v50 = vld [vmem:[%s24215_s6 + $0x6b0] sm:$0xf]  ;;  %v14983_v40 = vor.u32 %v16685_v13, %v14982_v7  ;;  %v15008_v7 = vld [vmem:[%s24215_s6 + $0x738] sm:$0xf0] }
 0x8d0   : > { %8524 = vmatmul.bf16.vlgmr.msrb.gmra.mxu3 %v8152_v43  ;;  %v15070_v43 = vld [vmem:[%s24215_s6 + $0x7b0] sm:$0xf] }
 0x8d1   : > { %8965 = vmatpush.bf16.msrb.mxu3 %v15007_v1  ;;  %v14894_v1 = vld [vmem:[%s24215_s6 + $0x650] sm:$0xf] }
 0x8d3   : > { %8622 = vmatpush.bf16.msra.mxu0 %v21665_v30  ;;  %v8119_v45 = vpop.f32.mrf.mxu1  ;;  %v16675_v30 = vld [vmem:[%s24215_s6 + $0x6b4] sm:$0xf0] }
 0x8d4   : > { %v14943_v34 = vor.u32 %v16675_v30, %v14942_v50 }
 0x8d6   : > { %8951 = vmatpush.bf16.msrb.mxu2 %v14943_v34  ;;  %v16705_v34 = vld [vmem:[%s24215_s6 + $0x7a4] sm:$0xf0] }
 0x8d7   : > { %v15063_v6 = vor.u32 %v16705_v34, %v15062_v56  ;;  %v16686_v34 = vld [vmem:[%s24215_s6 + $0x714] sm:$0xf] }
 0x8db   : > { %v8121_v58 = vpop.f32.mrf.mxu1 }
 0x8dc   : > { %v8153_v33 = vpack.c.bf16 %v8121_v58, %v8119_v45  ;;  %v16707_v45 = vld [vmem:[%s24215_s6 + $0x7b4] sm:$0xf0]  ;;  %v14902_v58 = vld [vmem:[%s24215_s6 + $0x660] sm:$0xf] }
 0x8dd   : > { %v15071_v42 = vor.u32 %v16707_v45, %v15070_v43  ;;  %v14903_v50 = vor.u32 %v16665_v15, %v14902_v58  ;;  %v15000_v43 = vld [vmem:[%s24215_s6 + $0x728] sm:$0xf0]  ;;  %v16704_v45 = vld [vmem:[%s24215_s6 + $0x7a4] sm:$0xf] }
 0x8de   : > { %8482 = vmatmul.bf16.vlgmr.msrb.gmra.mxu1 %v8153_v33  ;;  %8538 = vmatmul.bf16.vlgmr.msrb.gmra.mxu0 %v8153_v33  ;;  %v14966_v33 = vld [vmem:[%s24215_s6 + $0x6e0] sm:$0xf]  ;;  %v15064_v15 = vld [vmem:[%s24215_s6 + $0x7a8] sm:$0xf0] }
 0x8df   : > { %8635 = vmatpush.bf16.msrb.mxu1 %v21746_v11  ;;  %14830 = vmatmul.msk.bf16.vlgmr.msra.gmra.mxu2 %vm6611_vm11, %v14829_v48  ;;  %v14934_v11 = vld [vmem:[%s24215_s6 + $0x6a0] sm:$0xf] }
 0x8e0   : > { %14831 = vmatmul.msk.bf16.vlgmr.msra.gmra.mxu3 %vm6611_vm11, %v14829_v48  ;;  %v14935_v0 = vor.u32 %v16673_v41, %v14934_v11  ;;  %8979 = vmatpush.bf16.msrb.mxu0 %v15071_v42  ;;  %v16663_v11 = vld [vmem:[%s24215_s6 + $0x654] sm:$0xf0]  ;;  %v14958_v41 = vld [vmem:[%s24215_s6 + $0x6d0] sm:$0xf] }
 0x8e2   : > { %8952 = vmatpush.bf16.msrb.mxu2 %v14935_v0  ;;  %v16679_v0 = vld [vmem:[%s24215_s6 + $0x6d4] sm:$0xf0] }
 0x8e3   : > { %8636 = vmatpush.bf16.msrb.mxu1 %v21704_v22  ;;  %v16689_v22 = vld [vmem:[%s24215_s6 + $0x724] sm:$0xf0] }
 0x8e4   : > { %v14999_v54 = vor.u32 %v16689_v22, %v14998_v44  ;;  %v14895_v44 = vor.u32 %v16663_v11, %v14894_v1  ;;  %8980 = vmatpush.bf16.msrb.mxu0 %v15063_v6  ;;  %v14959_v22 = vor.u32 %v16679_v0, %v14958_v41  ;;  %v14992_v6 = vld [vmem:[%s24215_s6 + $0x718] sm:$0xf0]  ;;  %v16702_v1 = vld [vmem:[%s24215_s6 + $0x794] sm:$0xf]  ;;  %v15030_v0 = vld [vmem:[%s24215_s6 + $0x760] sm:$0xf] }
 0x8e5   : > { %v14995_v11 = vor.u32 %v16686_v34, %v14992_v6  ;;  %v15056_v41 = vld [vmem:[%s24215_s6 + $0x798] sm:$0xf0]  ;;  %v15032_v6 = vld [vmem:[%s24215_s6 + $0x768] sm:$0xf0] }
 0x8e6   : > { %8966 = vmatpush.bf16.msrb.mxu3 %v14999_v54  ;;  %8953 = vmatpush.bf16.msrb.mxu2 %v14927_v10  ;;  %v15054_v54 = vld [vmem:[%s24215_s6 + $0x790] sm:$0xf]  ;;  %v16661_v10 = vld [vmem:[%s24215_s6 + $0x644] sm:$0xf0] }
 0x8e7   : > { %v15055_v35 = vor.u32 %v16703_v17, %v15054_v54 }
 0x8e9   : > { %8981 = vmatpush.bf16.msrb.mxu0 %v15055_v35  ;;  %v16684_v35 = vld [vmem:[%s24215_s6 + $0x704] sm:$0xf] }
 0x8ea   : > { %8967 = vmatpush.bf16.msrb.mxu3 %v14991_v8  ;;  %v14887_v8 = vor.u32 %v16661_v10, %v14886_v3  ;;  %v14984_v3 = vld [vmem:[%s24215_s6 + $0x708] sm:$0xf0]  ;;  %v16700_v10 = vld [vmem:[%s24215_s6 + $0x784] sm:$0xf] }
 0x8ee   : > { %8552 = vmatmul.bf16.vlgmr.msra.gmra.mxu1 %v8154_v49  ;;  %14832 = vmatmul.msk.bf16.vlgmr.msra.gmra.mxu0 %vm6611_vm11, %v14829_v48  ;;  %v14919_v49 = vor.u32 %v16669_v38, %v14918_v62  ;;  %v16677_v62 = vld [vmem:[%s24215_s6 + $0x6c4] sm:$0xf0]  ;;  %v16690_v38 = vld [vmem:[%s24215_s6 + $0x734] sm:$0xf] }
 0x8ef   : > { %8968 = vmatpush.bf16.msrb.mxu3 %v14983_v40  ;;  %v15011_v13 = vor.u32 %v16690_v38, %v15008_v7  ;;  %v16706_v40 = vld [vmem:[%s24215_s6 + $0x7b4] sm:$0xf] }
 0x8f0   : > { %8954 = vmatpush.bf16.msrb.mxu2 %v14919_v49  ;;  %v14951_v49 = vor.u32 %v16677_v62, %v14950_v59  ;;  %v15075_v16 = vor.u32 %v16706_v40, %v15072_v52  ;;  %v15048_v62 = vld [vmem:[%s24215_s6 + $0x788] sm:$0xf0]  ;;  %v16682_v52 = vld [vmem:[%s24215_s6 + $0x6f4] sm:$0xf] }
 0x8f1   : > { %v15051_v7 = vor.u32 %v16700_v10, %v15048_v62  ;;  %v14960_v10 = vld [vmem:[%s24215_s6 + $0x6d8] sm:$0xf0] }
 0x8f3   : > { %8969 = vmatpush.bf16.msrb.mxu3 %v14975_v37  ;;  %v16688_v37 = vld [vmem:[%s24215_s6 + $0x724] sm:$0xf] }
 0x8f4   : > { %8955 = vmatpush.bf16.msrb.mxu2 %v14911_v47  ;;  %v16701_v47 = vld [vmem:[%s24215_s6 + $0x784] sm:$0xf0]  ;;  %v15003_v42 = vor.u32 %v16688_v37, %v15000_v43  ;;  %v15014_v43 = vld [vmem:[%s24215_s6 + $0x740] sm:$0xf] }
 0x8f5   : > { %v15047_v9 = vor.u32 %v16701_v47, %v15046_v36  ;;  %v16698_v36 = vld [vmem:[%s24215_s6 + $0x774] sm:$0xf] }
 0x8f7   : > { %8982 = vmatpush.bf16.msrb.mxu0 %v15047_v9  ;;  %v15040_v9 = vld [vmem:[%s24215_s6 + $0x778] sm:$0xf0] }
 0x8f8   : > { %8956 = vmatpush.bf16.msrb.mxu2 %v14903_v50  ;;  %v15038_v50 = vld [vmem:[%s24215_s6 + $0x770] sm:$0xf]  ;;  %v15043_v37 = vor.u32 %v16698_v36, %v15040_v9  ;;  %v14952_v9 = vld [vmem:[%s24215_s6 + $0x6c8] sm:$0xf0] }
 0x8fc   : > { %8957 = vmatpush.bf16.msrb.mxu2 %v14895_v44  ;;  %v15059_v44 = vor.u32 %v16702_v1, %v15056_v41  ;;  %v15078_v1 = vld [vmem:[%s24215_s6 + $0x7c0] sm:$0xf] }
 0x8fe   : > { %14833 = vmatmul.msk.bf16.vlgmr.msrb.gmra.mxu1 %vm6611_vm11, %v14829_v48  ;;  %v16681_v48 = vld [vmem:[%s24215_s6 + $0x6e4] sm:$0xf0] }
 0x8ff   : > { %v14967_v30 = vor.u32 %v16681_v48, %v14966_v33  ;;  %v15067_v48 = vor.u32 %v16704_v45, %v15064_v15  ;;  %v16693_v45 = vld [vmem:[%s24215_s6 + $0x744] sm:$0xf0] }
 0x900   : > { %8958 = vmatpush.bf16.msrb.mxu2 %v14887_v8  ;;  %v14987_v8 = vor.u32 %v16684_v35, %v14984_v3  ;;  %v15015_v15 = vor.u32 %v16693_v45, %v15014_v43  ;;  %v16678_v3 = vld [vmem:[%s24215_s6 + $0x6d4] sm:$0xf] }
 0x901   : > { %8970 = vmatpush.bf16.msrb.mxu3 %v14967_v30  ;;  %v16699_v30 = vld [vmem:[%s24215_s6 + $0x774] sm:$0xf0]  ;;  %v14963_v62 = vor.u32 %v16678_v3, %v14960_v10  ;;  %v15080_v3 = vld [vmem:[%s24215_s6 + $0x7c8] sm:$0xf0] }
 0x902   : > { %v15039_v56 = vor.u32 %v16699_v30, %v15038_v50  ;;  %v14968_v50 = vld [vmem:[%s24215_s6 + $0x6e8] sm:$0xf0]  ;;  %v16696_v30 = vld [vmem:[%s24215_s6 + $0x764] sm:$0xf] }
 0x904   : > { %9021 = vmatpush.bf16.msra.mxu2 %v15011_v13  ;;  %8983 = vmatpush.bf16.msrb.mxu0 %v15039_v56  ;;  %v16695_v13 = vld [vmem:[%s24215_s6 + $0x754] sm:$0xf0] }
 0x905   : > { %8971 = vmatpush.bf16.msrb.mxu3 %v14959_v22  ;;  %v16697_v22 = vld [vmem:[%s24215_s6 + $0x764] sm:$0xf0] }
 0x906   : > { %v15031_v17 = vor.u32 %v16697_v22, %v15030_v0  ;;  %v16674_v22 = vld [vmem:[%s24215_s6 + $0x6b4] sm:$0xf] }
 0x908   : > { %9022 = vmatpush.bf16.msra.mxu2 %v15003_v42  ;;  %8984 = vmatpush.bf16.msrb.mxu0 %v15031_v17  ;;  %v14944_v17 = vld [vmem:[%s24215_s6 + $0x6b8] sm:$0xf0] }
 0x909   : > { %8972 = vmatpush.bf16.msrb.mxu3 %v14951_v49  ;;  %v15022_v49 = vld [vmem:[%s24215_s6 + $0x750] sm:$0xf]  ;;  %v14947_v35 = vor.u32 %v16674_v22, %v14944_v17  ;;  %v16708_v22 = vld [vmem:[%s24215_s6 + $0x7c4] sm:$0xf] }
 0x90a   : > { %v15023_v40 = vor.u32 %v16695_v13, %v15022_v49  ;;  %v16672_v13 = vld [vmem:[%s24215_s6 + $0x6a4] sm:$0xf]  ;;  %v15083_v10 = vor.u32 %v16708_v22, %v15080_v3 }
 0x90c   : > { %9023 = vmatpush.bf16.msra.mxu2 %v14995_v11  ;;  %8985 = vmatpush.bf16.msrb.mxu0 %v15023_v40  ;;  %v16709_v11 = vld [vmem:[%s24215_s6 + $0x7c4] sm:$0xf0]  ;;  %v14936_v40 = vld [vmem:[%s24215_s6 + $0x6a8] sm:$0xf0] }
 0x90d   : > { %9035 = vmatpush.bf16.msra.mxu3 %v15075_v16  ;;  %v14976_v16 = vld [vmem:[%s24215_s6 + $0x6f8] sm:$0xf0]  ;;  %v15079_v0 = vor.u32 %v16709_v11, %v15078_v1  ;;  %v14939_v36 = vor.u32 %v16672_v13, %v14936_v40  ;;  %v14904_v40 = vld [vmem:[%s24215_s6 + $0x668] sm:$0xf0] }
 0x90e   : > { %v14979_v47 = vor.u32 %v16682_v52, %v14976_v16 }
 0x90f   : > { %9000 = vmatpush.bf16.msra.mxu1 %v15079_v0  ;;  %v14920_v0 = vld [vmem:[%s24215_s6 + $0x688] sm:$0xf0] }
 0x910   : > { %9024 = vmatpush.bf16.msra.mxu2 %v14987_v8  ;;  %8986 = vmatpush.bf16.msrb.mxu0 %v15015_v15  ;;  %v16694_v8 = vld [vmem:[%s24215_s6 + $0x754] sm:$0xf] }
 0x911   : > { %9036 = vmatpush.bf16.msra.mxu3 %v15067_v48  ;;  %v16680_v48 = vld [vmem:[%s24215_s6 + $0x6e4] sm:$0xf] }
 0x912   : > { %v14971_v34 = vor.u32 %v16680_v48, %v14968_v50  ;;  %v15016_v48 = vld [vmem:[%s24215_s6 + $0x748] sm:$0xf0]  ;;  %v16670_v50 = vld [vmem:[%s24215_s6 + $0x694] sm:$0xf] }
 0x913   : > { %9007 = vmatpush.bf16.msrb.mxu1 %v14947_v35 }
 0x914   : > { %9025 = vmatpush.bf16.msra.mxu2 %v14979_v47  ;;  %v16676_v47 = vld [vmem:[%s24215_s6 + $0x6c4] sm:$0xf]  ;;  %9056 = vmatpush.bf16.msra.mxu0 %v15083_v10 }
 0x915   : > { %9037 = vmatpush.bf16.msra.mxu3 %v15059_v44  ;;  %v15035_v44 = vor.u32 %v16696_v30, %v15032_v6  ;;  %v14955_v15 = vor.u32 %v16676_v47, %v14952_v9  ;;  %v14928_v30 = vld [vmem:[%s24215_s6 + $0x698] sm:$0xf0] }
 0x916   : > { %v14931_v1 = vor.u32 %v16670_v50, %v14928_v30 }
 0x917   : > { %9008 = vmatpush.bf16.msrb.mxu1 %v14939_v36  ;;  %v14896_v36 = vld [vmem:[%s24215_s6 + $0x658] sm:$0xf0] }
 0x918   : > { %9026 = vmatpush.bf16.msra.mxu2 %v14971_v34 }
 0x919   : > { %9038 = vmatpush.bf16.msra.mxu3 %v15051_v7  ;;  %v15024_v7 = vld [vmem:[%s24215_s6 + $0x758] sm:$0xf0] }
 0x91a   : > { %v15027_v49 = vor.u32 %v16694_v8, %v15024_v7  ;;  %v16666_v7 = vld [vmem:[%s24215_s6 + $0x674] sm:$0xf] }
 0x91b   : > { %9009 = vmatpush.bf16.msrb.mxu1 %v14931_v1  ;;  %v14888_v1 = vld [vmem:[%s24215_s6 + $0x648] sm:$0xf0] }
 0x91c   : > { %9027 = vmatpush.bf16.msra.mxu2 %v14963_v62 }
 0x91d   : > { %9039 = vmatpush.bf16.msra.mxu3 %v15043_v37  ;;  %v16692_v37 = vld [vmem:[%s24215_s6 + $0x744] sm:$0xf] }
 0x91e   : > { %v15019_v6 = vor.u32 %v16692_v37, %v15016_v48 }
 0x920   : > { %9028 = vmatpush.bf16.msra.mxu2 %v14955_v15 }
 0x921   : > { %9040 = vmatpush.bf16.msra.mxu3 %v15035_v44  ;;  %v16668_v44 = vld [vmem:[%s24215_s6 + $0x684] sm:$0xf] }
 0x925   : > { %9041 = vmatpush.bf16.msra.mxu3 %v15027_v49  ;;  %v16664_v49 = vld [vmem:[%s24215_s6 + $0x664] sm:$0xf] }
 0x929   : > { %9042 = vmatpush.bf16.msra.mxu3 %v15019_v6  ;;  %v16660_v6 = vld [vmem:[%s24215_s6 + $0x644] sm:$0xf] }
 0x942   : > { %v23244_v58 = vpop.f32.mrf.mxu2 }
 0x943   : > { %v23249_v33 = vpop.f32.mrf.mxu3 }
 0x94a   : > { %v23286_v59 = vpop.f32.mrf.mxu2 }
 0x94b   : > { %v23275_v54 = vpop.f32.mrf.mxu0  ;;  %v23291_v38 = vpop.f32.mrf.mxu3 }
 0x952   : > { %v23328_v56 = vpop.f32.mrf.mxu2 }
 0x953   : > { %v23317_v42 = vpop.f32.mrf.mxu0  ;;  %v8525_v41 = vpop.f32.mrf.mxu3 }
 0x95a   : > { %v8569_v34 = vpop.f32.mrf.mxu2 }
 0x95b   : > { %v8483_v52 = vpop.f32.mrf.mxu1  ;;  %v8539_v16 = vpop.f32.mrf.mxu0 }
 0x95c   : > { %v8484_v43 = vadd.f32 %v8483_v52, %v23275_v54  ;;  %v8540_v45 = vadd.f32 %v8539_v16, %v8525_v41  ;;  %v8527_v11 = vpop.f32.mrf.mxu3  ;;  %v14907_v52 = vor.u32 %v16664_v49, %v14904_v40  ;;  %v16662_v16 = vld [vmem:[%s24215_s6 + $0x654] sm:$0xf] }
 0x95d   : > { %v14899_v15 = vor.u32 %v16662_v16, %v14896_v36 }
 0x95e   : > { %v8498_v54 = vadd.f32 %v23244_v58, %v8484_v43 }
 0x960   : > { %v8512_v41 = vadd.f32 %v23249_v33, %v8498_v54  ;;  %v14923_v33 = vor.u32 %v16668_v44, %v14920_v0 }
 0x962   : > { %v23394_v58 = vadd.f32 %v8512_v41, %v23060_v31  ;;  %v8596_v8 = vpop.f32.mrf.mxu2  ;;  %9010 = vmatpush.bf16.msrb.mxu1 %v14923_v33  ;;  %v14912_v31 = vld [vmem:[%s24215_s6 + $0x678] sm:$0xf0] }
 0x963   : > { %v8485_v17 = vpop.f32.mrf.mxu1  ;;  %v8541_v35 = vpop.f32.mrf.mxu0  ;;  %v14915_v13 = vor.u32 %v16666_v7, %v14912_v31 }
 0x964   : > { %v8610_v62 = vpop.f32.mrf.mxu3  ;;  %v8542_v44 = vadd.f32 %v8541_v35, %v8527_v11  ;;  %v8486_v16 = vadd.f32 %v8485_v17, %v23317_v42 }
 0x966   : > { %9011 = vmatpush.bf16.msrb.mxu1 %v14915_v13 }
 0x96a   : > { %v8598_v43 = vpop.f32.mrf.mxu2  ;;  %9012 = vmatpush.bf16.msrb.mxu1 %v14907_v52  ;;  %v7995_v52 = vadd.f32 %v22978_v25, %v22970_v51 }
 0x96b   : > { %v8553_v47 = vpop.f32.mrf.mxu1  ;;  %v8624_v9 = vpop.f32.mrf.mxu0  ;;  %v8643_v50 = vpack.c.bf16 %v8598_v43, %v8596_v8 }
 0x96c   : > { %v8554_v37 = vadd.f32 %v8553_v47, %v8540_v45  ;;  %v8612_v30 = vpop.f32.mrf.mxu3  ;;  %v14891_v45 = vor.u32 %v16660_v6, %v14888_v1 }
 0x96d   : > { %v8644_v54 = vpack.c.bf16 %v8612_v30, %v8610_v62  ;;  %8959 = vmatmul.bf16.vlgmr.msrb.gmra.mxu2 %v8643_v50 }
 0x96e   : > { %v8568_v48 = vadd.f32 %v23328_v56, %v8554_v37  ;;  %9013 = vmatpush.bf16.msrb.mxu1 %v14899_v15  ;;  %v23454_v37 = vld [vmem:[%s24217_s8] sm:$0x3] }
 0x96f   : > { %8973 = vmatmul.bf16.vlgmr.msrb.gmra.mxu3 %v8644_v54 }
 0x970   : > { %v23425_v41 = vadd.f32 %v8568_v48, %v23084_v29  ;;  %v7143_v29 = vadd.f32 %v22458_v12, %v22456_v24 }
 0x972   : > { %9014 = vmatpush.bf16.msrb.mxu1 %v14891_v45  ;;  %v7157_v7 = vadd.f32 %v22484_v63, %v7143_v29  ;;  %v23443_v63 = vld [vmem:[%s24216_s7] sm:$0x3] }
 0x973   : > { %v8555_v56 = vpop.f32.mrf.mxu1  ;;  %v8626_v0 = vpop.f32.mrf.mxu0  ;;  %v9069_v17 = vperm.slane %v23443_v63, 0 }
 0x974   : > { %v8556_v22 = vadd.f32 %v8555_v56, %v8542_v44  ;;  %v8645_v33 = vpack.c.bf16 %v8626_v0, %v8624_v9 }
 0x976   : > { %v23427_v3 = vadd.f32 %v8569_v34, %v8556_v22  ;;  %8987 = vmatmul.bf16.vlgmr.msrb.gmra.mxu0 %v8645_v33  ;;  %v7171_v34 = vadd.f32 %v22568_v46, %v7157_v7 }
 0x978   : > { %v7494_v31 = vadd.f32 %v22657_v4, %v7171_v34  ;;  %v8009_v4 = vadd.f32 %v23028_v60, %v7995_v52  ;;  %v7199_v60 = vadd.f32 %v22540_v28, %v22655_v27 }
 0x97a   : > { %v7508_v40 = vadd.f32 %v22725_v2, %v7494_v31  ;;  %v8500_v2 = vadd.f32 %v23286_v59, %v8486_v16  ;;  %v8023_v51 = vadd.f32 %v23068_v26, %v8009_v4  ;;  %v7213_v1 = vadd.f32 %v22542_v20, %v7199_v60  ;;  %v15088_v16 = vld [vmem:[%s24218_s9] sm:$0xf]  ;;  %v16747_v4 = vld [vmem:[%s24219_s10 + $0x114] sm:$0xf0] }
 0x97b   : > { %v8638_v10 = vpop.f32.mrf.mxu1 }
 0x97c   : > { %v7522_v46 = vadd.f32 %v22626_v57, %v7508_v40  ;;  %v8514_v57 = vadd.f32 %v23291_v38, %v8500_v2  ;;  %v8051_v38 = vadd.f32 %v23042_v21, %v23086_v32  ;;  %v16733_v40 = vld [vmem:[%s24218_s9 + $0x8] sm:$0x10]  ;;  %v16746_v2 = vld [vmem:[%s24219_s10 + $0x114] sm:$0xf] }
 0x97d   : > { %9029 = vmatmul.bf16.vlgmr.msra.gmra.mxu2 %v8644_v54 }
 0x97e   : > { %v7536_v43 = vadd.f32 %v22634_v5, %v7522_v46  ;;  %v7227_v5 = vadd.f32 %v22570_v55, %v7213_v1  ;;  %v15180_v55 = vld [vmem:[%s24219_s10 + $0x120] sm:$0xf]  ;;  %v8065_v32 = vadd.f32 %v23044_v53, %v8051_v38  ;;  %v16743_v38 = vld [vmem:[%s24219_s10 + $0xf4] sm:$0xf0] }
 0x97f   : > { %9043 = vmatmul.bf16.vlgmr.msra.gmra.mxu3 %v8645_v33 }
 0x980   : > { %v8083_v15 = vadd.f32 %v8023_v51, %v7536_v43  ;;  %v7550_v0 = vadd.f32 %v22694_v61, %v7227_v5  ;;  %v16749_v61 = vld [vmem:[%s24219_s10 + $0x124] sm:$0xf0]  ;;  %v9070_v51 = vperm.slane %v23443_v63, 1  ;;  %v15156_v5 = vld [vmem:[%s24219_s10 + $0xf0] sm:$0xf] }
 0x982   : > { %v8574_v30 = vadd.f32 %v8514_v57, %v8083_v15  ;;  %v7564_v21 = vadd.f32 %v22711_v18, %v7550_v0 }
 0x983   : > { %v8640_v8 = vpop.f32.mrf.mxu1 }
 0x984   : > { %v8646_v62 = vpack.c.bf16 %v8640_v8, %v8638_v10  ;;  %v24478_v10 = vmov 65535   ;;  %v7578_v53 = vadd.f32 %v22742_v14, %v7564_v21  ;;  %v15172_v14 = vld [vmem:[%s24219_s10 + $0x110] sm:$0xf] }
 0x985   : > { %v9112_v8 = vsel %vm6616_vm9, 4294967295, %v24478_v10 }
 0x986   : > { %15084 = vmatmul.msk.bf16.vlgmr.msra.gmra.mxu1 %vm7113_vm10, %v8646_v62  ;;  %15085 = vmatmul.msk.bf16.vlgmr.msra.gmra.mxu0 %vm7113_vm10, %v8646_v62  ;;  %v23483_v18 = vsel %vm1498_vm3, %v9112_v8, 0  ;;  %vm9108_vm3 = vcmask 89088   ;;  %v16741_v8 = vld [vmem:[%s24219_s10 + $0xe4] sm:$0xf0] }
 0x996   : > { %9015 = vmatmul.bf16.vlgmr.msrb.gmra.mxu1 %v8643_v50 }
 0x9f0   : > { %v8960_v11 = vpop.f32.mrf.mxu2 }
 0x9f2   : > { %v8974_v35 = vpop.f32.mrf.mxu3 }
 0x9f3   : > { %v8975_v49 = vadd.f32 %v8974_v35, %v8960_v11  ;;  %v8988_v13 = vpop.f32.mrf.mxu0  ;;  %v16748_v11 = vld [vmem:[%s24219_s10 + $0x124] sm:$0xf]  ;;  %v15182_v35 = vld [vmem:[%s24219_s10 + $0x128] sm:$0xf0] }
 0x9f5   : > { %v8989_v36 = vadd.f32 %v8988_v13, %v8975_v49  ;;  %v15096_v13 = vld [vmem:[%s24218_s9 + $0x8] sm:$0xf] }
 0x9f8   : > { %v8962_v47 = vpop.f32.mrf.mxu2 }
 0x9fa   : > { %v8976_v24 = vpop.f32.mrf.mxu3 }
 0x9fb   : > { %v8977_v25 = vadd.f32 %v8976_v24, %v8962_v47  ;;  %v8990_v59 = vpop.f32.mrf.mxu0  ;;  %v15181_v47 = vor.u32 %v16749_v61, %v15180_v55  ;;  %v15185_v24 = vor.u32 %v16748_v11, %v15182_v35  ;;  %v15204_v61 = vld [vmem:[%s24219_s10 + $0x150] sm:$0xf]  ;;  %v16755_v35 = vld [vmem:[%s24219_s10 + $0x154] sm:$0xf0] }
 0x9fd   : > { %v8991_v26 = vadd.f32 %v8990_v59, %v8977_v25  ;;  %v15173_v59 = vor.u32 %v16747_v4, %v15172_v14  ;;  %v16737_v14 = vld [vmem:[%s24219_s10 + $0xc4] sm:$0xf0]  ;;  %v16751_v4 = vld [vmem:[%s24219_s10 + $0x134] sm:$0xf0] }
 0xa00   : > { %v9030_v28 = vpop.f32.mrf.mxu2 }
 0xa02   : > { %v9044_v22 = vpop.f32.mrf.mxu3 }
 0xa03   : > { %v9002_v12 = vpop.f32.mrf.mxu1  ;;  %v9058_v29 = vpop.f32.mrf.mxu0 }
 0xa04   : > { %v9003_v9 = vadd.f32 %v9002_v12, %v8989_v36  ;;  %v16710_v36 = vld [vmem:[%s24218_s9] sm:$0x10]  ;;  %v8079_v12 = vadd.f32 %v23070_v23, %v8065_v32  ;;  %v23516_v23 = vor.u32 %v16733_v40, %v15096_v13  ;;  %v15205_v13 = vor.u32 %v16755_v35, %v15204_v61 }
 0xa05   : > { %v23521_v57 = vor.u32 %v16710_v36, %v15088_v16  ;;  %v16753_v36 = vld [vmem:[%s24219_s10 + $0x144] sm:$0xf0]  ;;  %v16719_v61 = vld [vmem:[%s24219_s10 + $0x44] sm:$0xf] }
 0xa06   : > { %v9063_v42 = vadd.f32 %v9003_v9, %v23394_v58  ;;  %v9079_v58 = vperm.slane %v23454_v37, 0  ;;  %v15174_v9 = vld [vmem:[%s24219_s10 + $0x118] sm:$0xf0] }
 0xa07   : > { %v15177_v63 = vor.u32 %v16746_v2, %v15174_v9  ;;  %v15270_v2 = vld [vmem:[%s24219_s10 + $0x70] sm:$0xf]  ;;  %v16726_v9 = vld [vmem:[%s24219_s10 + $0x74] sm:$0xf0] }
 0xa08   : > { %v9073_v48 = vmul.f32 %v9069_v17, %v9063_v42  ;;  %v7592_v42 = vadd.f32 %v22692_v39, %v7578_v53 }
 0xa0a   : > { %v9083_v54 = vadd.f32 %v9079_v58, %v9073_v48  ;;  %v8084_v15 = vadd.f32 %v8079_v12, %v7592_v42  ;;  %v9046_v39 = vpop.f32.mrf.mxu3  ;;  %v16744_v48 = vld [vmem:[%s24219_s10 + $0x104] sm:$0xf]  ;;  %v15188_v12 = vld [vmem:[%s24219_s10 + $0x130] sm:$0xf]  ;;  %v15142_v42 = vld [vmem:[%s24219_s10 + $0xd8] sm:$0xf0] }
 0xa0b   : > { %v9004_v50 = vpop.f32.mrf.mxu1 }
 0xa0c   : > { %v9005_v6 = vadd.f32 %v9004_v50, %v8991_v26  ;;  %v9091_v27 = vmul.f32 0.01, %v9083_v54  ;;  %vm9087_vm11 = vcmp.ge.f32.partialorder %v9083_v54, 0.0  ;;  %v16745_v26 = vld [vmem:[%s24219_s10 + $0x104] sm:$0xf0]  ;;  %v9080_v50 = vperm.slane %v23454_v37, 1 }
 0xa0d   : > { %v8575_v1 = vadd.f32 %v23427_v3, %v8084_v15  ;;  %v15158_v3 = vld [vmem:[%s24219_s10 + $0xf8] sm:$0xf0]  ;;  %v16725_v15 = vld [vmem:[%s24219_s10 + $0x74] sm:$0xf] }
 0xa0e   : > { %v9065_v45 = vadd.f32 %v9005_v6, %v8574_v30  ;;  %v9095_v34 = vsel %vm9087_vm11, %v9083_v54, %v9091_v27  ;;  %v9060_v54 = vpop.f32.mrf.mxu0 }
 0xa10   : > { %v9075_v44 = vmul.f32 %v9069_v17, %v9065_v45  ;;  %v9032_v17 = vpop.f32.mrf.mxu2 }
 0xa12   : > { %v9085_v56 = vadd.f32 %v9079_v58, %v9075_v44  ;;  %v15166_v58 = vld [vmem:[%s24219_s10 + $0x108] sm:$0xf0] }
 0xa13   : > { %v9016_v33 = vpop.f32.mrf.mxu1  ;;  %v15169_v37 = vor.u32 %v16744_v48, %v15166_v58  ;;  %v15134_v58 = vld [vmem:[%s24219_s10 + $0xc8] sm:$0xf0] }
 0xa14   : > { %vm9089_vm12 = vcmp.ge.f32.partialorder %v9085_v56, 0.0  ;;  %v9093_v20 = vmul.f32 0.01, %v9085_v56  ;;  %v9031_v62 = vadd.f32 %v9030_v28, %v9016_v33  ;;  %v16742_v28 = vld [vmem:[%s24219_s10 + $0xf4] sm:$0xf] }
 0xa15   : > { %v15148_v33 = vld [vmem:[%s24219_s10 + $0xe0] sm:$0xf]  ;;  %v15161_v10 = vor.u32 %v16742_v28, %v15158_v3  ;;  %v15206_v3 = vld [vmem:[%s24219_s10 + $0x158] sm:$0xf0] }
 0xa16   : > { %v9045_v7 = vadd.f32 %v9044_v22, %v9031_v62  ;;  %v9097_v31 = vsel %vm9089_vm12, %v9085_v56, %v9093_v20  ;;  %v15157_v22 = vor.u32 %v16743_v38, %v15156_v5  ;;  %v16740_v20 = vld [vmem:[%s24219_s10 + $0xe4] sm:$0xf]  ;;  %v15150_v62 = vld [vmem:[%s24219_s10 + $0xe8] sm:$0xf0]  ;;  %v16734_v5 = vld [vmem:[%s24219_s10 + $0xb4] sm:$0xf] }
 0xa17   : > { %v9099_v49 = vpack.c.bf16 %v9097_v31, %v9095_v34  ;;  %v15153_v11 = vor.u32 %v16740_v20, %v15150_v62  ;;  %v16739_v34 = vld [vmem:[%s24219_s10 + $0xd4] sm:$0xf0]  ;;  %v16754_v38 = vld [vmem:[%s24219_s10 + $0x154] sm:$0xf]  ;;  %v15198_v62 = vld [vmem:[%s24219_s10 + $0x148] sm:$0xf0] }
 0xa18   : > { %v9059_v52 = vadd.f32 %v9058_v29, %v9045_v7  ;;  %v15149_v29 = vor.u32 %v16741_v8, %v15148_v33  ;;  %v15140_v7 = vld [vmem:[%s24219_s10 + $0xd0] sm:$0xf]  ;;  %v16721_v33 = vld [vmem:[%s24219_s10 + $0x54] sm:$0xf]  ;;  %v16752_v8 = vld [vmem:[%s24219_s10 + $0x144] sm:$0xf] }
 0xa19   : > { %v23503_v46 = vand.u32 %v23483_v18, %v9099_v49  ;;  %v15141_v40 = vor.u32 %v16739_v34, %v15140_v7  ;;  %v16731_v7 = vld [vmem:[%s24219_s10 + $0xa4] sm:$0xf]  ;;  %v15296_v34 = vld [vmem:[%s24219_s10 + $0xa8] sm:$0xf0] }
 0xa1a   : > { %v9064_v25 = vadd.f32 %v9059_v52, %v23425_v41  ;;  %v15164_v41 = vld [vmem:[%s24219_s10 + $0x100] sm:$0xf] }
 0xa1b   : > { %v9018_v43 = vpop.f32.mrf.mxu1  ;;  %9127 = vmatpush.bf16.msrb.mxu0 %v23503_v46  ;;  %9190 = vmatpush.bf16.msrb.mxu2 %v23503_v46  ;;  %v15165_v44 = vor.u32 %v16745_v26, %v15164_v41  ;;  %v15196_v52 = vld [vmem:[%s24219_s10 + $0x140] sm:$0xf]  ;;  %v16736_v26 = vld [vmem:[%s24219_s10 + $0xc4] sm:$0xf] }
 0xa1c   : > { %v9033_v60 = vadd.f32 %v9032_v17, %v9018_v43  ;;  %v9074_v30 = vmul.f32 %v9070_v51, %v9064_v25  ;;  %v15271_v25 = vor.u32 %v16726_v9, %v15270_v2  ;;  %v15124_v17 = vld [vmem:[%s24219_s10 + $0xb0] sm:$0xf]  ;;  %v15288_v9 = vld [vmem:[%s24219_s10 + $0x98] sm:$0xf0] }
 0xa1e   : > { %v9047_v6 = vadd.f32 %v9046_v39, %v9033_v60  ;;  %15098 = vmatmul.msk.bf16.vlgmr.msrb.gmra.mxu2 %vm9108_vm3, %v23516_v23  ;;  %15090 = vmatmul.msk.bf16.vlgmr.msrb.gmra.mxu0 %vm9108_vm3, %v23521_v57  ;;  %v9084_v27 = vadd.f32 %v9080_v50, %v9074_v30  ;;  %v15262_v60 = vld [vmem:[%s24219_s10 + $0x60] sm:$0xf]  ;;  %v15272_v39 = vld [vmem:[%s24219_s10 + $0x78] sm:$0xf0]  ;;  %v16722_v30 = vld [vmem:[%s24219_s10 + $0x54] sm:$0xf0] }
 0xa1f   : > { %9350 = vmatpush.bf16.msra.mxu0 %v15181_v47  ;;  %9378 = vmatpush.bf16.msra.mxu2 %v15185_v24  ;;  %v15132_v47 = vld [vmem:[%s24219_s10 + $0xc0] sm:$0xf]  ;;  %v15275_v48 = vor.u32 %v16725_v15, %v15272_v39  ;;  %v15280_v15 = vld [vmem:[%s24219_s10 + $0x88] sm:$0xf0] }
 0xa20   : > { %v9061_v45 = vadd.f32 %v9060_v54, %v9047_v6  ;;  %v9092_v21 = vmul.f32 0.01, %v9084_v27  ;;  %vm9088_vm9 = vcmp.ge.f32.partialorder %v9084_v27, 0.0  ;;  %v15133_v24 = vor.u32 %v16737_v14, %v15132_v47  ;;  %v16723_v54 = vld [vmem:[%s24219_s10 + $0x64] sm:$0xf] }
 0xa21   : > { %v15137_v6 = vor.u32 %v16736_v26, %v15134_v58  ;;  %v16732_v47 = vld [vmem:[%s24219_s10 + $0xa4] sm:$0xf0]  ;;  %v15214_v26 = vld [vmem:[%s24219_s10] sm:$0xf] }
 0xa22   : > { %v9066_v56 = vadd.f32 %v9061_v45, %v8575_v1  ;;  %v9096_v31 = vsel %vm9088_vm9, %v9084_v27, %v9092_v21  ;;  %v15264_v45 = vld [vmem:[%s24219_s10 + $0x68] sm:$0xf0]  ;;  %v15246_v27 = vld [vmem:[%s24219_s10 + $0x40] sm:$0xf]  ;;  %v16718_v21 = vld [vmem:[%s24219_s10 + $0x34] sm:$0xf0] }
 0xa23   : > { %9351 = vmatpush.bf16.msra.mxu0 %v15173_v59  ;;  %9379 = vmatpush.bf16.msra.mxu2 %v15177_v63  ;;  %v16724_v59 = vld [vmem:[%s24219_s10 + $0x64] sm:$0xf0]  ;;  %v15278_v58 = vld [vmem:[%s24219_s10 + $0x80] sm:$0xf] }
 0xa24   : > { %v9076_v0 = vmul.f32 %v9070_v51, %v9066_v56  ;;  %v15189_v51 = vor.u32 %v16751_v4, %v15188_v12  ;;  %v15263_v63 = vor.u32 %v16724_v59, %v15262_v60  ;;  %v16720_v56 = vld [vmem:[%s24219_s10 + $0x44] sm:$0xf0]  ;;  %v15240_v12 = vld [vmem:[%s24219_s10 + $0x38] sm:$0xf0]  ;;  %v16729_v4 = vld [vmem:[%s24219_s10 + $0x94] sm:$0xf] }
 0xa25   : > { %v15232_v59 = vld [vmem:[%s24219_s10 + $0x28] sm:$0xf0] }
 0xa26   : > { %v9086_v55 = vadd.f32 %v9080_v50, %v9076_v0  ;;  %v15254_v50 = vld [vmem:[%s24219_s10 + $0x50] sm:$0xf]  ;;  %v15209_v0 = vor.u32 %v16754_v38, %v15206_v3 }
 0xa27   : > { %9352 = vmatpush.bf16.msra.mxu0 %v15165_v44  ;;  %9380 = vmatpush.bf16.msra.mxu2 %v15169_v37  ;;  %v15255_v1 = vor.u32 %v16722_v30, %v15254_v50  ;;  %v15267_v44 = vor.u32 %v16723_v54, %v15264_v45  ;;  %v15126_v37 = vld [vmem:[%s24219_s10 + $0xb8] sm:$0xf0]  ;;  %v16728_v30 = vld [vmem:[%s24219_s10 + $0x84] sm:$0xf0] }
 0xa28   : > { %vm9090_vm13 = vcmp.ge.f32.partialorder %v9086_v55, 0.0  ;;  %v9094_v32 = vmul.f32 0.01, %v9086_v55  ;;  %v15129_v28 = vor.u32 %v16734_v5, %v15126_v37  ;;  %v15279_v54 = vor.u32 %v16728_v30, %v15278_v58  ;;  %v16711_v5 = vld [vmem:[%s24219_s10 + $0x4] sm:$0xf] }
 0xa29   : > { %v15216_v37 = vld [vmem:[%s24219_s10 + $0x8] sm:$0xf0]  ;;  %v16776_v58 = vld [vmem:[%s24219_s10 + $0x1f4] sm:$0xf0]  ;;  %v15408_v30 = vld [vmem:[%s24219_s10 + $0x1f8] sm:$0xf0] }
 0xa2a   : > { %v9098_v53 = vsel %vm9090_vm13, %v9086_v55, %v9094_v32  ;;  %v15238_v55 = vld [vmem:[%s24219_s10 + $0x30] sm:$0xf]  ;;  %v15201_v32 = vor.u32 %v16752_v8, %v15198_v62  ;;  %v15219_v38 = vor.u32 %v16711_v5, %v15216_v37 }
 0xa2b   : > { %9353 = vmatpush.bf16.msra.mxu0 %v15157_v22  ;;  %9381 = vmatpush.bf16.msra.mxu2 %v15161_v10  ;;  %v9100_v49 = vpack.c.bf16 %v9098_v53, %v9096_v31  ;;  %v15247_v22 = vor.u32 %v16720_v56, %v15246_v27  ;;  %v15256_v10 = vld [vmem:[%s24219_s10 + $0x58] sm:$0xf0]  ;;  %v15299_v31 = vor.u32 %v16731_v7, %v15296_v34  ;;  %v16750_v53 = vld [vmem:[%s24219_s10 + $0x134] sm:$0xf]  ;;  %v15382_v7 = vld [vmem:[%s24219_s10 + $0x1c0] sm:$0xf] }
 0xa2c   : > { %v15259_v20 = vor.u32 %v16721_v33, %v15256_v10  ;;  %v16770_v34 = vld [vmem:[%s24219_s10 + $0x1c4] sm:$0xf0] }
 0xa2d   : > { %v23581_v16 = vand.u32 %v23483_v18, %v9100_v49  ;;  %v15197_v18 = vor.u32 %v16753_v36, %v15196_v52  ;;  %v15190_v49 = vld [vmem:[%s24219_s10 + $0x138] sm:$0xf0]  ;;  %v16716_v52 = vld [vmem:[%s24219_s10 + $0x24] sm:$0xf0]  ;;  %v15294_v36 = vld [vmem:[%s24219_s10 + $0xa0] sm:$0xf] }
 0xa2f   : > { %9354 = vmatpush.bf16.msra.mxu0 %v15149_v29  ;;  %9382 = vmatpush.bf16.msra.mxu2 %v15153_v11  ;;  %v15239_v29 = vor.u32 %v16718_v21, %v15238_v55  ;;  %v15248_v11 = vld [vmem:[%s24219_s10 + $0x48] sm:$0xf0]  ;;  %v15306_v55 = vld [vmem:[%s24218_s9 + $0x10] sm:$0xf]  ;;  %v16756_v21 = vld [vmem:[%s24218_s9 + $0x10] sm:$0x10] }
 0xa30   : > { %9141 = vmatpush.bf16.msra.mxu1 %v23581_v16  ;;  %9204 = vmatpush.bf16.msrb.mxu3 %v23581_v16  ;;  %v15251_v35 = vor.u32 %v16719_v61, %v15248_v11  ;;  %v15392_v11 = vld [vmem:[%s24219_s10 + $0x1d8] sm:$0xf0] }
 0xa33   : > { %9355 = vmatpush.bf16.msra.mxu0 %v15141_v40  ;;  %15099 = vmatmul.msk.bf16.vlgmr.msrb.gmra.mxu3 %vm9108_vm3, %v23516_v23  ;;  %v16738_v23 = vld [vmem:[%s24219_s10 + $0xd4] sm:$0xf]  ;;  %v15193_v40 = vor.u32 %v16750_v53, %v15190_v49  ;;  %v15383_v53 = vor.u32 %v16770_v34, %v15382_v7  ;;  %v15384_v49 = vld [vmem:[%s24219_s10 + $0x1c8] sm:$0xf0] }
 0xa34   : > { %9369 = vmatpush.bf16.msrb.mxu1 %v15205_v13  ;;  %v15145_v43 = vor.u32 %v16738_v23, %v15142_v42  ;;  %9397 = vmatpush.bf16.msra.mxu3 %v15209_v0  ;;  %v15230_v13 = vld [vmem:[%s24219_s10 + $0x20] sm:$0xf]  ;;  %v15291_v23 = vor.u32 %v16729_v4, %v15288_v9  ;;  %v16765_v4 = vld [vmem:[%s24219_s10 + $0x1a4] sm:$0xf]  ;;  %v15368_v9 = vld [vmem:[%s24219_s10 + $0x1a8] sm:$0xf0] }
 0xa35   : > { %15091 = vmatmul.msk.bf16.vlgmr.msra.gmra.mxu1 %vm9108_vm3, %v23521_v57  ;;  %v16735_v57 = vld [vmem:[%s24219_s10 + $0xb4] sm:$0xf0]  ;;  %v15231_v14 = vor.u32 %v16716_v52, %v15230_v13  ;;  %v15336_v7 = vld [vmem:[%s24219_s10 + $0x168] sm:$0xf0] }
 0xa36   : > { %v15125_v41 = vor.u32 %v16735_v57, %v15124_v17  ;;  %9383 = vmatpush.bf16.msra.mxu2 %v15145_v43  ;;  %v15286_v17 = vld [vmem:[%s24219_s10 + $0x90] sm:$0xf]  ;;  %v16730_v43 = vld [vmem:[%s24219_s10 + $0x94] sm:$0xf0]  ;;  %v16715_v57 = vld [vmem:[%s24219_s10 + $0x24] sm:$0xf] }
 0xa37   : > { %9356 = vmatpush.bf16.msra.mxu0 %v15133_v24  ;;  %v16717_v24 = vld [vmem:[%s24219_s10 + $0x34] sm:$0xf]  ;;  %v15287_v60 = vor.u32 %v16730_v43, %v15286_v17  ;;  %v16768_v52 = vld [vmem:[%s24219_s10 + $0x1b4] sm:$0xf0] }
 0xa38   : > { %9370 = vmatpush.bf16.msrb.mxu1 %v15197_v18  ;;  %9398 = vmatpush.bf16.msra.mxu3 %v15201_v32  ;;  %v15295_v18 = vor.u32 %v16732_v47, %v15294_v36  ;;  %v15243_v2 = vor.u32 %v16717_v24, %v15240_v12  ;;  %v15307_v32 = vor.u32 %v16756_v21, %v15306_v55  ;;  %v16767_v36 = vld [vmem:[%s24219_s10 + $0x1b4] sm:$0xf]  ;;  %v15366_v24 = vld [vmem:[%s24219_s10 + $0x1a0] sm:$0xf]  ;;  %v16766_v12 = vld [vmem:[%s24219_s10 + $0x1a4] sm:$0xf0] }
 0xa39   : > { %v15344_v21 = vld [vmem:[%s24219_s10 + $0x178] sm:$0xf0] }
 0xa3a   : > { %9384 = vmatpush.bf16.msra.mxu2 %v15137_v6  ;;  %v16713_v6 = vld [vmem:[%s24219_s10 + $0x14] sm:$0xf] }
 0xa3b   : > { %9357 = vmatpush.bf16.msra.mxu0 %v15125_v41  ;;  %v15235_v41 = vor.u32 %v16715_v57, %v15232_v59  ;;  %v15416_v57 = vld [vmem:[%s24219_s10 + $0x208] sm:$0xf0]  ;;  %v16764_v59 = vld [vmem:[%s24219_s10 + $0x194] sm:$0xf0] }
 0xa3c   : > { %9371 = vmatpush.bf16.msrb.mxu1 %v15189_v51  ;;  %9399 = vmatpush.bf16.msra.mxu3 %v15193_v40  ;;  %v15222_v51 = vld [vmem:[%s24219_s10 + $0x10] sm:$0xf] }
 0xa3d   : > { %v15374_v40 = vld [vmem:[%s24219_s10 + $0x1b0] sm:$0xf] }
 0xa3e   : > { %9385 = vmatpush.bf16.msra.mxu2 %v15129_v28  ;;  %v15375_v47 = vor.u32 %v16768_v52, %v15374_v40 }
 0xa3f   : > { %9547 = vmatpush.bf16.msrb.mxu0 %v15275_v48  ;;  %v16712_v48 = vld [vmem:[%s24219_s10 + $0x4] sm:$0xf0] }
 0xa40   : > { %9519 = vmatpush.bf16.msra.mxu1 %v15271_v25  ;;  %v16714_v25 = vld [vmem:[%s24219_s10 + $0x14] sm:$0xf0]  ;;  %9538 = vmatpush.bf16.msrb.mxu3 %v15295_v18  ;;  %v15215_v50 = vor.u32 %v16712_v48, %v15214_v26  ;;  %v15406_v26 = vld [vmem:[%s24219_s10 + $0x1f0] sm:$0xf] }
 0xa41   : > { %v15223_v42 = vor.u32 %v16714_v25, %v15222_v51  ;;  %v15371_v51 = vor.u32 %v16765_v4, %v15368_v9  ;;  %v15414_v25 = vld [vmem:[%s24219_s10 + $0x200] sm:$0xf] }
 0xa42   : > { %9566 = vmatpush.bf16.msrb.mxu2 %v15299_v31  ;;  %v16769_v31 = vld [vmem:[%s24219_s10 + $0x1c4] sm:$0xf] }
 0xa43   : > { %9548 = vmatpush.bf16.msrb.mxu0 %v15267_v44  ;;  %v15387_v13 = vor.u32 %v16769_v31, %v15384_v49 }
 0xa44   : > { %9520 = vmatpush.bf16.msra.mxu1 %v15263_v63  ;;  %v16727_v63 = vld [vmem:[%s24219_s10 + $0x84] sm:$0xf]  ;;  %9539 = vmatpush.bf16.msrb.mxu3 %v15287_v60  ;;  %v15358_v60 = vld [vmem:[%s24219_s10 + $0x190] sm:$0xf] }
 0xa45   : > { %v15283_v39 = vor.u32 %v16727_v63, %v15280_v15  ;;  %v15359_v63 = vor.u32 %v16764_v59, %v15358_v60  ;;  %v16763_v15 = vld [vmem:[%s24219_s10 + $0x194] sm:$0xf] }
 0xa46   : > { %9567 = vmatpush.bf16.msrb.mxu2 %v15291_v23  ;;  %v16778_v23 = vld [vmem:[%s24219_s10 + $0x204] sm:$0xf0] }
 0xa47   : > { %9549 = vmatpush.bf16.msrb.mxu0 %v15259_v20  ;;  %v15415_v43 = vor.u32 %v16778_v23, %v15414_v25 }
 0xa48   : > { %9521 = vmatpush.bf16.msra.mxu1 %v15255_v1  ;;  %v15224_v1 = vld [vmem:[%s24219_s10 + $0x18] sm:$0xf0]  ;;  %9540 = vmatpush.bf16.msrb.mxu3 %v15279_v54  ;;  %v15350_v54 = vld [vmem:[%s24219_s10 + $0x180] sm:$0xf] }
 0xa49   : > { %v15227_v45 = vor.u32 %v16713_v6, %v15224_v1  ;;  %v15407_v6 = vor.u32 %v16776_v58, %v15406_v26 }
 0xa4a   : > { %9568 = vmatpush.bf16.msrb.mxu2 %v15283_v39  ;;  %v15360_v39 = vld [vmem:[%s24219_s10 + $0x198] sm:$0xf0] }
 0xa4b   : > { %9550 = vmatpush.bf16.msrb.mxu0 %v15251_v35  ;;  %v15363_v48 = vor.u32 %v16763_v15, %v15360_v39  ;;  %v9812_v39 = vld [vmem:[%s24220_s11] sm:$0x3] }
 0xa4c   : > { %9522 = vmatpush.bf16.msra.mxu1 %v15247_v22 }
 0xa4f   : > { %9551 = vmatpush.bf16.msrb.mxu0 %v15243_v2  ;;  %v15367_v2 = vor.u32 %v16766_v12, %v15366_v24 }
 0xa50   : > { %9523 = vmatpush.bf16.msra.mxu1 %v15239_v29  ;;  %v16771_v29 = vld [vmem:[%s24219_s10 + $0x1d4] sm:$0xf] }
 0xa51   : > { %v15395_v35 = vor.u32 %v16771_v29, %v15392_v11  ;;  %v16758_v29 = vld [vmem:[%s24219_s10 + $0x164] sm:$0xf0] }
 0xa53   : > { %9552 = vmatpush.bf16.msrb.mxu0 %v15235_v41 }
 0xa54   : > { %9524 = vmatpush.bf16.msra.mxu1 %v15231_v14  ;;  %v15376_v14 = vld [vmem:[%s24219_s10 + $0x1b8] sm:$0xf0] }
 0xa55   : > { %v15379_v18 = vor.u32 %v16767_v36, %v15376_v14 }
 0xa57   : > { %9553 = vmatpush.bf16.msrb.mxu0 %v15227_v45  ;;  %v16762_v45 = vld [vmem:[%s24219_s10 + $0x184] sm:$0xf0] }
 0xa58   : > { %9525 = vmatpush.bf16.msra.mxu1 %v15223_v42  ;;  %v16777_v42 = vld [vmem:[%s24219_s10 + $0x204] sm:$0xf]  ;;  %v15351_v37 = vor.u32 %v16762_v45, %v15350_v54 }
 0xa59   : > { %v15419_v41 = vor.u32 %v16777_v42, %v15416_v57 }
 0xa5b   : > { %9554 = vmatpush.bf16.msrb.mxu0 %v15219_v38  ;;  %v15352_v38 = vld [vmem:[%s24219_s10 + $0x188] sm:$0xf0] }
 0xa5c   : > { %9526 = vmatpush.bf16.msra.mxu1 %v15215_v50  ;;  %v16775_v50 = vld [vmem:[%s24219_s10 + $0x1f4] sm:$0xf] }
 0xa5d   : > { %v15411_v1 = vor.u32 %v16775_v50, %v15408_v30  ;;  %v9815_v30 = vperm.slane %v9812_v39, 1 }
 0xa9b   : > { %v9129_v27 = vpop.f32.mrf.mxu0 }
 0xaa1   : > { %v9192_v44 = vpop.f32.mrf.mxu2 }
 0xaa3   : > { %v9131_v22 = vpop.f32.mrf.mxu0 }
 0xaa4   : > { %v9148_v8 = vpack.c.bf16 %v9131_v22, %v9129_v27  ;;  %v16774_v27 = vld [vmem:[%s24219_s10 + $0x1e4] sm:$0xf0] }
 0xaa9   : > { %v9194_v28 = vpop.f32.mrf.mxu2 }
 0xaaa   : > { %v9211_v3 = vpack.c.bf16 %v9194_v28, %v9192_v44  ;;  %v16761_v44 = vld [vmem:[%s24219_s10 + $0x184] sm:$0xf] }
 0xaab   : > { %v15355_v28 = vor.u32 %v16761_v44, %v15352_v38 }
 0xaac   : > { %9386 = vmatmul.bf16.vlgmr.msra.gmra.mxu2 %v9211_v3  ;;  %9358 = vmatmul.bf16.vlgmr.msra.gmra.mxu0 %v9211_v3  ;;  %v15398_v3 = vld [vmem:[%s24219_s10 + $0x1e0] sm:$0xf] }
 0xaad   : > { %9780 = vmatpush.bf16.msra.mxu0 %v15395_v35  ;;  %v15399_v22 = vor.u32 %v16774_v27, %v15398_v3 }
 0xab1   : > { %9781 = vmatpush.bf16.msra.mxu0 %v15387_v13 }
 0xab2   : > { %v9143_v56 = vpop.f32.mrf.mxu1 }
 0xab5   : > { %9782 = vmatpush.bf16.msra.mxu0 %v15379_v18 }
 0xab6   : > { %v9206_v0 = vpop.f32.mrf.mxu3 }
 0xab9   : > { %9783 = vmatpush.bf16.msra.mxu0 %v15371_v51 }
 0xaba   : > { %v9145_v33 = vpop.f32.mrf.mxu1 }
 0xabb   : > { %v9149_v10 = vpack.c.bf16 %v9145_v33, %v9143_v56  ;;  %v16773_v56 = vld [vmem:[%s24219_s10 + $0x1e4] sm:$0xf]  ;;  %v15400_v33 = vld [vmem:[%s24219_s10 + $0x1e8] sm:$0xf0] }
 0xabc   : > { %9555 = vmatmul.bf16.vlgmr.msrb.gmra.mxu0 %v9148_v8 }
 0xabd   : > { %15301 = vmatmul.msk.bf16.vlgmr.msrb.gmra.mxu2 %vm9346_vm14, %v9149_v10  ;;  %9784 = vmatpush.bf16.msra.mxu0 %v15363_v48 }
 0xabe   : > { %v9208_v20 = vpop.f32.mrf.mxu3 }
 0xabf   : > { %v9212_v62 = vpack.c.bf16 %v9208_v20, %v9206_v0  ;;  %v16760_v20 = vld [vmem:[%s24219_s10 + $0x174] sm:$0xf0] }
 0xac1   : > { %15210 = vmatmul.msk.bf16.vlgmr.msrb.gmra.mxu1 %vm9346_vm14, %v9212_v62  ;;  %15211 = vmatmul.msk.bf16.vlgmr.msra.gmra.mxu3 %vm9346_vm14, %v9212_v62  ;;  %v16759_v62 = vld [vmem:[%s24219_s10 + $0x174] sm:$0xf] }
 0xac2   : > { %9593 = vmatpush.bf16.msra.mxu3 %v23503_v46  ;;  %9607 = vmatpush.bf16.msrb.mxu1 %v23581_v16  ;;  %v15390_v46 = vld [vmem:[%s24219_s10 + $0x1d0] sm:$0xf]  ;;  %v16772_v16 = vld [vmem:[%s24219_s10 + $0x1d4] sm:$0xf0] }
 0xac3   : > { %v15391_v61 = vor.u32 %v16772_v16, %v15390_v46  ;;  %9785 = vmatpush.bf16.msra.mxu0 %v15355_v28  ;;  %v15334_v16 = vld [vmem:[%s24219_s10 + $0x160] sm:$0xf] }
 0xac4   : > { %v15335_v35 = vor.u32 %v16758_v29, %v15334_v16 }
 0xac5   : > { %9752 = vmatpush.bf16.msra.mxu2 %v15391_v61  ;;  %v16757_v61 = vld [vmem:[%s24219_s10 + $0x164] sm:$0xf] }
 0xac6   : > { %v15339_v31 = vor.u32 %v16757_v61, %v15336_v7 }
 0xac9   : > { %9753 = vmatpush.bf16.msra.mxu2 %v15383_v53 }
 0xacd   : > { %9754 = vmatpush.bf16.msra.mxu2 %v15375_v47 }
 0xad1   : > { %9527 = vmatmul.bf16.vlgmr.msra.gmra.mxu1 %v9148_v8  ;;  %15300 = vmatmul.msk.bf16.vlgmr.msrb.gmra.mxu3 %vm9346_vm14, %v9149_v10  ;;  %v15403_v10 = vor.u32 %v16773_v56, %v15400_v33  ;;  %v15342_v8 = vld [vmem:[%s24219_s10 + $0x170] sm:$0xf]  ;;  %v9814_v56 = vperm.slane %v9812_v39, 0 }
 0xad2   : > { %9755 = vmatpush.bf16.msra.mxu2 %v15367_v2  ;;  %9771 = vmatpush.bf16.msrb.mxu3 %v15415_v43  ;;  %v15343_v55 = vor.u32 %v16760_v20, %v15342_v8 }
 0xad3   : > { %9799 = vmatpush.bf16.msra.mxu1 %v15419_v41 }
 0xad6   : > { %9756 = vmatpush.bf16.msra.mxu2 %v15359_v63  ;;  %9772 = vmatpush.bf16.msrb.mxu3 %v15407_v6 }
 0xad7   : > { %9800 = vmatpush.bf16.msra.mxu1 %v15411_v1  ;;  %v9822_v1 = vld [vmem:[%s24221_s12] sm:$0x3] }
 0xad8   : > { %v9824_v8 = vperm.slane %v9822_v1, 0 }
 0xada   : > { %9757 = vmatpush.bf16.msra.mxu2 %v15351_v37  ;;  %9773 = vmatpush.bf16.msrb.mxu3 %v15399_v22 }
 0xadb   : > { %9801 = vmatpush.bf16.msra.mxu1 %v15403_v10 }
 0xade   : > { %9758 = vmatpush.bf16.msra.mxu2 %v15343_v55 }
 0xae1   : > { %15308 = vmatmul.msk.bf16.vlgmr.msra.gmra.mxu3 %vm9108_vm3, %v15307_v32  ;;  %15309 = vmatmul.msk.bf16.vlgmr.msrb.gmra.mxu1 %vm9108_vm3, %v15307_v32  ;;  %v15347_v32 = vor.u32 %v16759_v62, %v15344_v21 }
 0xae2   : > { %9759 = vmatpush.bf16.msra.mxu2 %v15335_v35 }
 0xae3   : > { %9786 = vmatpush.bf16.msra.mxu0 %v15347_v32 }
 0xae7   : > { %9787 = vmatpush.bf16.msra.mxu0 %v15339_v31 }
 0xb29   : > { %v9359_v46 = vpop.f32.mrf.mxu0 }
 0xb2f   : > { %v9387_v23 = vpop.f32.mrf.mxu2 }
 0xb31   : > { %v9361_v13 = vpop.f32.mrf.mxu0 }
 0xb37   : > { %v9389_v42 = vpop.f32.mrf.mxu2 }
 0xb3e   : > { %v9373_v17 = vpop.f32.mrf.mxu1 }
 0xb3f   : > { %v9374_v34 = vadd.f32 %v9373_v17, %v9359_v46  ;;  %v9556_v17 = vpop.f32.mrf.mxu0 }
 0xb40   : > { %v9570_v43 = vpop.f32.mrf.mxu2 }
 0xb44   : > { %v9401_v5 = vpop.f32.mrf.mxu3 }
 0xb45   : > { %v9402_v60 = vadd.f32 %v9401_v5, %v9387_v23  ;;  %v9825_v5 = vperm.slane %v9822_v1, 1  ;;  %v16783_v23 = vld [vmem:[%s24223_s14 + $0x20] sm:$0xff]  ;;  %v16804_v1 = vld [vmem:[%s24223_s14 + $0xc8] sm:$0xff] }
 0xb46   : > { %v9375_v0 = vpop.f32.mrf.mxu1 }
 0xb47   : > { %v9376_v52 = vadd.f32 %v9375_v0, %v9361_v13  ;;  %v9558_v57 = vpop.f32.mrf.mxu0  ;;  %v9557_v59 = vadd.f32 %v9556_v17, %v9402_v60  ;;  %v16796_v13 = vld [vmem:[%s24223_s14 + $0x88] sm:$0xff]  ;;  %v16781_v17 = vld [vmem:[%s24223_s14 + $0x10] sm:$0xff]  ;;  %v16779_v60 = vld [vmem:[%s24223_s14] sm:$0xff] }
 0xb48   : > { %v9572_v41 = vpop.f32.mrf.mxu2 }
 0xb49   : > { %v9571_v26 = vadd.f32 %v9570_v43, %v9557_v59  ;;  %v16780_v43 = vld [vmem:[%s24223_s14 + $0x8] sm:$0xff]  ;;  %v16791_v59 = vld [vmem:[%s24223_s14 + $0x60] sm:$0xff] }
 0xb4c   : > { %v9403_v11 = vpop.f32.mrf.mxu3 }
 0xb4d   : > { %v9404_v48 = vadd.f32 %v9403_v11, %v9389_v42  ;;  %v16782_v42 = vld [vmem:[%s24223_s14 + $0x18] sm:$0xff] }
 0xb4e   : > { %v9528_v53 = vpop.f32.mrf.mxu1 }
 0xb4f   : > { %v9529_v49 = vadd.f32 %v9528_v53, %v9374_v34  ;;  %v9559_v54 = vadd.f32 %v9558_v57, %v9404_v48  ;;  %v16795_v34 = vld [vmem:[%s24223_s14 + $0x80] sm:$0xff]  ;;  %v16792_v57 = vld [vmem:[%s24223_s14 + $0x68] sm:$0xff] }
 0xb50   : > { %10012 = vmatpush.bf16.msrb.mxu0 %v16795_v34  ;;  %v16847_v34 = vld [vmem:[%s24226_s17 + $0x148] sm:$0xff] }
 0xb51   : > { %v9573_v3 = vadd.f32 %v9572_v41, %v9559_v54  ;;  %v16790_v41 = vld [vmem:[%s24223_s14 + $0x58] sm:$0xff]  ;;  %v15519_v54 = vld [vmem:[%s24222_s13 + $0x8] sm:$0xf] }
 0xb54   : > { %v9542_v40 = vpop.f32.mrf.mxu3 }
 0xb55   : > { %v9543_v36 = vadd.f32 %v9542_v40, %v9529_v49  ;;  %v16794_v40 = vld [vmem:[%s24223_s14 + $0x78] sm:$0xff] }
 0xb56   : > { %v9530_v47 = vpop.f32.mrf.mxu1  ;;  %10013 = vmatpush.bf16.msrb.mxu0 %v16794_v40  ;;  %v16824_v40 = vld [vmem:[%s24226_s17 + $0x90] sm:$0xff] }
 0xb57   : > { %v9531_v14 = vadd.f32 %v9530_v47, %v9376_v52  ;;  %v9846_v47 = vld [vmem:[%s24222_s13] sm:$0xf] }
 0xb5c   : > { %v9544_v18 = vpop.f32.mrf.mxu3 }
 0xb5d   : > { %v9545_v24 = vadd.f32 %v9544_v18, %v9531_v14 }
 0xb5e   : > { %v9609_v12 = vpop.f32.mrf.mxu1 }
 0xb64   : > { %v9595_v4 = vpop.f32.mrf.mxu3 }
 0xb66   : > { %v9611_v2 = vpop.f32.mrf.mxu1 }
 0xb67   : > { %v9615_v9 = vpack.c.bf16 %v9611_v2, %v9609_v12  ;;  %v16786_v2 = vld [vmem:[%s24223_s14 + $0x38] sm:$0xff] }
 0xb69   : > { %15420 = vmatmul.msk.bf16.vlgmr.msrb.gmra.mxu3 %vm9346_vm14, %v9615_v9  ;;  %15421 = vmatmul.msk.bf16.vlgmr.msra.gmra.mxu1 %vm9346_vm14, %v9615_v9  ;;  %v16787_v9 = vld [vmem:[%s24223_s14 + $0x40] sm:$0xff] }
 0xb6c   : > { %v9597_v51 = vpop.f32.mrf.mxu3 }
 0xb6d   : > { %v9614_v25 = vpack.c.bf16 %v9597_v51, %v9595_v4  ;;  %v15424_v51 = vld [vmem:[%s24222_s13 + $0x4] sm:$0xf] }
 0xb6f   : > { %9760 = vmatmul.bf16.vlgmr.msra.gmra.mxu2 %v9614_v25  ;;  %9788 = vmatmul.bf16.vlgmr.msra.gmra.mxu0 %v9614_v25  ;;  %v16784_v25 = vld [vmem:[%s24223_s14 + $0x28] sm:$0xff] }
 0xbe6   : > { %v9803_v63 = vpop.f32.mrf.mxu1 }
 0xbec   : > { %v9789_v15 = vpop.f32.mrf.mxu0  ;;  %v9775_v6 = vpop.f32.mrf.mxu3 }
 0xbed   : > { %v9804_v58 = vadd.f32 %v9803_v63, %v9789_v15  ;;  %v16789_v63 = vld [vmem:[%s24223_s14 + $0x50] sm:$0xff]  ;;  %v16788_v15 = vld [vmem:[%s24223_s14 + $0x48] sm:$0xff] }
 0xbee   : > { %v9805_v38 = vpop.f32.mrf.mxu1 }
 0xbef   : > { %v9809_v50 = vadd.f32 %v9804_v58, %v9571_v26 }
 0xbf1   : > { %v9819_v44 = vmul.f32 %v9815_v30, %v9809_v50 }
 0xbf2   : > { %v9761_v45 = vpop.f32.mrf.mxu2 }
 0xbf3   : > { %v9776_v37 = vadd.f32 %v9775_v6, %v9761_v45  ;;  %v9829_v22 = vadd.f32 %v9825_v5, %v9819_v44  ;;  %v16803_v45 = vld [vmem:[%s24223_s14 + $0xc0] sm:$0xff] }
 0xbf4   : > { %v9791_v28 = vpop.f32.mrf.mxu0  ;;  %v9777_v62 = vpop.f32.mrf.mxu3 }
 0xbf5   : > { %v9808_v27 = vadd.f32 %v9776_v37, %v9543_v36  ;;  %v9806_v0 = vadd.f32 %v9805_v38, %v9791_v28  ;;  %v9837_v21 = vmul.f32 0.01, %v9829_v22  ;;  %vm9833_vm15 = vcmp.ge.f32.partialorder %v9829_v22, 0.0 }
 0xbf7   : > { %v9811_v33 = vadd.f32 %v9806_v0, %v9573_v3  ;;  %v9818_v10 = vmul.f32 %v9814_v56, %v9808_v27  ;;  %v9841_v35 = vsel %vm9833_vm15, %v9829_v22, %v9837_v21  ;;  %v16802_v3 = vld [vmem:[%s24223_s14 + $0xb8] sm:$0xff]  ;;  %v16801_v27 = vld [vmem:[%s24223_s14 + $0xb0] sm:$0xff]  ;;  %v16799_v0 = vld [vmem:[%s24223_s14 + $0xa0] sm:$0xff] }
 0xbf8   : > { %v16805_v22 = vld [vmem:[%s24223_s14 + $0xd0] sm:$0xff] }
 0xbf9   : > { %v9821_v20 = vmul.f32 %v9815_v30, %v9811_v33  ;;  %v9828_v16 = vadd.f32 %v9824_v8, %v9818_v10  ;;  %v16798_v10 = vld [vmem:[%s24223_s14 + $0x98] sm:$0xff]  ;;  %v16812_v21 = vld [vmem:[%s24226_s17 + $0x30] sm:$0xff] }
 0xbfa   : > { %v9763_v55 = vpop.f32.mrf.mxu2 }
 0xbfb   : > { %v9831_v32 = vadd.f32 %v9825_v5, %v9821_v20  ;;  %v9778_v46 = vadd.f32 %v9777_v62, %v9763_v55  ;;  %v9836_v53 = vmul.f32 0.01, %v9828_v16  ;;  %vm9832_vm1 = vcmp.ge.f32.partialorder %v9828_v16, 0.0  ;;  %v16797_v20 = vld [vmem:[%s24223_s14 + $0x90] sm:$0xff] }
 0xbfd   : > { %vm9835_vm0 = vcmp.ge.f32.partialorder %v9831_v32, 0.0  ;;  %v9839_v29 = vmul.f32 0.01, %v9831_v32  ;;  %v9810_v61 = vadd.f32 %v9778_v46, %v9545_v24  ;;  %v9840_v14 = vsel %vm9832_vm1, %v9828_v16, %v9836_v53  ;;  %v16793_v24 = vld [vmem:[%s24223_s14 + $0x70] sm:$0xff]  ;;  %v16826_v16 = vld [vmem:[%s24226_s17 + $0xa0] sm:$0xff] }
 0xbfe   : > { %10014 = vmatpush.bf16.msrb.mxu0 %v16793_v24 }
 0xbff   : > { %v9820_v11 = vmul.f32 %v9814_v56, %v9810_v61  ;;  %v9843_v7 = vsel %vm9835_vm0, %v9831_v32, %v9839_v29  ;;  %v16800_v56 = vld [vmem:[%s24223_s14 + $0xa8] sm:$0xff] }
 0xc00   : > { %v9845_v31 = vpack.c.bf16 %v9843_v7, %v9841_v35  ;;  %v16819_v32 = vld [vmem:[%s24226_s17 + $0x68] sm:$0xff]  ;;  %v16825_v7 = vld [vmem:[%s24226_s17 + $0x98] sm:$0xff] }
 0xc01   : > { %v9830_v49 = vadd.f32 %v9824_v8, %v9820_v11  ;;  %v16811_v61 = vld [vmem:[%s24226_s17 + $0x28] sm:$0xff]  ;;  %v16818_v11 = vld [vmem:[%s24226_s17 + $0x60] sm:$0xff] }
 0xc02   : > { %v9855_v52 = vand.u32 %v9845_v31, %v24460_v19  ;;  %10015 = vmatpush.bf16.msrb.mxu0 %v16792_v57  ;;  %v16846_v31 = vld [vmem:[%s24226_s17 + $0x140] sm:$0xff]  ;;  %v16840_v57 = vld [vmem:[%s24226_s17 + $0x110] sm:$0xff] }
 0xc03   : > { %vm9834_vm2 = vcmp.ge.f32.partialorder %v9830_v49, 0.0  ;;  %v9838_v36 = vmul.f32 0.01, %v9830_v49 }
 0xc04   : > { %9877 = vmatpush.bf16.msrb.mxu1 %v9855_v52 }
 0xc05   : > { %v9842_v18 = vsel %vm9834_vm2, %v9830_v49, %v9838_v36  ;;  %v16810_v49 = vld [vmem:[%s24226_s17 + $0x20] sm:$0xff] }
 0xc06   : > { %v9844_v12 = vpack.c.bf16 %v9842_v18, %v9840_v14  ;;  %10016 = vmatpush.bf16.msrb.mxu0 %v16791_v59  ;;  %v16809_v14 = vld [vmem:[%s24226_s17 + $0x18] sm:$0xff]  ;;  %v16816_v18 = vld [vmem:[%s24226_s17 + $0x50] sm:$0xff]  ;;  %v16814_v59 = vld [vmem:[%s24226_s17 + $0x40] sm:$0xff] }
 0xc07   : > { %15423 = vmatmul.msk.bf16.vlgmr.msrb.gmra.mxu1 %vm9847_vm4, %v9846_v47 }
 0xc08   : > { %10032 = vmatpush.bf16.msra.mxu1 %v16796_v13  ;;  %v9852_v4 = vand.u32 %v9844_v12, %v24460_v19  ;;  %v16785_v19 = vld [vmem:[%s24223_s14 + $0x30] sm:$0xff]  ;;  %v16817_v13 = vld [vmem:[%s24226_s17 + $0x58] sm:$0xff]  ;;  %v16823_v12 = vld [vmem:[%s24226_s17 + $0x88] sm:$0xff] }
 0xc0a   : > { %9864 = vmatpush.bf16.msra.mxu3 %v9852_v4  ;;  %9915 = vmatpush.bf16.msrb.mxu2 %v9852_v4 }
 0xc0b   : > { %10017 = vmatpush.bf16.msrb.mxu0 %v16790_v41  ;;  %v16821_v41 = vld [vmem:[%s24226_s17 + $0x78] sm:$0xff] }
 0xc0c   : > { %10133 = vmatpush.bf16.msrb.mxu1 %v9852_v4 }
 0xc0d   : > { %15422 = vmatmul.msk.bf16.vlgmr.msra.gmra.mxu3 %vm9847_vm4, %v9846_v47  ;;  %15425 = vmatmul.msk.bf16.vlgmr.msrb.gmra.mxu2 %vm9847_vm4, %v15424_v51 }
 0xc0e   : > { %9928 = vmatpush.bf16.msrb.mxu3 %v9855_v52  ;;  %10095 = vmatpush.bf16.msra.mxu2 %v16786_v2  ;;  %v16808_v2 = vld [vmem:[%s24226_s17 + $0x10] sm:$0xff] }
 0xc0f   : > { %10018 = vmatpush.bf16.msrb.mxu0 %v16789_v63  ;;  %v16839_v63 = vld [vmem:[%s24226_s17 + $0x108] sm:$0xff] }
 0xc12   : > { %10115 = vmatpush.bf16.msra.mxu3 %v16787_v9  ;;  %10096 = vmatpush.bf16.msra.mxu2 %v16785_v19 }
 0xc13   : > { %10019 = vmatpush.bf16.msrb.mxu0 %v16788_v15  ;;  %v16844_v15 = vld [vmem:[%s24226_s17 + $0x130] sm:$0xff] }
 0xc16   : > { %10097 = vmatpush.bf16.msra.mxu2 %v16784_v25 }
 0xc17   : > { %10230 = vmatpush.bf16.msra.mxu0 %v16804_v1  ;;  %v16832_v1 = vld [vmem:[%s24226_s17 + $0xd0] sm:$0xff] }
 0xc1a   : > { %10098 = vmatpush.bf16.msra.mxu2 %v16783_v23 }
 0xc1b   : > { %10231 = vmatpush.bf16.msra.mxu0 %v16803_v45  ;;  %v16837_v45 = vld [vmem:[%s24226_s17 + $0xf8] sm:$0xff] }
 0xc1d   : > { %15426 = vmatmul.msk.bf16.vlgmr.msrb.gmra.mxu3 %vm9847_vm4, %v15424_v51  ;;  %v16807_v51 = vld [vmem:[%s24226_s17 + $0x8] sm:$0xff] }
 0xc1e   : > { %10099 = vmatpush.bf16.msra.mxu2 %v16782_v42  ;;  %10146 = vmatpush.bf16.msrb.mxu3 %v9855_v52  ;;  %v16815_v42 = vld [vmem:[%s24226_s17 + $0x48] sm:$0xff] }
 0xc1f   : > { %10232 = vmatpush.bf16.msra.mxu0 %v16802_v3 }
 0xc22   : > { %10100 = vmatpush.bf16.msra.mxu2 %v16781_v17  ;;  %v16822_v17 = vld [vmem:[%s24226_s17 + $0x80] sm:$0xff] }
 0xc23   : > { %10233 = vmatpush.bf16.msra.mxu0 %v16801_v27  ;;  %v16830_v27 = vld [vmem:[%s24226_s17 + $0xc0] sm:$0xff] }
 0xc26   : > { %10101 = vmatpush.bf16.msra.mxu2 %v16780_v43  ;;  %v16806_v43 = vld [vmem:[%s24226_s17] sm:$0xff] }
 0xc27   : > { %10234 = vmatpush.bf16.msra.mxu0 %v16800_v56  ;;  %v16851_v56 = vld [vmem:[%s24226_s17 + $0x168] sm:$0xff] }
 0xc2a   : > { %10102 = vmatpush.bf16.msra.mxu2 %v16779_v60  ;;  %v16845_v60 = vld [vmem:[%s24226_s17 + $0x138] sm:$0xff] }
 0xc2b   : > { %10235 = vmatpush.bf16.msra.mxu0 %v16799_v0  ;;  %v16835_v0 = vld [vmem:[%s24226_s17 + $0xe8] sm:$0xff] }
 0xc2e   : > { %10353 = vmatpush.bf16.msrb.mxu2 %v16819_v32 }
 0xc2f   : > { %10236 = vmatpush.bf16.msra.mxu0 %v16798_v10  ;;  %v16834_v10 = vld [vmem:[%s24226_s17 + $0xe0] sm:$0xff] }
 0xc32   : > { %10354 = vmatpush.bf16.msrb.mxu2 %v16818_v11 }
 0xc33   : > { %10237 = vmatpush.bf16.msra.mxu0 %v16797_v20  ;;  %v16849_v20 = vld [vmem:[%s24226_s17 + $0x158] sm:$0xff] }
 0xc36   : > { %10355 = vmatpush.bf16.msrb.mxu2 %v16817_v13 }
 0xc3a   : > { %10356 = vmatpush.bf16.msrb.mxu2 %v16816_v18 }
 0xc3e   : > { %10357 = vmatpush.bf16.msrb.mxu2 %v16815_v42 }
 0xc42   : > { %10358 = vmatpush.bf16.msrb.mxu2 %v16814_v59 }
 0xc84   : > { %v9879_v39 = vpop.f32.mrf.mxu1 }
 0xc85   : > { %v9884_v26 = vpack.c.bf16 %v9879_v39, %v9879_v39  ;;  %v16813_v39 = vld [vmem:[%s24226_s17 + $0x38] sm:$0xff] }
 0xc86   : > { %10359 = vmatpush.bf16.msrb.mxu2 %v16813_v39 }
 0xc87   : > { %15518 = vmatmul.msk.bf16.vlgmr.msra.gmra.mxu3 %vm7113_vm10, %v9884_v26  ;;  %v16820_v26 = vld [vmem:[%s24226_s17 + $0x70] sm:$0xff] }
 0xc88   : > { %10411 = vmatpush.bf16.msra.mxu3 %v16812_v21 }
 0xc8c   : > { %v9881_v48 = vpop.f32.mrf.mxu1  ;;  %10412 = vmatpush.bf16.msra.mxu3 %v16811_v61 }
 0xc8d   : > { %v16833_v48 = vld [vmem:[%s24226_s17 + $0xd8] sm:$0xff] }
 0xc90   : > { %v9866_v58 = vpop.f32.mrf.mxu3  ;;  %v9917_v50 = vpop.f32.mrf.mxu2  ;;  %10413 = vmatpush.bf16.msra.mxu3 %v16810_v49 }
 0xc91   : > { %v9883_v30 = vpack.c.bf16 %v9866_v58, %v9866_v58  ;;  %v9934_v6 = vpack.c.bf16 %v9917_v50, %v9917_v50  ;;  %v16854_v58 = vld [vmem:[%s24226_s17 + $0x180] sm:$0xff] }
 0xc93   : > { %10103 = vmatmul.bf16.vlgmr.msra.gmra.mxu2 %v9883_v30  ;;  %10020 = vmatmul.bf16.vlgmr.msrb.gmra.mxu0 %v9934_v6  ;;  %v16838_v30 = vld [vmem:[%s24226_s17 + $0x100] sm:$0xff]  ;;  %v16843_v6 = vld [vmem:[%s24226_s17 + $0x128] sm:$0xff] }
 0xc94   : > { %10710 = vmatpush.bf16.msrb.mxu0 %v16847_v34  ;;  %10414 = vmatpush.bf16.msra.mxu3 %v16809_v14 }
 0xc95   : > { %10560 = vmatpush.bf16.msra.mxu2 %v16833_v48 }
 0xc97   : > { %15521 = vmatmul.msk.bf16.vlgmr.msrb.gmra.mxu3 %vm9847_vm4, %v15519_v54 }
 0xc98   : > { %v9868_v44 = vpop.f32.mrf.mxu3  ;;  %v9919_v5 = vpop.f32.mrf.mxu2  ;;  %10711 = vmatpush.bf16.msrb.mxu0 %v16846_v31  ;;  %10415 = vmatpush.bf16.msra.mxu3 %v16808_v2 }
 0xc99   : > { %10561 = vmatpush.bf16.msra.mxu2 %v16832_v1  ;;  %v16842_v44 = vld [vmem:[%s24226_s17 + $0x120] sm:$0xff]  ;;  %v16831_v5 = vld [vmem:[%s24226_s17 + $0xc8] sm:$0xff] }
 0xc9c   : > { %10416 = vmatpush.bf16.msra.mxu3 %v16807_v51  ;;  %10712 = vmatpush.bf16.msrb.mxu0 %v16845_v60 }
 0xc9d   : > { %10562 = vmatpush.bf16.msra.mxu2 %v16831_v5 }
 0xca0   : > { %v9930_v37 = vpop.f32.mrf.mxu3  ;;  %10417 = vmatpush.bf16.msra.mxu3 %v16806_v43  ;;  %10713 = vmatpush.bf16.msrb.mxu0 %v16844_v15  ;;  %v10798_v15 = vld [vmem:[%s24227_s18] sm:$0x1] }
 0xca1   : > { %v9935_v38 = vpack.c.bf16 %v9930_v37, %v9930_v37  ;;  %v16852_v37 = vld [vmem:[%s24226_s17 + $0x170] sm:$0xff]  ;;  %10563 = vmatpush.bf16.msra.mxu2 %v16830_v27 }
 0xca3   : > { %15481 = vmatmul.msk.bf16.vlgmr.msra.gmra.mxu1 %vm7113_vm10, %v9935_v38  ;;  %v16836_v38 = vld [vmem:[%s24226_s17 + $0xf0] sm:$0xff] }
 0xca4   : > { %10250 = vmatpush.bf16.msra.mxu1 %v16805_v22  ;;  %10635 = vmatpush.bf16.msrb.mxu3 %v16840_v57  ;;  %v16829_v22 = vld [vmem:[%s24226_s17 + $0xb8] sm:$0xff] }
 0xca5   : > { %10714 = vmatpush.bf16.msrb.mxu0 %v16843_v6  ;;  %10564 = vmatpush.bf16.msra.mxu2 %v16829_v22 }
 0xca8   : > { %v9932_v28 = vpop.f32.mrf.mxu3  ;;  %10636 = vmatpush.bf16.msrb.mxu3 %v16839_v63 }
 0xca9   : > { %10715 = vmatpush.bf16.msrb.mxu0 %v16842_v44  ;;  %v16841_v28 = vld [vmem:[%s24226_s17 + $0x118] sm:$0xff] }
 0xcac   : > { %10637 = vmatpush.bf16.msrb.mxu3 %v16838_v30 }
 0xcad   : > { %10716 = vmatpush.bf16.msrb.mxu0 %v16841_v28 }
 0xcb0   : > { %10638 = vmatpush.bf16.msrb.mxu3 %v16837_v45  ;;  %v10809_v45 = vld [vmem:[#allocation2] sm:$0x1] }
 0xcb3   : > { %15520 = vmatmul.msk.bf16.vlgmr.msrb.gmra.mxu1 %vm9847_vm4, %v15519_v54  ;;  %v16853_v54 = vld [vmem:[%s24226_s17 + $0x178] sm:$0xff] }
 0xcb4   : > { %10485 = vmatpush.bf16.msrb.mxu1 %v16826_v16  ;;  %10639 = vmatpush.bf16.msrb.mxu3 %v16836_v38 }
 0xcb8   : > { %10486 = vmatpush.bf16.msrb.mxu1 %v16825_v7  ;;  %10640 = vmatpush.bf16.msrb.mxu3 %v16835_v0 }
 0xcbc   : > { %10487 = vmatpush.bf16.msrb.mxu1 %v16824_v40  ;;  %10641 = vmatpush.bf16.msrb.mxu3 %v16834_v10 }
 0xcc0   : > { %10488 = vmatpush.bf16.msrb.mxu1 %v16823_v12 }
 0xcc4   : > { %10489 = vmatpush.bf16.msrb.mxu1 %v16822_v17 }
 0xcc8   : > { %10490 = vmatpush.bf16.msrb.mxu1 %v16821_v41 }
 0xccc   : > { %10491 = vmatpush.bf16.msrb.mxu1 %v16820_v26 }
 0xd0a   : > { %v10117_v33 = vpop.f32.mrf.mxu3 }
 0xd10   : > { %v10021_v8 = vpop.f32.mrf.mxu0 }
 0xd12   : > { %v10119_v62 = vpop.f32.mrf.mxu3 }
 0xd13   : > { %v16827_v62 = vld [vmem:[%s24226_s17 + $0xa8] sm:$0xff] }
 0xd16   : > { %v10104_v55 = vpop.f32.mrf.mxu2 }
 0xd18   : > { %v10023_v46 = vpop.f32.mrf.mxu0 }
 0xd19   : > { %v16867_v46 = vld [vmem:[%s24224_s15] ss:$0 sm:$0xff] }
 0xd1a   : > { %v10148_v29 = vpop.f32.mrf.mxu3 }
 0xd1b   : > { %v10153_v35 = vpack.c.bf16 %v10148_v29, %v10148_v29  ;;  %v16868_v29 = vld [vmem:[%s24225_s16] ss:$0 sm:$0xff] }
 0xd1d   : > { %15576 = vmatmul.msk.bf16.vlgmr.msra.gmra.mxu1 %vm7113_vm10, %v10153_v35 }
 0xd1e   : > { %v10106_v53 = vpop.f32.mrf.mxu2  ;;  %10785 = vmatpush.bf16.msra.mxu1 %v16854_v58 }
 0xd20   : > { %v10034_v52 = vpop.f32.mrf.mxu1 }
 0xd21   : > { %v10035_v36 = vadd.f32 %v10034_v52, %v10021_v8  ;;  %v16828_v8 = vld [vmem:[%s24226_s17 + $0xb0] sm:$0xff] }
 0xd22   : > { %v10150_v47 = vpop.f32.mrf.mxu3  ;;  %10786 = vmatpush.bf16.msra.mxu1 %v16853_v54  ;;  %10565 = vmatpush.bf16.msra.mxu2 %v16828_v8  ;;  %v16878_v54 = vmov 0  }
 0xd23   : > { %v10105_v24 = vadd.f32 %v10104_v55, %v10035_v36  ;;  %v16848_v55 = vld [vmem:[%s24226_s17 + $0x150] sm:$0xff]  ;;  %16866 = vset.pattern.permute.xlu0 %v16878_v54 }
 0xd25   : > { %v24075_v4 = vadd.f32 %v10117_v33, %v10105_v24  ;;  %v16850_v33 = vld [vmem:[%s24226_s17 + $0x160] sm:$0xff] }
 0xd26   : > { %10787 = vmatpush.bf16.msra.mxu1 %v16852_v37  ;;  %10566 = vmatpush.bf16.msra.mxu2 %v16827_v62 }
 0xd28   : > { %v10036_v9 = vpop.f32.mrf.mxu1 }
 0xd2a   : > { %10788 = vmatpush.bf16.msra.mxu1 %v16851_v56 }
 0xd2e   : > { %10789 = vmatpush.bf16.msra.mxu1 %v16850_v33 }
 0xd30   : > { %v10135_v19 = vpop.f32.mrf.mxu1 }
 0xd31   : > { %v10152_v25 = vpack.c.bf16 %v10135_v19, %v10135_v19 }
 0xd32   : > { %10790 = vmatpush.bf16.msra.mxu1 %v16849_v20 }
 0xd33   : > { %10238 = vmatmul.bf16.vlgmr.msra.gmra.mxu0 %v10152_v25 }
 0xd36   : > { %10791 = vmatpush.bf16.msra.mxu1 %v16848_v55 }
 0xd38   : > { %v10137_v23 = vpop.f32.mrf.mxu1 }
 0xd9a   : > { %v10252_v50 = vpop.f32.mrf.mxu1 }
 0xda2   : > { %v10254_v3 = vpop.f32.mrf.mxu1 }
 0xdb0   : > { %v10239_v21 = vpop.f32.mrf.mxu0 }
 0xdb1   : > { %v10253_v32 = vadd.f32 %v10252_v50, %v10239_v21  ;;  %v10803_v50 = vld [vmem:[%s24228_s19] sm:$0x1] }
 0xdb3   : > { %v10256_v16 = vadd.f32 %v10253_v32, %v24075_v4 }
 0xdb5   : > { %v10261_v61 = vmul.f32 %v16867_v46, %v10256_v16 }
 0xdb7   : > { %v10266_v11 = vadd.f32 %v16868_v29, %v10261_v61 }
 0xdb8   : > { %v10241_v35 = vpop.f32.mrf.mxu0 }
 0xdb9   : > { %vm10267_vm5 = vcmp.ge.f32.partialorder %v10266_v11, 0.0  ;;  %v10268_v7 = vmul.f32 0.01, %v10266_v11 }
 0xdbb   : > { %v10269_v34 = vsel %vm10267_vm5, %v10266_v11, %v10268_v7 }
 0xdbc   : > { %v10270_v31 = vpack.c.bf16 %v10269_v34, %v10269_v34 }
 0xdbe   : > { %v10301_v53 = vunpack.c.l.b16 %v10270_v31  ;;  %15648 = vmatmul.msk.bf16.vlgmr.msra.gmra.mxu3 %vm10348_vm6, %v10270_v31 }
 0xdc0   : > { %v10302_v49 = vpack.c.b16 %v10301_v53, %v10301_v53 }
 0xdc2   : > { %v10304_v13 = vshrl.u32 %v10302_v49, 16  ;;  %v10438_v40 = vrot.slane %v10302_v49, 1  ;;  %v10588_v36 = vrot.slane %v10302_v49, 2  ;;  %v10738_v14 = vrot.slane %v10302_v49, 3 }
 0xdc4   : > { %15619 = vmatmul.msk.bf16.vlgmr.msrb.gmra.mxu2 %vm10348_vm6, %v10304_v13  ;;  %15691 = vmatmul.msk.bf16.vlgmr.msrb.gmra.mxu1 %vm10348_vm6, %v10438_v40  ;;  %v10663_v52 = vrot.slane %v10304_v13, 2  ;;  %v10513_v47 = vrot.slane %v10304_v13, 1 }
 0xdc6   : > { %15820 = vmatmul.msk.bf16.vlgmr.msrb.gmra.mxu0 %vm10348_vm6, %v10663_v52 }
 0xdce   : > { %15777 = vmatmul.msk.bf16.vlgmr.msrb.gmra.mxu3 %vm10348_vm6, %v10588_v36 }
 0xdd4   : > { %15734 = vmatmul.msk.bf16.vlgmr.msra.gmra.mxu2 %vm10348_vm6, %v10513_v47  ;;  %15863 = vmatmul.msk.bf16.vlgmr.msra.gmra.mxu1 %vm10348_vm6, %v10738_v14 }
 0xe41   : > { %v10419_v18 = vpop.f32.mrf.mxu3  ;;  %v10493_v24 = vpop.f32.mrf.mxu1 }
 0xe43   : > { %v10718_v12 = vpop.f32.mrf.mxu0 }
 0xe47   : > { %v10361_v4 = vpop.f32.mrf.mxu2 }
 0xe48   : > { %v10420_v42 = vadd.f32 %v10419_v18, %v10361_v4 }
 0xe49   : > { %v10421_v2 = vpop.f32.mrf.mxu3  ;;  %v10495_v9 = vpop.f32.mrf.mxu1 }
 0xe4a   : > { %v10497_v17 = vadd.f32 %v10493_v24, %v10420_v42 }
 0xe4b   : > { %v10720_v51 = vpop.f32.mrf.mxu0 }
 0xe4f   : > { %v10363_v19 = vpop.f32.mrf.mxu2 }
 0xe51   : > { %v10643_v25 = vpop.f32.mrf.mxu3  ;;  %v10793_v23 = vpop.f32.mrf.mxu1 }
 0xe57   : > { %v10568_v43 = vpop.f32.mrf.mxu2 }
 0xe58   : > { %v10572_v57 = vadd.f32 %v10568_v43, %v10497_v17 }
 0xe59   : > { %v10645_v60 = vpop.f32.mrf.mxu3  ;;  %v10795_v59 = vpop.f32.mrf.mxu1 }
 0xe5a   : > { %v10647_v41 = vadd.f32 %v10643_v25, %v10572_v57 }
 0xe5c   : > { %v10722_v63 = vadd.f32 %v10718_v12, %v10647_v41 }
 0xe5e   : > { %v10797_v39 = vadd.f32 %v10793_v23, %v10722_v63 }
 0xe5f   : > { %v10570_v26 = vpop.f32.mrf.mxu2 }
 0xe60   : > { %v10799_v48 = vadd.f32 %v10798_v15, %v10797_v39 }
 0xe62   : > { %vm10800_vm7 = vcmp.ge.f32.partialorder %v10799_v48, 0.0  ;;  %v10801_v58 = vmul.f32 0.01, %v10799_v48 }
 0xe64   : > { %v10802_v30 = vsel %vm10800_vm7, %v10799_v48, %v10801_v58 }
 0xe65   : > { %v10804_v6 = vmul.f32 %v10803_v50, %v10802_v30 }
 0xe67   : > { %v10806_v1 = vsel %vm10805_vm8, %v10804_v6, 0.0 }
 0xe68   : > { %10807 = vadd.xlane.f32.xlu0 %v10806_v1 }
 0xedb   : > { %v10808_v44 = vpop.xlane.xlu0 %10807 }
 0xedc   : > { %v10810_v5 = vadd.f32 %v10809_v45, %v10808_v44 }
 0xede   : > { %10813 = vperm.xlu0 %16866, %v10810_v5  }
 0xf50   : > { %v10814_v37 = vpop.permute.xlu0 %10813 }
 0xf51   : > { %10816 = vst [vmem:[%s654_s25] sm:$0x1] %v10814_v37 }
 0xf52 PF: > { %s33_s26 = sadd.s32 1, %s16875_s26  }
 0xf53   : > { %p30_p4 = scmp.ge.s32.totalorder %s33_s26, 4  }
 0xf55   :  { %32 = sbr.rel (!%p30_p4) target bundleno = 7 (0x7), region = 168 }

</bundles_post_ra>
